<compile_context>
chip_gen: v7x
topology: tpu7x:2x2x1
jax: 0.10.0
libtpu: 0.0.40
codegen_flags: <defaults>
</compile_context>

<pallas_src>
import jax
import jax.numpy as jnp
from jax.experimental import pallas as pl
from jax.experimental.pallas import tpu as pltpu


DEFAULT_TILE_N = 512                  # 512 keeps v5e's single vst slot happy; 1024 also fits
VMEM_LIMIT = 32 * 1024 * 1024         # working set ~11 MiB at tile 512; safe on v7x's 64 MiB


# ----------------------------------------------------------------------------
# Fused kernel: per-point MLP chain (bias+ReLU each layer) + max over points,
# optionally followed (on the last reduction step) by a fused FC head.
# ----------------------------------------------------------------------------
def _make_chain_kernel(n_layers, n_fc):
    def kernel(*refs):
        x_ref = refs[0]
        layer_refs = refs[1:1 + 2 * n_layers]
        fc_refs = refs[1 + 2 * n_layers:1 + 2 * (n_layers + n_fc)]
        o_ref = refs[1 + 2 * (n_layers + n_fc)]
        acc_ref = refs[1 + 2 * (n_layers + n_fc) + 1] if n_fc else None

        step = pl.program_id(2)

        h = x_ref[0].astype(jnp.bfloat16)                       # (tile_n, Cin)
        y = None
        for li in range(n_layers):
            w_ref = layer_refs[2 * li]
            b_ref = layer_refs[2 * li + 1]
            # per-batch (folded-transform) weights arrive as (1, Cin, Cout) blocks
            w = w_ref[0] if len(w_ref.shape) == 3 else w_ref[...]
            y = jnp.dot(h, w, preferred_element_type=jnp.float32)   # MXU, f32 acc
            y = jnp.maximum(y + b_ref[...], 0.0)                    # bias + ReLU (f32)
            if li < n_layers - 1:                                   # skip dead final cast
                h = y.astype(jnp.bfloat16)
        tile_max = jnp.max(y, axis=0, keepdims=True)                # (1, C_last)

        if n_fc == 0:
            # Output-resident running max; step 0 writes directly (no -inf init).
            @pl.when(step == 0)
            def _():
                o_ref[0, 0] = tile_max

            @pl.when(step != 0)
            def _():
                o_ref[0, 0] = jnp.maximum(o_ref[0, 0], tile_max)
        else:
            @pl.when(step == 0)
            def _():
                acc_ref[...] = tile_max

            @pl.when(step != 0)
            def _():
                acc_ref[...] = jnp.maximum(acc_ref[...], tile_max)

            # Fused FC head on the (1, C_last) global-max vector.
            @pl.when(step == pl.num_programs(2) - 1)
            def _():
                g = acc_ref[...].astype(jnp.bfloat16)
                z = None
                for fi in range(n_fc):
                    wf = fc_refs[2 * fi][...]
                    bf = fc_refs[2 * fi + 1][...]
                    z = jnp.dot(g, wf, preferred_element_type=jnp.float32) + bf
                    if fi < n_fc - 1:                               # no ReLU after fc3
                        g = jnp.maximum(z, 0.0).astype(jnp.bfloat16)
                o_ref[0] = z

    return kernel


def point_mlp_chain(x_bnc, layers, tile_n, *, fc_layers=None, num_splits=1):
    """x_bnc: (B, Np, Cin) bf16 with Np % tile_n == 0.
    layers: list of (W, b); W either (Cin, Cout) shared or (B, Cin, Cout) per-batch.
    fc_layers: optional FC head fused onto the global-max vector.
    num_splits: split the point axis into S independent partial maxes
                (returns (B, S, C_last)); ignored when fc_layers is given.
    """
    B, Np, Cin = x_bnc.shape
    assert Np % tile_n == 0
    n_tiles = Np // tile_n
    if fc_layers is not None:
        num_splits = 1
    if num_splits > 1 and (n_tiles % num_splits != 0 or n_tiles < num_splits):
        num_splits = 1
    S = num_splits
    n_red = n_tiles // S
    n_layers = len(layers)
    c_last = layers[-1][0].shape[-1]

    in_specs = [pl.BlockSpec((1, tile_n, Cin),
                             lambda b, s, n, n_red=n_red: (b, s * n_red + n, 0))]
    args = [x_bnc]
    for w, bvec in layers:
        w = w.astype(jnp.bfloat16)
        b2 = bvec.reshape(1, -1).astype(jnp.float32)
        if w.ndim == 3:      # per-batch folded weight
            in_specs.append(pl.BlockSpec((1,) + w.shape[1:], lambda b, s, n: (b, 0, 0)))
        else:                # shared weight: constant block, stays resident in VMEM
            in_specs.append(pl.BlockSpec(w.shape, lambda b, s, n: (0, 0)))
        in_specs.append(pl.BlockSpec(b2.shape, lambda b, s, n: (0, 0)))
        args += [w, b2]

    scratch_shapes = []
    n_fc = 0
    if fc_layers is not None:
        n_fc = len(fc_layers)
        for w, bvec in fc_layers:
            w = w.astype(jnp.bfloat16)
            b2 = bvec.reshape(1, -1).astype(jnp.float32)
            in_specs.append(pl.BlockSpec(w.shape, lambda b, s, n: (0, 0)))
            in_specs.append(pl.BlockSpec(b2.shape, lambda b, s, n: (0, 0)))
            args += [w, b2]
        fc_out = fc_layers[-1][0].shape[-1]
        out_shape = jax.ShapeDtypeStruct((B, 1, fc_out), jnp.float32)
        out_spec = pl.BlockSpec((1, 1, fc_out), lambda b, s, n: (b, 0, 0))
        scratch_shapes = [pltpu.VMEM((1, c_last), jnp.float32)]    # resident global max
    else:
        out_shape = jax.ShapeDtypeStruct((B, S, 1, c_last), jnp.float32)
        out_spec = pl.BlockSpec((1, 1, 1, c_last), lambda b, s, n: (b, s, 0, 0))

    out = pl.pallas_call(
        _make_chain_kernel(n_layers, n_fc),
        out_shape=out_shape,
        grid=(B, S, n_red),
        in_specs=in_specs,
        out_specs=out_spec,
        scratch_shapes=scratch_shapes,
        compiler_params=pltpu.CompilerParams(
            dimension_semantics=("parallel", "parallel", "arbitrary"),
            vmem_limit_bytes=VMEM_LIMIT,
        ),
    )(*args)

    if fc_layers is not None:
        return out.reshape(B, -1)                                  # (B, fc_out)
    if S == 1:
        return out.reshape(B, c_last)
    return out.reshape(B, S, c_last)                               # partial maxes


# ----------------------------------------------------------------------------
# Parameter initialization (deterministic, in-script).  Conv1d(k=1) weights
# (Cout, Cin, 1) and Linear weights (Cout, Cin) are stored pre-transposed (Cin, Cout).
# ----------------------------------------------------------------------------
def _w(key, cin, cout, scale=0.05):
    return scale * jax.random.normal(key, (cin, cout), dtype=jnp.float32)


def _b(key, cout, scale=0.05):
    return scale * jax.random.normal(key, (cout,), dtype=jnp.float32)


def init_stn(key, k):
    """STN3d when k == 3, STNkd otherwise."""
    ks = jax.random.split(key, 12)
    return {
        "conv1_w": _w(ks[0], k, 64), "conv1_b": _b(ks[1], 64),
        "conv2_w": _w(ks[2], 64, 128), "conv2_b": _b(ks[3], 128),
        "conv3_w": _w(ks[4], 128, 1024), "conv3_b": _b(ks[5], 1024),
        "fc1_w": _w(ks[6], 1024, 512), "fc1_b": _b(ks[7], 512),
        "fc2_w": _w(ks[8], 512, 256), "fc2_b": _b(ks[9], 256),
        # fc3: zero weight, identity bias (as in the PyTorch __init__)
        "fc3_w": jnp.zeros((256, k * k), dtype=jnp.float32),
        "fc3_b": jnp.eye(k, dtype=jnp.float32).reshape(-1),
    }


def init_pointnet(key, hidden_dim=512):
    ks = jax.random.split(key, 12)
    return {
        "stn3d": init_stn(ks[0], 3),
        "stnkd": init_stn(ks[1], 64),
        "conv1_w": _w(ks[2], 3, 64), "conv1_b": _b(ks[3], 64),
        "conv2_w": _w(ks[4], 64, 64), "conv2_b": _b(ks[5], 64),
        "conv3_w": _w(ks[6], 64, 64), "conv3_b": _b(ks[7], 64),
        "conv4_w": _w(ks[8], 64, 128), "conv4_b": _b(ks[9], 128),
        "conv5_w": _w(ks[10], 128, hidden_dim), "conv5_b": _b(ks[11], hidden_dim),
    }


# ----------------------------------------------------------------------------
# Forward pass (weight folding in plain JAX, heavy compute in Pallas)
# ----------------------------------------------------------------------------
def _pad_points(x, multiple):
    """Pad the points axis to a multiple of `multiple` by repeating the last point.
    Exact for this model: all ops are per-point and every reduction is a max."""
    pad = (-x.shape[1]) % multiple
    if pad == 0:
        return x
    return jnp.pad(x, ((0, 0), (0, pad), (0, 0)), mode="edge")


def pointnet_forward(params, x, tile_n=DEFAULT_TILE_N):
    """x: (B, num_points, 3)  ->  (B, hidden_dim) global feature."""
    B, N, _ = x.shape
    # small-N fallback tile: multiple of 16 (bf16 packs 16 rows per vreg)
    tn = tile_n if N >= tile_n else max(16, ((N + 15) // 16) * 16)
    xp = _pad_points(x.astype(jnp.float32), tn)
    x_bf = xp.astype(jnp.bfloat16)
    n_tiles = xp.shape[1] // tn
    splits = 2 if (n_tiles >= 2 and n_tiles % 2 == 0) else 1       # v7x megacore at small B

    p3, pk = params["stn3d"], params["stnkd"]

    # ---- STN3d: conv1->conv2->conv3 (+ReLU) -> max -> fc1->fc2->fc3, one kernel
    trans3 = point_mlp_chain(
        x_bf,
        [(p3["conv1_w"], p3["conv1_b"]),
         (p3["conv2_w"], p3["conv2_b"]),
         (p3["conv3_w"], p3["conv3_b"])],
        tn,
        fc_layers=[(p3["fc1_w"], p3["fc1_b"]),
                   (p3["fc2_w"], p3["fc2_b"]),
                   (p3["fc3_w"], p3["fc3_b"])],
    ).reshape(B, 3, 3)

    # PyTorch does bmm(trans3, x) on (B,3,N): row layout x_row @ trans3^T.
    # Fold into conv1:  x_row @ trans3^T @ W1 = x_row @ (trans3^T @ W1).
    w1p = jnp.einsum("bji,jk->bik", trans3, params["conv1_w"])     # (B, 3, 64)

    # ---- STNkd: recompute conv1'/conv2 in VMEM, then STN convs + max + FC head
    trans64 = point_mlp_chain(
        x_bf,
        [(w1p, params["conv1_b"]),
         (params["conv2_w"], params["conv2_b"]),
         (pk["conv1_w"], pk["conv1_b"]),
         (pk["conv2_w"], pk["conv2_b"]),
         (pk["conv3_w"], pk["conv3_b"])],
        tn,
        fc_layers=[(pk["fc1_w"], pk["fc1_b"]),
                   (pk["fc2_w"], pk["fc2_b"]),
                   (pk["fc3_w"], pk["fc3_b"])],
    ).reshape(B, 64, 64)

    # PyTorch does bmm(h_row, trans64) on (B,N,64).
    # Fold into conv3:  (h @ trans64) @ W3 = h @ (trans64 @ W3).
    w3p = jnp.einsum("bij,jk->bik", trans64, params["conv3_w"])    # (B, 64, 64)

    # ---- main chain: folded conv1, conv2, folded conv3, conv4, conv5 + global max
    g = point_mlp_chain(
        x_bf,
        [(w1p, params["conv1_b"]),
         (params["conv2_w"], params["conv2_b"]),
         (w3p, params["conv3_b"]),
         (params["conv4_w"], params["conv4_b"]),
         (params["conv5_w"], params["conv5_b"])],
        tn,
        num_splits=splits,
    )
    if g.ndim == 3:                                                # combine partial maxes
        g = jnp.max(g, axis=1)
    return g


# ----------------------------------------------------------------------------
# Pure-JAX reference (matches the PyTorch module op-for-op) for validation
# ----------------------------------------------------------------------------
def pointnet_reference(params, x):
    def conv(h, w, b):
        return jax.nn.relu(h @ w + b)

    def stn(h, p, k):
        o = conv(h, p["conv1_w"], p["conv1_b"])
        o = conv(o, p["conv2_w"], p["conv2_b"])
        o = conv(o, p["conv3_w"], p["conv3_b"])
        o = jnp.max(o, axis=1)
        o = jax.nn.relu(o @ p["fc1_w"] + p["fc1_b"])
        o = jax.nn.relu(o @ p["fc2_w"] + p["fc2_b"])
        o = o @ p["fc3_w"] + p["fc3_b"]
        return o.reshape(-1, k, k)

    p3, pk = params["stn3d"], params["stnkd"]
    trans3 = stn(x, p3, 3)
    xt = jnp.einsum("bnj,bij->bni", x, trans3)          # bmm(trans3, x) in row layout
    h = conv(xt, params["conv1_w"], params["conv1_b"])
    h = conv(h, params["conv2_w"], params["conv2_b"])
    trans64 = stn(h, pk, 64)
    h = jnp.einsum("bni,bij->bnj", h, trans64)          # bmm(h, trans64)
    h = conv(h, params["conv3_w"], params["conv3_b"])
    h = conv(h, params["conv4_w"], params["conv4_b"])
    h = conv(h, params["conv5_w"], params["conv5_b"])
    return jnp.max(h, axis=1)


# ----------------------------------------------------------------------------
if __name__ == "__main__":
    key = jax.random.PRNGKey(0)
    pkey, xkey, tkey = jax.random.split(key, 3)

    HIDDEN = 512
    B, N = 2, 32
    params = init_pointnet(pkey, hidden_dim=HIDDEN)
    # Perturb fc3 weights (test-only) so the STN transforms are not identity --
    # this exercises the transform-folding path against the reference.
    params["stn3d"]["fc3_w"] = 0.05 * jax.random.normal(tkey, (256, 9), jnp.float32)
    params["stnkd"]["fc3_w"] = 0.02 * jax.random.normal(tkey, (256, 64 * 64), jnp.float32)

    x = jax.random.normal(xkey, (B, N, 3), dtype=jnp.float32)

    fwd = jax.jit(lambda xx: pointnet_forward(params, xx))
    out = fwd(x)
    jax.block_until_ready(out)

    ref = pointnet_reference(params, x)
    jax.block_until_ready(ref)

    assert out.shape == (B, HIDDEN), out.shape
    assert bool(jnp.all(jnp.isfinite(out)))
    assert bool(jnp.allclose(out, ref, rtol=1e-1, atol=1e-2)), (
        float(jnp.max(jnp.abs(out - ref))))
    print("KERNEL_OK")
</pallas_src>

<mosaic_0001>
module attributes {stable_mosaic.version = 11 : i64} {
  func.func @kernel(%arg0: i32, %arg1: i32, %arg2: i32, %arg3: memref<1x32x3xbf16, #tpu.memory_space<vmem>>, %arg4: memref<3x64xbf16, #tpu.memory_space<vmem>>, %arg5: memref<1x64xf32, #tpu.memory_space<vmem>>, %arg6: memref<64x128xbf16, #tpu.memory_space<vmem>>, %arg7: memref<1x128xf32, #tpu.memory_space<vmem>>, %arg8: memref<128x1024xbf16, #tpu.memory_space<vmem>>, %arg9: memref<1x1024xf32, #tpu.memory_space<vmem>>, %arg10: memref<1024x512xbf16, #tpu.memory_space<vmem>>, %arg11: memref<1x512xf32, #tpu.memory_space<vmem>>, %arg12: memref<512x256xbf16, #tpu.memory_space<vmem>>, %arg13: memref<1x256xf32, #tpu.memory_space<vmem>>, %arg14: memref<256x9xbf16, #tpu.memory_space<vmem>>, %arg15: memref<1x9xf32, #tpu.memory_space<vmem>>, %arg16: memref<1x1x9xf32, #tpu.memory_space<vmem>>, %arg17: memref<1x1024xf32, #tpu.memory_space<vmem>>) attributes {dimension_semantics = [#tpu.dimension_semantics<parallel>, #tpu.dimension_semantics<parallel>, #tpu.dimension_semantics<arbitrary>], iteration_bounds = array<i64: 2, 1, 1>, scalar_prefetch = 0 : i64, scratch_operands = 1 : i64, tpu.core_type = #tpu.core_type<tc>, window_params = [{transform_indices = @transform_0, window_bounds = array<i64: 1, 32, 3>}, {pipeline_mode = #tpu.pipeline_mode<synchronous>, transform_indices = @transform_1, window_bounds = array<i64: 3, 64>}, {pipeline_mode = #tpu.pipeline_mode<synchronous>, transform_indices = @transform_2, window_bounds = array<i64: 1, 64>}, {pipeline_mode = #tpu.pipeline_mode<synchronous>, transform_indices = @transform_3, window_bounds = array<i64: 64, 128>}, {pipeline_mode = #tpu.pipeline_mode<synchronous>, transform_indices = @transform_4, window_bounds = array<i64: 1, 128>}, {pipeline_mode = #tpu.pipeline_mode<synchronous>, transform_indices = @transform_5, window_bounds = array<i64: 128, 1024>}, {pipeline_mode = #tpu.pipeline_mode<synchronous>, transform_indices = @transform_6, window_bounds = array<i64: 1, 1024>}, {pipeline_mode = #tpu.pipeline_mode<synchronous>, transform_indices = @transform_7, window_bounds = array<i64: 1024, 512>}, {pipeline_mode = #tpu.pipeline_mode<synchronous>, transform_indices = @transform_8, window_bounds = array<i64: 1, 512>}, {pipeline_mode = #tpu.pipeline_mode<synchronous>, transform_indices = @transform_9, window_bounds = array<i64: 512, 256>}, {pipeline_mode = #tpu.pipeline_mode<synchronous>, transform_indices = @transform_10, window_bounds = array<i64: 1, 256>}, {pipeline_mode = #tpu.pipeline_mode<synchronous>, transform_indices = @transform_11, window_bounds = array<i64: 256, 9>}, {pipeline_mode = #tpu.pipeline_mode<synchronous>, transform_indices = @transform_12, window_bounds = array<i64: 1, 9>}, {transform_indices = @transform_13, window_bounds = array<i64: 1, 1, 9>}]} {
    %c0 = arith.constant 0 : index
    %c0_0 = arith.constant 0 : index
    %c0_1 = arith.constant 0 : index
    %0 = vector.load %arg3[%c0, %c0_0, %c0_1] : memref<1x32x3xbf16, #tpu.memory_space<vmem>>, vector<1x32x3xbf16>
    %1 = vector.shape_cast %0 : vector<1x32x3xbf16> to vector<32x3xbf16>
    %c0_2 = arith.constant 0 : index
    %c0_3 = arith.constant 0 : index
    %2 = vector.load %arg4[%c0_2, %c0_3] : memref<3x64xbf16, #tpu.memory_space<vmem>>, vector<3x64xbf16>
    %cst = arith.constant dense<0.000000e+00> : vector<32x64xf32>
    %3 = tpu.matmul %1, %2, %cst {dimension_numbers = #tpu.dot_dimension_numbers<[1], [0], [0], [1], [0, 0, 1, 1], [], []>} : vector<32x3xbf16>, vector<3x64xbf16>, vector<32x64xf32> -> vector<32x64xf32>
    %c0_4 = arith.constant 0 : index
    %c0_5 = arith.constant 0 : index
    %4 = vector.load %arg5[%c0_4, %c0_5] : memref<1x64xf32, #tpu.memory_space<vmem>>, vector<1x64xf32>
    %5 = vector.broadcast %4 : vector<1x64xf32> to vector<32x64xf32>
    %6 = arith.addf %3, %5 : vector<32x64xf32>
    %cst_6 = arith.constant 0.000000e+00 : f32
    %7 = vector.broadcast %cst_6 : f32 to vector<32x64xf32>
    %8 = arith.maximumf %6, %7 : vector<32x64xf32>
    %9 = arith.truncf %8 : vector<32x64xf32> to vector<32x64xbf16>
    %c0_7 = arith.constant 0 : index
    %c0_8 = arith.constant 0 : index
    %10 = vector.load %arg6[%c0_7, %c0_8] : memref<64x128xbf16, #tpu.memory_space<vmem>>, vector<64x128xbf16>
    %cst_9 = arith.constant dense<0.000000e+00> : vector<32x128xf32>
    %11 = tpu.matmul %9, %10, %cst_9 {dimension_numbers = #tpu.dot_dimension_numbers<[1], [0], [0], [1], [0, 0, 1, 1], [], []>} : vector<32x64xbf16>, vector<64x128xbf16>, vector<32x128xf32> -> vector<32x128xf32>
    %c0_10 = arith.constant 0 : index
    %c0_11 = arith.constant 0 : index
    %12 = vector.load %arg7[%c0_10, %c0_11] : memref<1x128xf32, #tpu.memory_space<vmem>>, vector<1x128xf32>
    %13 = vector.broadcast %12 : vector<1x128xf32> to vector<32x128xf32>
    %14 = arith.addf %11, %13 : vector<32x128xf32>
    %cst_12 = arith.constant 0.000000e+00 : f32
    %15 = vector.broadcast %cst_12 : f32 to vector<32x128xf32>
    %16 = arith.maximumf %14, %15 : vector<32x128xf32>
    %17 = arith.truncf %16 : vector<32x128xf32> to vector<32x128xbf16>
    %c0_13 = arith.constant 0 : index
    %c0_14 = arith.constant 0 : index
    %18 = vector.load %arg8[%c0_13, %c0_14] : memref<128x1024xbf16, #tpu.memory_space<vmem>>, vector<128x1024xbf16>
    %cst_15 = arith.constant dense<0.000000e+00> : vector<32x1024xf32>
    %19 = tpu.matmul %17, %18, %cst_15 {dimension_numbers = #tpu.dot_dimension_numbers<[1], [0], [0], [1], [0, 0, 1, 1], [], []>} : vector<32x128xbf16>, vector<128x1024xbf16>, vector<32x1024xf32> -> vector<32x1024xf32>
    %c0_16 = arith.constant 0 : index
    %c0_17 = arith.constant 0 : index
    %20 = vector.load %arg9[%c0_16, %c0_17] : memref<1x1024xf32, #tpu.memory_space<vmem>>, vector<1x1024xf32>
    %21 = vector.broadcast %20 : vector<1x1024xf32> to vector<32x1024xf32>
    %22 = arith.addf %19, %21 : vector<32x1024xf32>
    %cst_18 = arith.constant 0.000000e+00 : f32
    %23 = vector.broadcast %cst_18 : f32 to vector<32x1024xf32>
    %24 = arith.maximumf %22, %23 : vector<32x1024xf32>
    %cst_19 = arith.constant dense<0xFF800000> : vector<1024xf32>
    %25 = vector.multi_reduction <maximumf>, %24, %cst_19 [0] : vector<32x1024xf32> to vector<1024xf32>
    %26 = vector.shape_cast %25 : vector<1024xf32> to vector<1x1024xf32>
    %c0_i32 = arith.constant 0 : i32
    %27 = arith.cmpi eq, %arg2, %c0_i32 : i32
    %28 = arith.extui %27 : i1 to i32
    %c0_i32_20 = arith.constant 0 : i32
    %29 = arith.cmpi ne, %28, %c0_i32_20 : i32
    scf.if %29 {
      %c0_25 = arith.constant 0 : index
      %c0_26 = arith.constant 0 : index
      %36 = vector.load %arg17[%c0_25, %c0_26] : memref<1x1024xf32, #tpu.memory_space<vmem>>, vector<1x1024xf32>
      tpu.vector_store %arg17[%c0_25, %c0_26], %26 {strides = array<i32>} : memref<1x1024xf32, #tpu.memory_space<vmem>>, vector<1x1024xf32>,
    } else {
    }
    %c0_i32_21 = arith.constant 0 : i32
    %30 = arith.cmpi ne, %arg2, %c0_i32_21 : i32
    %31 = arith.extui %30 : i1 to i32
    %c0_i32_22 = arith.constant 0 : i32
    %32 = arith.cmpi ne, %31, %c0_i32_22 : i32
    scf.if %32 {
      %c0_25 = arith.constant 0 : index
      %c0_26 = arith.constant 0 : index
      %36 = vector.load %arg17[%c0_25, %c0_26] : memref<1x1024xf32, #tpu.memory_space<vmem>>, vector<1x1024xf32>
      %37 = arith.maximumf %36, %26 : vector<1x1024xf32>
      %c0_27 = arith.constant 0 : index
      %c0_28 = arith.constant 0 : index
      %38 = vector.load %arg17[%c0_27, %c0_28] : memref<1x1024xf32, #tpu.memory_space<vmem>>, vector<1x1024xf32>
      tpu.vector_store %arg17[%c0_27, %c0_28], %37 {strides = array<i32>} : memref<1x1024xf32, #tpu.memory_space<vmem>>, vector<1x1024xf32>,
    } else {
    }
    %c0_i32_23 = arith.constant 0 : i32
    %33 = arith.cmpi eq, %arg2, %c0_i32_23 : i32
    %34 = arith.extui %33 : i1 to i32
    %c0_i32_24 = arith.constant 0 : i32
    %35 = arith.cmpi ne, %34, %c0_i32_24 : i32
    scf.if %35 {
      %c0_25 = arith.constant 0 : index
      %c0_26 = arith.constant 0 : index
      %36 = vector.load %arg17[%c0_25, %c0_26] : memref<1x1024xf32, #tpu.memory_space<vmem>>, vector<1x1024xf32>
      %37 = arith.truncf %36 : vector<1x1024xf32> to vector<1x1024xbf16>
      %c0_27 = arith.constant 0 : index
      %c0_28 = arith.constant 0 : index
      %38 = vector.load %arg10[%c0_27, %c0_28] : memref<1024x512xbf16, #tpu.memory_space<vmem>>, vector<1024x512xbf16>
      %c0_29 = arith.constant 0 : index
      %c0_30 = arith.constant 0 : index
      %39 = vector.load %arg11[%c0_29, %c0_30] : memref<1x512xf32, #tpu.memory_space<vmem>>, vector<1x512xf32>
      %cst_31 = arith.constant dense<0.000000e+00> : vector<1x512xf32>
      %40 = tpu.matmul %37, %38, %cst_31 {dimension_numbers = #tpu.dot_dimension_numbers<[1], [0], [0], [1], [0, 0, 1, 1], [], []>} : vector<1x1024xbf16>, vector<1024x512xbf16>, vector<1x512xf32> -> vector<1x512xf32>
      %41 = arith.addf %40, %39 : vector<1x512xf32>
      %cst_32 = arith.constant 0.000000e+00 : f32
      %42 = vector.broadcast %cst_32 : f32 to vector<1x512xf32>
      %43 = arith.maximumf %41, %42 : vector<1x512xf32>
      %44 = arith.truncf %43 : vector<1x512xf32> to vector<1x512xbf16>
      %c0_33 = arith.constant 0 : index
      %c0_34 = arith.constant 0 : index
      %45 = vector.load %arg12[%c0_33, %c0_34] : memref<512x256xbf16, #tpu.memory_space<vmem>>, vector<512x256xbf16>
      %c0_35 = arith.constant 0 : index
      %c0_36 = arith.constant 0 : index
      %46 = vector.load %arg13[%c0_35, %c0_36] : memref<1x256xf32, #tpu.memory_space<vmem>>, vector<1x256xf32>
      %cst_37 = arith.constant dense<0.000000e+00> : vector<1x256xf32>
      %47 = tpu.matmul %44, %45, %cst_37 {dimension_numbers = #tpu.dot_dimension_numbers<[1], [0], [0], [1], [0, 0, 1, 1], [], []>} : vector<1x512xbf16>, vector<512x256xbf16>, vector<1x256xf32> -> vector<1x256xf32>
      %48 = arith.addf %47, %46 : vector<1x256xf32>
      %cst_38 = arith.constant 0.000000e+00 : f32
      %49 = vector.broadcast %cst_38 : f32 to vector<1x256xf32>
      %50 = arith.maximumf %48, %49 : vector<1x256xf32>
      %51 = arith.truncf %50 : vector<1x256xf32> to vector<1x256xbf16>
      %c0_39 = arith.constant 0 : index
      %c0_40 = arith.constant 0 : index
      %52 = vector.load %arg14[%c0_39, %c0_40] : memref<256x9xbf16, #tpu.memory_space<vmem>>, vector<256x9xbf16>
      %c0_41 = arith.constant 0 : index
      %c0_42 = arith.constant 0 : index
      %53 = vector.load %arg15[%c0_41, %c0_42] : memref<1x9xf32, #tpu.memory_space<vmem>>, vector<1x9xf32>
      %cst_43 = arith.constant dense<0.000000e+00> : vector<1x9xf32>
      %54 = tpu.matmul %51, %52, %cst_43 {dimension_numbers = #tpu.dot_dimension_numbers<[1], [0], [0], [1], [0, 0, 1, 1], [], []>} : vector<1x256xbf16>, vector<256x9xbf16>, vector<1x9xf32> -> vector<1x9xf32>
      %55 = arith.addf %54, %53 : vector<1x9xf32>
      %c0_44 = arith.constant 0 : index
      %c0_45 = arith.constant 0 : index
      %c0_46 = arith.constant 0 : index
      %56 = vector.load %arg16[%c0_44, %c0_45, %c0_46] : memref<1x1x9xf32, #tpu.memory_space<vmem>>, vector<1x1x9xf32>
      %57 = vector.shape_cast %56 : vector<1x1x9xf32> to vector<1x9xf32>
      %58 = vector.shape_cast %55 : vector<1x9xf32> to vector<1x1x9xf32>
      tpu.vector_store %arg16[%c0_44, %c0_45, %c0_46], %58 {strides = array<i32>} : memref<1x1x9xf32, #tpu.memory_space<vmem>>, vector<1x1x9xf32>,
    } else {
    }
    return
  }
  func.func @transform_0(%arg0: i32, %arg1: i32, %arg2: i32) -> (i32, i32, i32) {
    %c1_i32 = arith.constant 1 : i32
    %0 = arith.muli %arg1, %c1_i32 : i32
    %1 = arith.addi %0, %arg2 : i32
    %c0_i32 = arith.constant 0 : i32
    %c0_i32_0 = arith.constant 0 : i32
    return %arg0, %1, %c0_i32 : i32, i32, i32
  }
  func.func @transform_1(%arg0: i32, %arg1: i32, %arg2: i32) -> (i32, i32) {
    %c0_i32 = arith.constant 0 : i32
    %c0_i32_0 = arith.constant 0 : i32
    %c0_i32_1 = arith.constant 0 : i32
    return %c0_i32, %c0_i32_0 : i32, i32
  }
  func.func @transform_2(%arg0: i32, %arg1: i32, %arg2: i32) -> (i32, i32) {
    %c0_i32 = arith.constant 0 : i32
    %c0_i32_0 = arith.constant 0 : i32
    %c0_i32_1 = arith.constant 0 : i32
    return %c0_i32, %c0_i32_0 : i32, i32
  }
  func.func @transform_3(%arg0: i32, %arg1: i32, %arg2: i32) -> (i32, i32) {
    %c0_i32 = arith.constant 0 : i32
    %c0_i32_0 = arith.constant 0 : i32
    %c0_i32_1 = arith.constant 0 : i32
    return %c0_i32, %c0_i32_0 : i32, i32
  }
  func.func @transform_4(%arg0: i32, %arg1: i32, %arg2: i32) -> (i32, i32) {
    %c0_i32 = arith.constant 0 : i32
    %c0_i32_0 = arith.constant 0 : i32
    %c0_i32_1 = arith.constant 0 : i32
    return %c0_i32, %c0_i32_0 : i32, i32
  }
  func.func @transform_5(%arg0: i32, %arg1: i32, %arg2: i32) -> (i32, i32) {
    %c0_i32 = arith.constant 0 : i32
    %c0_i32_0 = arith.constant 0 : i32
    %c0_i32_1 = arith.constant 0 : i32
    return %c0_i32, %c0_i32_0 : i32, i32
  }
  func.func @transform_6(%arg0: i32, %arg1: i32, %arg2: i32) -> (i32, i32) {
    %c0_i32 = arith.constant 0 : i32
    %c0_i32_0 = arith.constant 0 : i32
    %c0_i32_1 = arith.constant 0 : i32
    return %c0_i32, %c0_i32_0 : i32, i32
  }
  func.func @transform_7(%arg0: i32, %arg1: i32, %arg2: i32) -> (i32, i32) {
    %c0_i32 = arith.constant 0 : i32
    %c0_i32_0 = arith.constant 0 : i32
    %c0_i32_1 = arith.constant 0 : i32
    return %c0_i32, %c0_i32_0 : i32, i32
  }
  func.func @transform_8(%arg0: i32, %arg1: i32, %arg2: i32) -> (i32, i32) {
    %c0_i32 = arith.constant 0 : i32
    %c0_i32_0 = arith.constant 0 : i32
    %c0_i32_1 = arith.constant 0 : i32
    return %c0_i32, %c0_i32_0 : i32, i32
  }
  func.func @transform_9(%arg0: i32, %arg1: i32, %arg2: i32) -> (i32, i32) {
    %c0_i32 = arith.constant 0 : i32
    %c0_i32_0 = arith.constant 0 : i32
    %c0_i32_1 = arith.constant 0 : i32
    return %c0_i32, %c0_i32_0 : i32, i32
  }
  func.func @transform_10(%arg0: i32, %arg1: i32, %arg2: i32) -> (i32, i32) {
    %c0_i32 = arith.constant 0 : i32
    %c0_i32_0 = arith.constant 0 : i32
    %c0_i32_1 = arith.constant 0 : i32
    return %c0_i32, %c0_i32_0 : i32, i32
  }
  func.func @transform_11(%arg0: i32, %arg1: i32, %arg2: i32) -> (i32, i32) {
    %c0_i32 = arith.constant 0 : i32
    %c0_i32_0 = arith.constant 0 : i32
    %c0_i32_1 = arith.constant 0 : i32
    return %c0_i32, %c0_i32_0 : i32, i32
  }
  func.func @transform_12(%arg0: i32, %arg1: i32, %arg2: i32) -> (i32, i32) {
    %c0_i32 = arith.constant 0 : i32
    %c0_i32_0 = arith.constant 0 : i32
    %c0_i32_1 = arith.constant 0 : i32
    return %c0_i32, %c0_i32_0 : i32, i32
  }
  func.func @transform_13(%arg0: i32, %arg1: i32, %arg2: i32) -> (i32, i32, i32) {
    %c0_i32 = arith.constant 0 : i32
    %c0_i32_0 = arith.constant 0 : i32
    %c0_i32_1 = arith.constant 0 : i32
    return %arg0, %c0_i32, %c0_i32_0 : i32, i32, i32
  }
}

module attributes {stable_mosaic.version = 11 : i64} {
  func.func @kernel(%arg0: i32, %arg1: i32, %arg2: i32, %arg3: memref<1x32x3xbf16, #tpu.memory_space<vmem>>, %arg4: memref<1x3x64xbf16, #tpu.memory_space<vmem>>, %arg5: memref<1x64xf32, #tpu.memory_space<vmem>>, %arg6: memref<64x64xbf16, #tpu.memory_space<vmem>>, %arg7: memref<1x64xf32, #tpu.memory_space<vmem>>, %arg8: memref<64x64xbf16, #tpu.memory_space<vmem>>, %arg9: memref<1x64xf32, #tpu.memory_space<vmem>>, %arg10: memref<64x128xbf16, #tpu.memory_space<vmem>>, %arg11: memref<1x128xf32, #tpu.memory_space<vmem>>, %arg12: memref<128x1024xbf16, #tpu.memory_space<vmem>>, %arg13: memref<1x1024xf32, #tpu.memory_space<vmem>>, %arg14: memref<1024x512xbf16, #tpu.memory_space<vmem>>, %arg15: memref<1x512xf32, #tpu.memory_space<vmem>>, %arg16: memref<512x256xbf16, #tpu.memory_space<vmem>>, %arg17: memref<1x256xf32, #tpu.memory_space<vmem>>, %arg18: memref<256x4096xbf16, #tpu.memory_space<vmem>>, %arg19: memref<1x4096xf32, #tpu.memory_space<vmem>>, %arg20: memref<1x1x4096xf32, #tpu.memory_space<vmem>>, %arg21: memref<1x1024xf32, #tpu.memory_space<vmem>>) attributes {dimension_semantics = [#tpu.dimension_semantics<parallel>, #tpu.dimension_semantics<parallel>, #tpu.dimension_semantics<arbitrary>], iteration_bounds = array<i64: 2, 1, 1>, scalar_prefetch = 0 : i64, scratch_operands = 1 : i64, tpu.core_type = #tpu.core_type<tc>, window_params = [{transform_indices = @transform_0, window_bounds = array<i64: 1, 32, 3>}, {transform_indices = @transform_1, window_bounds = array<i64: 1, 3, 64>}, {pipeline_mode = #tpu.pipeline_mode<synchronous>, transform_indices = @transform_2, window_bounds = array<i64: 1, 64>}, {pipeline_mode = #tpu.pipeline_mode<synchronous>, transform_indices = @transform_3, window_bounds = array<i64: 64, 64>}, {pipeline_mode = #tpu.pipeline_mode<synchronous>, transform_indices = @transform_4, window_bounds = array<i64: 1, 64>}, {pipeline_mode = #tpu.pipeline_mode<synchronous>, transform_indices = @transform_5, window_bounds = array<i64: 64, 64>}, {pipeline_mode = #tpu.pipeline_mode<synchronous>, transform_indices = @transform_6, window_bounds = array<i64: 1, 64>}, {pipeline_mode = #tpu.pipeline_mode<synchronous>, transform_indices = @transform_7, window_bounds = array<i64: 64, 128>}, {pipeline_mode = #tpu.pipeline_mode<synchronous>, transform_indices = @transform_8, window_bounds = array<i64: 1, 128>}, {pipeline_mode = #tpu.pipeline_mode<synchronous>, transform_indices = @transform_9, window_bounds = array<i64: 128, 1024>}, {pipeline_mode = #tpu.pipeline_mode<synchronous>, transform_indices = @transform_10, window_bounds = array<i64: 1, 1024>}, {pipeline_mode = #tpu.pipeline_mode<synchronous>, transform_indices = @transform_11, window_bounds = array<i64: 1024, 512>}, {pipeline_mode = #tpu.pipeline_mode<synchronous>, transform_indices = @transform_12, window_bounds = array<i64: 1, 512>}, {pipeline_mode = #tpu.pipeline_mode<synchronous>, transform_indices = @transform_13, window_bounds = array<i64: 512, 256>}, {pipeline_mode = #tpu.pipeline_mode<synchronous>, transform_indices = @transform_14, window_bounds = array<i64: 1, 256>}, {pipeline_mode = #tpu.pipeline_mode<synchronous>, transform_indices = @transform_15, window_bounds = array<i64: 256, 4096>}, {pipeline_mode = #tpu.pipeline_mode<synchronous>, transform_indices = @transform_16, window_bounds = array<i64: 1, 4096>}, {transform_indices = @transform_17, window_bounds = array<i64: 1, 1, 4096>}]} {
    %c0 = arith.constant 0 : index
    %c0_0 = arith.constant 0 : index
    %c0_1 = arith.constant 0 : index
    %0 = vector.load %arg3[%c0, %c0_0, %c0_1] : memref<1x32x3xbf16, #tpu.memory_space<vmem>>, vector<1x32x3xbf16>
    %1 = vector.shape_cast %0 : vector<1x32x3xbf16> to vector<32x3xbf16>
    %c0_2 = arith.constant 0 : index
    %c0_3 = arith.constant 0 : index
    %c0_4 = arith.constant 0 : index
    %2 = vector.load %arg4[%c0_2, %c0_3, %c0_4] : memref<1x3x64xbf16, #tpu.memory_space<vmem>>, vector<1x3x64xbf16>
    %3 = vector.shape_cast %2 : vector<1x3x64xbf16> to vector<3x64xbf16>
    %cst = arith.constant dense<0.000000e+00> : vector<32x64xf32>
    %4 = tpu.matmul %1, %3, %cst {dimension_numbers = #tpu.dot_dimension_numbers<[1], [0], [0], [1], [0, 0, 1, 1], [], []>} : vector<32x3xbf16>, vector<3x64xbf16>, vector<32x64xf32> -> vector<32x64xf32>
    %c0_5 = arith.constant 0 : index
    %c0_6 = arith.constant 0 : index
    %5 = vector.load %arg5[%c0_5, %c0_6] : memref<1x64xf32, #tpu.memory_space<vmem>>, vector<1x64xf32>
    %6 = vector.broadcast %5 : vector<1x64xf32> to vector<32x64xf32>
    %7 = arith.addf %4, %6 : vector<32x64xf32>
    %cst_7 = arith.constant 0.000000e+00 : f32
    %8 = vector.broadcast %cst_7 : f32 to vector<32x64xf32>
    %9 = arith.maximumf %7, %8 : vector<32x64xf32>
    %10 = arith.truncf %9 : vector<32x64xf32> to vector<32x64xbf16>
    %c0_8 = arith.constant 0 : index
    %c0_9 = arith.constant 0 : index
    %11 = vector.load %arg6[%c0_8, %c0_9] : memref<64x64xbf16, #tpu.memory_space<vmem>>, vector<64x64xbf16>
    %cst_10 = arith.constant dense<0.000000e+00> : vector<32x64xf32>
    %12 = tpu.matmul %10, %11, %cst_10 {dimension_numbers = #tpu.dot_dimension_numbers<[1], [0], [0], [1], [0, 0, 1, 1], [], []>} : vector<32x64xbf16>, vector<64x64xbf16>, vector<32x64xf32> -> vector<32x64xf32>
    %c0_11 = arith.constant 0 : index
    %c0_12 = arith.constant 0 : index
    %13 = vector.load %arg7[%c0_11, %c0_12] : memref<1x64xf32, #tpu.memory_space<vmem>>, vector<1x64xf32>
    %14 = vector.broadcast %13 : vector<1x64xf32> to vector<32x64xf32>
    %15 = arith.addf %12, %14 : vector<32x64xf32>
    %cst_13 = arith.constant 0.000000e+00 : f32
    %16 = vector.broadcast %cst_13 : f32 to vector<32x64xf32>
    %17 = arith.maximumf %15, %16 : vector<32x64xf32>
    %18 = arith.truncf %17 : vector<32x64xf32> to vector<32x64xbf16>
    %c0_14 = arith.constant 0 : index
    %c0_15 = arith.constant 0 : index
    %19 = vector.load %arg8[%c0_14, %c0_15] : memref<64x64xbf16, #tpu.memory_space<vmem>>, vector<64x64xbf16>
    %cst_16 = arith.constant dense<0.000000e+00> : vector<32x64xf32>
    %20 = tpu.matmul %18, %19, %cst_16 {dimension_numbers = #tpu.dot_dimension_numbers<[1], [0], [0], [1], [0, 0, 1, 1], [], []>} : vector<32x64xbf16>, vector<64x64xbf16>, vector<32x64xf32> -> vector<32x64xf32>
    %c0_17 = arith.constant 0 : index
    %c0_18 = arith.constant 0 : index
    %21 = vector.load %arg9[%c0_17, %c0_18] : memref<1x64xf32, #tpu.memory_space<vmem>>, vector<1x64xf32>
    %22 = vector.broadcast %21 : vector<1x64xf32> to vector<32x64xf32>
    %23 = arith.addf %20, %22 : vector<32x64xf32>
    %cst_19 = arith.constant 0.000000e+00 : f32
    %24 = vector.broadcast %cst_19 : f32 to vector<32x64xf32>
    %25 = arith.maximumf %23, %24 : vector<32x64xf32>
    %26 = arith.truncf %25 : vector<32x64xf32> to vector<32x64xbf16>
    %c0_20 = arith.constant 0 : index
    %c0_21 = arith.constant 0 : index
    %27 = vector.load %arg10[%c0_20, %c0_21] : memref<64x128xbf16, #tpu.memory_space<vmem>>, vector<64x128xbf16>
    %cst_22 = arith.constant dense<0.000000e+00> : vector<32x128xf32>
    %28 = tpu.matmul %26, %27, %cst_22 {dimension_numbers = #tpu.dot_dimension_numbers<[1], [0], [0], [1], [0, 0, 1, 1], [], []>} : vector<32x64xbf16>, vector<64x128xbf16>, vector<32x128xf32> -> vector<32x128xf32>
    %c0_23 = arith.constant 0 : index
    %c0_24 = arith.constant 0 : index
    %29 = vector.load %arg11[%c0_23, %c0_24] : memref<1x128xf32, #tpu.memory_space<vmem>>, vector<1x128xf32>
    %30 = vector.broadcast %29 : vector<1x128xf32> to vector<32x128xf32>
    %31 = arith.addf %28, %30 : vector<32x128xf32>
    %cst_25 = arith.constant 0.000000e+00 : f32
    %32 = vector.broadcast %cst_25 : f32 to vector<32x128xf32>
    %33 = arith.maximumf %31, %32 : vector<32x128xf32>
    %34 = arith.truncf %33 : vector<32x128xf32> to vector<32x128xbf16>
    %c0_26 = arith.constant 0 : index
    %c0_27 = arith.constant 0 : index
    %35 = vector.load %arg12[%c0_26, %c0_27] : memref<128x1024xbf16, #tpu.memory_space<vmem>>, vector<128x1024xbf16>
    %cst_28 = arith.constant dense<0.000000e+00> : vector<32x1024xf32>
    %36 = tpu.matmul %34, %35, %cst_28 {dimension_numbers = #tpu.dot_dimension_numbers<[1], [0], [0], [1], [0, 0, 1, 1], [], []>} : vector<32x128xbf16>, vector<128x1024xbf16>, vector<32x1024xf32> -> vector<32x1024xf32>
    %c0_29 = arith.constant 0 : index
    %c0_30 = arith.constant 0 : index
    %37 = vector.load %arg13[%c0_29, %c0_30] : memref<1x1024xf32, #tpu.memory_space<vmem>>, vector<1x1024xf32>
    %38 = vector.broadcast %37 : vector<1x1024xf32> to vector<32x1024xf32>
    %39 = arith.addf %36, %38 : vector<32x1024xf32>
    %cst_31 = arith.constant 0.000000e+00 : f32
    %40 = vector.broadcast %cst_31 : f32 to vector<32x1024xf32>
    %41 = arith.maximumf %39, %40 : vector<32x1024xf32>
    %cst_32 = arith.constant dense<0xFF800000> : vector<1024xf32>
    %42 = vector.multi_reduction <maximumf>, %41, %cst_32 [0] : vector<32x1024xf32> to vector<1024xf32>
    %43 = vector.shape_cast %42 : vector<1024xf32> to vector<1x1024xf32>
    %c0_i32 = arith.constant 0 : i32
    %44 = arith.cmpi eq, %arg2, %c0_i32 : i32
    %45 = arith.extui %44 : i1 to i32
    %c0_i32_33 = arith.constant 0 : i32
    %46 = arith.cmpi ne, %45, %c0_i32_33 : i32
    scf.if %46 {
      %c0_38 = arith.constant 0 : index
      %c0_39 = arith.constant 0 : index
      %53 = vector.load %arg21[%c0_38, %c0_39] : memref<1x1024xf32, #tpu.memory_space<vmem>>, vector<1x1024xf32>
      tpu.vector_store %arg21[%c0_38, %c0_39], %43 {strides = array<i32>} : memref<1x1024xf32, #tpu.memory_space<vmem>>, vector<1x1024xf32>,
    } else {
    }
    %c0_i32_34 = arith.constant 0 : i32
    %47 = arith.cmpi ne, %arg2, %c0_i32_34 : i32
    %48 = arith.extui %47 : i1 to i32
    %c0_i32_35 = arith.constant 0 : i32
    %49 = arith.cmpi ne, %48, %c0_i32_35 : i32
    scf.if %49 {
      %c0_38 = arith.constant 0 : index
      %c0_39 = arith.constant 0 : index
      %53 = vector.load %arg21[%c0_38, %c0_39] : memref<1x1024xf32, #tpu.memory_space<vmem>>, vector<1x1024xf32>
      %54 = arith.maximumf %53, %43 : vector<1x1024xf32>
      %c0_40 = arith.constant 0 : index
      %c0_41 = arith.constant 0 : index
      %55 = vector.load %arg21[%c0_40, %c0_41] : memref<1x1024xf32, #tpu.memory_space<vmem>>, vector<1x1024xf32>
      tpu.vector_store %arg21[%c0_40, %c0_41], %54 {strides = array<i32>} : memref<1x1024xf32, #tpu.memory_space<vmem>>, vector<1x1024xf32>,
    } else {
    }
    %c0_i32_36 = arith.constant 0 : i32
    %50 = arith.cmpi eq, %arg2, %c0_i32_36 : i32
    %51 = arith.extui %50 : i1 to i32
    %c0_i32_37 = arith.constant 0 : i32
    %52 = arith.cmpi ne, %51, %c0_i32_37 : i32
    scf.if %52 {
      %c0_38 = arith.constant 0 : index
      %c0_39 = arith.constant 0 : index
      %53 = vector.load %arg21[%c0_38, %c0_39] : memref<1x1024xf32, #tpu.memory_space<vmem>>, vector<1x1024xf32>
      %54 = arith.truncf %53 : vector<1x1024xf32> to vector<1x1024xbf16>
      %c0_40 = arith.constant 0 : index
      %c0_41 = arith.constant 0 : index
      %55 = vector.load %arg14[%c0_40, %c0_41] : memref<1024x512xbf16, #tpu.memory_space<vmem>>, vector<1024x512xbf16>
      %c0_42 = arith.constant 0 : index
      %c0_43 = arith.constant 0 : index
      %56 = vector.load %arg15[%c0_42, %c0_43] : memref<1x512xf32, #tpu.memory_space<vmem>>, vector<1x512xf32>
      %cst_44 = arith.constant dense<0.000000e+00> : vector<1x512xf32>
      %57 = tpu.matmul %54, %55, %cst_44 {dimension_numbers = #tpu.dot_dimension_numbers<[1], [0], [0], [1], [0, 0, 1, 1], [], []>} : vector<1x1024xbf16>, vector<1024x512xbf16>, vector<1x512xf32> -> vector<1x512xf32>
      %58 = arith.addf %57, %56 : vector<1x512xf32>
      %cst_45 = arith.constant 0.000000e+00 : f32
      %59 = vector.broadcast %cst_45 : f32 to vector<1x512xf32>
      %60 = arith.maximumf %58, %59 : vector<1x512xf32>
      %61 = arith.truncf %60 : vector<1x512xf32> to vector<1x512xbf16>
      %c0_46 = arith.constant 0 : index
      %c0_47 = arith.constant 0 : index
      %62 = vector.load %arg16[%c0_46, %c0_47] : memref<512x256xbf16, #tpu.memory_space<vmem>>, vector<512x256xbf16>
      %c0_48 = arith.constant 0 : index
      %c0_49 = arith.constant 0 : index
      %63 = vector.load %arg17[%c0_48, %c0_49] : memref<1x256xf32, #tpu.memory_space<vmem>>, vector<1x256xf32>
      %cst_50 = arith.constant dense<0.000000e+00> : vector<1x256xf32>
      %64 = tpu.matmul %61, %62, %cst_50 {dimension_numbers = #tpu.dot_dimension_numbers<[1], [0], [0], [1], [0, 0, 1, 1], [], []>} : vector<1x512xbf16>, vector<512x256xbf16>, vector<1x256xf32> -> vector<1x256xf32>
      %65 = arith.addf %64, %63 : vector<1x256xf32>
      %cst_51 = arith.constant 0.000000e+00 : f32
      %66 = vector.broadcast %cst_51 : f32 to vector<1x256xf32>
      %67 = arith.maximumf %65, %66 : vector<1x256xf32>
      %68 = arith.truncf %67 : vector<1x256xf32> to vector<1x256xbf16>
      %c0_52 = arith.constant 0 : index
      %c0_53 = arith.constant 0 : index
      %69 = vector.load %arg18[%c0_52, %c0_53] : memref<256x4096xbf16, #tpu.memory_space<vmem>>, vector<256x4096xbf16>
      %c0_54 = arith.constant 0 : index
      %c0_55 = arith.constant 0 : index
      %70 = vector.load %arg19[%c0_54, %c0_55] : memref<1x4096xf32, #tpu.memory_space<vmem>>, vector<1x4096xf32>
      %cst_56 = arith.constant dense<0.000000e+00> : vector<1x4096xf32>
      %71 = tpu.matmul %68, %69, %cst_56 {dimension_numbers = #tpu.dot_dimension_numbers<[1], [0], [0], [1], [0, 0, 1, 1], [], []>} : vector<1x256xbf16>, vector<256x4096xbf16>, vector<1x4096xf32> -> vector<1x4096xf32>
      %72 = arith.addf %71, %70 : vector<1x4096xf32>
      %c0_57 = arith.constant 0 : index
      %c0_58 = arith.constant 0 : index
      %c0_59 = arith.constant 0 : index
      %73 = vector.load %arg20[%c0_57, %c0_58, %c0_59] : memref<1x1x4096xf32, #tpu.memory_space<vmem>>, vector<1x1x4096xf32>
      %74 = vector.shape_cast %73 : vector<1x1x4096xf32> to vector<1x4096xf32>
      %75 = vector.shape_cast %72 : vector<1x4096xf32> to vector<1x1x4096xf32>
      tpu.vector_store %arg20[%c0_57, %c0_58, %c0_59], %75 {strides = array<i32>} : memref<1x1x4096xf32, #tpu.memory_space<vmem>>, vector<1x1x4096xf32>,
    } else {
    }
    return
  }
  func.func @transform_0(%arg0: i32, %arg1: i32, %arg2: i32) -> (i32, i32, i32) {
    %c1_i32 = arith.constant 1 : i32
    %0 = arith.muli %arg1, %c1_i32 : i32
    %1 = arith.addi %0, %arg2 : i32
    %c0_i32 = arith.constant 0 : i32
    %c0_i32_0 = arith.constant 0 : i32
    return %arg0, %1, %c0_i32 : i32, i32, i32
  }
  func.func @transform_1(%arg0: i32, %arg1: i32, %arg2: i32) -> (i32, i32, i32) {
    %c0_i32 = arith.constant 0 : i32
    %c0_i32_0 = arith.constant 0 : i32
    %c0_i32_1 = arith.constant 0 : i32
    return %arg0, %c0_i32, %c0_i32_0 : i32, i32, i32
  }
  func.func @transform_2(%arg0: i32, %arg1: i32, %arg2: i32) -> (i32, i32) {
    %c0_i32 = arith.constant 0 : i32
    %c0_i32_0 = arith.constant 0 : i32
    %c0_i32_1 = arith.constant 0 : i32
    return %c0_i32, %c0_i32_0 : i32, i32
  }
  func.func @transform_3(%arg0: i32, %arg1: i32, %arg2: i32) -> (i32, i32) {
    %c0_i32 = arith.constant 0 : i32
    %c0_i32_0 = arith.constant 0 : i32
    %c0_i32_1 = arith.constant 0 : i32
    return %c0_i32, %c0_i32_0 : i32, i32
  }
  func.func @transform_4(%arg0: i32, %arg1: i32, %arg2: i32) -> (i32, i32) {
    %c0_i32 = arith.constant 0 : i32
    %c0_i32_0 = arith.constant 0 : i32
    %c0_i32_1 = arith.constant 0 : i32
    return %c0_i32, %c0_i32_0 : i32, i32
  }
  func.func @transform_5(%arg0: i32, %arg1: i32, %arg2: i32) -> (i32, i32) {
    %c0_i32 = arith.constant 0 : i32
    %c0_i32_0 = arith.constant 0 : i32
    %c0_i32_1 = arith.constant 0 : i32
    return %c0_i32, %c0_i32_0 : i32, i32
  }
  func.func @transform_6(%arg0: i32, %arg1: i32, %arg2: i32) -> (i32, i32) {
    %c0_i32 = arith.constant 0 : i32
    %c0_i32_0 = arith.constant 0 : i32
    %c0_i32_1 = arith.constant 0 : i32
    return %c0_i32, %c0_i32_0 : i32, i32
  }
  func.func @transform_7(%arg0: i32, %arg1: i32, %arg2: i32) -> (i32, i32) {
    %c0_i32 = arith.constant 0 : i32
    %c0_i32_0 = arith.constant 0 : i32
    %c0_i32_1 = arith.constant 0 : i32
    return %c0_i32, %c0_i32_0 : i32, i32
  }
  func.func @transform_8(%arg0: i32, %arg1: i32, %arg2: i32) -> (i32, i32) {
    %c0_i32 = arith.constant 0 : i32
    %c0_i32_0 = arith.constant 0 : i32
    %c0_i32_1 = arith.constant 0 : i32
    return %c0_i32, %c0_i32_0 : i32, i32
  }
  func.func @transform_9(%arg0: i32, %arg1: i32, %arg2: i32) -> (i32, i32) {
    %c0_i32 = arith.constant 0 : i32
    %c0_i32_0 = arith.constant 0 : i32
    %c0_i32_1 = arith.constant 0 : i32
    return %c0_i32, %c0_i32_0 : i32, i32
  }
  func.func @transform_10(%arg0: i32, %arg1: i32, %arg2: i32) -> (i32, i32) {
    %c0_i32 = arith.constant 0 : i32
    %c0_i32_0 = arith.constant 0 : i32
    %c0_i32_1 = arith.constant 0 : i32
    return %c0_i32, %c0_i32_0 : i32, i32
  }
  func.func @transform_11(%arg0: i32, %arg1: i32, %arg2: i32) -> (i32, i32) {
    %c0_i32 = arith.constant 0 : i32
    %c0_i32_0 = arith.constant 0 : i32
    %c0_i32_1 = arith.constant 0 : i32
    return %c0_i32, %c0_i32_0 : i32, i32
  }
  func.func @transform_12(%arg0: i32, %arg1: i32, %arg2: i32) -> (i32, i32) {
    %c0_i32 = arith.constant 0 : i32
    %c0_i32_0 = arith.constant 0 : i32
    %c0_i32_1 = arith.constant 0 : i32
    return %c0_i32, %c0_i32_0 : i32, i32
  }
  func.func @transform_13(%arg0: i32, %arg1: i32, %arg2: i32) -> (i32, i32) {
    %c0_i32 = arith.constant 0 : i32
    %c0_i32_0 = arith.constant 0 : i32
    %c0_i32_1 = arith.constant 0 : i32
    return %c0_i32, %c0_i32_0 : i32, i32
  }
  func.func @transform_14(%arg0: i32, %arg1: i32, %arg2: i32) -> (i32, i32) {
    %c0_i32 = arith.constant 0 : i32
    %c0_i32_0 = arith.constant 0 : i32
    %c0_i32_1 = arith.constant 0 : i32
    return %c0_i32, %c0_i32_0 : i32, i32
  }
  func.func @transform_15(%arg0: i32, %arg1: i32, %arg2: i32) -> (i32, i32) {
    %c0_i32 = arith.constant 0 : i32
    %c0_i32_0 = arith.constant 0 : i32
    %c0_i32_1 = arith.constant 0 : i32
    return %c0_i32, %c0_i32_0 : i32, i32
  }
  func.func @transform_16(%arg0: i32, %arg1: i32, %arg2: i32) -> (i32, i32) {
    %c0_i32 = arith.constant 0 : i32
    %c0_i32_0 = arith.constant 0 : i32
    %c0_i32_1 = arith.constant 0 : i32
    return %c0_i32, %c0_i32_0 : i32, i32
  }
  func.func @transform_17(%arg0: i32, %arg1: i32, %arg2: i32) -> (i32, i32, i32) {
    %c0_i32 = arith.constant 0 : i32
    %c0_i32_0 = arith.constant 0 : i32
    %c0_i32_1 = arith.constant 0 : i32
    return %arg0, %c0_i32, %c0_i32_0 : i32, i32, i32
  }
}

module attributes {stable_mosaic.version = 11 : i64} {
  func.func @kernel(%arg0: i32, %arg1: i32, %arg2: i32, %arg3: memref<1x32x3xbf16, #tpu.memory_space<vmem>>, %arg4: memref<1x3x64xbf16, #tpu.memory_space<vmem>>, %arg5: memref<1x64xf32, #tpu.memory_space<vmem>>, %arg6: memref<64x64xbf16, #tpu.memory_space<vmem>>, %arg7: memref<1x64xf32, #tpu.memory_space<vmem>>, %arg8: memref<1x64x64xbf16, #tpu.memory_space<vmem>>, %arg9: memref<1x64xf32, #tpu.memory_space<vmem>>, %arg10: memref<64x128xbf16, #tpu.memory_space<vmem>>, %arg11: memref<1x128xf32, #tpu.memory_space<vmem>>, %arg12: memref<128x512xbf16, #tpu.memory_space<vmem>>, %arg13: memref<1x512xf32, #tpu.memory_space<vmem>>, %arg14: memref<1x1x1x512xf32, #tpu.memory_space<vmem>>) attributes {dimension_semantics = [#tpu.dimension_semantics<parallel>, #tpu.dimension_semantics<parallel>, #tpu.dimension_semantics<arbitrary>], iteration_bounds = array<i64: 2, 1, 1>, scalar_prefetch = 0 : i64, scratch_operands = 0 : i64, tpu.core_type = #tpu.core_type<tc>, window_params = [{transform_indices = @transform_0, window_bounds = array<i64: 1, 32, 3>}, {transform_indices = @transform_1, window_bounds = array<i64: 1, 3, 64>}, {pipeline_mode = #tpu.pipeline_mode<synchronous>, transform_indices = @transform_2, window_bounds = array<i64: 1, 64>}, {pipeline_mode = #tpu.pipeline_mode<synchronous>, transform_indices = @transform_3, window_bounds = array<i64: 64, 64>}, {pipeline_mode = #tpu.pipeline_mode<synchronous>, transform_indices = @transform_4, window_bounds = array<i64: 1, 64>}, {transform_indices = @transform_5, window_bounds = array<i64: 1, 64, 64>}, {pipeline_mode = #tpu.pipeline_mode<synchronous>, transform_indices = @transform_6, window_bounds = array<i64: 1, 64>}, {pipeline_mode = #tpu.pipeline_mode<synchronous>, transform_indices = @transform_7, window_bounds = array<i64: 64, 128>}, {pipeline_mode = #tpu.pipeline_mode<synchronous>, transform_indices = @transform_8, window_bounds = array<i64: 1, 128>}, {pipeline_mode = #tpu.pipeline_mode<synchronous>, transform_indices = @transform_9, window_bounds = array<i64: 128, 512>}, {pipeline_mode = #tpu.pipeline_mode<synchronous>, transform_indices = @transform_10, window_bounds = array<i64: 1, 512>}, {transform_indices = @transform_11, window_bounds = array<i64: 1, 1, 1, 512>}]} {
    %c0 = arith.constant 0 : index
    %c0_0 = arith.constant 0 : index
    %c0_1 = arith.constant 0 : index
    %0 = vector.load %arg3[%c0, %c0_0, %c0_1] : memref<1x32x3xbf16, #tpu.memory_space<vmem>>, vector<1x32x3xbf16>
    %1 = vector.shape_cast %0 : vector<1x32x3xbf16> to vector<32x3xbf16>
    %c0_2 = arith.constant 0 : index
    %c0_3 = arith.constant 0 : index
    %c0_4 = arith.constant 0 : index
    %2 = vector.load %arg4[%c0_2, %c0_3, %c0_4] : memref<1x3x64xbf16, #tpu.memory_space<vmem>>, vector<1x3x64xbf16>
    %3 = vector.shape_cast %2 : vector<1x3x64xbf16> to vector<3x64xbf16>
    %cst = arith.constant dense<0.000000e+00> : vector<32x64xf32>
    %4 = tpu.matmul %1, %3, %cst {dimension_numbers = #tpu.dot_dimension_numbers<[1], [0], [0], [1], [0, 0, 1, 1], [], []>} : vector<32x3xbf16>, vector<3x64xbf16>, vector<32x64xf32> -> vector<32x64xf32>
    %c0_5 = arith.constant 0 : index
    %c0_6 = arith.constant 0 : index
    %5 = vector.load %arg5[%c0_5, %c0_6] : memref<1x64xf32, #tpu.memory_space<vmem>>, vector<1x64xf32>
    %6 = vector.broadcast %5 : vector<1x64xf32> to vector<32x64xf32>
    %7 = arith.addf %4, %6 : vector<32x64xf32>
    %cst_7 = arith.constant 0.000000e+00 : f32
    %8 = vector.broadcast %cst_7 : f32 to vector<32x64xf32>
    %9 = arith.maximumf %7, %8 : vector<32x64xf32>
    %10 = arith.truncf %9 : vector<32x64xf32> to vector<32x64xbf16>
    %c0_8 = arith.constant 0 : index
    %c0_9 = arith.constant 0 : index
    %11 = vector.load %arg6[%c0_8, %c0_9] : memref<64x64xbf16, #tpu.memory_space<vmem>>, vector<64x64xbf16>
    %cst_10 = arith.constant dense<0.000000e+00> : vector<32x64xf32>
    %12 = tpu.matmul %10, %11, %cst_10 {dimension_numbers = #tpu.dot_dimension_numbers<[1], [0], [0], [1], [0, 0, 1, 1], [], []>} : vector<32x64xbf16>, vector<64x64xbf16>, vector<32x64xf32> -> vector<32x64xf32>
    %c0_11 = arith.constant 0 : index
    %c0_12 = arith.constant 0 : index
    %13 = vector.load %arg7[%c0_11, %c0_12] : memref<1x64xf32, #tpu.memory_space<vmem>>, vector<1x64xf32>
    %14 = vector.broadcast %13 : vector<1x64xf32> to vector<32x64xf32>
    %15 = arith.addf %12, %14 : vector<32x64xf32>
    %cst_13 = arith.constant 0.000000e+00 : f32
    %16 = vector.broadcast %cst_13 : f32 to vector<32x64xf32>
    %17 = arith.maximumf %15, %16 : vector<32x64xf32>
    %18 = arith.truncf %17 : vector<32x64xf32> to vector<32x64xbf16>
    %c0_14 = arith.constant 0 : index
    %c0_15 = arith.constant 0 : index
    %c0_16 = arith.constant 0 : index
    %19 = vector.load %arg8[%c0_14, %c0_15, %c0_16] : memref<1x64x64xbf16, #tpu.memory_space<vmem>>, vector<1x64x64xbf16>
    %20 = vector.shape_cast %19 : vector<1x64x64xbf16> to vector<64x64xbf16>
    %cst_17 = arith.constant dense<0.000000e+00> : vector<32x64xf32>
    %21 = tpu.matmul %18, %20, %cst_17 {dimension_numbers = #tpu.dot_dimension_numbers<[1], [0], [0], [1], [0, 0, 1, 1], [], []>} : vector<32x64xbf16>, vector<64x64xbf16>, vector<32x64xf32> -> vector<32x64xf32>
    %c0_18 = arith.constant 0 : index
    %c0_19 = arith.constant 0 : index
    %22 = vector.load %arg9[%c0_18, %c0_19] : memref<1x64xf32, #tpu.memory_space<vmem>>, vector<1x64xf32>
    %23 = vector.broadcast %22 : vector<1x64xf32> to vector<32x64xf32>
    %24 = arith.addf %21, %23 : vector<32x64xf32>
    %cst_20 = arith.constant 0.000000e+00 : f32
    %25 = vector.broadcast %cst_20 : f32 to vector<32x64xf32>
    %26 = arith.maximumf %24, %25 : vector<32x64xf32>
    %27 = arith.truncf %26 : vector<32x64xf32> to vector<32x64xbf16>
    %c0_21 = arith.constant 0 : index
    %c0_22 = arith.constant 0 : index
    %28 = vector.load %arg10[%c0_21, %c0_22] : memref<64x128xbf16, #tpu.memory_space<vmem>>, vector<64x128xbf16>
    %cst_23 = arith.constant dense<0.000000e+00> : vector<32x128xf32>
    %29 = tpu.matmul %27, %28, %cst_23 {dimension_numbers = #tpu.dot_dimension_numbers<[1], [0], [0], [1], [0, 0, 1, 1], [], []>} : vector<32x64xbf16>, vector<64x128xbf16>, vector<32x128xf32> -> vector<32x128xf32>
    %c0_24 = arith.constant 0 : index
    %c0_25 = arith.constant 0 : index
    %30 = vector.load %arg11[%c0_24, %c0_25] : memref<1x128xf32, #tpu.memory_space<vmem>>, vector<1x128xf32>
    %31 = vector.broadcast %30 : vector<1x128xf32> to vector<32x128xf32>
    %32 = arith.addf %29, %31 : vector<32x128xf32>
    %cst_26 = arith.constant 0.000000e+00 : f32
    %33 = vector.broadcast %cst_26 : f32 to vector<32x128xf32>
    %34 = arith.maximumf %32, %33 : vector<32x128xf32>
    %35 = arith.truncf %34 : vector<32x128xf32> to vector<32x128xbf16>
    %c0_27 = arith.constant 0 : index
    %c0_28 = arith.constant 0 : index
    %36 = vector.load %arg12[%c0_27, %c0_28] : memref<128x512xbf16, #tpu.memory_space<vmem>>, vector<128x512xbf16>
    %cst_29 = arith.constant dense<0.000000e+00> : vector<32x512xf32>
    %37 = tpu.matmul %35, %36, %cst_29 {dimension_numbers = #tpu.dot_dimension_numbers<[1], [0], [0], [1], [0, 0, 1, 1], [], []>} : vector<32x128xbf16>, vector<128x512xbf16>, vector<32x512xf32> -> vector<32x512xf32>
    %c0_30 = arith.constant 0 : index
    %c0_31 = arith.constant 0 : index
    %38 = vector.load %arg13[%c0_30, %c0_31] : memref<1x512xf32, #tpu.memory_space<vmem>>, vector<1x512xf32>
    %39 = vector.broadcast %38 : vector<1x512xf32> to vector<32x512xf32>
    %40 = arith.addf %37, %39 : vector<32x512xf32>
    %cst_32 = arith.constant 0.000000e+00 : f32
    %41 = vector.broadcast %cst_32 : f32 to vector<32x512xf32>
    %42 = arith.maximumf %40, %41 : vector<32x512xf32>
    %cst_33 = arith.constant dense<0xFF800000> : vector<512xf32>
    %43 = vector.multi_reduction <maximumf>, %42, %cst_33 [0] : vector<32x512xf32> to vector<512xf32>
    %44 = vector.shape_cast %43 : vector<512xf32> to vector<1x512xf32>
    %c0_i32 = arith.constant 0 : i32
    %45 = arith.cmpi eq, %arg2, %c0_i32 : i32
    %46 = arith.extui %45 : i1 to i32
    %c0_i32_34 = arith.constant 0 : i32
    %47 = arith.cmpi ne, %46, %c0_i32_34 : i32
    scf.if %47 {
      %c0_37 = arith.constant 0 : index
      %c0_38 = arith.constant 0 : index
      %c0_39 = arith.constant 0 : index
      %c0_40 = arith.constant 0 : index
      %51 = vector.load %arg14[%c0_37, %c0_38, %c0_39, %c0_40] : memref<1x1x1x512xf32, #tpu.memory_space<vmem>>, vector<1x1x1x512xf32>
      %52 = vector.shape_cast %51 : vector<1x1x1x512xf32> to vector<1x512xf32>
      %53 = vector.shape_cast %44 : vector<1x512xf32> to vector<1x1x1x512xf32>
      tpu.vector_store %arg14[%c0_37, %c0_38, %c0_39, %c0_40], %53 {strides = array<i32>} : memref<1x1x1x512xf32, #tpu.memory_space<vmem>>, vector<1x1x1x512xf32>,
    } else {
    }
    %c0_i32_35 = arith.constant 0 : i32
    %48 = arith.cmpi ne, %arg2, %c0_i32_35 : i32
    %49 = arith.extui %48 : i1 to i32
    %c0_i32_36 = arith.constant 0 : i32
    %50 = arith.cmpi ne, %49, %c0_i32_36 : i32
    scf.if %50 {
      %c0_37 = arith.constant 0 : index
      %c0_38 = arith.constant 0 : index
      %c0_39 = arith.constant 0 : index
      %c0_40 = arith.constant 0 : index
      %51 = vector.load %arg14[%c0_37, %c0_38, %c0_39, %c0_40] : memref<1x1x1x512xf32, #tpu.memory_space<vmem>>, vector<1x1x1x512xf32>
      %52 = vector.shape_cast %51 : vector<1x1x1x512xf32> to vector<1x512xf32>
      %53 = arith.maximumf %52, %44 : vector<1x512xf32>
      %c0_41 = arith.constant 0 : index
      %c0_42 = arith.constant 0 : index
      %c0_43 = arith.constant 0 : index
      %c0_44 = arith.constant 0 : index
      %54 = vector.load %arg14[%c0_41, %c0_42, %c0_43, %c0_44] : memref<1x1x1x512xf32, #tpu.memory_space<vmem>>, vector<1x1x1x512xf32>
      %55 = vector.shape_cast %54 : vector<1x1x1x512xf32> to vector<1x512xf32>
      %56 = vector.shape_cast %53 : vector<1x512xf32> to vector<1x1x1x512xf32>
      tpu.vector_store %arg14[%c0_41, %c0_42, %c0_43, %c0_44], %56 {strides = array<i32>} : memref<1x1x1x512xf32, #tpu.memory_space<vmem>>, vector<1x1x1x512xf32>,
    } else {
    }
    return
  }
  func.func @transform_0(%arg0: i32, %arg1: i32, %arg2: i32) -> (i32, i32, i32) {
    %c1_i32 = arith.constant 1 : i32
    %0 = arith.muli %arg1, %c1_i32 : i32
    %1 = arith.addi %0, %arg2 : i32
    %c0_i32 = arith.constant 0 : i32
    %c0_i32_0 = arith.constant 0 : i32
    return %arg0, %1, %c0_i32 : i32, i32, i32
  }
  func.func @transform_1(%arg0: i32, %arg1: i32, %arg2: i32) -> (i32, i32, i32) {
    %c0_i32 = arith.constant 0 : i32
    %c0_i32_0 = arith.constant 0 : i32
    %c0_i32_1 = arith.constant 0 : i32
    return %arg0, %c0_i32, %c0_i32_0 : i32, i32, i32
  }
  func.func @transform_2(%arg0: i32, %arg1: i32, %arg2: i32) -> (i32, i32) {
    %c0_i32 = arith.constant 0 : i32
    %c0_i32_0 = arith.constant 0 : i32
    %c0_i32_1 = arith.constant 0 : i32
    return %c0_i32, %c0_i32_0 : i32, i32
  }
  func.func @transform_3(%arg0: i32, %arg1: i32, %arg2: i32) -> (i32, i32) {
    %c0_i32 = arith.constant 0 : i32
    %c0_i32_0 = arith.constant 0 : i32
    %c0_i32_1 = arith.constant 0 : i32
    return %c0_i32, %c0_i32_0 : i32, i32
  }
  func.func @transform_4(%arg0: i32, %arg1: i32, %arg2: i32) -> (i32, i32) {
    %c0_i32 = arith.constant 0 : i32
    %c0_i32_0 = arith.constant 0 : i32
    %c0_i32_1 = arith.constant 0 : i32
    return %c0_i32, %c0_i32_0 : i32, i32
  }
  func.func @transform_5(%arg0: i32, %arg1: i32, %arg2: i32) -> (i32, i32, i32) {
    %c0_i32 = arith.constant 0 : i32
    %c0_i32_0 = arith.constant 0 : i32
    %c0_i32_1 = arith.constant 0 : i32
    return %arg0, %c0_i32, %c0_i32_0 : i32, i32, i32
  }
  func.func @transform_6(%arg0: i32, %arg1: i32, %arg2: i32) -> (i32, i32) {
    %c0_i32 = arith.constant 0 : i32
    %c0_i32_0 = arith.constant 0 : i32
    %c0_i32_1 = arith.constant 0 : i32
    return %c0_i32, %c0_i32_0 : i32, i32
  }
  func.func @transform_7(%arg0: i32, %arg1: i32, %arg2: i32) -> (i32, i32) {
    %c0_i32 = arith.constant 0 : i32
    %c0_i32_0 = arith.constant 0 : i32
    %c0_i32_1 = arith.constant 0 : i32
    return %c0_i32, %c0_i32_0 : i32, i32
  }
  func.func @transform_8(%arg0: i32, %arg1: i32, %arg2: i32) -> (i32, i32) {
    %c0_i32 = arith.constant 0 : i32
    %c0_i32_0 = arith.constant 0 : i32
    %c0_i32_1 = arith.constant 0 : i32
    return %c0_i32, %c0_i32_0 : i32, i32
  }
  func.func @transform_9(%arg0: i32, %arg1: i32, %arg2: i32) -> (i32, i32) {
    %c0_i32 = arith.constant 0 : i32
    %c0_i32_0 = arith.constant 0 : i32
    %c0_i32_1 = arith.constant 0 : i32
    return %c0_i32, %c0_i32_0 : i32, i32
  }
  func.func @transform_10(%arg0: i32, %arg1: i32, %arg2: i32) -> (i32, i32) {
    %c0_i32 = arith.constant 0 : i32
    %c0_i32_0 = arith.constant 0 : i32
    %c0_i32_1 = arith.constant 0 : i32
    return %c0_i32, %c0_i32_0 : i32, i32
  }
  func.func @transform_11(%arg0: i32, %arg1: i32, %arg2: i32) -> (i32, i32, i32, i32) {
    %c0_i32 = arith.constant 0 : i32
    %c0_i32_0 = arith.constant 0 : i32
    %c0_i32_1 = arith.constant 0 : i32
    return %arg0, %arg1, %c0_i32, %c0_i32_0 : i32, i32, i32, i32
  }
}

</mosaic_0001>

<bundles_post_ra>
// kernel: _lambda_.3
= control target key start
LH: loop header
LB: loop body
LE: loop exit
PB: predicated region body
PF: predicated region fallthrough
CT: control target
= control target key end

     0   :  { %s5337_s25 = smov 0   ;;  %s5339_s26 = smov 0   ;;  %s6722_s0 = inlined_call_operand.vmem [shape: bf16[2,32,3], index: 0, kind: input, shape index: {}]   ;;  %s6723_s1 = inlined_call_operand.vmem [shape: bf16[3,64], index: 1, kind: input, shape index: {}]   ;;  %s6724_s2 = inlined_call_operand.vmem [shape: f32[1,64], index: 2, kind: input, shape index: {}]   ;;  %s6725_s3 = inlined_call_operand.vmem [shape: bf16[64,128], index: 3, kind: input, shape index: {}]   ;;  %s6726_s4 = inlined_call_operand.vmem [shape: f32[1,128], index: 4, kind: input, shape index: {}]   ;;  %s6727_s5 = inlined_call_operand.vmem [shape: bf16[128,1024], index: 5, kind: input, shape index: {}]   ;;  %s6728_s6 = inlined_call_operand.vmem [shape: f32[1,1024], index: 6, kind: input, shape index: {}]   ;;  %s6729_s7 = inlined_call_operand.vmem [shape: bf16[1024,512], index: 7, kind: input, shape index: {}]   ;;  %s6730_s8 = inlined_call_operand.vmem [shape: f32[1,512], index: 8, kind: input, shape index: {}]   ;;  %s6731_s9 = inlined_call_operand.vmem [shape: bf16[512,256], index: 9, kind: input, shape index: {}]   ;;  %s6732_s10 = inlined_call_operand.vmem [shape: f32[1,256], index: 10, kind: input, shape index: {}]   ;;  %s6733_s11 = inlined_call_operand.vmem [shape: bf16[256,9], index: 11, kind: input, shape index: {}]   ;;  %s6734_s12 = inlined_call_operand.vmem [shape: f32[1,9], index: 12, kind: input, shape index: {}]   ;;  %s6735_s13 = inlined_call_operand.vmem [shape: f32[2,1,9], index: 13, kind: output, shape index: {}]  }
   0x1   :  { %s5341_s27 = smov 0  }
   0x2 LB: > { %s42_s28 = sadd.s32 1, %s5258_s26  ;;  %p4210_p0 = scmp.ge.s32.totalorder %s5262_s27, 1  ;;  %s5262_s27 = sphi %s5341_s27, %s23_s27   ;;  %s5258_s26 = sphi %s5339_s26, %s6737_s26   ;;  %s5254_s25 = sphi %s5337_s25, %s6736_s25  }
   0x3   : > { %p44_p1 = scmp.ge.s32.totalorder %s42_s28, 2  ;;  %p417_p2 = scmp.lt.s32.totalorder %s5262_s27, 3 }
   0x5   : > { %s6739_s28 = smov (%p44_p1, %s42_s28), 0  ;;  %p418_p3 = pnand %p4210_p0, %p417_p2 }
   0x6   : > { %v484_v0 = vld [vmem:[%s6723_s1] sm:$0x3] (!%p418_p3)  ;;  %vm509_vm0 = vcmask (!%p418_p3), 1040384   ;;  %vm510_vm1 = vcmask (!%p418_p3), 1041408   ;;  %p466_p4 = scmp.lt.s32.totalorder (!%p418_p3), %s5254_s25, 1  ;;  %v5264_v1 = vmov (!%p418_p3), 65535  }
   0x7   : > { %421 = sbr.rel (%p418_p3) target bundleno = 1696 (0x6a0), region = 72  ;;  %v511_v2 = vsel (!%p418_p3), %vm509_vm0, 4294967295, %v5264_v1  ;;  %v4740_v4 = vld [vmem:[%s6725_s3] sm:$0xff] (!%p418_p3)   ;;  %vm502_vm2 = vcmask (!%p418_p3), 23552   ;;  %v4741_v6 = vld [vmem:[%s6725_s3 + $0x8] sm:$0xff] (!%p418_p3)   ;;  %v4742_v9 = vld [vmem:[%s6725_s3 + $0x10] sm:$0xff] (!%p418_p3)  }
   0x8   : > { %v512_v3 = vsel (!%p418_p3), %vm510_vm1, %v511_v2, 0  ;;  %v4743_v10 = vld [vmem:[%s6725_s3 + $0x18] sm:$0xff] (!%p418_p3)   ;;  %v5379_v11 = vld [vmem:[%s6727_s5] sm:$0xff] (!%p418_p3)  ;;  %v674_v15 = vld [vmem:[%s6727_s5 + $0x10] sm:$0xff] (!%p418_p3)  ;;  %vm610_vm3 = vcmask (!%p418_p3), 523264   ;;  %vm4140_vm4 = vcmask (!%p418_p3), 65536  }
   0x9   : > { %v514_v5 = vand.u32 (!%p418_p3), %v512_v3, %v484_v0  ;;  %v5384_v12 = vld [vmem:[%s6727_s5 + $0x20] sm:$0xff] (!%p418_p3)  ;;  %v678_v16 = vld [vmem:[%s6727_s5 + $0x30] sm:$0xff] (!%p418_p3) }
   0xa   : > { %v4225_v13 = vcombine.low (!%p418_p3), %v5379_v11, %v5384_v12  ;;  %v4226_v14 = vcombine.high (!%p418_p3), %v5379_v11, %v5384_v12  ;;  %v4230_v17 = vcombine.high (!%p418_p3), %v674_v15, %v678_v16  ;;  %v4229_v18 = vcombine.low (!%p418_p3), %v674_v15, %v678_v16  ;;  %v682_v19 = vld [vmem:[%s6727_s5 + $0x50] sm:$0xff] (!%p418_p3)  ;;  %v4213_v39 = vld [vmem:[%s6724_s2] ss:$0 sm:$0xff] (!%p418_p3) }
   0xb   : > { %4659 = vmatprep.subr.bf16.mxu1 (!%p418_p3), %v514_v5  ;;  %v686_v20 = vld [vmem:[%s6727_s5 + $0x70] sm:$0xff] (!%p418_p3)  ;;  %v680_v52 = vld [vmem:[%s6727_s5 + $0x40] sm:$0xff] (!%p418_p3) }
   0xc   : > { %4660 = vmatpush3.bf16.msra.mxu1 (!%p418_p3), %v514_v5  ;;  %1204 = vmatprep.subr.bf16.mxu0 (!%p418_p3), %v4230_v17  ;;  %v4238_v21 = vcombine.high (!%p418_p3), %v682_v19, %v686_v20  ;;  %v4237_v22 = vcombine.low (!%p418_p3), %v682_v19, %v686_v20  ;;  %v690_v23 = vld [vmem:[%s6727_s5 + $0x90] sm:$0xff] (!%p418_p3)  ;;  %v684_v53 = vld [vmem:[%s6727_s5 + $0x60] sm:$0xff] (!%p418_p3) }
   0xd   : > { %4665 = vmatprep.subr.bf16.mxu1 (!%p418_p3), %v4740_v4  ;;  %1205 = vmatpush1.bf16.msra.mxu0 (!%p418_p3), %v4229_v18  ;;  %v694_v24 = vld [vmem:[%s6727_s5 + $0xb0] sm:$0xff] (!%p418_p3)  ;;  %v4234_v56 = vcombine.high (!%p418_p3), %v680_v52, %v684_v53  ;;  %v688_v57 = vld [vmem:[%s6727_s5 + $0x80] sm:$0xff] (!%p418_p3)  ;;  %v4233_v59 = vcombine.low (!%p418_p3), %v680_v52, %v684_v53  ;;  %v697_v53 = vld [vmem:[%s6727_s5 + $0xc8] sm:$0xff] (!%p418_p3) }
   0xe   : > { %s6741_s25 = smov (!%p466_p4, %s5254_s25), 1  ;;  %1206 = vmatprep.subr.bf16.mxu0 %v4238_v21  ;;  %v4246_v25 = vcombine.high %v690_v23, %v694_v24  ;;  %v4245_v26 = vcombine.low %v690_v23, %v694_v24  ;;  %v698_v27 = vld [vmem:[%s6727_s5 + $0xd0] sm:$0xff]  ;;  %v692_v58 = vld [vmem:[%s6727_s5 + $0xa0] sm:$0xff] }
   0xf   : > { %s4627_s16 = sshll.u32 %s6741_s25, 4  ;;  %v702_v28 = vld [vmem:[%s6727_s5 + $0xf0] sm:$0xff]  ;;  %v4242_v60 = vcombine.high %v688_v57, %v692_v58  ;;  %v696_v61 = vld [vmem:[%s6727_s5 + $0xc0] sm:$0xff]  ;;  %v4241_v63 = vcombine.low %v688_v57, %v692_v58  ;;  %v705_v57 = vld [vmem:[%s6727_s5 + $0x108] sm:$0xff]  ;;  %s478_s21 = scalar_lea.vmem %s6735_s13, %s6741_s25 }
  0x10   : > { %s473_s19 = scalar_lea.vmem %s6722_s0, %s4627_s16  ;;  %v4254_v29 = vcombine.high %v698_v27, %v702_v28  ;;  %v4253_v30 = vcombine.low %v698_v27, %v702_v28  ;;  %v706_v31 = vld [vmem:[%s6727_s5 + $0x110] sm:$0xff]  ;;  %v700_v62 = vld [vmem:[%s6727_s5 + $0xe0] sm:$0xff]  ;;  %v677_v27 = vld [vmem:[%s6727_s5 + $0x28] sm:$0xff] }
  0x11   : > { %v4738_v7 = vld [vmem:[%s473_s19] sm:$0xff]   ;;  %v4739_v8 = vld [vmem:[%s473_s19 + $0x8] sm:$0xff]   ;;  %1207 = vmatpush1.bf16.msra.mxu0 %v4237_v22  ;;  %v710_v32 = vld [vmem:[%s6727_s5 + $0x130] sm:$0xff]  ;;  %v4250_v0 = vcombine.high %v696_v61, %v700_v62  ;;  %v4249_v3 = vcombine.low %v696_v61, %v700_v62 }
  0x12   : > { %4661 = vmatprep.mubr.msk.bf16.mxu1 %vm502_vm2, %v4738_v7  ;;  %1208 = vmatprep.subr.bf16.mxu0 %v4246_v25  ;;  %v4262_v33 = vcombine.high %v706_v31, %v710_v32  ;;  %v4261_v34 = vcombine.low %v706_v31, %v710_v32  ;;  %v714_v35 = vld [vmem:[%s6727_s5 + $0x150] sm:$0xff]  ;;  %v704_v1 = vld [vmem:[%s6727_s5 + $0x100] sm:$0xff]  ;;  %v709_v58 = vld [vmem:[%s6727_s5 + $0x128] sm:$0xff] }
  0x13   : > { %4662 = vmatmul.mubr.msk.bf16.vlgmr.msra.gmra.mrb[0].mxu1 %vm502_vm2, %v4739_v8  ;;  %v718_v36 = vld [vmem:[%s6727_s5 + $0x170] sm:$0xff]  ;;  %v708_v2 = vld [vmem:[%s6727_s5 + $0x120] sm:$0xff]  ;;  %v713_v61 = vld [vmem:[%s6727_s5 + $0x148] sm:$0xff] }
  0x14   : > { %4666 = vmatpush3.bf16.msra.mxu1 %v4740_v4  ;;  %v4270_v37 = vcombine.high %v714_v35, %v718_v36  ;;  %v4269_v38 = vcombine.low %v714_v35, %v718_v36  ;;  %v4258_v4 = vcombine.high %v704_v1, %v708_v2  ;;  %v712_v5 = vld [vmem:[%s6727_s5 + $0x140] sm:$0xff]  ;;  %v4257_v7 = vcombine.low %v704_v1, %v708_v2  ;;  %v730_v21 = vld [vmem:[%s6727_s5 + $0x1d0] sm:$0xff]  ;;  %v717_v62 = vld [vmem:[%s6727_s5 + $0x168] sm:$0xff] }
  0x15   : > { %4667 = vmatprep.subr.bf16.mxu1 %v4741_v6  ;;  %1209 = vmatpush1.bf16.msra.mxu0 %v4245_v26  ;;  %v724_v11 = vld [vmem:[%s6727_s5 + $0x1a0] sm:$0xff]  ;;  %v734_v22 = vld [vmem:[%s6727_s5 + $0x1f0] sm:$0xff]  ;;  %v673_v26 = vld [vmem:[%s6727_s5 + $0x8] sm:$0xff] }
  0x16   : > { %1210 = vmatprep.subr.bf16.mxu0 %v4254_v29  ;;  %v728_v18 = vld [vmem:[%s6727_s5 + $0x1c0] sm:$0xff]  ;;  %v4286_v24 = vcombine.high %v730_v21, %v734_v22  ;;  %v4285_v25 = vcombine.low %v730_v21, %v734_v22  ;;  %v4228_v28 = vcombine.high %v673_v26, %v677_v27  ;;  %v4227_v29 = vcombine.low %v673_v26, %v677_v27  ;;  %v721_v1 = vld [vmem:[%s6727_s5 + $0x188] sm:$0xff]  ;;  %v699_v21 = vld [vmem:[%s6727_s5 + $0xd8] sm:$0xff] }
  0x17   : > { %v732_v19 = vld [vmem:[%s6727_s5 + $0x1e0] sm:$0xff]  ;;  %v725_v2 = vld [vmem:[%s6727_s5 + $0x1a8] sm:$0xff]  ;;  %v703_v22 = vld [vmem:[%s6727_s5 + $0xf8] sm:$0xff] }
  0x18   : > { %4668 = vmatpush3.bf16.msra.mxu1 %v4741_v6  ;;  %v716_v6 = vld [vmem:[%s6727_s5 + $0x160] sm:$0xff]  ;;  %v4282_v20 = vcombine.high %v728_v18, %v732_v19  ;;  %v4281_v23 = vcombine.low %v728_v18, %v732_v19  ;;  %v695_v18 = vld [vmem:[%s6727_s5 + $0xb8] sm:$0xff]  ;;  %v4255_v27 = vcombine.low %v699_v21, %v703_v22 }
  0x19   : > { %4669 = vmatprep.subr.bf16.mxu1 %v4742_v9  ;;  %1211 = vmatpush1.bf16.msra.mxu0 %v4253_v30  ;;  %v4266_v8 = vcombine.high %v712_v5, %v716_v6  ;;  %v5265_v30 = vmov 0   ;;  %v4218_v31 = vld [vmem:[%s6726_s4] ss:$0 sm:$0xff]  ;;  %v711_v26 = vld [vmem:[%s6727_s5 + $0x138] sm:$0xff] }
  0x1a   : > { %1212 = vmatprep.subr.bf16.mxu0 %v4262_v33  ;;  %1236 = vmatprep.mubr.bf16.mxu0 %v5265_v30 }
  0x1c   : > { %4670 = vmatpush3.bf16.msra.mxu1 %v4742_v9  ;;  %v4265_v9 = vcombine.low %v712_v5, %v716_v6  ;;  %v729_v5 = vld [vmem:[%s6727_s5 + $0x1c8] sm:$0xff] }
  0x1d   : > { %4671 = vmatprep.subr.bf16.mxu1 %v4743_v10  ;;  %1213 = vmatpush1.bf16.msra.mxu0 %v4261_v34  ;;  %v733_v6 = vld [vmem:[%s6727_s5 + $0x1e8] sm:$0xff] }
  0x1e   : > { %1214 = vmatprep.subr.bf16.mxu0 %v4270_v37 }
  0x20   : > { %4672 = vmatpush3.bf16.msra.mxu1 %v4743_v10  ;;  %v720_v10 = vld [vmem:[%s6727_s5 + $0x180] sm:$0xff] }
  0x21   : > { %1098 = vmatprep.subr.bf16.mxu1 %v4226_v14  ;;  %1215 = vmatpush1.bf16.msra.mxu0 %v4269_v38  ;;  %v4274_v12 = vcombine.high %v720_v10, %v724_v11  ;;  %v726_v14 = vld [vmem:[%s6727_s5 + $0x1b0] sm:$0xff]  ;;  %v4273_v15 = vcombine.low %v720_v10, %v724_v11  ;;  %v679_v10 = vld [vmem:[%s6727_s5 + $0x38] sm:$0xff]  ;;  %v4283_v11 = vcombine.low %v729_v5, %v733_v6 }
  0xe6   : > { %v4663_v40 = vpop.f32.mrb[0].mxu1 }
  0xe7   : > { %v559_v41 = vadd.f32 %v4663_v40, %v4213_v39  ;;  %v550_v42 = vpop.f32.mrb[1].mxu1 }
  0xe8   : > { %v551_v43 = vadd.f32 %v4213_v39, %v550_v42  ;;  %v4664_v44 = vpop.f32.mrb[2].mxu1  ;;  %v681_v42 = vld [vmem:[%s6727_s5 + $0x48] sm:$0xff] }
  0xe9   : > { %v562_v45 = vadd.f32 %v4664_v44, %v4213_v39  ;;  %v553_v46 = vpop.f32.mrb[3].mxu1  ;;  %v567_v48 = vmax.f32 %v559_v41, 0.0 }
  0xea   : > { %v554_v47 = vadd.f32 %v4213_v39, %v553_v46  ;;  %v565_v50 = vmax.f32 %v551_v43, 0.0  ;;  %v685_v43 = vld [vmem:[%s6727_s5 + $0x68] sm:$0xff] }
  0xeb   : > { %v568_v49 = vmax.f32 %v562_v45, 0.0 }
  0xec   : > { %v566_v51 = vmax.f32 %v554_v47, 0.0 }
  0xed   : > { %v570_v54 = vpack.c.bf16 %v568_v49, %v567_v48  ;;  %v4236_v48 = vcombine.high %v681_v42, %v685_v43  ;;  %v689_v49 = vld [vmem:[%s6727_s5 + $0x88] sm:$0xff] }
  0xee   : > { %v569_v55 = vpack.c.bf16 %v566_v51, %v565_v50  ;;  %v693_v50 = vld [vmem:[%s6727_s5 + $0xa8] sm:$0xff]  ;;  %v4235_v51 = vcombine.low %v681_v42, %v685_v43  ;;  %v4746_v43 = vld [vmem:[%s6729_s7 + $0x4] ss:$16 sps:$4 sm:$0xff]  }
  0xef   : > { %v4244_v52 = vcombine.high %v689_v49, %v693_v50 }
  0xf0   : > { %4673 = vmatprep.mubr.msk.bf16.mxu1 %vm610_vm3, %v569_v55  ;;  %v4243_v55 = vcombine.low %v689_v49, %v693_v50  ;;  %v4753_v49 = vld [vmem:[%s6729_s7 + $0x28] ss:$16 sps:$4 sm:$0xff]   ;;  %v4758_v50 = vld [vmem:[%s6729_s7 + $0x44] ss:$16 sps:$4 sm:$0xff]  }
  0xf1   : > { %4674 = vmatmul.mubr.msk.bf16.vlgmr.msra.gmra.mrb[4].mxu1 %vm610_vm3, %v570_v54  ;;  %v701_v54 = vld [vmem:[%s6727_s5 + $0xe8] sm:$0xff] }
  0xf2   : > { %1099 = vmatpush1.bf16.msra.mxu1 %v4225_v13  ;;  %v722_v13 = vld [vmem:[%s6727_s5 + $0x190] sm:$0xff]  ;;  %1130 = vmatprep.mubr.bf16.mxu1 %v5265_v30 }
  0xf3   : > { %1100 = vmatprep.subr.bf16.mxu1 %v4234_v56  ;;  %v4278_v16 = vcombine.high %v722_v13, %v726_v14  ;;  %v4277_v17 = vcombine.low %v722_v13, %v726_v14  ;;  %v4252_v56 = vcombine.high %v697_v53, %v701_v54  ;;  %v683_v13 = vld [vmem:[%s6727_s5 + $0x58] sm:$0xff] }
  0xf4   : > { %v687_v14 = vld [vmem:[%s6727_s5 + $0x78] sm:$0xff] }
  0xf5   : > { %1216 = vmatprep.subr.bf16.mxu0 %v4278_v16  ;;  %v4240_v16 = vcombine.high %v683_v13, %v687_v14  ;;  %v4239_v19 = vcombine.low %v683_v13, %v687_v14  ;;  %v4795_v13 = vld [vmem:[%s6729_s7 + $0x108] ss:$16 sps:$4 sm:$0xff]   ;;  %v4800_v14 = vld [vmem:[%s6729_s7 + $0x124] ss:$16 sps:$4 sm:$0xff]  }
  0xf6   : > { %1101 = vmatpush1.bf16.msra.mxu1 %v4233_v59  ;;  %1217 = vmatpush1.bf16.msra.mxu0 %v4277_v17  ;;  %v4251_v59 = vcombine.low %v697_v53, %v701_v54  ;;  %v691_v17 = vld [vmem:[%s6727_s5 + $0x98] sm:$0xff]  ;;  %v4764_v54 = vld [vmem:[%s6729_s7 + $0x64] ss:$16 sps:$4 sm:$0xff]  }
  0xf7   : > { %1102 = vmatprep.subr.bf16.mxu1 %v4242_v60  ;;  %1218 = vmatprep.subr.bf16.mxu0 %v4286_v24  ;;  %v4260_v60 = vcombine.high %v705_v57, %v709_v58  ;;  %v4256_v24 = vcombine.high %v699_v21, %v703_v22  ;;  %v4759_v53 = vld [vmem:[%s6729_s7 + $0x48] ss:$16 sps:$4 sm:$0xff]   ;;  %v4812_v22 = vld [vmem:[%s6729_s7 + $0x164] ss:$16 sps:$4 sm:$0xff]  }
  0xf8   : > { %v4807_v21 = vld [vmem:[%s6729_s7 + $0x148] ss:$16 sps:$4 sm:$0xff]  }
  0xfa   : > { %1103 = vmatpush1.bf16.msra.mxu1 %v4241_v63  ;;  %1219 = vmatpush1.bf16.msra.mxu0 %v4285_v25  ;;  %v4259_v63 = vcombine.low %v705_v57, %v709_v58  ;;  %v707_v25 = vld [vmem:[%s6727_s5 + $0x118] sm:$0xff]  ;;  %v4770_v58 = vld [vmem:[%s6729_s7 + $0x84] ss:$16 sps:$4 sm:$0xff]  }
  0xfb   : > { %1104 = vmatprep.subr.bf16.mxu1 %v4250_v0  ;;  %v4268_v0 = vcombine.high %v713_v61, %v717_v62  ;;  %3153 = vmatprep.subr.bf16.mxu0 %v4746_v43  ;;  %v4765_v57 = vld [vmem:[%s6729_s7 + $0x68] ss:$16 sps:$4 sm:$0xff]   ;;  %v4842_v43 = vld [vmem:[%s6729_s7 + $0x204] ss:$16 sps:$4 sm:$0xff]  }
  0xfe   : > { %1105 = vmatpush1.bf16.msra.mxu1 %v4249_v3  ;;  %v4267_v3 = vcombine.low %v713_v61, %v717_v62  ;;  %v4771_v61 = vld [vmem:[%s6729_s7 + $0x88] ss:$16 sps:$4 sm:$0xff]   ;;  %v4776_v62 = vld [vmem:[%s6729_s7 + $0xa4] ss:$16 sps:$4 sm:$0xff]  }
  0xff   : > { %1106 = vmatprep.subr.bf16.mxu1 %v4258_v4  ;;  %v4276_v4 = vcombine.high %v721_v1, %v725_v2 }
 0x102   : > { %1107 = vmatpush1.bf16.msra.mxu1 %v4257_v7  ;;  %v4275_v7 = vcombine.low %v721_v1, %v725_v2  ;;  %v4777_v1 = vld [vmem:[%s6729_s7 + $0xa8] ss:$16 sps:$4 sm:$0xff]   ;;  %v4782_v2 = vld [vmem:[%s6729_s7 + $0xc4] ss:$16 sps:$4 sm:$0xff]  }
 0x103   : > { %1108 = vmatprep.subr.bf16.mxu1 %v4266_v8  ;;  %v4284_v8 = vcombine.high %v729_v5, %v733_v6  ;;  %v4783_v5 = vld [vmem:[%s6729_s7 + $0xc8] ss:$16 sps:$4 sm:$0xff]   ;;  %v4788_v6 = vld [vmem:[%s6729_s7 + $0xe4] ss:$16 sps:$4 sm:$0xff]  }
 0x106   : > { %1109 = vmatpush1.bf16.msra.mxu1 %v4265_v9  ;;  %v675_v9 = vld [vmem:[%s6727_s5 + $0x18] sm:$0xff] }
 0x107   : > { %1110 = vmatprep.subr.bf16.mxu1 %v4274_v12  ;;  %v4232_v12 = vcombine.high %v675_v9, %v679_v10 }
 0x10a   : > { %1111 = vmatpush1.bf16.msra.mxu1 %v4273_v15  ;;  %v4231_v15 = vcombine.low %v675_v9, %v679_v10  ;;  %v4789_v9 = vld [vmem:[%s6729_s7 + $0xe8] ss:$16 sps:$4 sm:$0xff]   ;;  %v4794_v10 = vld [vmem:[%s6729_s7 + $0x104] ss:$16 sps:$4 sm:$0xff]  }
 0x10b   : > { %1112 = vmatprep.subr.bf16.mxu1 %v4282_v20  ;;  %v4248_v20 = vcombine.high %v691_v17, %v695_v18 }
 0x10e   : > { %1113 = vmatpush1.bf16.msra.mxu1 %v4281_v23  ;;  %v4247_v23 = vcombine.low %v691_v17, %v695_v18  ;;  %v4801_v17 = vld [vmem:[%s6729_s7 + $0x128] ss:$16 sps:$4 sm:$0xff]   ;;  %v4806_v18 = vld [vmem:[%s6729_s7 + $0x144] ss:$16 sps:$4 sm:$0xff]  }
 0x10f   : > { %1151 = vmatprep.subr.bf16.mxu1 %v4228_v28  ;;  %v4264_v28 = vcombine.high %v707_v25, %v711_v26 }
 0x1c4   : > { %v4675_v32 = vpop.f32.mrb[4].mxu1 }
 0x1c5   : > { %v660_v33 = vadd.f32 %v4675_v32, %v4218_v31  ;;  %v651_v34 = vpop.f32.mrb[5].mxu1  ;;  %v4263_v32 = vcombine.low %v707_v25, %v711_v26  ;;  %v4813_v25 = vld [vmem:[%s6729_s7 + $0x168] ss:$16 sps:$4 sm:$0xff]   ;;  %v4818_v26 = vld [vmem:[%s6729_s7 + $0x184] ss:$16 sps:$4 sm:$0xff]  }
 0x1c6   : > { %v652_v35 = vadd.f32 %v4218_v31, %v651_v34  ;;  %v4676_v36 = vpop.f32.mrb[6].mxu1  ;;  %v723_v34 = vld [vmem:[%s6727_s5 + $0x198] sm:$0xff] }
 0x1c7   : > { %v663_v37 = vadd.f32 %v4676_v36, %v4218_v31  ;;  %v654_v38 = vpop.f32.mrb[7].mxu1  ;;  %v668_v40 = vmax.f32 %v660_v33, 0.0 }
 0x1c8   : > { %v655_v39 = vadd.f32 %v4218_v31, %v654_v38  ;;  %v666_v44 = vmax.f32 %v652_v35, 0.0  ;;  %v719_v31 = vld [vmem:[%s6727_s5 + $0x178] sm:$0xff] }
 0x1c9   : > { %v669_v41 = vmax.f32 %v663_v37, 0.0  ;;  %v727_v35 = vld [vmem:[%s6727_s5 + $0x1b8] sm:$0xff] }
 0x1ca   : > { %v667_v45 = vmax.f32 %v655_v39, 0.0  ;;  %v4280_v37 = vcombine.high %v723_v34, %v727_v35  ;;  %v731_v38 = vld [vmem:[%s6727_s5 + $0x1d8] sm:$0xff] }
 0x1cb   : > { %v5500_v46 = vpack.c.bf16 %v669_v41, %v668_v40  ;;  %v735_v39 = vld [vmem:[%s6727_s5 + $0x1f8] sm:$0xff]  ;;  %v4279_v40 = vcombine.low %v723_v34, %v727_v35  ;;  %v4830_v35 = vld [vmem:[%s6729_s7 + $0x1c4] ss:$16 sps:$4 sm:$0xff]  }
 0x1cc   : > { %v5502_v47 = vpack.c.bf16 %v667_v45, %v666_v44  ;;  %v4288_v41 = vcombine.high %v731_v38, %v735_v39  ;;  %v4287_v42 = vcombine.low %v731_v38, %v735_v39  ;;  %v4749_v44 = vld [vmem:[%s6729_s7 + $0xc] ss:$16 sps:$4 sm:$0xff]   ;;  %v4744_v45 = vld [vmem:[%s6729_s7] ss:$16 sps:$4 sm:$0xff]   ;;  %v4825_v34 = vld [vmem:[%s6729_s7 + $0x1a8] ss:$16 sps:$4 sm:$0xff]  }
 0x1cd   : > { %v4831_v38 = vld [vmem:[%s6729_s7 + $0x1c8] ss:$16 sps:$4 sm:$0xff]   ;;  %v4834_v39 = vld [vmem:[%s6729_s7 + $0x1e0] ss:$16 sps:$4 sm:$0xff]  }
 0x1ce   : > { %1131 = vmatmul.mubr.bf16.vlgmr.msra.gmra.mrb[8].mxu1 %v5502_v47  ;;  %1237 = vmatmul.mubr.bf16.vlgmr.msra.gmra.mrb[0].mxu0 %v5502_v47 }
 0x1cf   : > { %1152 = vmatpush1.bf16.msra.mxu1 %v4227_v29  ;;  %1140 = vmatprep.mubr.bf16.mxu1 %v5265_v30  ;;  %v715_v29 = vld [vmem:[%s6727_s5 + $0x158] sm:$0xff] }
 0x1d0   : > { %1153 = vmatprep.subr.bf16.mxu1 %v4236_v48  ;;  %1246 = vmatprep.mubr.bf16.mxu0 %v5265_v30  ;;  %v4272_v33 = vcombine.high %v715_v29, %v719_v31  ;;  %v4271_v36 = vcombine.low %v715_v29, %v719_v31  ;;  %v4750_v48 = vld [vmem:[%s6729_s7 + $0x20] ss:$16 sps:$4 sm:$0xff]   ;;  %v4819_v29 = vld [vmem:[%s6729_s7 + $0x188] ss:$16 sps:$4 sm:$0xff]   ;;  %v4824_v31 = vld [vmem:[%s6729_s7 + $0x1a4] ss:$16 sps:$4 sm:$0xff]  }
 0x1d1   : > { %3154 = vmatpush1.bf16.msra.mxu0 %v4744_v45  ;;  %v738_v45 = vlaneseq }
 0x1d3   : > { %1154 = vmatpush1.bf16.msra.mxu1 %v4235_v51  ;;  %v4761_v51 = vld [vmem:[%s6729_s7 + $0x4c] ss:$16 sps:$4 sm:$0xff]  }
 0x1d4   : > { %1155 = vmatprep.subr.bf16.mxu1 %v4244_v52  ;;  %v4756_v52 = vld [vmem:[%s6729_s7 + $0x40] ss:$16 sps:$4 sm:$0xff]  }
 0x1d6   : > { %1141 = vmatmul.mubr.bf16.gmra.mrb[12].mxu1 %v5500_v46  ;;  %1247 = vmatmul.mubr.bf16.gmra.mrb[4].mxu0 %v5500_v46 }
 0x1d7   : > { %1156 = vmatpush1.bf16.msra.mxu1 %v4243_v55  ;;  %1183 = vmatprep.mubr.bf16.mxu1 %v5265_v30  ;;  %v4767_v55 = vld [vmem:[%s6729_s7 + $0x6c] ss:$16 sps:$4 sm:$0xff]  }
 0x1d8   : > { %1157 = vmatprep.subr.bf16.mxu1 %v4252_v56  ;;  %v4762_v56 = vld [vmem:[%s6729_s7 + $0x60] ss:$16 sps:$4 sm:$0xff]  }
 0x1db   : > { %1158 = vmatpush1.bf16.msra.mxu1 %v4251_v59  ;;  %v4773_v59 = vld [vmem:[%s6729_s7 + $0x8c] ss:$16 sps:$4 sm:$0xff]  }
 0x1dc   : > { %1159 = vmatprep.subr.bf16.mxu1 %v4260_v60  ;;  %v4768_v60 = vld [vmem:[%s6729_s7 + $0x80] ss:$16 sps:$4 sm:$0xff]  }
 0x1df   : > { %1160 = vmatpush1.bf16.msra.mxu1 %v4259_v63  ;;  %v4779_v63 = vld [vmem:[%s6729_s7 + $0xac] ss:$16 sps:$4 sm:$0xff]  }
 0x1e0   : > { %1161 = vmatprep.subr.bf16.mxu1 %v4268_v0  ;;  %v4774_v0 = vld [vmem:[%s6729_s7 + $0xa0] ss:$16 sps:$4 sm:$0xff]  }
 0x1e3   : > { %1162 = vmatpush1.bf16.msra.mxu1 %v4267_v3  ;;  %v4785_v3 = vld [vmem:[%s6729_s7 + $0xcc] ss:$16 sps:$4 sm:$0xff]  }
 0x1e4   : > { %1163 = vmatprep.subr.bf16.mxu1 %v4276_v4  ;;  %v4780_v4 = vld [vmem:[%s6729_s7 + $0xc0] ss:$16 sps:$4 sm:$0xff]  }
 0x1e7   : > { %1164 = vmatpush1.bf16.msra.mxu1 %v4275_v7  ;;  %v4791_v7 = vld [vmem:[%s6729_s7 + $0xec] ss:$16 sps:$4 sm:$0xff]  }
 0x1e8   : > { %1165 = vmatprep.subr.bf16.mxu1 %v4284_v8  ;;  %v4786_v8 = vld [vmem:[%s6729_s7 + $0xe0] ss:$16 sps:$4 sm:$0xff]  }
 0x1eb   : > { %1166 = vmatpush1.bf16.msra.mxu1 %v4283_v11  ;;  %v4797_v11 = vld [vmem:[%s6729_s7 + $0x10c] ss:$16 sps:$4 sm:$0xff]  }
 0x1ec   : > { %1257 = vmatprep.subr.bf16.mxu1 %v4232_v12  ;;  %v4792_v12 = vld [vmem:[%s6729_s7 + $0x100] ss:$16 sps:$4 sm:$0xff]  }
 0x1ee   : > { %1184 = vmatmul.mubr.bf16.vlgmr.msra.gmra.mrb[16].mxu1 %v5502_v47 }
 0x1ef   : > { %1258 = vmatpush1.bf16.msra.mxu1 %v4231_v15  ;;  %1193 = vmatprep.mubr.bf16.mxu1 %v5265_v30  ;;  %v4803_v15 = vld [vmem:[%s6729_s7 + $0x12c] ss:$16 sps:$4 sm:$0xff]  }
 0x1f0   : > { %1259 = vmatprep.subr.bf16.mxu1 %v4240_v16  ;;  %v4798_v16 = vld [vmem:[%s6729_s7 + $0x120] ss:$16 sps:$4 sm:$0xff]  }
 0x1f3   : > { %1260 = vmatpush1.bf16.msra.mxu1 %v4239_v19  ;;  %v4809_v19 = vld [vmem:[%s6729_s7 + $0x14c] ss:$16 sps:$4 sm:$0xff]  }
 0x1f4   : > { %1261 = vmatprep.subr.bf16.mxu1 %v4248_v20  ;;  %v4804_v20 = vld [vmem:[%s6729_s7 + $0x140] ss:$16 sps:$4 sm:$0xff]  }
 0x1f6   : > { %1194 = vmatmul.mubr.bf16.gmra.mrb[20].mxu1 %v5500_v46 }
 0x1f7   : > { %1262 = vmatpush1.bf16.msra.mxu1 %v4247_v23  ;;  %1289 = vmatprep.mubr.bf16.mxu1 %v5265_v30  ;;  %v4815_v23 = vld [vmem:[%s6729_s7 + $0x16c] ss:$16 sps:$4 sm:$0xff]  }
 0x1f8   : > { %1263 = vmatprep.subr.bf16.mxu1 %v4256_v24  ;;  %v4810_v24 = vld [vmem:[%s6729_s7 + $0x160] ss:$16 sps:$4 sm:$0xff]  }
 0x1fb   : > { %1264 = vmatpush1.bf16.msra.mxu1 %v4255_v27  ;;  %v4821_v27 = vld [vmem:[%s6729_s7 + $0x18c] ss:$16 sps:$4 sm:$0xff]  }
 0x1fc   : > { %1265 = vmatprep.subr.bf16.mxu1 %v4264_v28  ;;  %v4816_v28 = vld [vmem:[%s6729_s7 + $0x180] ss:$16 sps:$4 sm:$0xff]  }
 0x1ff   : > { %1266 = vmatpush1.bf16.msra.mxu1 %v4263_v32  ;;  %v4827_v32 = vld [vmem:[%s6729_s7 + $0x1ac] ss:$16 sps:$4 sm:$0xff]  }
 0x200   : > { %1267 = vmatprep.subr.bf16.mxu1 %v4272_v33  ;;  %v4822_v33 = vld [vmem:[%s6729_s7 + $0x1a0] ss:$16 sps:$4 sm:$0xff]  }
 0x203   : > { %1268 = vmatpush1.bf16.msra.mxu1 %v4271_v36  ;;  %v4833_v36 = vld [vmem:[%s6729_s7 + $0x1cc] ss:$16 sps:$4 sm:$0xff]  }
 0x204   : > { %1269 = vmatprep.subr.bf16.mxu1 %v4280_v37  ;;  %v4828_v37 = vld [vmem:[%s6729_s7 + $0x1c0] ss:$16 sps:$4 sm:$0xff]  }
 0x207   : > { %1270 = vmatpush1.bf16.msra.mxu1 %v4279_v40  ;;  %v4836_v40 = vld [vmem:[%s6729_s7 + $0x1e4] ss:$16 sps:$4 sm:$0xff]  }
 0x208   : > { %1271 = vmatprep.subr.bf16.mxu1 %v4288_v41  ;;  %v4837_v41 = vld [vmem:[%s6729_s7 + $0x1e8] ss:$16 sps:$4 sm:$0xff]  }
 0x20b   : > { %1272 = vmatpush1.bf16.msra.mxu1 %v4287_v42  ;;  %v4839_v42 = vld [vmem:[%s6729_s7 + $0x1ec] ss:$16 sps:$4 sm:$0xff]  }
 0x20c   : > { %3317 = vmatprep.subr.bf16.mxu1 %v4749_v44  ;;  %v4845_v44 = vld [vmem:[%s6729_s7 + $0x20c] ss:$16 sps:$4 sm:$0xff]  }
 0x20e   : > { %1290 = vmatmul.mubr.bf16.vlgmr.msra.gmra.mrb[24].mxu1 %v5502_v47  ;;  %v4747_v47 = vld [vmem:[%s6729_s7 + $0x8] ss:$16 sps:$4 sm:$0xff]  }
 0x20f   : > { %1299 = vmatprep.mubr.bf16.mxu1 %v5265_v30  ;;  %3318 = vmatpush1.bf16.msra.mxu1 %v4747_v47  ;;  %v4752_v30 = vld [vmem:[%s6729_s7 + $0x24] ss:$16 sps:$4 sm:$0xff]   ;;  %v5800_v47 = vshrl.u32 %v738_v45, 7 }
 0x210   : > { %3155 = vmatprep.subr.bf16.mxu0 %v4752_v30 }
 0x211   : > { %3156 = vmatpush1.bf16.msra.mxu0 %v4750_v48  ;;  %v5803_v30 = vsub.s32 0, %v5800_v47  ;;  %v5809_v48 = vld [vmem:[%s6728_s6] sm:$0xff] }
 0x212   : > { %3157 = vmatprep.subr.bf16.mxu0 %v4758_v50  ;;  %v760_v50 = vsub.s32 5, %v5800_v47 }
 0x215   : > { %3158 = vmatpush1.bf16.msra.mxu0 %v4756_v52 }
 0x216   : > { %1300 = vmatmul.mubr.bf16.gmra.mrb[28].mxu1 %v5500_v46  ;;  %v4755_v46 = vld [vmem:[%s6729_s7 + $0x2c] ss:$16 sps:$4 sm:$0xff]   ;;  %3159 = vmatprep.subr.bf16.mxu0 %v4764_v54  ;;  %v761_v54 = vrot.slane %v5809_v48, %v760_v50 }
 0x217   : > { %3319 = vmatprep.subr.bf16.mxu1 %v4755_v46  ;;  %v756_v46 = vsub.s32 4, %v5800_v47 }
 0x218   : > { %3320 = vmatpush1.bf16.msra.mxu1 %v4753_v49  ;;  %v5812_v49 = vsub.s32 1, %v5800_v47 }
 0x219   : > { %3321 = vmatprep.subr.bf16.mxu1 %v4761_v51  ;;  %3160 = vmatpush1.bf16.msra.mxu0 %v4762_v56  ;;  %v741_v51 = vrot.slane %v5809_v48, %v5803_v30  ;;  %v757_v52 = vrot.slane %v5809_v48, %v756_v46 }
 0x21a   : > { %3161 = vmatprep.subr.bf16.mxu0 %v4770_v58 }
 0x21c   : > { %3322 = vmatpush1.bf16.msra.mxu1 %v4759_v53  ;;  %v745_v53 = vrot.slane %v5809_v48, %v5812_v49 }
 0x21d   : > { %3323 = vmatprep.subr.bf16.mxu1 %v4767_v55  ;;  %3162 = vmatpush1.bf16.msra.mxu0 %v4768_v60 }
 0x21e   : > { %3163 = vmatprep.subr.bf16.mxu0 %v4776_v62 }
 0x220   : > { %3324 = vmatpush1.bf16.msra.mxu1 %v4765_v57 }
 0x221   : > { %3325 = vmatprep.subr.bf16.mxu1 %v4773_v59  ;;  %3164 = vmatpush1.bf16.msra.mxu0 %v4774_v0 }
 0x222   : > { %3165 = vmatprep.subr.bf16.mxu0 %v4782_v2 }
 0x224   : > { %3326 = vmatpush1.bf16.msra.mxu1 %v4771_v61 }
 0x225   : > { %3327 = vmatprep.subr.bf16.mxu1 %v4779_v63  ;;  %3166 = vmatpush1.bf16.msra.mxu0 %v4780_v4 }
 0x226   : > { %3167 = vmatprep.subr.bf16.mxu0 %v4788_v6 }
 0x228   : > { %3328 = vmatpush1.bf16.msra.mxu1 %v4777_v1 }
 0x229   : > { %3329 = vmatprep.subr.bf16.mxu1 %v4785_v3  ;;  %3168 = vmatpush1.bf16.msra.mxu0 %v4786_v8 }
 0x22a   : > { %3169 = vmatprep.subr.bf16.mxu0 %v4794_v10 }
 0x22c   : > { %3330 = vmatpush1.bf16.msra.mxu1 %v4783_v5 }
 0x22d   : > { %3331 = vmatprep.subr.bf16.mxu1 %v4791_v7  ;;  %3170 = vmatpush1.bf16.msra.mxu0 %v4792_v12 }
 0x22e   : > { %3171 = vmatprep.subr.bf16.mxu0 %v4800_v14 }
 0x230   : > { %3332 = vmatpush1.bf16.msra.mxu1 %v4789_v9 }
 0x231   : > { %3333 = vmatprep.subr.bf16.mxu1 %v4797_v11  ;;  %3172 = vmatpush1.bf16.msra.mxu0 %v4798_v16 }
 0x232   : > { %3173 = vmatprep.subr.bf16.mxu0 %v4806_v18 }
 0x234   : > { %3334 = vmatpush1.bf16.msra.mxu1 %v4795_v13 }
 0x235   : > { %3335 = vmatprep.subr.bf16.mxu1 %v4803_v15  ;;  %3174 = vmatpush1.bf16.msra.mxu0 %v4804_v20 }
 0x236   : > { %3175 = vmatprep.subr.bf16.mxu0 %v4812_v22 }
 0x238   : > { %3336 = vmatpush1.bf16.msra.mxu1 %v4801_v17 }
 0x239   : > { %3337 = vmatprep.subr.bf16.mxu1 %v4809_v19  ;;  %3176 = vmatpush1.bf16.msra.mxu0 %v4810_v24 }
 0x23a   : > { %3177 = vmatprep.subr.bf16.mxu0 %v4818_v26 }
 0x23c   : > { %3338 = vmatpush1.bf16.msra.mxu1 %v4807_v21 }
 0x23d   : > { %3339 = vmatprep.subr.bf16.mxu1 %v4815_v23  ;;  %3178 = vmatpush1.bf16.msra.mxu0 %v4816_v28 }
 0x23e   : > { %3179 = vmatprep.subr.bf16.mxu0 %v4824_v31 }
 0x240   : > { %3340 = vmatpush1.bf16.msra.mxu1 %v4813_v25 }
 0x241   : > { %3341 = vmatprep.subr.bf16.mxu1 %v4821_v27  ;;  %3180 = vmatpush1.bf16.msra.mxu0 %v4822_v33 }
 0x242   : > { %3181 = vmatprep.subr.bf16.mxu0 %v4830_v35 }
 0x244   : > { %3342 = vmatpush1.bf16.msra.mxu1 %v4819_v29 }
 0x245   : > { %3343 = vmatprep.subr.bf16.mxu1 %v4827_v32  ;;  %3182 = vmatpush1.bf16.msra.mxu0 %v4828_v37 }
 0x246   : > { %3183 = vmatprep.subr.bf16.mxu0 %v4836_v40 }
 0x248   : > { %3344 = vmatpush1.bf16.msra.mxu1 %v4825_v34 }
 0x249   : > { %3345 = vmatprep.subr.bf16.mxu1 %v4833_v36  ;;  %3184 = vmatpush1.bf16.msra.mxu0 %v4834_v39 }
 0x24a   : > { %3194 = vmatprep.subr.bf16.mxu0 %v4842_v43 }
 0x24c   : > { %3346 = vmatpush1.bf16.msra.mxu1 %v4831_v38 }
 0x24d   : > { %3347 = vmatprep.subr.bf16.mxu1 %v4839_v42 }
 0x250   : > { %3348 = vmatpush1.bf16.msra.mxu1 %v4837_v41 }
 0x251   : > { %3358 = vmatprep.subr.bf16.mxu1 %v4845_v44 }
 0x2a1   : > { %v1132_v55 = vpop.f32.mrb[8].mxu1  ;;  %v1238_v56 = vpop.f32.mrb[0].mxu0 }
 0x2a2   : > { %v1133_v57 = vadd.f32 %v1132_v55, %v741_v51  ;;  %v1239_v58 = vadd.f32 %v1238_v56, %v757_v52  ;;  %v1134_v59 = vpop.f32.mrb[9].mxu1  ;;  %v1240_v60 = vpop.f32.mrb[1].mxu0 }
 0x2a3   : > { %v1135_v61 = vadd.f32 %v1134_v59, %v745_v53  ;;  %v1241_v62 = vadd.f32 %v1240_v60, %v761_v54  ;;  %v1136_v63 = vpop.f32.mrb[10].mxu1  ;;  %v1242_v0 = vpop.f32.mrb[2].mxu0 }
 0x2a4   : > { %v1137_v1 = vadd.f32 %v1136_v63, %v741_v51  ;;  %v1243_v2 = vadd.f32 %v1242_v0, %v757_v52  ;;  %v1138_v3 = vpop.f32.mrb[11].mxu1  ;;  %v1244_v4 = vpop.f32.mrb[3].mxu0  ;;  %v1310_v7 = vmax.f32 %v1133_v57, 0.0  ;;  %v1314_v8 = vmax.f32 %v1239_v58, 0.0 }
 0x2a5   : > { %v1139_v5 = vadd.f32 %v1138_v3, %v745_v53  ;;  %v1245_v6 = vadd.f32 %v1244_v4, %v761_v54  ;;  %v1311_v11 = vmax.f32 %v1135_v61, 0.0  ;;  %v1315_v12 = vmax.f32 %v1241_v62, 0.0 }
 0x2a6   : > { %v1318_v9 = vmax.f32 %v1137_v1, 0.0  ;;  %v1322_v10 = vmax.f32 %v1243_v2, 0.0 }
 0x2a7   : > { %v1319_v13 = vmax.f32 %v1139_v5, 0.0  ;;  %v1323_v14 = vmax.f32 %v1245_v6, 0.0 }
 0x2a8   : > { %v1342_v15 = vmax.f32 %v1310_v7, %v1318_v9  ;;  %v1378_v16 = vmax.f32 %v1314_v8, %v1322_v10 }
 0x2a9   : > { %v1351_v17 = vmax.f32 %v1311_v11, %v1319_v13  ;;  %v1387_v18 = vmax.f32 %v1315_v12, %v1323_v14  ;;  %v1142_v19 = vpop.f32.mrb[12].mxu1  ;;  %v1248_v20 = vpop.f32.mrb[4].mxu0  ;;  %v5826_v11 = vsub.s32 2, %v5800_v47  ;;  %v5829_v14 = vsub.s32 3, %v5800_v47 }
 0x2aa   : > { %v1143_v21 = vadd.f32 %v1142_v19, %v741_v51  ;;  %v1249_v22 = vadd.f32 %v1248_v20, %v757_v52  ;;  %v1144_v23 = vpop.f32.mrb[13].mxu1  ;;  %v1250_v24 = vpop.f32.mrb[5].mxu0 }
 0x2ab   : > { %v1145_v25 = vadd.f32 %v1144_v23, %v745_v53  ;;  %v1251_v26 = vadd.f32 %v1250_v24, %v761_v54  ;;  %v1146_v27 = vpop.f32.mrb[14].mxu1  ;;  %v1252_v28 = vpop.f32.mrb[6].mxu0  ;;  %v749_v19 = vrot.slane %v5809_v48, %v5826_v11 }
 0x2ac   : > { %v1326_v29 = vmax.f32 %v1143_v21, 0.0  ;;  %v1330_v31 = vmax.f32 %v1249_v22, 0.0  ;;  %v1147_v32 = vadd.f32 %v1146_v27, %v741_v51  ;;  %v1253_v33 = vadd.f32 %v1252_v28, %v757_v52  ;;  %v1148_v34 = vpop.f32.mrb[15].mxu1  ;;  %v1254_v35 = vpop.f32.mrb[7].mxu0 }
 0x2ad   : > { %v1327_v36 = vmax.f32 %v1145_v25, 0.0  ;;  %v1331_v37 = vmax.f32 %v1251_v26, 0.0  ;;  %v1149_v38 = vadd.f32 %v1148_v34, %v745_v53  ;;  %v1255_v39 = vadd.f32 %v1254_v35, %v761_v54 }
 0x2ae   : > { %v1343_v40 = vmax.f32 %v1342_v15, %v1326_v29  ;;  %v1379_v41 = vmax.f32 %v1378_v16, %v1330_v31  ;;  %v1334_v42 = vmax.f32 %v1147_v32, 0.0  ;;  %v1338_v43 = vmax.f32 %v1253_v33, 0.0 }
 0x2af   : > { %v1352_v44 = vmax.f32 %v1351_v17, %v1327_v36  ;;  %v1388_v45 = vmax.f32 %v1387_v18, %v1331_v37  ;;  %v1335_v55 = vmax.f32 %v1149_v38, 0.0  ;;  %v1339_v56 = vmax.f32 %v1255_v39, 0.0 }
 0x2b0   : > { %v1344_v57 = vmax.f32 %v1343_v40, %v1334_v42  ;;  %v1380_v58 = vmax.f32 %v1379_v41, %v1338_v43  ;;  %v753_v22 = vrot.slane %v5809_v48, %v5829_v14 }
 0x2b1   : > { %v1353_v59 = vmax.f32 %v1352_v44, %v1335_v55  ;;  %v1389_v60 = vmax.f32 %v1388_v45, %v1339_v56 }
 0x2b2   : > { %v1345_v51 = vrot.slane %v1344_v57, 4  ;;  %v1381_v52 = vrot.slane %v1380_v58, 4 }
 0x2b3   : > { %v1354_v61 = vrot.slane %v1353_v59, 4  ;;  %v1390_v62 = vrot.slane %v1389_v60, 4 }
 0x2b4   : > { %v1346_v63 = vmax.f32 %v1344_v57, %v1345_v51  ;;  %v1382_v0 = vmax.f32 %v1380_v58, %v1381_v52 }
 0x2b5   : > { %v1355_v53 = vmax.f32 %v1353_v59, %v1354_v61  ;;  %v1391_v54 = vmax.f32 %v1389_v60, %v1390_v62 }
 0x2b6   : > { %v1347_v1 = vrot.slane %v1346_v63, 2  ;;  %v1383_v2 = vrot.slane %v1382_v0, 2 }
 0x2b7   : > { %v1356_v3 = vrot.slane %v1355_v53, 2  ;;  %v1392_v4 = vrot.slane %v1391_v54, 2 }
 0x2b8   : > { %v1348_v5 = vmax.f32 %v1346_v63, %v1347_v1  ;;  %v1384_v6 = vmax.f32 %v1382_v0, %v1383_v2  ;;  %v5266_v0 = vmov 1966171168  }
 0x2b9   : > { %v1357_v7 = vmax.f32 %v1355_v53, %v1356_v3  ;;  %v1393_v8 = vmax.f32 %v1391_v54, %v1392_v4  ;;  %v1431_v53 = vunpack.c.l.s4 %v5266_v0 }
 0x2ba   : > { %v1349_v9 = vrot.slane %v1348_v5, 1  ;;  %v1385_v10 = vrot.slane %v1384_v6, 1 }
 0x2bb   : > { %v1358_v12 = vrot.slane %v1357_v7, 1  ;;  %v1394_v13 = vrot.slane %v1393_v8, 1  ;;  %v1432_v4 = vunpack.c.0.s8 %v1431_v53 }
 0x2bc   : > { %v1350_v15 = vmax.f32 %v1348_v5, %v1349_v9  ;;  %v5831_v16 = vmax.f32 %v1384_v6, %v1385_v10  ;;  %v768_v9 = vsub.s32 7, %v5800_v47 }
 0x2bd   : > { %v1359_v17 = vmax.f32 %v1357_v7, %v1358_v12  ;;  %v5833_v18 = vmax.f32 %v1393_v8, %v1394_v13  ;;  %v764_v7 = vsub.s32 6, %v5800_v47  ;;  %v1435_v12 = vsub.s32 %v1432_v4, %v5800_v47  ;;  %v5131_v47 = vld [vmem:[%s6731_s9 + $0x10] ss:$8 sps:$4 sm:$0xff]  }
 0x2bf   : > { %v1426_v20 = vcombine.low %v1350_v15, %v1359_v17  ;;  %v1428_v21 = vcombine.low %v5831_v16, %v5833_v18  ;;  %v765_v15 = vrot.slane %v5809_v48, %v764_v7  ;;  %v4840_v16 = vld [vmem:[%s6729_s7 + $0x200] ss:$16 sps:$4 sm:$0xff]   ;;  %v4843_v18 = vld [vmem:[%s6729_s7 + $0x208] ss:$16 sps:$4 sm:$0xff]  }
 0x2c1   : > { %v1185_v23 = vpop.f32.mrb[16].mxu1 }
 0x2c2   : > { %v1186_v24 = vadd.f32 %v1185_v23, %v749_v19  ;;  %v1187_v25 = vpop.f32.mrb[17].mxu1 }
 0x2c3   : > { %v1188_v26 = vadd.f32 %v1187_v25, %v753_v22  ;;  %v1189_v27 = vpop.f32.mrb[18].mxu1 }
 0x2c4   : > { %v1190_v28 = vadd.f32 %v1189_v27, %v749_v19  ;;  %v1191_v29 = vpop.f32.mrb[19].mxu1  ;;  %v1312_v32 = vmax.f32 %v1186_v24, 0.0 }
 0x2c5   : > { %v1192_v31 = vadd.f32 %v1191_v29, %v753_v22  ;;  %v1313_v34 = vmax.f32 %v1188_v26, 0.0 }
 0x2c6   : > { %v1320_v33 = vmax.f32 %v1190_v28, 0.0 }
 0x2c7   : > { %v1321_v35 = vmax.f32 %v1192_v31, 0.0 }
 0x2c8   : > { %v1360_v36 = vmax.f32 %v1312_v32, %v1320_v33 }
 0x2c9   : > { %v1369_v37 = vmax.f32 %v1313_v34, %v1321_v35  ;;  %v1195_v38 = vpop.f32.mrb[20].mxu1 }
 0x2ca   : > { %v1196_v39 = vadd.f32 %v1195_v38, %v749_v19  ;;  %v1197_v40 = vpop.f32.mrb[21].mxu1 }
 0x2cb   : > { %v1198_v41 = vadd.f32 %v1197_v40, %v753_v22  ;;  %v1199_v42 = vpop.f32.mrb[22].mxu1 }
 0x2cc   : > { %v1328_v43 = vmax.f32 %v1196_v39, 0.0  ;;  %v1200_v44 = vadd.f32 %v1199_v42, %v749_v19  ;;  %v1201_v45 = vpop.f32.mrb[23].mxu1  ;;  %v769_v19 = vrot.slane %v5809_v48, %v768_v9 }
 0x2cd   : > { %v1329_v55 = vmax.f32 %v1198_v41, 0.0  ;;  %v1202_v56 = vadd.f32 %v1201_v45, %v753_v22  ;;  %v1436_v22 = vrot.slane %v1426_v20, %v1435_v12 }
 0x2ce   : > { %v1361_v57 = vmax.f32 %v1360_v36, %v1328_v43  ;;  %v1336_v58 = vmax.f32 %v1200_v44, 0.0 }
 0x2cf   : > { %v1370_v59 = vmax.f32 %v1369_v37, %v1329_v55  ;;  %v1337_v60 = vmax.f32 %v1202_v56, 0.0 }
 0x2d0   : > { %v1362_v51 = vmax.f32 %v1361_v57, %v1336_v58 }
 0x2d1   : > { %v1371_v52 = vmax.f32 %v1370_v59, %v1337_v60 }
 0x2d2   : > { %v1363_v61 = vrot.slane %v1362_v51, 4 }
 0x2d3   : > { %v1372_v62 = vrot.slane %v1371_v52, 4 }
 0x2d4   : > { %v1364_v63 = vmax.f32 %v1362_v51, %v1363_v61 }
 0x2d5   : > { %v1373_v54 = vmax.f32 %v1371_v52, %v1372_v62 }
 0x2d6   : > { %v1365_v1 = vrot.slane %v1364_v63, 2 }
 0x2d7   : > { %v1374_v2 = vrot.slane %v1373_v54, 2 }
 0x2d8   : > { %v1366_v3 = vmax.f32 %v1364_v63, %v1365_v1 }
 0x2d9   : > { %v1375_v5 = vmax.f32 %v1373_v54, %v1374_v2 }
 0x2da   : > { %v1367_v6 = vrot.slane %v1366_v3, 1 }
 0x2db   : > { %v1376_v8 = vrot.slane %v1375_v5, 1 }
 0x2dc   : > { %v1368_v10 = vmax.f32 %v1366_v3, %v1367_v6 }
 0x2dd   : > { %v1377_v13 = vmax.f32 %v1375_v5, %v1376_v8 }
 0x2df   : > { %v1427_v17 = vcombine.low %v1368_v10, %v1377_v13  ;;  %v1450_v10 = vrot.slane %v1428_v21, %v1435_v12 }
 0x2e1   : > { %v1443_v23 = vrot.slane %v1427_v17, %v1435_v12  ;;  %v1291_v24 = vpop.f32.mrb[24].mxu1 }
 0x2e2   : > { %v1292_v25 = vadd.f32 %v1291_v24, %v765_v15  ;;  %v1293_v26 = vpop.f32.mrb[25].mxu1 }
 0x2e3   : > { %v1458_v27 = vcombine.low %v1436_v22, %v1443_v23  ;;  %v1294_v28 = vadd.f32 %v1293_v26, %v769_v19  ;;  %v1295_v29 = vpop.f32.mrb[26].mxu1 }
 0x2e4   : > { %v1296_v31 = vadd.f32 %v1295_v29, %v765_v15  ;;  %v1297_v32 = vpop.f32.mrb[27].mxu1  ;;  %v1316_v34 = vmax.f32 %v1292_v25, 0.0  ;;  %v4846_v29 = vld [vmem:[%s6729_s7 + $0x220] ss:$16 sps:$4 sm:$0xff]  }
 0x2e5   : > { %v1298_v33 = vadd.f32 %v1297_v32, %v769_v19  ;;  %v1317_v36 = vmax.f32 %v1294_v28, 0.0  ;;  %v1466_v17 = vrot.slane %v1458_v27, %v1435_v12  ;;  %v4851_v27 = vld [vmem:[%s6729_s7 + $0x22c] ss:$16 sps:$4 sm:$0xff]   ;;  %v4854_v32 = vld [vmem:[%s6729_s7 + $0x244] ss:$16 sps:$4 sm:$0xff]  }
 0x2e6   : > { %v1324_v35 = vmax.f32 %v1296_v31, 0.0  ;;  %v4849_v31 = vld [vmem:[%s6729_s7 + $0x228] ss:$16 sps:$4 sm:$0xff]  }
 0x2e7   : > { %v1325_v37 = vmax.f32 %v1298_v33, 0.0  ;;  %v4857_v33 = vld [vmem:[%s6729_s7 + $0x24c] ss:$16 sps:$4 sm:$0xff]  }
 0x2e8   : > { %v1396_v38 = vmax.f32 %v1316_v34, %v1324_v35  ;;  %v4852_v34 = vld [vmem:[%s6729_s7 + $0x240] ss:$16 sps:$4 sm:$0xff]   ;;  %v4855_v35 = vld [vmem:[%s6729_s7 + $0x248] ss:$16 sps:$4 sm:$0xff]  }
 0x2e9   : > { %v1405_v39 = vmax.f32 %v1317_v36, %v1325_v37  ;;  %v1301_v40 = vpop.f32.mrb[28].mxu1  ;;  %v4860_v36 = vld [vmem:[%s6729_s7 + $0x264] ss:$16 sps:$4 sm:$0xff]   ;;  %v4863_v37 = vld [vmem:[%s6729_s7 + $0x26c] ss:$16 sps:$4 sm:$0xff]  }
 0x2ea   : > { %v1302_v41 = vadd.f32 %v1301_v40, %v765_v15  ;;  %v1303_v48 = vpop.f32.mrb[29].mxu1  ;;  %v4866_v40 = vld [vmem:[%s6729_s7 + $0x284] ss:$16 sps:$4 sm:$0xff]  }
 0x2eb   : > { %v1304_v20 = vadd.f32 %v1303_v48, %v769_v19  ;;  %v1305_v42 = vpop.f32.mrb[30].mxu1  ;;  %v4864_v48 = vld [vmem:[%s6729_s7 + $0x280] ss:$16 sps:$4 sm:$0xff]  }
 0x2ec   : > { %v1332_v43 = vmax.f32 %v1302_v41, 0.0  ;;  %v1306_v44 = vadd.f32 %v1305_v42, %v765_v15  ;;  %v1307_v45 = vpop.f32.mrb[31].mxu1  ;;  %v4869_v41 = vld [vmem:[%s6729_s7 + $0x28c] ss:$16 sps:$4 sm:$0xff]   ;;  %v4872_v42 = vld [vmem:[%s6729_s7 + $0x2a4] ss:$16 sps:$4 sm:$0xff]  }
 0x2ed   : > { %v1333_v55 = vmax.f32 %v1304_v20, 0.0  ;;  %v1308_v56 = vadd.f32 %v1307_v45, %v769_v19  ;;  %v4867_v20 = vld [vmem:[%s6729_s7 + $0x288] ss:$16 sps:$4 sm:$0xff]  }
 0x2ee   : > { %v1397_v57 = vmax.f32 %v1396_v38, %v1332_v43  ;;  %v1340_v58 = vmax.f32 %v1306_v44, 0.0  ;;  %v4858_v38 = vld [vmem:[%s6729_s7 + $0x260] ss:$16 sps:$4 sm:$0xff]   ;;  %v4875_v43 = vld [vmem:[%s6729_s7 + $0x2ac] ss:$16 sps:$4 sm:$0xff]  }
 0x2ef   : > { %v1406_v59 = vmax.f32 %v1405_v39, %v1333_v55  ;;  %v1341_v60 = vmax.f32 %v1308_v56, 0.0  ;;  %v4861_v39 = vld [vmem:[%s6729_s7 + $0x268] ss:$16 sps:$4 sm:$0xff]   ;;  %v4870_v44 = vld [vmem:[%s6729_s7 + $0x2a0] ss:$16 sps:$4 sm:$0xff]  }
 0x2f0   : > { %v1398_v51 = vmax.f32 %v1397_v57, %v1340_v58  ;;  %v4873_v45 = vld [vmem:[%s6729_s7 + $0x2a8] ss:$16 sps:$4 sm:$0xff]   ;;  %v4878_v55 = vld [vmem:[%s6729_s7 + $0x2c4] ss:$16 sps:$4 sm:$0xff]   ;;  %v4881_v56 = vld [vmem:[%s6729_s7 + $0x2cc] ss:$16 sps:$4 sm:$0xff]  }
 0x2f1   : > { %v1407_v52 = vmax.f32 %v1406_v59, %v1341_v60  ;;  %v4876_v57 = vld [vmem:[%s6729_s7 + $0x2c0] ss:$16 sps:$4 sm:$0xff]   ;;  %v4879_v58 = vld [vmem:[%s6729_s7 + $0x2c8] ss:$16 sps:$4 sm:$0xff]   ;;  %v4884_v59 = vld [vmem:[%s6729_s7 + $0x2e4] ss:$16 sps:$4 sm:$0xff]  }
 0x2f2   : > { %v1399_v61 = vrot.slane %v1398_v51, 4  ;;  %v4887_v60 = vld [vmem:[%s6729_s7 + $0x2ec] ss:$16 sps:$4 sm:$0xff]  }
 0x2f3   : > { %v1408_v62 = vrot.slane %v1407_v52, 4 }
 0x2f4   : > { %v1400_v63 = vmax.f32 %v1398_v51, %v1399_v61  ;;  %v4882_v51 = vld [vmem:[%s6729_s7 + $0x2e0] ss:$16 sps:$4 sm:$0xff]   ;;  %v4890_v61 = vld [vmem:[%s6729_s7 + $0x304] ss:$16 sps:$4 sm:$0xff]  }
 0x2f5   : > { %v1409_v0 = vmax.f32 %v1407_v52, %v1408_v62  ;;  %v4885_v52 = vld [vmem:[%s6729_s7 + $0x2e8] ss:$16 sps:$4 sm:$0xff]   ;;  %v4893_v62 = vld [vmem:[%s6729_s7 + $0x30c] ss:$16 sps:$4 sm:$0xff]  }
 0x2f6   : > { %v1401_v53 = vrot.slane %v1400_v63, 2 }
 0x2f7   : > { %v1410_v54 = vrot.slane %v1409_v0, 2 }
 0x2f8   : > { %v1402_v1 = vmax.f32 %v1400_v63, %v1401_v53  ;;  %v4888_v63 = vld [vmem:[%s6729_s7 + $0x300] ss:$16 sps:$4 sm:$0xff]   ;;  %v4896_v53 = vld [vmem:[%s6729_s7 + $0x324] ss:$16 sps:$4 sm:$0xff]  }
 0x2f9   : > { %v1411_v2 = vmax.f32 %v1409_v0, %v1410_v54  ;;  %v4891_v0 = vld [vmem:[%s6729_s7 + $0x308] ss:$16 sps:$4 sm:$0xff]   ;;  %v4899_v54 = vld [vmem:[%s6729_s7 + $0x32c] ss:$16 sps:$4 sm:$0xff]  }
 0x2fa   : > { %v1403_v3 = vrot.slane %v1402_v1, 1 }
 0x2fb   : > { %v1412_v4 = vrot.slane %v1411_v2, 1 }
 0x2fc   : > { %v1404_v5 = vmax.f32 %v1402_v1, %v1403_v3  ;;  %v4894_v1 = vld [vmem:[%s6729_s7 + $0x320] ss:$16 sps:$4 sm:$0xff]   ;;  %v4902_v3 = vld [vmem:[%s6729_s7 + $0x344] ss:$16 sps:$4 sm:$0xff]  }
 0x2fd   : > { %v1413_v6 = vmax.f32 %v1411_v2, %v1412_v4  ;;  %v4897_v2 = vld [vmem:[%s6729_s7 + $0x328] ss:$16 sps:$4 sm:$0xff]   ;;  %v4905_v4 = vld [vmem:[%s6729_s7 + $0x34c] ss:$16 sps:$4 sm:$0xff]  }
 0x2ff   : > { %v1429_v8 = vcombine.low %v1404_v5, %v1413_v6  ;;  %v4900_v5 = vld [vmem:[%s6729_s7 + $0x340] ss:$16 sps:$4 sm:$0xff]   ;;  %v4903_v6 = vld [vmem:[%s6729_s7 + $0x348] ss:$16 sps:$4 sm:$0xff]  }
 0x301   : > { %v1457_v13 = vrot.slane %v1429_v8, %v1435_v12  ;;  %v4908_v8 = vld [vmem:[%s6729_s7 + $0x364] ss:$16 sps:$4 sm:$0xff]  }
 0x303   : > { %v1459_v15 = vcombine.low %v1450_v10, %v1457_v13  ;;  %v4911_v10 = vld [vmem:[%s6729_s7 + $0x36c] ss:$16 sps:$4 sm:$0xff]   ;;  %v4906_v13 = vld [vmem:[%s6729_s7 + $0x360] ss:$16 sps:$4 sm:$0xff]  }
 0x305   : > { %v1473_v19 = vrot.slane %v1459_v15, %v1435_v12  ;;  %v4848_v12 = vld [vmem:[%s6729_s7 + $0x224] ss:$16 sps:$4 sm:$0xff]   ;;  %v4909_v15 = vld [vmem:[%s6729_s7 + $0x368] ss:$16 sps:$4 sm:$0xff]  }
 0x307   : > { %v5853_v22 = vcombine.low %v1466_v17, %v1473_v19  ;;  %v4914_v17 = vld [vmem:[%s6729_s7 + $0x384] ss:$16 sps:$4 sm:$0xff]   ;;  %v4917_v19 = vld [vmem:[%s6729_s7 + $0x38c] ss:$16 sps:$4 sm:$0xff]  }
 0x309   : > { %v1554_v23 = vrot.slane %v5853_v22, %v5812_v49  ;;  %v1550_v24 = vrot.slane %v5853_v22, %v5803_v30  ;;  %v1562_v25 = vrot.slane %v5853_v22, %v5829_v14 }
 0x30b   : > { %v1588_v26 = vpack.c.bf16 %v1554_v23, %v1554_v23  ;;  %v1587_v21 = vpack.c.bf16 %v1550_v24, %v1550_v24  ;;  %v1590_v28 = vpack.c.bf16 %v1562_v25, %v1562_v25  ;;  %v4912_v23 = vld [vmem:[%s6729_s7 + $0x380] ss:$16 sps:$4 sm:$0xff]   ;;  %v4915_v24 = vld [vmem:[%s6729_s7 + $0x388] ss:$16 sps:$4 sm:$0xff]   ;;  %v4920_v25 = vld [vmem:[%s6729_s7 + $0x3a4] ss:$16 sps:$4 sm:$0xff]  }
 0x30d   : > { %3185 = vmatprep.mubr.bf16.mxu0 %v1588_v26  ;;  %3349 = vmatprep.mubr.bf16.mxu1 %v1588_v26  ;;  %v4923_v26 = vld [vmem:[%s6729_s7 + $0x3ac] ss:$16 sps:$4 sm:$0xff]  }
 0x30e   : > { %3186 = vmatmul.mubr.bf16.vlgmr.msra.gmra.mrb[8].mxu0 %v1587_v21  ;;  %3350 = vmatmul.mubr.bf16.vlgmr.msra.gmra.mrb[32].mxu1 %v1587_v21  ;;  %v4926_v21 = vld [vmem:[%s6729_s7 + $0x3c4] ss:$16 sps:$4 sm:$0xff]  }
 0x30f   : > { %3195 = vmatpush1.bf16.msra.mxu0 %v4840_v16  ;;  %3359 = vmatpush1.bf16.msra.mxu1 %v4843_v18  ;;  %v4918_v16 = vld [vmem:[%s6729_s7 + $0x3a0] ss:$16 sps:$4 sm:$0xff]   ;;  %v4921_v18 = vld [vmem:[%s6729_s7 + $0x3a8] ss:$16 sps:$4 sm:$0xff]  }
 0x310   : > { %3226 = vmatprep.mubr.bf16.mxu0 %v1590_v28  ;;  %3390 = vmatprep.mubr.bf16.mxu1 %v1590_v28  ;;  %v4927_v28 = vld [vmem:[%s6729_s7 + $0x3c8] ss:$16 sps:$4 sm:$0xff]  }
 0x311   : > { %3196 = vmatprep.subr.bf16.mxu0 %v4848_v12  ;;  %3360 = vmatprep.subr.bf16.mxu1 %v4851_v27  ;;  %v4929_v12 = vld [vmem:[%s6729_s7 + $0x3cc] ss:$16 sps:$4 sm:$0xff]   ;;  %v4924_v27 = vld [vmem:[%s6729_s7 + $0x3c0] ss:$16 sps:$4 sm:$0xff]  }
 0x313   : > { %3197 = vmatpush1.bf16.msra.mxu0 %v4846_v29  ;;  %3361 = vmatpush1.bf16.msra.mxu1 %v4849_v31  ;;  %v4932_v29 = vld [vmem:[%s6729_s7 + $0x3e4] ss:$16 sps:$4 sm:$0xff]   ;;  %v4935_v31 = vld [vmem:[%s6729_s7 + $0x3ec] ss:$16 sps:$4 sm:$0xff]  }
 0x314   : > { %3198 = vmatprep.subr.bf16.mxu0 %v4854_v32  ;;  %3362 = vmatprep.subr.bf16.mxu1 %v4857_v33  ;;  %v4930_v32 = vld [vmem:[%s6729_s7 + $0x3e0] ss:$16 sps:$4 sm:$0xff]   ;;  %v4933_v33 = vld [vmem:[%s6729_s7 + $0x3e8] ss:$16 sps:$4 sm:$0xff]  }
 0x317   : > { %3199 = vmatpush1.bf16.msra.mxu0 %v4852_v34  ;;  %3363 = vmatpush1.bf16.msra.mxu1 %v4855_v35  ;;  %v1558_v34 = vrot.slane %v5853_v22, %v5826_v11  ;;  %v4938_v35 = vld [vmem:[%s6729_s7 + $0x404] ss:$16 sps:$4 sm:$0xff]  }
 0x318   : > { %3200 = vmatprep.subr.bf16.mxu0 %v4860_v36  ;;  %3364 = vmatprep.subr.bf16.mxu1 %v4863_v37  ;;  %v4941_v36 = vld [vmem:[%s6729_s7 + $0x40c] ss:$16 sps:$4 sm:$0xff]   ;;  %v1570_v37 = vrot.slane %v5853_v22, %v760_v50 }
 0x319   : > { %v4947_v50 = vld [vmem:[%s6729_s7 + $0x42c] ss:$16 sps:$4 sm:$0xff]  }
 0x31b   : > { %3201 = vmatpush1.bf16.msra.mxu0 %v4858_v38  ;;  %3365 = vmatpush1.bf16.msra.mxu1 %v4861_v39  ;;  %v4936_v38 = vld [vmem:[%s6729_s7 + $0x400] ss:$16 sps:$4 sm:$0xff]   ;;  %v1589_v39 = vpack.c.bf16 %v1558_v34, %v1558_v34  ;;  %v5011_v34 = vld [vmem:[%s6729_s7 + $0x588] ss:$16 sps:$4 sm:$0xff]  }
 0x31c   : > { %3202 = vmatprep.subr.bf16.mxu0 %v4866_v40  ;;  %3366 = vmatprep.subr.bf16.mxu1 %v4869_v41  ;;  %v4939_v40 = vld [vmem:[%s6729_s7 + $0x408] ss:$16 sps:$4 sm:$0xff]   ;;  %v1592_v41 = vpack.c.bf16 %v1570_v37, %v1570_v37  ;;  %v5014_v37 = vld [vmem:[%s6729_s7 + $0x5a0] ss:$16 sps:$4 sm:$0xff]  }
 0x31f   : > { %3203 = vmatpush1.bf16.msra.mxu0 %v4864_v48  ;;  %3367 = vmatpush1.bf16.msra.mxu1 %v4867_v20  ;;  %v4944_v48 = vld [vmem:[%s6729_s7 + $0x424] ss:$16 sps:$4 sm:$0xff]   ;;  %v4942_v20 = vld [vmem:[%s6729_s7 + $0x420] ss:$16 sps:$4 sm:$0xff]  }
 0x320   : > { %3204 = vmatprep.subr.bf16.mxu0 %v4872_v42  ;;  %3368 = vmatprep.subr.bf16.mxu1 %v4875_v43  ;;  %v4945_v42 = vld [vmem:[%s6729_s7 + $0x428] ss:$16 sps:$4 sm:$0xff]   ;;  %v4950_v43 = vld [vmem:[%s6729_s7 + $0x444] ss:$16 sps:$4 sm:$0xff]  }
 0x323   : > { %3205 = vmatpush1.bf16.msra.mxu0 %v4870_v44  ;;  %3369 = vmatpush1.bf16.msra.mxu1 %v4873_v45  ;;  %v4953_v44 = vld [vmem:[%s6729_s7 + $0x44c] ss:$16 sps:$4 sm:$0xff]   ;;  %v4948_v45 = vld [vmem:[%s6729_s7 + $0x440] ss:$16 sps:$4 sm:$0xff]  }
 0x324   : > { %3206 = vmatprep.subr.bf16.mxu0 %v4878_v55  ;;  %3370 = vmatprep.subr.bf16.mxu1 %v4881_v56  ;;  %v4951_v55 = vld [vmem:[%s6729_s7 + $0x448] ss:$16 sps:$4 sm:$0xff]   ;;  %v4956_v56 = vld [vmem:[%s6729_s7 + $0x464] ss:$16 sps:$4 sm:$0xff]  }
 0x327   : > { %3207 = vmatpush1.bf16.msra.mxu0 %v4876_v57  ;;  %3371 = vmatpush1.bf16.msra.mxu1 %v4879_v58  ;;  %v4959_v57 = vld [vmem:[%s6729_s7 + $0x46c] ss:$16 sps:$4 sm:$0xff]   ;;  %v4954_v58 = vld [vmem:[%s6729_s7 + $0x460] ss:$16 sps:$4 sm:$0xff]  }
 0x328   : > { %3208 = vmatprep.subr.bf16.mxu0 %v4884_v59  ;;  %3372 = vmatprep.subr.bf16.mxu1 %v4887_v60  ;;  %v4957_v59 = vld [vmem:[%s6729_s7 + $0x468] ss:$16 sps:$4 sm:$0xff]   ;;  %v4962_v60 = vld [vmem:[%s6729_s7 + $0x484] ss:$16 sps:$4 sm:$0xff]  }
 0x32b   : > { %3209 = vmatpush1.bf16.msra.mxu0 %v4882_v51  ;;  %3373 = vmatpush1.bf16.msra.mxu1 %v4885_v52  ;;  %v4965_v51 = vld [vmem:[%s6729_s7 + $0x48c] ss:$16 sps:$4 sm:$0xff]   ;;  %v4960_v52 = vld [vmem:[%s6729_s7 + $0x480] ss:$16 sps:$4 sm:$0xff]  }
 0x32c   : > { %3210 = vmatprep.subr.bf16.mxu0 %v4890_v61  ;;  %3374 = vmatprep.subr.bf16.mxu1 %v4893_v62  ;;  %v4963_v61 = vld [vmem:[%s6729_s7 + $0x488] ss:$16 sps:$4 sm:$0xff]   ;;  %v4968_v62 = vld [vmem:[%s6729_s7 + $0x4a4] ss:$16 sps:$4 sm:$0xff]  }
 0x32f   : > { %3211 = vmatpush1.bf16.msra.mxu0 %v4888_v63  ;;  %3375 = vmatpush1.bf16.msra.mxu1 %v4891_v0  ;;  %v4971_v63 = vld [vmem:[%s6729_s7 + $0x4ac] ss:$16 sps:$4 sm:$0xff]   ;;  %v4966_v0 = vld [vmem:[%s6729_s7 + $0x4a0] ss:$16 sps:$4 sm:$0xff]  }
 0x330   : > { %3212 = vmatprep.subr.bf16.mxu0 %v4896_v53  ;;  %3376 = vmatprep.subr.bf16.mxu1 %v4899_v54  ;;  %v4969_v53 = vld [vmem:[%s6729_s7 + $0x4a8] ss:$16 sps:$4 sm:$0xff]   ;;  %v4974_v54 = vld [vmem:[%s6729_s7 + $0x4c4] ss:$16 sps:$4 sm:$0xff]  }
 0x333   : > { %3213 = vmatpush1.bf16.msra.mxu0 %v4894_v1  ;;  %3377 = vmatpush1.bf16.msra.mxu1 %v4897_v2  ;;  %v4977_v1 = vld [vmem:[%s6729_s7 + $0x4cc] ss:$16 sps:$4 sm:$0xff]   ;;  %v4972_v2 = vld [vmem:[%s6729_s7 + $0x4c0] ss:$16 sps:$4 sm:$0xff]  }
 0x334   : > { %3214 = vmatprep.subr.bf16.mxu0 %v4902_v3  ;;  %3378 = vmatprep.subr.bf16.mxu1 %v4905_v4  ;;  %v4975_v3 = vld [vmem:[%s6729_s7 + $0x4c8] ss:$16 sps:$4 sm:$0xff]   ;;  %v4980_v4 = vld [vmem:[%s6729_s7 + $0x4e4] ss:$16 sps:$4 sm:$0xff]  }
 0x337   : > { %3215 = vmatpush1.bf16.msra.mxu0 %v4900_v5  ;;  %3379 = vmatpush1.bf16.msra.mxu1 %v4903_v6  ;;  %v4983_v5 = vld [vmem:[%s6729_s7 + $0x4ec] ss:$16 sps:$4 sm:$0xff]   ;;  %v4978_v6 = vld [vmem:[%s6729_s7 + $0x4e0] ss:$16 sps:$4 sm:$0xff]  }
 0x338   : > { %3216 = vmatprep.subr.bf16.mxu0 %v4908_v8  ;;  %3380 = vmatprep.subr.bf16.mxu1 %v4911_v10  ;;  %v4981_v8 = vld [vmem:[%s6729_s7 + $0x4e8] ss:$16 sps:$4 sm:$0xff]   ;;  %v4986_v10 = vld [vmem:[%s6729_s7 + $0x504] ss:$16 sps:$4 sm:$0xff]  }
 0x33b   : > { %3217 = vmatpush1.bf16.msra.mxu0 %v4906_v13  ;;  %3381 = vmatpush1.bf16.msra.mxu1 %v4909_v15  ;;  %v4989_v13 = vld [vmem:[%s6729_s7 + $0x50c] ss:$16 sps:$4 sm:$0xff]   ;;  %v4984_v15 = vld [vmem:[%s6729_s7 + $0x500] ss:$16 sps:$4 sm:$0xff]  }
 0x33c   : > { %3218 = vmatprep.subr.bf16.mxu0 %v4914_v17  ;;  %3382 = vmatprep.subr.bf16.mxu1 %v4917_v19  ;;  %v4987_v17 = vld [vmem:[%s6729_s7 + $0x508] ss:$16 sps:$4 sm:$0xff]   ;;  %v4992_v19 = vld [vmem:[%s6729_s7 + $0x524] ss:$16 sps:$4 sm:$0xff]  }
 0x33f   : > { %3219 = vmatpush1.bf16.msra.mxu0 %v4912_v23  ;;  %3383 = vmatpush1.bf16.msra.mxu1 %v4915_v24  ;;  %v4995_v23 = vld [vmem:[%s6729_s7 + $0x52c] ss:$16 sps:$4 sm:$0xff]   ;;  %v4990_v24 = vld [vmem:[%s6729_s7 + $0x520] ss:$16 sps:$4 sm:$0xff]  }
 0x340   : > { %3220 = vmatprep.subr.bf16.mxu0 %v4920_v25  ;;  %3384 = vmatprep.subr.bf16.mxu1 %v4923_v26  ;;  %v4993_v25 = vld [vmem:[%s6729_s7 + $0x528] ss:$16 sps:$4 sm:$0xff]   ;;  %v4998_v26 = vld [vmem:[%s6729_s7 + $0x544] ss:$16 sps:$4 sm:$0xff]  }
 0x343   : > { %3221 = vmatpush1.bf16.msra.mxu0 %v4918_v16  ;;  %3385 = vmatpush1.bf16.msra.mxu1 %v4921_v18  ;;  %v5001_v16 = vld [vmem:[%s6729_s7 + $0x54c] ss:$16 sps:$4 sm:$0xff]   ;;  %v4996_v18 = vld [vmem:[%s6729_s7 + $0x540] ss:$16 sps:$4 sm:$0xff]  }
 0x344   : > { %3222 = vmatprep.subr.bf16.mxu0 %v4926_v21  ;;  %3386 = vmatprep.subr.bf16.mxu1 %v4929_v12  ;;  %v4999_v21 = vld [vmem:[%s6729_s7 + $0x548] ss:$16 sps:$4 sm:$0xff]   ;;  %v5004_v12 = vld [vmem:[%s6729_s7 + $0x564] ss:$16 sps:$4 sm:$0xff]  }
 0x347   : > { %3223 = vmatpush1.bf16.msra.mxu0 %v4924_v27  ;;  %3387 = vmatpush1.bf16.msra.mxu1 %v4927_v28  ;;  %v5007_v27 = vld [vmem:[%s6729_s7 + $0x56c] ss:$16 sps:$4 sm:$0xff]   ;;  %v5002_v28 = vld [vmem:[%s6729_s7 + $0x560] ss:$16 sps:$4 sm:$0xff]  }
 0x348   : > { %3224 = vmatprep.subr.bf16.mxu0 %v4932_v29  ;;  %3388 = vmatprep.subr.bf16.mxu1 %v4935_v31  ;;  %v5005_v29 = vld [vmem:[%s6729_s7 + $0x568] ss:$16 sps:$4 sm:$0xff]   ;;  %v5010_v31 = vld [vmem:[%s6729_s7 + $0x584] ss:$16 sps:$4 sm:$0xff]  }
 0x34b   : > { %3225 = vmatpush1.bf16.msra.mxu0 %v4930_v32  ;;  %3389 = vmatpush1.bf16.msra.mxu1 %v4933_v33  ;;  %v5013_v32 = vld [vmem:[%s6729_s7 + $0x58c] ss:$16 sps:$4 sm:$0xff]   ;;  %v5008_v33 = vld [vmem:[%s6729_s7 + $0x580] ss:$16 sps:$4 sm:$0xff]  }
 0x34c   : > { %3235 = vmatprep.subr.bf16.mxu0 %v4938_v35  ;;  %3399 = vmatprep.subr.bf16.mxu1 %v4941_v36  ;;  %v5016_v35 = vld [vmem:[%s6729_s7 + $0x5a4] ss:$16 sps:$4 sm:$0xff]   ;;  %v5019_v36 = vld [vmem:[%s6729_s7 + $0x5ac] ss:$16 sps:$4 sm:$0xff]  }
 0x34e   : > { %3227 = vmatmul.mubr.bf16.vlgmr.msra.gmra.mrb[8].mxu0 %v1589_v39  ;;  %3391 = vmatmul.mubr.bf16.vlgmr.msra.gmra.mrb[32].mxu1 %v1589_v39  ;;  %v5022_v39 = vld [vmem:[%s6729_s7 + $0x5c4] ss:$16 sps:$4 sm:$0xff]  }
 0x34f   : > { %3236 = vmatpush1.bf16.msra.mxu0 %v4936_v38  ;;  %3267 = vmatprep.mubr.bf16.mxu0 %v1592_v41  ;;  %v5017_v38 = vld [vmem:[%s6729_s7 + $0x5a8] ss:$16 sps:$4 sm:$0xff]  }
 0x350   : > { %3400 = vmatpush1.bf16.msra.mxu1 %v4939_v40  ;;  %3431 = vmatprep.mubr.bf16.mxu1 %v1592_v41  ;;  %v5025_v40 = vld [vmem:[%s6729_s7 + $0x5cc] ss:$16 sps:$4 sm:$0xff]   ;;  %v5020_v41 = vld [vmem:[%s6729_s7 + $0x5c0] ss:$16 sps:$4 sm:$0xff]  }
 0x351   : > { %3237 = vmatprep.subr.bf16.mxu0 %v4944_v48  ;;  %3401 = vmatprep.subr.bf16.mxu1 %v4947_v50  ;;  %v5023_v48 = vld [vmem:[%s6729_s7 + $0x5c8] ss:$16 sps:$4 sm:$0xff]   ;;  %v5028_v50 = vld [vmem:[%s6729_s7 + $0x5e4] ss:$16 sps:$4 sm:$0xff]  }
 0x353   : > { %3238 = vmatpush1.bf16.msra.mxu0 %v4942_v20  ;;  %v5031_v20 = vld [vmem:[%s6729_s7 + $0x5ec] ss:$16 sps:$4 sm:$0xff]  }
 0x354   : > { %3402 = vmatpush1.bf16.msra.mxu1 %v4945_v42  ;;  %3239 = vmatprep.subr.bf16.mxu0 %v4950_v43  ;;  %v5026_v42 = vld [vmem:[%s6729_s7 + $0x5e0] ss:$16 sps:$4 sm:$0xff]   ;;  %v5029_v43 = vld [vmem:[%s6729_s7 + $0x5e8] ss:$16 sps:$4 sm:$0xff]  }
 0x355   : > { %3403 = vmatprep.subr.bf16.mxu1 %v4953_v44  ;;  %v1566_v44 = vrot.slane %v5853_v22, %v756_v46 }
 0x357   : > { %3240 = vmatpush1.bf16.msra.mxu0 %v4948_v45  ;;  %v5034_v45 = vld [vmem:[%s6729_s7 + $0x604] ss:$16 sps:$4 sm:$0xff]   ;;  %v1591_v46 = vpack.c.bf16 %v1566_v44, %v1566_v44  ;;  %v5115_v44 = vld [vmem:[%s6729_s7 + $0x7ac] ss:$16 sps:$4 sm:$0xff]  }
 0x358   : > { %3404 = vmatpush1.bf16.msra.mxu1 %v4951_v55  ;;  %3241 = vmatprep.subr.bf16.mxu0 %v4956_v56  ;;  %v5037_v55 = vld [vmem:[%s6729_s7 + $0x60c] ss:$16 sps:$4 sm:$0xff]   ;;  %v1578_v56 = vrot.slane %v5853_v22, %v768_v9 }
 0x359   : > { %3405 = vmatprep.subr.bf16.mxu1 %v4959_v57  ;;  %v5032_v57 = vld [vmem:[%s6729_s7 + $0x600] ss:$16 sps:$4 sm:$0xff]   ;;  %v5043_v9 = vld [vmem:[%s6729_s7 + $0x62c] ss:$16 sps:$4 sm:$0xff]  }
 0x35b   : > { %3242 = vmatpush1.bf16.msra.mxu0 %v4954_v58  ;;  %v5035_v58 = vld [vmem:[%s6729_s7 + $0x608] ss:$16 sps:$4 sm:$0xff]  }
 0x35c   : > { %3406 = vmatpush1.bf16.msra.mxu1 %v4957_v59  ;;  %3243 = vmatprep.subr.bf16.mxu0 %v4962_v60  ;;  %v5040_v59 = vld [vmem:[%s6729_s7 + $0x624] ss:$16 sps:$4 sm:$0xff]   ;;  %v1594_v60 = vpack.c.bf16 %v1578_v56, %v1578_v56 }
 0x35d   : > { %3407 = vmatprep.subr.bf16.mxu1 %v4965_v51  ;;  %v5038_v51 = vld [vmem:[%s6729_s7 + $0x620] ss:$16 sps:$4 sm:$0xff]   ;;  %v5118_v56 = vld [vmem:[%s6729_s7 + $0x7c4] ss:$16 sps:$4 sm:$0xff]  }
 0x35f   : > { %3244 = vmatpush1.bf16.msra.mxu0 %v4960_v52  ;;  %v5041_v52 = vld [vmem:[%s6729_s7 + $0x628] ss:$16 sps:$4 sm:$0xff]  }
 0x360   : > { %3408 = vmatpush1.bf16.msra.mxu1 %v4963_v61  ;;  %3245 = vmatprep.subr.bf16.mxu0 %v4968_v62  ;;  %v5046_v61 = vld [vmem:[%s6729_s7 + $0x644] ss:$16 sps:$4 sm:$0xff]   ;;  %v5049_v62 = vld [vmem:[%s6729_s7 + $0x64c] ss:$16 sps:$4 sm:$0xff]  }
 0x361   : > { %3409 = vmatprep.subr.bf16.mxu1 %v4971_v63  ;;  %v5044_v63 = vld [vmem:[%s6729_s7 + $0x640] ss:$16 sps:$4 sm:$0xff]  }
 0x363   : > { %3246 = vmatpush1.bf16.msra.mxu0 %v4966_v0  ;;  %v5047_v0 = vld [vmem:[%s6729_s7 + $0x648] ss:$16 sps:$4 sm:$0xff]  }
 0x364   : > { %3410 = vmatpush1.bf16.msra.mxu1 %v4969_v53  ;;  %3247 = vmatprep.subr.bf16.mxu0 %v4974_v54  ;;  %v5052_v53 = vld [vmem:[%s6729_s7 + $0x664] ss:$16 sps:$4 sm:$0xff]   ;;  %v5055_v54 = vld [vmem:[%s6729_s7 + $0x66c] ss:$16 sps:$4 sm:$0xff]  }
 0x365   : > { %3411 = vmatprep.subr.bf16.mxu1 %v4977_v1  ;;  %v5050_v1 = vld [vmem:[%s6729_s7 + $0x660] ss:$16 sps:$4 sm:$0xff]  }
 0x367   : > { %3248 = vmatpush1.bf16.msra.mxu0 %v4972_v2  ;;  %v5053_v2 = vld [vmem:[%s6729_s7 + $0x668] ss:$16 sps:$4 sm:$0xff]  }
 0x368   : > { %3412 = vmatpush1.bf16.msra.mxu1 %v4975_v3  ;;  %3249 = vmatprep.subr.bf16.mxu0 %v4980_v4  ;;  %v5058_v3 = vld [vmem:[%s6729_s7 + $0x684] ss:$16 sps:$4 sm:$0xff]   ;;  %v5061_v4 = vld [vmem:[%s6729_s7 + $0x68c] ss:$16 sps:$4 sm:$0xff]  }
 0x369   : > { %3413 = vmatprep.subr.bf16.mxu1 %v4983_v5  ;;  %v5056_v5 = vld [vmem:[%s6729_s7 + $0x680] ss:$16 sps:$4 sm:$0xff]  }
 0x36b   : > { %3250 = vmatpush1.bf16.msra.mxu0 %v4978_v6  ;;  %v5059_v6 = vld [vmem:[%s6729_s7 + $0x688] ss:$16 sps:$4 sm:$0xff]  }
 0x36c   : > { %3414 = vmatpush1.bf16.msra.mxu1 %v4981_v8  ;;  %3251 = vmatprep.subr.bf16.mxu0 %v4986_v10  ;;  %v5064_v8 = vld [vmem:[%s6729_s7 + $0x6a4] ss:$16 sps:$4 sm:$0xff]   ;;  %v5067_v10 = vld [vmem:[%s6729_s7 + $0x6ac] ss:$16 sps:$4 sm:$0xff]  }
 0x36d   : > { %3415 = vmatprep.subr.bf16.mxu1 %v4989_v13  ;;  %v5062_v13 = vld [vmem:[%s6729_s7 + $0x6a0] ss:$16 sps:$4 sm:$0xff]  }
 0x36f   : > { %3252 = vmatpush1.bf16.msra.mxu0 %v4984_v15  ;;  %v5065_v15 = vld [vmem:[%s6729_s7 + $0x6a8] ss:$16 sps:$4 sm:$0xff]  }
 0x370   : > { %3416 = vmatpush1.bf16.msra.mxu1 %v4987_v17  ;;  %3253 = vmatprep.subr.bf16.mxu0 %v4992_v19  ;;  %v5070_v17 = vld [vmem:[%s6729_s7 + $0x6c4] ss:$16 sps:$4 sm:$0xff]   ;;  %v5073_v19 = vld [vmem:[%s6729_s7 + $0x6cc] ss:$16 sps:$4 sm:$0xff]  }
 0x371   : > { %3417 = vmatprep.subr.bf16.mxu1 %v4995_v23  ;;  %v5068_v23 = vld [vmem:[%s6729_s7 + $0x6c0] ss:$16 sps:$4 sm:$0xff]  }
 0x373   : > { %3254 = vmatpush1.bf16.msra.mxu0 %v4990_v24  ;;  %v5071_v24 = vld [vmem:[%s6729_s7 + $0x6c8] ss:$16 sps:$4 sm:$0xff]  }
 0x374   : > { %3418 = vmatpush1.bf16.msra.mxu1 %v4993_v25  ;;  %3255 = vmatprep.subr.bf16.mxu0 %v4998_v26  ;;  %v5076_v25 = vld [vmem:[%s6729_s7 + $0x6e4] ss:$16 sps:$4 sm:$0xff]   ;;  %v5079_v26 = vld [vmem:[%s6729_s7 + $0x6ec] ss:$16 sps:$4 sm:$0xff]  }
 0x375   : > { %3419 = vmatprep.subr.bf16.mxu1 %v5001_v16  ;;  %v5074_v16 = vld [vmem:[%s6729_s7 + $0x6e0] ss:$16 sps:$4 sm:$0xff]  }
 0x377   : > { %3256 = vmatpush1.bf16.msra.mxu0 %v4996_v18  ;;  %v5077_v18 = vld [vmem:[%s6729_s7 + $0x6e8] ss:$16 sps:$4 sm:$0xff]  }
 0x378   : > { %3420 = vmatpush1.bf16.msra.mxu1 %v4999_v21  ;;  %3257 = vmatprep.subr.bf16.mxu0 %v5004_v12  ;;  %v5082_v21 = vld [vmem:[%s6729_s7 + $0x704] ss:$16 sps:$4 sm:$0xff]   ;;  %v5085_v12 = vld [vmem:[%s6729_s7 + $0x70c] ss:$16 sps:$4 sm:$0xff]  }
 0x379   : > { %3421 = vmatprep.subr.bf16.mxu1 %v5007_v27  ;;  %v5080_v27 = vld [vmem:[%s6729_s7 + $0x700] ss:$16 sps:$4 sm:$0xff]  }
 0x37b   : > { %3258 = vmatpush1.bf16.msra.mxu0 %v5002_v28  ;;  %v5083_v28 = vld [vmem:[%s6729_s7 + $0x708] ss:$16 sps:$4 sm:$0xff]  }
 0x37c   : > { %3422 = vmatpush1.bf16.msra.mxu1 %v5005_v29  ;;  %3259 = vmatprep.subr.bf16.mxu0 %v5010_v31  ;;  %v5088_v29 = vld [vmem:[%s6729_s7 + $0x724] ss:$16 sps:$4 sm:$0xff]   ;;  %v5091_v31 = vld [vmem:[%s6729_s7 + $0x72c] ss:$16 sps:$4 sm:$0xff]  }
 0x37d   : > { %3423 = vmatprep.subr.bf16.mxu1 %v5013_v32  ;;  %v5086_v32 = vld [vmem:[%s6729_s7 + $0x720] ss:$16 sps:$4 sm:$0xff]  }
 0x37f   : > { %3260 = vmatpush1.bf16.msra.mxu0 %v5008_v33  ;;  %v5089_v33 = vld [vmem:[%s6729_s7 + $0x728] ss:$16 sps:$4 sm:$0xff]  }
 0x380   : > { %3424 = vmatpush1.bf16.msra.mxu1 %v5011_v34  ;;  %3261 = vmatprep.subr.bf16.mxu0 %v5016_v35  ;;  %v5094_v34 = vld [vmem:[%s6729_s7 + $0x744] ss:$16 sps:$4 sm:$0xff]   ;;  %v5097_v35 = vld [vmem:[%s6729_s7 + $0x74c] ss:$16 sps:$4 sm:$0xff]  }
 0x381   : > { %3425 = vmatprep.subr.bf16.mxu1 %v5019_v36  ;;  %v5092_v36 = vld [vmem:[%s6729_s7 + $0x740] ss:$16 sps:$4 sm:$0xff]  }
 0x383   : > { %3262 = vmatpush1.bf16.msra.mxu0 %v5014_v37  ;;  %v5095_v37 = vld [vmem:[%s6729_s7 + $0x748] ss:$16 sps:$4 sm:$0xff]  }
 0x384   : > { %3426 = vmatpush1.bf16.msra.mxu1 %v5017_v38  ;;  %3263 = vmatprep.subr.bf16.mxu0 %v5022_v39  ;;  %v5100_v38 = vld [vmem:[%s6729_s7 + $0x764] ss:$16 sps:$4 sm:$0xff]   ;;  %v5103_v39 = vld [vmem:[%s6729_s7 + $0x76c] ss:$16 sps:$4 sm:$0xff]  }
 0x385   : > { %3427 = vmatprep.subr.bf16.mxu1 %v5025_v40  ;;  %v5098_v40 = vld [vmem:[%s6729_s7 + $0x760] ss:$16 sps:$4 sm:$0xff]  }
 0x387   : > { %3264 = vmatpush1.bf16.msra.mxu0 %v5020_v41  ;;  %v5101_v41 = vld [vmem:[%s6729_s7 + $0x768] ss:$16 sps:$4 sm:$0xff]  }
 0x388   : > { %3428 = vmatpush1.bf16.msra.mxu1 %v5023_v48  ;;  %3265 = vmatprep.subr.bf16.mxu0 %v5028_v50  ;;  %v5106_v48 = vld [vmem:[%s6729_s7 + $0x784] ss:$16 sps:$4 sm:$0xff]   ;;  %v5109_v50 = vld [vmem:[%s6729_s7 + $0x78c] ss:$16 sps:$4 sm:$0xff]  }
 0x389   : > { %3429 = vmatprep.subr.bf16.mxu1 %v5031_v20  ;;  %v5104_v20 = vld [vmem:[%s6729_s7 + $0x780] ss:$16 sps:$4 sm:$0xff]  }
 0x38b   : > { %3266 = vmatpush1.bf16.msra.mxu0 %v5026_v42  ;;  %v5107_v42 = vld [vmem:[%s6729_s7 + $0x788] ss:$16 sps:$4 sm:$0xff]  }
 0x38c   : > { %3430 = vmatpush1.bf16.msra.mxu1 %v5029_v43  ;;  %3276 = vmatprep.subr.bf16.mxu0 %v5034_v45  ;;  %v5112_v43 = vld [vmem:[%s6729_s7 + $0x7a4] ss:$16 sps:$4 sm:$0xff]   ;;  %v5110_v45 = vld [vmem:[%s6729_s7 + $0x7a0] ss:$16 sps:$4 sm:$0xff]  }
 0x38d   : > { %3440 = vmatprep.subr.bf16.mxu1 %v5037_v55  ;;  %v5113_v55 = vld [vmem:[%s6729_s7 + $0x7a8] ss:$16 sps:$4 sm:$0xff]  }
 0x38e   : > { %3268 = vmatmul.mubr.bf16.vlgmr.msra.gmra.mrb[8].mxu0 %v1591_v46 }
 0x38f   : > { %3432 = vmatmul.mubr.bf16.vlgmr.msra.gmra.mrb[32].mxu1 %v1591_v46  ;;  %3277 = vmatpush1.bf16.msra.mxu0 %v5032_v57  ;;  %v5121_v57 = vld [vmem:[%s6729_s7 + $0x7cc] ss:$16 sps:$4 sm:$0xff]   ;;  %v5116_v46 = vld [vmem:[%s6729_s7 + $0x7c0] ss:$16 sps:$4 sm:$0xff]  }
 0x390   : > { %3308 = vmatprep.mubr.bf16.mxu0 %v1594_v60  ;;  %3441 = vmatpush1.bf16.msra.mxu1 %v5035_v58  ;;  %v5119_v58 = vld [vmem:[%s6729_s7 + $0x7c8] ss:$16 sps:$4 sm:$0xff]  }
 0x391   : > { %3472 = vmatprep.mubr.bf16.mxu1 %v1594_v60  ;;  %3278 = vmatprep.subr.bf16.mxu0 %v5040_v59  ;;  %v5124_v59 = vld [vmem:[%s6729_s7 + $0x7e4] ss:$16 sps:$4 sm:$0xff]   ;;  %v5127_v60 = vld [vmem:[%s6729_s7 + $0x7ec] ss:$16 sps:$4 sm:$0xff]  }
 0x392   : > { %3442 = vmatprep.subr.bf16.mxu1 %v5043_v9  ;;  %v5122_v9 = vld [vmem:[%s6729_s7 + $0x7e0] ss:$16 sps:$4 sm:$0xff]  }
 0x393   : > { %3279 = vmatpush1.bf16.msra.mxu0 %v5038_v51  ;;  %v5125_v51 = vld [vmem:[%s6729_s7 + $0x7e8] ss:$16 sps:$4 sm:$0xff]  }
 0x394   : > { %3443 = vmatpush1.bf16.msra.mxu1 %v5041_v52  ;;  %3280 = vmatprep.subr.bf16.mxu0 %v5046_v61  ;;  %v1574_v52 = vrot.slane %v5853_v22, %v764_v7  ;;  %v5130_v61 = vld [vmem:[%s6731_s9 + $0x4] ss:$8 sps:$4 sm:$0xff]   ;;  %v5134_v22 = vld [vmem:[%s6731_s9 + $0x20] ss:$8 sps:$4 sm:$0xff]  }
 0x395   : > { %3444 = vmatprep.subr.bf16.mxu1 %v5049_v62  ;;  %v5128_v62 = vld [vmem:[%s6731_s9] ss:$8 sps:$4 sm:$0xff]   ;;  %v5136_v7 = vld [vmem:[%s6731_s9 + $0x24] ss:$8 sps:$4 sm:$0xff]  }
 0x397   : > { %3281 = vmatpush1.bf16.msra.mxu0 %v5044_v63  ;;  %v1593_v63 = vpack.c.bf16 %v1574_v52, %v1574_v52 }
 0x398   : > { %3445 = vmatpush1.bf16.msra.mxu1 %v5047_v0  ;;  %3282 = vmatprep.subr.bf16.mxu0 %v5052_v53  ;;  %v5133_v0 = vld [vmem:[%s6731_s9 + $0x14] ss:$8 sps:$4 sm:$0xff]  }
 0x399   : > { %3446 = vmatprep.subr.bf16.mxu1 %v5055_v54  ;;  %v5139_v53 = vld [vmem:[%s6731_s9 + $0x34] ss:$8 sps:$4 sm:$0xff]   ;;  %v5137_v54 = vld [vmem:[%s6731_s9 + $0x30] ss:$8 sps:$4 sm:$0xff]  }
 0x39b   : > { %3283 = vmatpush1.bf16.msra.mxu0 %v5050_v1  ;;  %v5142_v1 = vld [vmem:[%s6731_s9 + $0x44] ss:$8 sps:$4 sm:$0xff]  }
 0x39c   : > { %3447 = vmatpush1.bf16.msra.mxu1 %v5053_v2  ;;  %3284 = vmatprep.subr.bf16.mxu0 %v5058_v3  ;;  %v5140_v2 = vld [vmem:[%s6731_s9 + $0x40] ss:$8 sps:$4 sm:$0xff]   ;;  %v5145_v3 = vld [vmem:[%s6731_s9 + $0x54] ss:$8 sps:$4 sm:$0xff]  }
 0x39d   : > { %3448 = vmatprep.subr.bf16.mxu1 %v5061_v4  ;;  %v5143_v4 = vld [vmem:[%s6731_s9 + $0x50] ss:$8 sps:$4 sm:$0xff]  }
 0x39f   : > { %3285 = vmatpush1.bf16.msra.mxu0 %v5056_v5  ;;  %v5148_v5 = vld [vmem:[%s6731_s9 + $0x64] ss:$8 sps:$4 sm:$0xff]  }
 0x3a0   : > { %3449 = vmatpush1.bf16.msra.mxu1 %v5059_v6  ;;  %3286 = vmatprep.subr.bf16.mxu0 %v5064_v8  ;;  %v5146_v6 = vld [vmem:[%s6731_s9 + $0x60] ss:$8 sps:$4 sm:$0xff]   ;;  %v5151_v8 = vld [vmem:[%s6731_s9 + $0x74] ss:$8 sps:$4 sm:$0xff]  }
 0x3a1   : > { %3450 = vmatprep.subr.bf16.mxu1 %v5067_v10  ;;  %v5149_v10 = vld [vmem:[%s6731_s9 + $0x70] ss:$8 sps:$4 sm:$0xff]  }
 0x3a3   : > { %3287 = vmatpush1.bf16.msra.mxu0 %v5062_v13  ;;  %v5154_v13 = vld [vmem:[%s6731_s9 + $0x84] ss:$8 sps:$4 sm:$0xff]  }
 0x3a4   : > { %3451 = vmatpush1.bf16.msra.mxu1 %v5065_v15  ;;  %3288 = vmatprep.subr.bf16.mxu0 %v5070_v17  ;;  %v5152_v15 = vld [vmem:[%s6731_s9 + $0x80] ss:$8 sps:$4 sm:$0xff]   ;;  %v5157_v17 = vld [vmem:[%s6731_s9 + $0x94] ss:$8 sps:$4 sm:$0xff]  }
 0x3a5   : > { %3452 = vmatprep.subr.bf16.mxu1 %v5073_v19  ;;  %v5155_v19 = vld [vmem:[%s6731_s9 + $0x90] ss:$8 sps:$4 sm:$0xff]  }
 0x3a7   : > { %3289 = vmatpush1.bf16.msra.mxu0 %v5068_v23  ;;  %v5160_v23 = vld [vmem:[%s6731_s9 + $0xa4] ss:$8 sps:$4 sm:$0xff]  }
 0x3a8   : > { %3453 = vmatpush1.bf16.msra.mxu1 %v5071_v24  ;;  %3290 = vmatprep.subr.bf16.mxu0 %v5076_v25  ;;  %v5158_v24 = vld [vmem:[%s6731_s9 + $0xa0] ss:$8 sps:$4 sm:$0xff]   ;;  %v5163_v25 = vld [vmem:[%s6731_s9 + $0xb4] ss:$8 sps:$4 sm:$0xff]  }
 0x3a9   : > { %3454 = vmatprep.subr.bf16.mxu1 %v5079_v26  ;;  %v5161_v26 = vld [vmem:[%s6731_s9 + $0xb0] ss:$8 sps:$4 sm:$0xff]  }
 0x3ab   : > { %3291 = vmatpush1.bf16.msra.mxu0 %v5074_v16  ;;  %v5166_v16 = vld [vmem:[%s6731_s9 + $0xc4] ss:$8 sps:$4 sm:$0xff]  }
 0x3ac   : > { %3455 = vmatpush1.bf16.msra.mxu1 %v5077_v18  ;;  %3292 = vmatprep.subr.bf16.mxu0 %v5082_v21  ;;  %v5164_v18 = vld [vmem:[%s6731_s9 + $0xc0] ss:$8 sps:$4 sm:$0xff]   ;;  %v5169_v21 = vld [vmem:[%s6731_s9 + $0xd4] ss:$8 sps:$4 sm:$0xff]  }
 0x3ad   : > { %3456 = vmatprep.subr.bf16.mxu1 %v5085_v12  ;;  %v5167_v12 = vld [vmem:[%s6731_s9 + $0xd0] ss:$8 sps:$4 sm:$0xff]  }
 0x3af   : > { %3293 = vmatpush1.bf16.msra.mxu0 %v5080_v27  ;;  %v5172_v27 = vld [vmem:[%s6731_s9 + $0xe4] ss:$8 sps:$4 sm:$0xff]  }
 0x3b0   : > { %3457 = vmatpush1.bf16.msra.mxu1 %v5083_v28  ;;  %3294 = vmatprep.subr.bf16.mxu0 %v5088_v29  ;;  %v5170_v28 = vld [vmem:[%s6731_s9 + $0xe0] ss:$8 sps:$4 sm:$0xff]   ;;  %v5175_v29 = vld [vmem:[%s6731_s9 + $0xf4] ss:$8 sps:$4 sm:$0xff]  }
 0x3b1   : > { %3458 = vmatprep.subr.bf16.mxu1 %v5091_v31  ;;  %v5173_v31 = vld [vmem:[%s6731_s9 + $0xf0] ss:$8 sps:$4 sm:$0xff]  }
 0x3b3   : > { %3295 = vmatpush1.bf16.msra.mxu0 %v5086_v32  ;;  %v5178_v32 = vld [vmem:[%s6731_s9 + $0x104] ss:$8 sps:$4 sm:$0xff]  }
 0x3b4   : > { %3459 = vmatpush1.bf16.msra.mxu1 %v5089_v33  ;;  %3296 = vmatprep.subr.bf16.mxu0 %v5094_v34  ;;  %v5224_v33 = vld [vmem:[%s6733_s11 + $0x40] sm:$0xff]  }
 0x3b5   : > { %3460 = vmatprep.subr.bf16.mxu1 %v5097_v35  ;;  %v5225_v34 = vld [vmem:[%s6733_s11] sm:$0xff]   ;;  %v5226_v35 = vld [vmem:[%s6733_s11 + $0x48] sm:$0xff]  }
 0x3b7   : > { %3297 = vmatpush1.bf16.msra.mxu0 %v5092_v36  ;;  %v5227_v36 = vld [vmem:[%s6733_s11 + $0x8] sm:$0xff]  }
 0x3b8   : > { %3461 = vmatpush1.bf16.msra.mxu1 %v5095_v37  ;;  %3298 = vmatprep.subr.bf16.mxu0 %v5100_v38  ;;  %v5228_v37 = vld [vmem:[%s6733_s11 + $0x50] sm:$0xff]  }
 0x3b9   : > { %3462 = vmatprep.subr.bf16.mxu1 %v5103_v39  ;;  %v5229_v38 = vld [vmem:[%s6733_s11 + $0x10] sm:$0xff]   ;;  %v5230_v39 = vld [vmem:[%s6733_s11 + $0x58] sm:$0xff]  }
 0x3bb   : > { %3299 = vmatpush1.bf16.msra.mxu0 %v5098_v40  ;;  %v5231_v40 = vld [vmem:[%s6733_s11 + $0x18] sm:$0xff]  }
 0x3bc   : > { %3463 = vmatpush1.bf16.msra.mxu1 %v5101_v41  ;;  %3300 = vmatprep.subr.bf16.mxu0 %v5106_v48  ;;  %v5232_v41 = vld [vmem:[%s6733_s11 + $0x60] sm:$0xff]  }
 0x3bd   : > { %3464 = vmatprep.subr.bf16.mxu1 %v5109_v50  ;;  %v5233_v48 = vld [vmem:[%s6733_s11 + $0x20] sm:$0xff]   ;;  %v5234_v50 = vld [vmem:[%s6733_s11 + $0x68] sm:$0xff]  }
 0x3bf   : > { %3301 = vmatpush1.bf16.msra.mxu0 %v5104_v20  ;;  %v5235_v20 = vld [vmem:[%s6733_s11 + $0x28] sm:$0xff]  }
 0x3c0   : > { %3465 = vmatpush1.bf16.msra.mxu1 %v5107_v42  ;;  %3302 = vmatprep.subr.bf16.mxu0 %v5112_v43  ;;  %v6583_v42 = vld [vmem:[%s6730_s8] sm:$0xf] }
 0x3c1   : > { %3466 = vmatprep.subr.bf16.mxu1 %v5115_v44  ;;  %v3136_v43 = vrot.slane %v6583_v42, %v5803_v30  ;;  %v3140_v44 = vrot.slane %v6583_v42, %v5812_v49 }
 0x3c3   : > { %3303 = vmatpush1.bf16.msra.mxu0 %v5110_v45  ;;  %v3148_v45 = vrot.slane %v6583_v42, %v5829_v14  ;;  %v5176_v14 = vld [vmem:[%s6731_s9 + $0x100] ss:$8 sps:$4 sm:$0xff]  }
 0x3c4   : > { %3467 = vmatpush1.bf16.msra.mxu1 %v5113_v55  ;;  %3304 = vmatprep.subr.bf16.mxu0 %v5118_v56 }
 0x3c5   : > { %3468 = vmatprep.subr.bf16.mxu1 %v5121_v57 }
 0x3c7   : > { %3305 = vmatpush1.bf16.msra.mxu0 %v5116_v46 }
 0x3c8   : > { %3469 = vmatpush1.bf16.msra.mxu1 %v5119_v58  ;;  %3306 = vmatprep.subr.bf16.mxu0 %v5124_v59 }
 0x3c9   : > { %3470 = vmatprep.subr.bf16.mxu1 %v5127_v60 }
 0x3cb   : > { %3307 = vmatpush1.bf16.msra.mxu0 %v5122_v9 }
 0x3cc   : > { %3471 = vmatpush1.bf16.msra.mxu1 %v5125_v51  ;;  %3885 = vmatprep.subr.bf16.mxu0 %v5130_v61 }
 0x3cd   : > { %4637 = vmatprep.subr.bf16.mxu1 %v5224_v33  ;;  %v5220_v33 = vld [vmem:[%s6731_s9 + $0x1e4] ss:$8 sps:$4 sm:$0xff]  }
 0x3ce   : > { %3309 = vmatmul.mubr.bf16.vlgmr.msra.gmra.mrb[8].mxu0 %v1593_v63 }
 0x3cf   : > { %3473 = vmatmul.mubr.bf16.vlgmr.msra.gmra.mrb[32].mxu1 %v1593_v63  ;;  %3886 = vmatpush1.bf16.msra.mxu0 %v5128_v62 }
 0x3d0   : > { %3887 = vmatprep.subr.bf16.mxu0 %v5133_v0  ;;  %4638 = vmatpush3.bf16.msra.mxu1 %v5225_v34  ;;  %v5218_v34 = vld [vmem:[%s6731_s9 + $0x1e0] ss:$8 sps:$4 sm:$0xff]  }
 0x3d1   : > { %4639 = vmatprep.subr.bf16.mxu1 %v5226_v35 }
 0x3d3   : > { %3888 = vmatpush1.bf16.msra.mxu0 %v5131_v47 }
 0x3d4   : > { %3889 = vmatprep.subr.bf16.mxu0 %v5136_v7  ;;  %4640 = vmatpush3.bf16.msra.mxu1 %v5227_v36  ;;  %v5223_v36 = vld [vmem:[%s6731_s9 + $0x1f4] ss:$8 sps:$4 sm:$0xff]  }
 0x3d5   : > { %4641 = vmatprep.subr.bf16.mxu1 %v5228_v37 }
 0x3d7   : > { %3890 = vmatpush1.bf16.msra.mxu0 %v5134_v22  ;;  %v5181_v22 = vld [vmem:[%s6731_s9 + $0x114] ss:$8 sps:$4 sm:$0xff]  }
 0x3d8   : > { %3891 = vmatprep.subr.bf16.mxu0 %v5139_v53  ;;  %4642 = vmatpush3.bf16.msra.mxu1 %v5229_v38 }
 0x3d9   : > { %4643 = vmatprep.subr.bf16.mxu1 %v5230_v39  ;;  %v5236_v39 = vld [vmem:[%s6733_s11 + $0x70] sm:$0xff]  }
 0x3db   : > { %3892 = vmatpush1.bf16.msra.mxu0 %v5137_v54  ;;  %v5179_v54 = vld [vmem:[%s6731_s9 + $0x110] ss:$8 sps:$4 sm:$0xff]  }
 0x3dc   : > { %3893 = vmatprep.subr.bf16.mxu0 %v5142_v1  ;;  %4644 = vmatpush3.bf16.msra.mxu1 %v5231_v40  ;;  %v5184_v1 = vld [vmem:[%s6731_s9 + $0x124] ss:$8 sps:$4 sm:$0xff]   ;;  %v5237_v40 = vld [vmem:[%s6733_s11 + $0x30] sm:$0xff]  }
 0x3dd   : > { %4645 = vmatprep.subr.bf16.mxu1 %v5232_v41  ;;  %v5238_v41 = vld [vmem:[%s6733_s11 + $0x78] sm:$0xff]  }
 0x3df   : > { %3894 = vmatpush1.bf16.msra.mxu0 %v5140_v2  ;;  %v5182_v2 = vld [vmem:[%s6731_s9 + $0x120] ss:$8 sps:$4 sm:$0xff]  }
 0x3e0   : > { %3895 = vmatprep.subr.bf16.mxu0 %v5145_v3  ;;  %4646 = vmatpush3.bf16.msra.mxu1 %v5233_v48  ;;  %v5187_v3 = vld [vmem:[%s6731_s9 + $0x134] ss:$8 sps:$4 sm:$0xff]  }
 0x3e1   : > { %4647 = vmatprep.subr.bf16.mxu1 %v5234_v50  ;;  %v5239_v48 = vld [vmem:[%s6733_s11 + $0x38] sm:$0xff]   ;;  %v3553_v50 = vld [vmem:[%s6732_s10] sm:$0x3] }
 0x3e3   : > { %3896 = vmatpush1.bf16.msra.mxu0 %v5143_v4  ;;  %v5185_v4 = vld [vmem:[%s6731_s9 + $0x130] ss:$8 sps:$4 sm:$0xff]  }
 0x3e4   : > { %3897 = vmatprep.subr.bf16.mxu0 %v5148_v5  ;;  %4648 = vmatpush3.bf16.msra.mxu1 %v5235_v20  ;;  %v5190_v5 = vld [vmem:[%s6731_s9 + $0x144] ss:$8 sps:$4 sm:$0xff]   ;;  %v3878_v20 = vrot.slane %v3553_v50, %v5803_v30  ;;  %v4003_v30 = vld [vmem:[%s6734_s12] sm:$0x1] }
 0x3e5   : > { %4649 = vmatprep.subr.bf16.mxu1 %v5236_v39 }
 0x3e7   : > { %3898 = vmatpush1.bf16.msra.mxu0 %v5146_v6  ;;  %v5188_v6 = vld [vmem:[%s6731_s9 + $0x140] ss:$8 sps:$4 sm:$0xff]  }
 0x3e8   : > { %3899 = vmatprep.subr.bf16.mxu0 %v5151_v8  ;;  %v5193_v8 = vld [vmem:[%s6731_s9 + $0x154] ss:$8 sps:$4 sm:$0xff]   ;;  %4650 = vmatpush3.bf16.msra.mxu1 %v5237_v40 }
 0x3e9   : > { %4651 = vmatprep.subr.bf16.mxu1 %v5238_v41 }
 0x3eb   : > { %3900 = vmatpush1.bf16.msra.mxu0 %v5149_v10  ;;  %v5191_v10 = vld [vmem:[%s6731_s9 + $0x150] ss:$8 sps:$4 sm:$0xff]  }
 0x3ec   : > { %3901 = vmatprep.subr.bf16.mxu0 %v5154_v13  ;;  %v5196_v13 = vld [vmem:[%s6731_s9 + $0x164] ss:$8 sps:$4 sm:$0xff]   ;;  %4652 = vmatpush3.bf16.msra.mxu1 %v5239_v48 }
 0x3ef   : > { %3902 = vmatpush1.bf16.msra.mxu0 %v5152_v15  ;;  %v5194_v15 = vld [vmem:[%s6731_s9 + $0x160] ss:$8 sps:$4 sm:$0xff]  }
 0x3f0   : > { %3903 = vmatprep.subr.bf16.mxu0 %v5157_v17  ;;  %v5199_v17 = vld [vmem:[%s6731_s9 + $0x174] ss:$8 sps:$4 sm:$0xff]  }
 0x3f3   : > { %3904 = vmatpush1.bf16.msra.mxu0 %v5155_v19  ;;  %v5197_v19 = vld [vmem:[%s6731_s9 + $0x170] ss:$8 sps:$4 sm:$0xff]  }
 0x3f4   : > { %3905 = vmatprep.subr.bf16.mxu0 %v5160_v23  ;;  %v5202_v23 = vld [vmem:[%s6731_s9 + $0x184] ss:$8 sps:$4 sm:$0xff]  }
 0x3f7   : > { %3906 = vmatpush1.bf16.msra.mxu0 %v5158_v24  ;;  %v5200_v24 = vld [vmem:[%s6731_s9 + $0x180] ss:$8 sps:$4 sm:$0xff]  }
 0x3f8   : > { %3907 = vmatprep.subr.bf16.mxu0 %v5163_v25  ;;  %v5205_v25 = vld [vmem:[%s6731_s9 + $0x194] ss:$8 sps:$4 sm:$0xff]  }
 0x3fb   : > { %3908 = vmatpush1.bf16.msra.mxu0 %v5161_v26  ;;  %v5203_v26 = vld [vmem:[%s6731_s9 + $0x190] ss:$8 sps:$4 sm:$0xff]  }
 0x3fc   : > { %3909 = vmatprep.subr.bf16.mxu0 %v5166_v16  ;;  %v5208_v16 = vld [vmem:[%s6731_s9 + $0x1a4] ss:$8 sps:$4 sm:$0xff]  }
 0x3ff   : > { %3910 = vmatpush1.bf16.msra.mxu0 %v5164_v18  ;;  %v5206_v18 = vld [vmem:[%s6731_s9 + $0x1a0] ss:$8 sps:$4 sm:$0xff]  }
 0x400   : > { %3911 = vmatprep.subr.bf16.mxu0 %v5169_v21  ;;  %v5211_v21 = vld [vmem:[%s6731_s9 + $0x1b4] ss:$8 sps:$4 sm:$0xff]  }
 0x403   : > { %3912 = vmatpush1.bf16.msra.mxu0 %v5167_v12  ;;  %v5209_v12 = vld [vmem:[%s6731_s9 + $0x1b0] ss:$8 sps:$4 sm:$0xff]  }
 0x404   : > { %3913 = vmatprep.subr.bf16.mxu0 %v5172_v27  ;;  %v5214_v27 = vld [vmem:[%s6731_s9 + $0x1c4] ss:$8 sps:$4 sm:$0xff]  }
 0x407   : > { %3914 = vmatpush1.bf16.msra.mxu0 %v5170_v28  ;;  %v5212_v28 = vld [vmem:[%s6731_s9 + $0x1c0] ss:$8 sps:$4 sm:$0xff]  }
 0x408   : > { %3915 = vmatprep.subr.bf16.mxu0 %v5175_v29  ;;  %v5217_v29 = vld [vmem:[%s6731_s9 + $0x1d4] ss:$8 sps:$4 sm:$0xff]  }
 0x40b   : > { %3916 = vmatpush1.bf16.msra.mxu0 %v5173_v31  ;;  %v5215_v31 = vld [vmem:[%s6731_s9 + $0x1d0] ss:$8 sps:$4 sm:$0xff]  }
 0x40c   : > { %3926 = vmatprep.subr.bf16.mxu0 %v5178_v32  ;;  %v3144_v32 = vrot.slane %v6583_v42, %v5826_v11  ;;  %v5221_v11 = vld [vmem:[%s6731_s9 + $0x1f0] ss:$8 sps:$4 sm:$0xff]   ;;  %v3882_v42 = vrot.slane %v3553_v50, %v5812_v49 }
 0x4a1   : > { %v3310_v55 = vpop.f32.mrb[8].mxu0 }
 0x4a2   : > { %v4677_v56 = vadd.f32 %v3310_v55, %v3136_v43  ;;  %v6591_v57 = vpop.f32.mrb[32].mxu1  ;;  %v3312_v46 = vpop.f32.mrb[9].mxu0 }
 0x4a3   : > { %v4678_v58 = vadd.f32 %v3312_v46, %v3140_v44  ;;  %v3476_v59 = vpop.f32.mrb[33].mxu1  ;;  %v3314_v60 = vpop.f32.mrb[10].mxu0  ;;  %v4679_v35 = vadd.f32 %v6591_v57, %v3144_v32 }
 0x4a4   : > { %v3481_v9 = vmax.f32 %v4677_v56, 0.0  ;;  %v4680_v51 = vadd.f32 %v3476_v59, %v3148_v45  ;;  %v3478_v52 = vpop.f32.mrb[34].mxu1  ;;  %v3315_v61 = vpop.f32.mrb[11].mxu0 }
 0x4a5   : > { %v3482_v62 = vmax.f32 %v4678_v58, 0.0  ;;  %v3479_v63 = vpop.f32.mrb[35].mxu1  ;;  %v3483_v37 = vmax.f32 %v4679_v35, 0.0 }
 0x4a6   : > { %v3484_v0 = vmax.f32 %v4680_v51, 0.0  ;;  %v3485_v7 = vpack.c.bf16 %v3481_v9, %v3481_v9 }
 0x4a7   : > { %v3486_v47 = vpack.c.bf16 %v3482_v62, %v3482_v62  ;;  %v3487_v38 = vpack.c.bf16 %v3483_v37, %v3483_v37 }
 0x4a8   : > { %v3488_v53 = vpack.c.bf16 %v3484_v0, %v3484_v0 }
 0x4a9   : > { %3917 = vmatprep.mubr.bf16.mxu0 %v3486_v47 }
 0x4aa   : > { %3918 = vmatmul.mubr.bf16.vlgmr.msra.gmra.mrb[12].mxu0 %v3485_v7 }
 0x4ab   : > { %3927 = vmatpush1.bf16.msra.mxu0 %v5176_v14  ;;  %3958 = vmatprep.mubr.bf16.mxu0 %v3488_v53 }
 0x4ac   : > { %3928 = vmatprep.subr.bf16.mxu0 %v5181_v22 }
 0x4af   : > { %3929 = vmatpush1.bf16.msra.mxu0 %v5179_v54 }
 0x4b0   : > { %3930 = vmatprep.subr.bf16.mxu0 %v5184_v1 }
 0x4b3   : > { %3931 = vmatpush1.bf16.msra.mxu0 %v5182_v2 }
 0x4b4   : > { %3932 = vmatprep.subr.bf16.mxu0 %v5187_v3 }
 0x4b7   : > { %3933 = vmatpush1.bf16.msra.mxu0 %v5185_v4 }
 0x4b8   : > { %3934 = vmatprep.subr.bf16.mxu0 %v5190_v5 }
 0x4bb   : > { %3935 = vmatpush1.bf16.msra.mxu0 %v5188_v6 }
 0x4bc   : > { %3936 = vmatprep.subr.bf16.mxu0 %v5193_v8 }
 0x4bf   : > { %3937 = vmatpush1.bf16.msra.mxu0 %v5191_v10 }
 0x4c0   : > { %3938 = vmatprep.subr.bf16.mxu0 %v5196_v13 }
 0x4c3   : > { %3939 = vmatpush1.bf16.msra.mxu0 %v5194_v15 }
 0x4c4   : > { %3940 = vmatprep.subr.bf16.mxu0 %v5199_v17 }
 0x4c7   : > { %3941 = vmatpush1.bf16.msra.mxu0 %v5197_v19 }
 0x4c8   : > { %3942 = vmatprep.subr.bf16.mxu0 %v5202_v23 }
 0x4cb   : > { %3943 = vmatpush1.bf16.msra.mxu0 %v5200_v24 }
 0x4cc   : > { %3944 = vmatprep.subr.bf16.mxu0 %v5205_v25 }
 0x4cf   : > { %3945 = vmatpush1.bf16.msra.mxu0 %v5203_v26 }
 0x4d0   : > { %3946 = vmatprep.subr.bf16.mxu0 %v5208_v16 }
 0x4d3   : > { %3947 = vmatpush1.bf16.msra.mxu0 %v5206_v18 }
 0x4d4   : > { %3948 = vmatprep.subr.bf16.mxu0 %v5211_v21 }
 0x4d7   : > { %3949 = vmatpush1.bf16.msra.mxu0 %v5209_v12 }
 0x4d8   : > { %3950 = vmatprep.subr.bf16.mxu0 %v5214_v27 }
 0x4db   : > { %3951 = vmatpush1.bf16.msra.mxu0 %v5212_v28 }
 0x4dc   : > { %3952 = vmatprep.subr.bf16.mxu0 %v5217_v29 }
 0x4df   : > { %3953 = vmatpush1.bf16.msra.mxu0 %v5215_v31 }
 0x4e0   : > { %3954 = vmatprep.subr.bf16.mxu0 %v5220_v33 }
 0x4e3   : > { %3955 = vmatpush1.bf16.msra.mxu0 %v5218_v34 }
 0x4e4   : > { %3956 = vmatprep.subr.bf16.mxu0 %v5223_v36 }
 0x4e7   : > { %3957 = vmatpush1.bf16.msra.mxu0 %v5221_v11 }
 0x4ea   : > { %3959 = vmatmul.mubr.bf16.vlgmr.msra.gmra.mrb[12].mxu0 %v3487_v38 }
 0x5bd   : > { %v3960_v43 = vpop.f32.mrb[12].mxu0 }
 0x5be   : > { %v4681_v44 = vadd.f32 %v3960_v43, %v3878_v20  ;;  %v3962_v45 = vpop.f32.mrb[13].mxu0 }
 0x5bf   : > { %v4682_v55 = vadd.f32 %v3962_v45, %v3882_v42  ;;  %v3964_v56 = vpop.f32.mrb[14].mxu0 }
 0x5c0   : > { %v3967_v57 = vmax.f32 %v4681_v44, 0.0  ;;  %v3965_v46 = vpop.f32.mrb[15].mxu0 }
 0x5c1   : > { %v3968_v58 = vmax.f32 %v4682_v55, 0.0 }
 0x5c2   : > { %v3969_v60 = vpack.c.bf16 %v3967_v57, %v3967_v57 }
 0x5c3   : > { %v3970_v59 = vpack.c.bf16 %v3968_v58, %v3968_v58 }
 0x5c5   : > { %4132 = vmatprep.mubr.bf16.mxu1 %v3970_v59 }
 0x5c6   : > { %4133 = vmatmul.mubr.bf16.vlgmr.msra.gmra.mrb[36].mxu1 %v3969_v60 }
 0x699   : > { %v4653_v9 = vpop.f32.mrb[36].mxu1 }
 0x69a   : > { %v4654_v51 = vpop.f32.mrb[37].mxu1 }
 0x69b   : > { %v4655_v49 = vadd.f32 %v4654_v51, %v4653_v9  ;;  %v4656_v52 = vpop.f32.mrb[38].mxu1 }
 0x69c   : > { %v4657_v61 = vpop.f32.mrb[39].mxu1 }
 0x69d   : > { %v4135_v62 = vadd.f32 %v4655_v49, %v4003_v30 }
 0x69f   : > { %4141 = vst.msk [vmem:[%s478_s21] sm:$0x1] %vm4140_vm4, %v4135_v62 }
 0x6a0 PF: > { %s23_s27 = sadd.s32 1, %s5262_s27   ;;  %s6736_s25 = smov %s5258_s26 }
 0x6a1   : > { %p20_p5 = scmp.ge.s32.totalorder %s23_s27, 4   ;;  %s6737_s26 = smov %s6739_s28 }
 0x6a3   :  { %22 = sbr.rel (!%p20_p5) target bundleno = 2 (0x2), region = 114 }

// kernel: _lambda_.5
= control target key start
LH: loop header
LB: loop body
LE: loop exit
PB: predicated region body
PF: predicated region fallthrough
CT: control target
= control target key end

     0   :  { %s1739_s17 = smov 0   ;;  %s1741_s18 = smov 0   ;;  %s1940_s0 = inlined_call_operand.vmem [shape: bf16[2,32,3], index: 0, kind: input, shape index: {}]   ;;  %s1941_s1 = inlined_call_operand.vmem [shape: bf16[2,3,64], index: 1, kind: input, shape index: {}]   ;;  %s1942_s2 = inlined_call_operand.vmem [shape: f32[1,64], index: 2, kind: input, shape index: {}]   ;;  %s1943_s3 = inlined_call_operand.vmem [shape: bf16[64,64], index: 3, kind: input, shape index: {}]   ;;  %s1944_s4 = inlined_call_operand.vmem [shape: f32[1,64], index: 4, kind: input, shape index: {}]   ;;  %s1945_s5 = inlined_call_operand.vmem [shape: bf16[2,64,64], index: 5, kind: input, shape index: {}]   ;;  %s1946_s6 = inlined_call_operand.vmem [shape: f32[1,64], index: 6, kind: input, shape index: {}]   ;;  %s1947_s7 = inlined_call_operand.vmem [shape: bf16[64,128], index: 7, kind: input, shape index: {}]   ;;  %s1948_s8 = inlined_call_operand.vmem [shape: f32[1,128], index: 8, kind: input, shape index: {}]   ;;  %s1949_s9 = inlined_call_operand.vmem [shape: bf16[128,512], index: 9, kind: input, shape index: {}]   ;;  %s1950_s10 = inlined_call_operand.vmem [shape: f32[1,512], index: 10, kind: input, shape index: {}]   ;;  %s1951_s11 = inlined_call_operand.vmem [shape: f32[2,1,1,512], index: 11, kind: output, shape index: {}]  }
   0x1   :  { %s1743_s19 = smov 0  }
   0x2 LB: > { %s40_s20 = sadd.s32 1, %s1670_s18  ;;  %p1431_p0 = scmp.ge.s32.totalorder %s1674_s19, 1  ;;  %s1674_s19 = sphi %s1743_s19, %s21_s19   ;;  %s1670_s18 = sphi %s1741_s18, %s1953_s18   ;;  %s1666_s17 = sphi %s1739_s17, %s1952_s17  }
   0x3   : > { %p42_p1 = scmp.ge.s32.totalorder %s40_s20, 2  ;;  %p388_p2 = scmp.lt.s32.totalorder %s1674_s19, 3 }
   0x5   : > { %s1955_s20 = smov (%p42_p1, %s40_s20), 0  ;;  %p389_p3 = pnand %p1431_p0, %p388_p2 }
   0x6   : > { %p447_p4 = scmp.lt.s32.totalorder (!%p389_p3), %s1666_s17, 1  ;;  %vm504_vm0 = vcmask (!%p389_p3), 1040384   ;;  %vm505_vm1 = vcmask (!%p389_p3), 1041408   ;;  %v1592_v0 = vld [vmem:[%s1943_s3] sm:$0xff] (!%p389_p3)   ;;  %v1676_v1 = vmov (!%p389_p3), 65535   ;;  %v1593_v3 = vld [vmem:[%s1943_s3 + $0x8] sm:$0xff] (!%p389_p3)  }
   0x7   : > { %392 = sbr.rel (%p389_p3) target bundleno = 1161 (0x489), region = 64  ;;  %v506_v2 = vsel (!%p389_p3), %vm504_vm0, 4294967295, %v1676_v1  ;;  %1527 = vmatprep.subr.bf16.mxu1 (!%p389_p3), %v1592_v0  ;;  %vm497_vm2 = vcmask (!%p389_p3), 23552   ;;  %v1594_v9 = vld [vmem:[%s1943_s3 + $0x10] sm:$0xff] (!%p389_p3)   ;;  %v1595_v10 = vld [vmem:[%s1943_s3 + $0x18] sm:$0xff] (!%p389_p3)   ;;  %vm605_vm3 = vcmask (!%p389_p3), 523264  }
   0x8   : > { %v507_v4 = vsel (!%p389_p3), %vm505_vm1, %v506_v2, 0  ;;  %1528 = vmatpush3.bf16.msra.mxu1 (!%p389_p3), %v1592_v0  ;;  %v1438_v13 = vld [vmem:[%s1942_s2] ss:$0 sm:$0xff] (!%p389_p3)  ;;  %v1601_v31 = vld [vmem:[%s1947_s7 + $0x8] sm:$0xff] (!%p389_p3)   ;;  %v1602_v47 = vld [vmem:[%s1947_s7 + $0x10] sm:$0xff] (!%p389_p3)  }
   0x9   : > { %1529 = vmatprep.subr.bf16.mxu1 (!%p389_p3), %v1593_v3  ;;  %v1600_v30 = vld [vmem:[%s1947_s7] sm:$0xff] (!%p389_p3)   ;;  %v1603_v48 = vld [vmem:[%s1947_s7 + $0x18] sm:$0xff] (!%p389_p3)  }
   0xa   : > { %v1443_v32 = vld [vmem:[%s1944_s4] ss:$0 sm:$0xff] (!%p389_p3)  ;;  %v1606_v50 = vld [vmem:[%s1949_s9 + $0x4] ss:$16 sps:$4 sm:$0xff] (!%p389_p3)   ;;  %v1609_v51 = vld [vmem:[%s1949_s9 + $0xc] ss:$16 sps:$4 sm:$0xff] (!%p389_p3)  }
   0xb   : > { %v1604_v49 = vld [vmem:[%s1949_s9] ss:$16 sps:$4 sm:$0xff] (!%p389_p3)   ;;  %v1612_v52 = vld [vmem:[%s1949_s9 + $0x24] ss:$16 sps:$4 sm:$0xff] (!%p389_p3)  }
   0xc   : > { %1530 = vmatpush3.bf16.msra.mxu1 (!%p389_p3), %v1593_v3  ;;  %v1610_v53 = vld [vmem:[%s1949_s9 + $0x20] ss:$16 sps:$4 sm:$0xff] (!%p389_p3)   ;;  %v1618_v54 = vld [vmem:[%s1949_s9 + $0x44] ss:$16 sps:$4 sm:$0xff] (!%p389_p3)  }
   0xd   : > { %1531 = vmatprep.subr.bf16.mxu1 (!%p389_p3), %v1594_v9  ;;  %v1616_v55 = vld [vmem:[%s1949_s9 + $0x40] ss:$16 sps:$4 sm:$0xff] (!%p389_p3)   ;;  %v1624_v56 = vld [vmem:[%s1949_s9 + $0x64] ss:$16 sps:$4 sm:$0xff] (!%p389_p3)  }
   0xe   : > { %s1957_s17 = smov (!%p447_p4, %s1666_s17), 1  ;;  %v1622_v57 = vld [vmem:[%s1949_s9 + $0x60] ss:$16 sps:$4 sm:$0xff]   ;;  %v1630_v58 = vld [vmem:[%s1949_s9 + $0x84] ss:$16 sps:$4 sm:$0xff]  }
   0xf   : > { %s1434_s25 = sshll.u32 %s1957_s17, 1  ;;  %s1499_s26 = sshll.u32 %s1957_s17, 5  ;;  %v1628_v59 = vld [vmem:[%s1949_s9 + $0x80] ss:$16 sps:$4 sm:$0xff]   ;;  %v1636_v60 = vld [vmem:[%s1949_s9 + $0xa4] ss:$16 sps:$4 sm:$0xff]  }
  0x10   : > { %s460_s29 = scalar_lea.vmem %s1941_s1, %s1434_s25  ;;  %s1773_s13 = scalar_lea.vmem %s1945_s5, %s1499_s26  ;;  %1532 = vmatpush3.bf16.msra.mxu1 %v1594_v9  ;;  %v1634_v61 = vld [vmem:[%s1949_s9 + $0xa0] ss:$16 sps:$4 sm:$0xff]  }
  0x11   : > { %v479_v5 = vld [vmem:[%s460_s29] sm:$0x3]  ;;  %s1498_s14 = sshll.u32 %s1957_s17, 4  ;;  %1533 = vmatprep.subr.bf16.mxu1 %v1595_v10  ;;  %v1597_v12 = vld [vmem:[%s1773_s13 + $0x8] sm:$0xff]   ;;  %v1598_v28 = vld [vmem:[%s1773_s13 + $0x10] sm:$0xff]   ;;  %s1437_s15 = sshll.u32 %s1957_s17, 2 }
  0x12   : > { %v509_v6 = vand.u32 %v507_v4, %v479_v5  ;;  %s454_s21 = scalar_lea.vmem %s1940_s0, %s1498_s14  ;;  %v1596_v11 = vld [vmem:[%s1773_s13] sm:$0xff]   ;;  %v1599_v29 = vld [vmem:[%s1773_s13 + $0x18] sm:$0xff]  }
  0x13   : > { %v1590_v7 = vld [vmem:[%s454_s21] sm:$0xff]   ;;  %v1591_v8 = vld [vmem:[%s454_s21 + $0x8] sm:$0xff]   ;;  %s473_s21 = scalar_lea.vmem %s1951_s11, %s1437_s15 }
  0x14   : > { %1521 = vmatprep.subr.bf16.mxu0 %v509_v6  ;;  %1523 = vmatprep.mubr.msk.bf16.mxu0 %vm497_vm2, %v1590_v7  ;;  %v1450_v62 = vld [vmem:[%s1946_s6] ss:$0 sm:$0xff] }
  0x15   : > { %1522 = vmatpush3.bf16.msra.mxu0 %v509_v6  ;;  %1534 = vmatpush3.bf16.msra.mxu1 %v1595_v10 }
  0x16   : > { %1539 = vmatprep.subr.bf16.mxu0 %v1596_v11  ;;  %1551 = vmatprep.subr.bf16.mxu1 %v1600_v30 }
  0x18   : > { %1524 = vmatmul.mubr.msk.bf16.vlgmr.msra.gmra.mrb[0].mxu0 %vm497_vm2, %v1591_v8 }
  0x19   : > { %1540 = vmatpush3.bf16.msra.mxu0 %v1596_v11 }
  0x1a   : > { %1541 = vmatprep.subr.bf16.mxu0 %v1597_v12 }
  0x1d   : > { %1542 = vmatpush3.bf16.msra.mxu0 %v1597_v12 }
  0x1e   : > { %1543 = vmatprep.subr.bf16.mxu0 %v1598_v28 }
  0x21   : > { %1544 = vmatpush3.bf16.msra.mxu0 %v1598_v28  ;;  %v1648_v28 = vld [vmem:[%s1949_s9 + $0xe4] ss:$16 sps:$4 sm:$0xff]  }
  0x22   : > { %1545 = vmatprep.subr.bf16.mxu0 %v1599_v29 }
  0x25   : > { %1546 = vmatpush3.bf16.msra.mxu0 %v1599_v29  ;;  %v1651_v29 = vld [vmem:[%s1949_s9 + $0xec] ss:$16 sps:$4 sm:$0xff]  }
  0x26   : > { %1081 = vmatprep.subr.bf16.mxu0 %v1606_v50 }
  0xeb   : > { %v1525_v14 = vpop.f32.mrb[0].mxu0 }
  0xec   : > { %v554_v15 = vadd.f32 %v1525_v14, %v1438_v13  ;;  %v545_v16 = vpop.f32.mrb[1].mxu0  ;;  %v1615_v14 = vld [vmem:[%s1949_s9 + $0x2c] ss:$16 sps:$4 sm:$0xff]  }
  0xed   : > { %v546_v17 = vadd.f32 %v1438_v13, %v545_v16  ;;  %v1526_v18 = vpop.f32.mrb[2].mxu0  ;;  %v1621_v16 = vld [vmem:[%s1949_s9 + $0x4c] ss:$16 sps:$4 sm:$0xff]  }
  0xee   : > { %v557_v19 = vadd.f32 %v1526_v18, %v1438_v13  ;;  %v548_v20 = vpop.f32.mrb[3].mxu0  ;;  %v562_v22 = vmax.f32 %v554_v15, 0.0  ;;  %v1613_v15 = vld [vmem:[%s1949_s9 + $0x28] ss:$16 sps:$4 sm:$0xff]   ;;  %v1627_v18 = vld [vmem:[%s1949_s9 + $0x6c] ss:$16 sps:$4 sm:$0xff]  }
  0xef   : > { %v549_v21 = vadd.f32 %v1438_v13, %v548_v20  ;;  %v560_v24 = vmax.f32 %v546_v17, 0.0  ;;  %v1607_v13 = vld [vmem:[%s1949_s9 + $0x8] ss:$16 sps:$4 sm:$0xff]   ;;  %v1633_v20 = vld [vmem:[%s1949_s9 + $0x8c] ss:$16 sps:$4 sm:$0xff]  }
  0xf0   : > { %v563_v23 = vmax.f32 %v557_v19, 0.0  ;;  %v1619_v17 = vld [vmem:[%s1949_s9 + $0x48] ss:$16 sps:$4 sm:$0xff]  }
  0xf1   : > { %v561_v25 = vmax.f32 %v549_v21, 0.0  ;;  %v1625_v19 = vld [vmem:[%s1949_s9 + $0x68] ss:$16 sps:$4 sm:$0xff]  }
  0xf2   : > { %v565_v26 = vpack.c.bf16 %v563_v23, %v562_v22  ;;  %v1631_v21 = vld [vmem:[%s1949_s9 + $0x88] ss:$16 sps:$4 sm:$0xff]   ;;  %v1639_v22 = vld [vmem:[%s1949_s9 + $0xac] ss:$16 sps:$4 sm:$0xff]  }
  0xf3   : > { %v564_v27 = vpack.c.bf16 %v561_v25, %v560_v24  ;;  %v1637_v23 = vld [vmem:[%s1949_s9 + $0xa8] ss:$16 sps:$4 sm:$0xff]   ;;  %v1642_v24 = vld [vmem:[%s1949_s9 + $0xc4] ss:$16 sps:$4 sm:$0xff]   ;;  %v1645_v25 = vld [vmem:[%s1949_s9 + $0xcc] ss:$16 sps:$4 sm:$0xff]  }
  0xf5   : > { %1535 = vmatprep.mubr.msk.bf16.mxu1 %vm605_vm3, %v564_v27  ;;  %v1643_v27 = vld [vmem:[%s1949_s9 + $0xc8] ss:$16 sps:$4 sm:$0xff]  }
  0xf6   : > { %1536 = vmatmul.mubr.msk.bf16.vlgmr.msra.gmra.mrb[0].mxu1 %vm605_vm3, %v565_v26  ;;  %v1640_v26 = vld [vmem:[%s1949_s9 + $0xc0] ss:$16 sps:$4 sm:$0xff]  }
  0xf7   : > { %1552 = vmatpush3.bf16.msra.mxu1 %v1600_v30  ;;  %v1646_v30 = vld [vmem:[%s1949_s9 + $0xe0] ss:$16 sps:$4 sm:$0xff]  }
  0xf8   : > { %1553 = vmatprep.subr.bf16.mxu1 %v1601_v31 }
  0xfb   : > { %1554 = vmatpush3.bf16.msra.mxu1 %v1601_v31  ;;  %v1649_v31 = vld [vmem:[%s1949_s9 + $0xe8] ss:$16 sps:$4 sm:$0xff]  }
  0xfc   : > { %1555 = vmatprep.subr.bf16.mxu1 %v1602_v47 }
  0xff   : > { %1556 = vmatpush3.bf16.msra.mxu1 %v1602_v47 }
 0x100   : > { %1557 = vmatprep.subr.bf16.mxu1 %v1603_v48 }
 0x103   : > { %1558 = vmatpush3.bf16.msra.mxu1 %v1603_v48  ;;  %v901_v48 = vlaneseq }
 0x104   : > { %1134 = vmatprep.subr.bf16.mxu1 %v1609_v51 }
 0x105   : > { %vm1274_vm4 = vcmp.lt.s32.totalorder %v901_v48, 512 }
 0x1c9   : > { %v1537_v33 = vpop.f32.mrb[0].mxu1 }
 0x1ca   : > { %v655_v34 = vadd.f32 %v1537_v33, %v1443_v32  ;;  %v646_v35 = vpop.f32.mrb[1].mxu1  ;;  %v1457_v33 = vld [vmem:[%s1948_s8] ss:$0 sm:$0xff] }
 0x1cb   : > { %v647_v36 = vadd.f32 %v1443_v32, %v646_v35  ;;  %v1538_v37 = vpop.f32.mrb[2].mxu1 }
 0x1cc   : > { %v658_v38 = vadd.f32 %v1538_v37, %v1443_v32  ;;  %v649_v39 = vpop.f32.mrb[3].mxu1  ;;  %v663_v41 = vmax.f32 %v655_v34, 0.0 }
 0x1cd   : > { %v650_v40 = vadd.f32 %v1443_v32, %v649_v39  ;;  %v661_v43 = vmax.f32 %v647_v36, 0.0  ;;  %v1677_v32 = vmov 0  }
 0x1ce   : > { %v664_v42 = vmax.f32 %v658_v38, 0.0 }
 0x1cf   : > { %v662_v44 = vmax.f32 %v650_v40, 0.0 }
 0x1d0   : > { %v666_v45 = vpack.c.bf16 %v664_v42, %v663_v41 }
 0x1d1   : > { %v665_v46 = vpack.c.bf16 %v662_v44, %v661_v43 }
 0x1d3   : > { %1547 = vmatprep.mubr.msk.bf16.mxu0 %vm605_vm3, %v665_v46 }
 0x1d4   : > { %1548 = vmatmul.mubr.msk.bf16.vlgmr.msra.gmra.mrb[4].mxu0 %vm605_vm3, %v666_v45 }
 0x1d5   : > { %1082 = vmatpush1.bf16.msra.mxu0 %v1604_v49  ;;  %1113 = vmatprep.mubr.bf16.mxu0 %v1677_v32  ;;  %v1916_v49 = vshrl.u32 %v901_v48, 7 }
 0x1d6   : > { %1083 = vmatprep.subr.bf16.mxu0 %v1612_v52  ;;  %v899_v52 = vld [vmem:[%s1950_s10] sm:$0xf] }
 0x1d7   : > { %v903_v50 = vsub.s32 0, %v1916_v49  ;;  %v911_v51 = vsub.s32 2, %v1916_v49 }
 0x1d9   : > { %1084 = vmatpush1.bf16.msra.mxu0 %v1610_v53  ;;  %v907_v53 = vsub.s32 1, %v1916_v49 }
 0x1da   : > { %1085 = vmatprep.subr.bf16.mxu0 %v1618_v54  ;;  %v915_v54 = vsub.s32 3, %v1916_v49 }
 0x1dd   : > { %1086 = vmatpush1.bf16.msra.mxu0 %v1616_v55  ;;  %v904_v55 = vrot.slane %v899_v52, %v903_v50 }
 0x1de   : > { %1087 = vmatprep.subr.bf16.mxu0 %v1624_v56  ;;  %v912_v56 = vrot.slane %v899_v52, %v911_v51 }
 0x1e1   : > { %1088 = vmatpush1.bf16.msra.mxu0 %v1622_v57  ;;  %v908_v57 = vrot.slane %v899_v52, %v907_v53 }
 0x1e2   : > { %1089 = vmatprep.subr.bf16.mxu0 %v1630_v58  ;;  %v916_v58 = vrot.slane %v899_v52, %v915_v54 }
 0x1e5   : > { %1090 = vmatpush1.bf16.msra.mxu0 %v1628_v59 }
 0x1e6   : > { %1091 = vmatprep.subr.bf16.mxu0 %v1636_v60 }
 0x1e9   : > { %1092 = vmatpush1.bf16.msra.mxu0 %v1634_v61 }
 0x1ea   : > { %1093 = vmatprep.subr.bf16.mxu0 %v1642_v24 }
 0x1ed   : > { %1094 = vmatpush1.bf16.msra.mxu0 %v1640_v26 }
 0x1ee   : > { %1095 = vmatprep.subr.bf16.mxu0 %v1648_v28 }
 0x1f1   : > { %1096 = vmatpush1.bf16.msra.mxu0 %v1646_v30 }
 0x2a7   : > { %v1549_v63 = vpop.f32.mrb[4].mxu0 }
 0x2a8   : > { %v755_v0 = vadd.f32 %v1549_v63, %v1450_v62  ;;  %v746_v1 = vpop.f32.mrb[5].mxu0 }
 0x2a9   : > { %v747_v2 = vadd.f32 %v1450_v62, %v746_v1  ;;  %v1550_v3 = vpop.f32.mrb[6].mxu0 }
 0x2aa   : > { %v758_v4 = vadd.f32 %v1550_v3, %v1450_v62  ;;  %v749_v5 = vpop.f32.mrb[7].mxu0  ;;  %v763_v7 = vmax.f32 %v755_v0, 0.0 }
 0x2ab   : > { %v750_v6 = vadd.f32 %v1450_v62, %v749_v5  ;;  %v761_v9 = vmax.f32 %v747_v2, 0.0 }
 0x2ac   : > { %v764_v8 = vmax.f32 %v758_v4, 0.0 }
 0x2ad   : > { %v762_v10 = vmax.f32 %v750_v6, 0.0 }
 0x2ae   : > { %v766_v11 = vpack.c.bf16 %v764_v8, %v763_v7 }
 0x2af   : > { %v765_v12 = vpack.c.bf16 %v762_v10, %v761_v9 }
 0x2b1   : > { %1559 = vmatprep.mubr.msk.bf16.mxu1 %vm605_vm3, %v765_v12 }
 0x2b2   : > { %1560 = vmatmul.mubr.msk.bf16.vlgmr.msra.gmra.mrb[4].mxu1 %vm605_vm3, %v766_v11 }
 0x2b3   : > { %1135 = vmatpush1.bf16.msra.mxu1 %v1607_v13  ;;  %1166 = vmatprep.mubr.bf16.mxu1 %v1677_v32 }
 0x2b4   : > { %1136 = vmatprep.subr.bf16.mxu1 %v1615_v14 }
 0x2b7   : > { %1137 = vmatpush1.bf16.msra.mxu1 %v1613_v15 }
 0x2b8   : > { %1138 = vmatprep.subr.bf16.mxu1 %v1621_v16 }
 0x2bb   : > { %1139 = vmatpush1.bf16.msra.mxu1 %v1619_v17 }
 0x2bc   : > { %1140 = vmatprep.subr.bf16.mxu1 %v1627_v18 }
 0x2bf   : > { %1141 = vmatpush1.bf16.msra.mxu1 %v1625_v19 }
 0x2c0   : > { %1142 = vmatprep.subr.bf16.mxu1 %v1633_v20 }
 0x2c3   : > { %1143 = vmatpush1.bf16.msra.mxu1 %v1631_v21 }
 0x2c4   : > { %1144 = vmatprep.subr.bf16.mxu1 %v1639_v22 }
 0x2c7   : > { %1145 = vmatpush1.bf16.msra.mxu1 %v1637_v23 }
 0x2c8   : > { %1146 = vmatprep.subr.bf16.mxu1 %v1645_v25 }
 0x2cb   : > { %1147 = vmatpush1.bf16.msra.mxu1 %v1643_v27 }
 0x2cc   : > { %1148 = vmatprep.subr.bf16.mxu1 %v1651_v29 }
 0x2cf   : > { %1149 = vmatpush1.bf16.msra.mxu1 %v1649_v31 }
 0x385   : > { %v1561_v34 = vpop.f32.mrb[4].mxu1 }
 0x386   : > { %v855_v35 = vadd.f32 %v1561_v34, %v1457_v33  ;;  %v846_v36 = vpop.f32.mrb[5].mxu1 }
 0x387   : > { %v847_v37 = vadd.f32 %v1457_v33, %v846_v36  ;;  %v1562_v38 = vpop.f32.mrb[6].mxu1 }
 0x388   : > { %v858_v39 = vadd.f32 %v1562_v38, %v1457_v33  ;;  %v849_v40 = vpop.f32.mrb[7].mxu1  ;;  %v863_v42 = vmax.f32 %v855_v35, 0.0 }
 0x389   : > { %v850_v41 = vadd.f32 %v1457_v33, %v849_v40  ;;  %v861_v44 = vmax.f32 %v847_v37, 0.0 }
 0x38a   : > { %v864_v43 = vmax.f32 %v858_v39, 0.0 }
 0x38b   : > { %v862_v45 = vmax.f32 %v850_v41, 0.0 }
 0x38c   : > { %v866_v46 = vpack.c.bf16 %v864_v43, %v863_v42 }
 0x38d   : > { %v865_v47 = vpack.c.bf16 %v862_v45, %v861_v44 }
 0x38f   : > { %1114 = vmatmul.mubr.bf16.vlgmr.msra.gmra.mrb[8].mxu0 %v865_v47  ;;  %1167 = vmatmul.mubr.bf16.vlgmr.msra.gmra.mrb[8].mxu1 %v865_v47 }
 0x390   : > { %1123 = vmatprep.mubr.bf16.mxu0 %v1677_v32  ;;  %1176 = vmatprep.mubr.bf16.mxu1 %v1677_v32 }
 0x397   : > { %1124 = vmatmul.mubr.bf16.gmra.mrb[12].mxu0 %v866_v46  ;;  %1177 = vmatmul.mubr.bf16.gmra.mrb[12].mxu1 %v866_v46 }
 0x462   : > { %v1115_v59 = vpop.f32.mrb[8].mxu0  ;;  %v1168_v60 = vpop.f32.mrb[8].mxu1 }
 0x463   : > { %v1116_v61 = vadd.f32 %v1115_v59, %v904_v55  ;;  %v1169_v62 = vadd.f32 %v1168_v60, %v912_v56  ;;  %v1117_v63 = vpop.f32.mrb[9].mxu0  ;;  %v1170_v0 = vpop.f32.mrb[9].mxu1 }
 0x464   : > { %v1118_v1 = vadd.f32 %v1117_v63, %v908_v57  ;;  %v1171_v2 = vadd.f32 %v1170_v0, %v916_v58  ;;  %v1119_v3 = vpop.f32.mrb[10].mxu0  ;;  %v1172_v4 = vpop.f32.mrb[10].mxu1 }
 0x465   : > { %v1120_v5 = vadd.f32 %v1119_v3, %v904_v55  ;;  %v1173_v6 = vadd.f32 %v1172_v4, %v912_v56  ;;  %v1121_v7 = vpop.f32.mrb[11].mxu0  ;;  %v1174_v8 = vpop.f32.mrb[11].mxu1  ;;  %v1187_v11 = vmax.f32 %v1116_v61, 0.0  ;;  %v1189_v12 = vmax.f32 %v1169_v62, 0.0 }
 0x466   : > { %v1122_v9 = vadd.f32 %v1121_v7, %v908_v57  ;;  %v1175_v10 = vadd.f32 %v1174_v8, %v916_v58  ;;  %v1188_v15 = vmax.f32 %v1118_v1, 0.0  ;;  %v1190_v16 = vmax.f32 %v1171_v2, 0.0 }
 0x467   : > { %v1191_v13 = vmax.f32 %v1120_v5, 0.0  ;;  %v1193_v14 = vmax.f32 %v1173_v6, 0.0 }
 0x468   : > { %v1192_v17 = vmax.f32 %v1122_v9, 0.0  ;;  %v1194_v18 = vmax.f32 %v1175_v10, 0.0 }
 0x469   : > { %v1203_v19 = vmax.f32 %v1187_v11, %v1191_v13  ;;  %v1221_v20 = vmax.f32 %v1189_v12, %v1193_v14 }
 0x46a   : > { %v1212_v21 = vmax.f32 %v1188_v15, %v1192_v17  ;;  %v1230_v22 = vmax.f32 %v1190_v16, %v1194_v18  ;;  %v1125_v23 = vpop.f32.mrb[12].mxu0  ;;  %v1178_v24 = vpop.f32.mrb[12].mxu1 }
 0x46b   : > { %v1126_v25 = vadd.f32 %v1125_v23, %v904_v55  ;;  %v1179_v26 = vadd.f32 %v1178_v24, %v912_v56  ;;  %v1127_v27 = vpop.f32.mrb[13].mxu0  ;;  %v1180_v28 = vpop.f32.mrb[13].mxu1 }
 0x46c   : > { %v1128_v29 = vadd.f32 %v1127_v27, %v908_v57  ;;  %v1181_v30 = vadd.f32 %v1180_v28, %v916_v58  ;;  %v1129_v31 = vpop.f32.mrb[14].mxu0  ;;  %v1182_v32 = vpop.f32.mrb[14].mxu1 }
 0x46d   : > { %v1195_v33 = vmax.f32 %v1126_v25, 0.0  ;;  %v1197_v34 = vmax.f32 %v1179_v26, 0.0  ;;  %v1130_v35 = vadd.f32 %v1129_v31, %v904_v55  ;;  %v1183_v36 = vadd.f32 %v1182_v32, %v912_v56  ;;  %v1131_v37 = vpop.f32.mrb[15].mxu0  ;;  %v1184_v38 = vpop.f32.mrb[15].mxu1 }
 0x46e   : > { %v1196_v39 = vmax.f32 %v1128_v29, 0.0  ;;  %v1198_v40 = vmax.f32 %v1181_v30, 0.0  ;;  %v1132_v41 = vadd.f32 %v1131_v37, %v908_v57  ;;  %v1185_v42 = vadd.f32 %v1184_v38, %v916_v58 }
 0x46f   : > { %v1204_v43 = vmax.f32 %v1203_v19, %v1195_v33  ;;  %v1222_v44 = vmax.f32 %v1221_v20, %v1197_v34  ;;  %v1199_v45 = vmax.f32 %v1130_v35, 0.0  ;;  %v1201_v46 = vmax.f32 %v1183_v36, 0.0 }
 0x470   : > { %v1213_v47 = vmax.f32 %v1212_v21, %v1196_v39  ;;  %v1231_v50 = vmax.f32 %v1230_v22, %v1198_v40  ;;  %v1200_v51 = vmax.f32 %v1132_v41, 0.0  ;;  %v1202_v52 = vmax.f32 %v1185_v42, 0.0 }
 0x471   : > { %v1205_v53 = vmax.f32 %v1204_v43, %v1199_v45  ;;  %v1223_v54 = vmax.f32 %v1222_v44, %v1201_v46  ;;  %v1678_v58 = vmov 1966171168  }
 0x472   : > { %v1214_v59 = vmax.f32 %v1213_v47, %v1200_v51  ;;  %v1232_v60 = vmax.f32 %v1231_v50, %v1202_v52  ;;  %v1250_v1 = vunpack.c.l.s4 %v1678_v58 }
 0x473   : > { %v1206_v55 = vrot.slane %v1205_v53, 4  ;;  %v1224_v56 = vrot.slane %v1223_v54, 4 }
 0x474   : > { %v1215_v61 = vrot.slane %v1214_v59, 4  ;;  %v1233_v62 = vrot.slane %v1232_v60, 4  ;;  %v1251_v10 = vunpack.c.0.s8 %v1250_v1 }
 0x475   : > { %v1207_v63 = vmax.f32 %v1205_v53, %v1206_v55  ;;  %v1225_v0 = vmax.f32 %v1223_v54, %v1224_v56 }
 0x476   : > { %v1216_v57 = vmax.f32 %v1214_v59, %v1215_v61  ;;  %v1234_v2 = vmax.f32 %v1232_v60, %v1233_v62  ;;  %v1254_v19 = vsub.s32 %v1251_v10, %v1916_v49 }
 0x477   : > { %v1208_v3 = vrot.slane %v1207_v63, 2  ;;  %v1226_v4 = vrot.slane %v1225_v0, 2 }
 0x478   : > { %v1217_v5 = vrot.slane %v1216_v57, 2  ;;  %v1235_v6 = vrot.slane %v1234_v2, 2 }
 0x479   : > { %v1209_v7 = vmax.f32 %v1207_v63, %v1208_v3  ;;  %v1227_v8 = vmax.f32 %v1225_v0, %v1226_v4 }
 0x47a   : > { %v1218_v9 = vmax.f32 %v1216_v57, %v1217_v5  ;;  %v1236_v11 = vmax.f32 %v1234_v2, %v1235_v6 }
 0x47b   : > { %v1210_v12 = vrot.slane %v1209_v7, 1  ;;  %v1228_v13 = vrot.slane %v1227_v8, 1 }
 0x47c   : > { %v1219_v14 = vrot.slane %v1218_v9, 1  ;;  %v1237_v15 = vrot.slane %v1236_v11, 1 }
 0x47d   : > { %v1211_v16 = vmax.f32 %v1209_v7, %v1210_v12  ;;  %v1229_v17 = vmax.f32 %v1227_v8, %v1228_v13 }
 0x47e   : > { %v1220_v18 = vmax.f32 %v1218_v9, %v1219_v14  ;;  %v1238_v20 = vmax.f32 %v1236_v11, %v1237_v15 }
 0x480   : > { %v1247_v21 = vcombine.low %v1211_v16, %v1220_v18  ;;  %v1248_v22 = vcombine.low %v1229_v17, %v1238_v20 }
 0x482   : > { %v1255_v23 = vrot.slane %v1247_v21, %v1254_v19  ;;  %v1262_v24 = vrot.slane %v1248_v22, %v1254_v19 }
 0x484   : > { %v1263_v25 = vcombine.low %v1255_v23, %v1262_v24 }
 0x486   : > { %v1270_v26 = vrot.slane %v1263_v25, %v1254_v19 }
 0x488   : > { %1276 = vst.msk [vmem:[%s473_s21] sm:$0xf] %vm1274_vm4, %v1270_v26 }
 0x489 PF: > { %s21_s19 = sadd.s32 1, %s1674_s19   ;;  %s1952_s17 = smov %s1670_s18 }
 0x48a   : > { %p18_p5 = scmp.ge.s32.totalorder %s21_s19, 4   ;;  %s1953_s18 = smov %s1955_s20 }
 0x48c   :  { %20 = sbr.rel (!%p18_p5) target bundleno = 2 (0x2), region = 108 }

// kernel: _lambda_.4
= control target key start
LH: loop header
LB: loop body
LE: loop exit
PB: predicated region body
PF: predicated region fallthrough
CT: control target
= control target key end

     0   :  { %s10182_s24 = smov 0   ;;  %s10184_s25 = smov 0   ;;  %s13314_s0 = inlined_call_operand.vmem [shape: bf16[2,32,3], index: 0, kind: input, shape index: {}]   ;;  %s13315_s1 = inlined_call_operand.vmem [shape: bf16[2,3,64], index: 1, kind: input, shape index: {}]   ;;  %s13316_s2 = inlined_call_operand.vmem [shape: f32[1,64], index: 2, kind: input, shape index: {}]   ;;  %s13317_s3 = inlined_call_operand.vmem [shape: bf16[64,64], index: 3, kind: input, shape index: {}]   ;;  %s13318_s4 = inlined_call_operand.vmem [shape: f32[1,64], index: 4, kind: input, shape index: {}]   ;;  %s13319_s5 = inlined_call_operand.vmem [shape: bf16[64,64], index: 5, kind: input, shape index: {}]   ;;  %s13320_s6 = inlined_call_operand.vmem [shape: f32[1,64], index: 6, kind: input, shape index: {}]   ;;  %s13321_s7 = inlined_call_operand.vmem [shape: bf16[64,128], index: 7, kind: input, shape index: {}]   ;;  %s13322_s8 = inlined_call_operand.vmem [shape: f32[1,128], index: 8, kind: input, shape index: {}]   ;;  %s13323_s9 = inlined_call_operand.vmem [shape: bf16[128,1024], index: 9, kind: input, shape index: {}]   ;;  %s13324_s10 = inlined_call_operand.vmem [shape: f32[1,1024], index: 10, kind: input, shape index: {}]   ;;  %s13325_s11 = inlined_call_operand.vmem [shape: bf16[1024,512], index: 11, kind: input, shape index: {}]   ;;  %s13326_s12 = inlined_call_operand.vmem [shape: f32[1,512], index: 12, kind: input, shape index: {}]   ;;  %s13327_s13 = inlined_call_operand.vmem [shape: bf16[512,256], index: 13, kind: input, shape index: {}]   ;;  %s13328_s14 = inlined_call_operand.vmem [shape: f32[1,256], index: 14, kind: input, shape index: {}]   ;;  %s13329_s15 = inlined_call_operand.vmem [shape: bf16[256,4096], index: 15, kind: input, shape index: {}]   ;;  %s13330_s16 = inlined_call_operand.vmem [shape: f32[1,4096], index: 16, kind: input, shape index: {}]   ;;  %s13331_s17 = inlined_call_operand.vmem [shape: f32[2,1,4096], index: 17, kind: output, shape index: {}]  }
   0x1   :  { %13332 = sst [smem:[#allocation4_spill]] %s13314_s0  ;;  %s10186_s26 = smov 0  }
   0x2   :  { %13333 = sst [smem:[#allocation5_spill]] %s13315_s1 }
   0x3 LB: > { %s46_s27 = sadd.s32 1, %s10083_s25  ;;  %p8516_p0 = scmp.ge.s32.totalorder %s10087_s26, 1  ;;  %s10087_s26 = sphi %s10186_s26, %s27_s26   ;;  %s10083_s25 = sphi %s10184_s25, %s13339_s25   ;;  %s10079_s24 = sphi %s10182_s24, %s13338_s24  }
   0x4   : > { %p48_p1 = scmp.ge.s32.totalorder %s46_s27, 2  ;;  %p526_p2 = scmp.lt.s32.totalorder %s10087_s26, 3 }
   0x6   : > { %s13341_s27 = smov (%p48_p1, %s46_s27), 0  ;;  %p527_p3 = pnand %p8516_p0, %p526_p2 }
   0x7   : > { %13334 = sst [smem:[#allocation3_spill]] %s13341_s27  ;;  %p588_p4 = scmp.lt.s32.totalorder (!%p527_p3), %s10079_s24, 1  ;;  %vm636_vm0 = vcmask (!%p527_p3), 1040384   ;;  %vm637_vm1 = vcmask (!%p527_p3), 1041408   ;;  %v9572_v0 = vld [vmem:[%s13317_s3] sm:$0xff] (!%p527_p3)   ;;  %v10089_v1 = vmov (!%p527_p3), 65535  }
   0x8   : > { %530 = sbr.rel (%p527_p3) target bundleno = 2634 (0xa4a), region = 88  ;;  %v638_v2 = vsel (!%p527_p3), %vm636_vm0, 4294967295, %v10089_v1  ;;  %v9573_v3 = vld [vmem:[%s13317_s3 + $0x8] sm:$0xff] (!%p527_p3)   ;;  %vm629_vm2 = vcmask (!%p527_p3), 23552   ;;  %9473 = vmatprep.subr.bf16.mxu1 (!%p527_p3), %v9572_v0  ;;  %s13335_s20 = sld [smem:[#allocation5_spill]] (!%p527_p3)  ;;  %v9574_v9 = vld [vmem:[%s13317_s3 + $0x10] sm:$0xff] (!%p527_p3)  }
   0x9   : > { %9474 = vmatpush3.bf16.msra.mxu1 (!%p527_p3), %v9572_v0  ;;  %v639_v4 = vsel (!%p527_p3), %vm637_vm1, %v638_v2, 0  ;;  %s13336_s29 = sld [smem:[#allocation4_spill]] (!%p527_p3)  ;;  %v9575_v10 = vld [vmem:[%s13317_s3 + $0x18] sm:$0xff] (!%p527_p3)   ;;  %v9576_v11 = vld [vmem:[%s13319_s5] sm:$0xff] (!%p527_p3)   ;;  %v9577_v12 = vld [vmem:[%s13319_s5 + $0x8] sm:$0xff] (!%p527_p3)   ;;  %vm737_vm3 = vcmask (!%p527_p3), 523264  }
   0xa   : > { %9475 = vmatprep.subr.bf16.mxu1 (!%p527_p3), %v9573_v3  ;;  %v8521_v13 = vld [vmem:[%s13316_s2] ss:$0 sm:$0xff] (!%p527_p3)  ;;  %v9578_v28 = vld [vmem:[%s13319_s5 + $0x10] sm:$0xff] (!%p527_p3)   ;;  %v9579_v29 = vld [vmem:[%s13319_s5 + $0x18] sm:$0xff] (!%p527_p3)  }
   0xb   : > { %v9580_v30 = vld [vmem:[%s13321_s7] sm:$0xff] (!%p527_p3)   ;;  %v9581_v31 = vld [vmem:[%s13321_s7 + $0x8] sm:$0xff] (!%p527_p3)   ;;  %v9582_v47 = vld [vmem:[%s13321_s7 + $0x10] sm:$0xff] (!%p527_p3)  }
   0xc   : > { %v8526_v32 = vld [vmem:[%s13318_s4] ss:$0 sm:$0xff] (!%p527_p3)  ;;  %v9583_v48 = vld [vmem:[%s13321_s7 + $0x18] sm:$0xff] (!%p527_p3)   ;;  %v1000_v51 = vld [vmem:[%s13323_s9 + $0x8] sm:$0xff] (!%p527_p3) }
   0xd   : > { %9476 = vmatpush3.bf16.msra.mxu1 (!%p527_p3), %v9573_v3  ;;  %v999_v49 = vld [vmem:[%s13323_s9] sm:$0xff] (!%p527_p3)  ;;  %v1004_v54 = vld [vmem:[%s13323_s9 + $0x28] sm:$0xff] (!%p527_p3) }
   0xe   : > { %9477 = vmatprep.subr.bf16.mxu1 (!%p527_p3), %v9574_v9  ;;  %v1003_v50 = vld [vmem:[%s13323_s9 + $0x20] sm:$0xff] (!%p527_p3)  ;;  %v8549_v57 = vcombine.low (!%p527_p3), %v1000_v51, %v1004_v54  ;;  %v8550_v58 = vcombine.high (!%p527_p3), %v1000_v51, %v1004_v54 }
   0xf   : > { %s13343_s24 = smov (!%p588_p4, %s10079_s24), 1  ;;  %v8547_v52 = vcombine.low %v999_v49, %v1003_v50  ;;  %v8548_v53 = vcombine.high %v999_v49, %v1003_v50  ;;  %v1007_v55 = vld [vmem:[%s13323_s9 + $0x40] sm:$0xff]  ;;  %v1048_v50 = vld [vmem:[%s13323_s9 + $0x188] sm:$0xff] }
  0x10   : > { %s8519_s18 = sshll.u32 %s13343_s24, 1  ;;  %s9445_s22 = sshll.u32 %s13343_s24, 4  ;;  %v1011_v56 = vld [vmem:[%s13323_s9 + $0x60] sm:$0xff] }
  0x11   : > { %s601_s21 = scalar_lea.vmem %s13335_s20, %s8519_s18  ;;  %s595_s0 = scalar_lea.vmem %s13336_s29, %s9445_s22  ;;  %9478 = vmatpush3.bf16.msra.mxu1 %v9574_v9  ;;  %v8556_v59 = vcombine.high %v1007_v55, %v1011_v56  ;;  %v8555_v60 = vcombine.low %v1007_v55, %v1011_v56  ;;  %v1015_v61 = vld [vmem:[%s13323_s9 + $0x80] sm:$0xff] }
  0x12   : > { %v611_v5 = vld [vmem:[%s601_s21] sm:$0x3]  ;;  %v9571_v8 = vld [vmem:[%s595_s0 + $0x8] sm:$0xff]   ;;  %9479 = vmatprep.subr.bf16.mxu1 %v9575_v10  ;;  %s8520_s18 = sshll.u32 %s13343_s24, 5 }
  0x13   : > { %v641_v6 = vand.u32 %v639_v4, %v611_v5  ;;  %v9570_v7 = vld [vmem:[%s595_s0] sm:$0xff]   ;;  %s12927_s0 = scalar_lea.vmem %s13331_s17, %s8520_s18 }
  0x14   : > { %9469 = vmatprep.mubr.msk.bf16.mxu0 %vm629_vm2, %v9570_v7  ;;  %v1019_v62 = vld [vmem:[%s13323_s9 + $0xa0] sm:$0xff] }
  0x15   : > { %9467 = vmatprep.subr.bf16.mxu0 %v641_v6  ;;  %9480 = vmatpush3.bf16.msra.mxu1 %v9575_v10  ;;  %v8564_v63 = vcombine.high %v1015_v61, %v1019_v62  ;;  %v8563_v0 = vcombine.low %v1015_v61, %v1019_v62  ;;  %v1023_v1 = vld [vmem:[%s13323_s9 + $0xc0] sm:$0xff] }
  0x16   : > { %9468 = vmatpush3.bf16.msra.mxu0 %v641_v6  ;;  %9497 = vmatprep.subr.bf16.mxu1 %v9580_v30  ;;  %v1027_v2 = vld [vmem:[%s13323_s9 + $0xe0] sm:$0xff] }
  0x17   : > { %9485 = vmatprep.subr.bf16.mxu0 %v9576_v11  ;;  %v8572_v3 = vcombine.high %v1023_v1, %v1027_v2  ;;  %v8571_v4 = vcombine.low %v1023_v1, %v1027_v2  ;;  %v1031_v5 = vld [vmem:[%s13323_s9 + $0x100] sm:$0xff]  ;;  %v1005_v1 = vld [vmem:[%s13323_s9 + $0x30] sm:$0xff]  ;;  %v1002_v2 = vld [vmem:[%s13323_s9 + $0x18] sm:$0xff] }
  0x18   : > { %v1035_v6 = vld [vmem:[%s13323_s9 + $0x120] sm:$0xff] }
  0x19   : > { %9470 = vmatmul.mubr.msk.bf16.vlgmr.msra.gmra.mrb[0].mxu0 %vm629_vm2, %v9571_v8  ;;  %v8580_v7 = vcombine.high %v1031_v5, %v1035_v6  ;;  %v8579_v8 = vcombine.low %v1031_v5, %v1035_v6  ;;  %v1039_v9 = vld [vmem:[%s13323_s9 + $0x140] sm:$0xff] }
  0x1a   : > { %9486 = vmatpush3.bf16.msra.mxu0 %v9576_v11  ;;  %v1043_v10 = vld [vmem:[%s13323_s9 + $0x160] sm:$0xff] }
  0x1b   : > { %9487 = vmatprep.subr.bf16.mxu0 %v9577_v12  ;;  %v8588_v11 = vcombine.high %v1039_v9, %v1043_v10  ;;  %v1051_v49 = vld [vmem:[%s13323_s9 + $0x1a0] sm:$0xff] }
  0x1c   : > { %v1055_v56 = vld [vmem:[%s13323_s9 + $0x1c0] sm:$0xff] }
  0x1e   : > { %9488 = vmatpush3.bf16.msra.mxu0 %v9577_v12  ;;  %v8587_v12 = vcombine.low %v1039_v9, %v1043_v10  ;;  %v8540_v9 = vld [vmem:[%s13322_s8] ss:$0 sm:$0xff] }
  0x1f   : > { %9489 = vmatprep.subr.bf16.mxu0 %v9578_v28 }
  0x22   : > { %9490 = vmatpush3.bf16.msra.mxu0 %v9578_v28 }
  0x23   : > { %9491 = vmatprep.subr.bf16.mxu0 %v9579_v29 }
  0x26   : > { %9492 = vmatpush3.bf16.msra.mxu0 %v9579_v29 }
  0x27   : > { %1425 = vmatprep.subr.bf16.mxu0 %v8548_v53 }
  0xec   : > { %v9471_v14 = vpop.f32.mrb[0].mxu0 }
  0xed   : > { %v686_v15 = vadd.f32 %v9471_v14, %v8521_v13  ;;  %v677_v16 = vpop.f32.mrb[1].mxu0 }
  0xee   : > { %v678_v17 = vadd.f32 %v8521_v13, %v677_v16  ;;  %v9472_v18 = vpop.f32.mrb[2].mxu0 }
  0xef   : > { %v689_v19 = vadd.f32 %v9472_v18, %v8521_v13  ;;  %v680_v20 = vpop.f32.mrb[3].mxu0  ;;  %v694_v22 = vmax.f32 %v686_v15, 0.0 }
  0xf0   : > { %v681_v21 = vadd.f32 %v8521_v13, %v680_v20  ;;  %v692_v24 = vmax.f32 %v678_v17, 0.0  ;;  %v8533_v13 = vld [vmem:[%s13320_s6] ss:$0 sm:$0xff] }
  0xf1   : > { %v695_v23 = vmax.f32 %v689_v19, 0.0 }
  0xf2   : > { %v693_v25 = vmax.f32 %v681_v21, 0.0 }
  0xf3   : > { %v697_v26 = vpack.c.bf16 %v695_v23, %v694_v22 }
  0xf4   : > { %v696_v27 = vpack.c.bf16 %v693_v25, %v692_v24 }
  0xf6   : > { %9481 = vmatprep.mubr.msk.bf16.mxu1 %vm737_vm3, %v696_v27  ;;  %v1012_v27 = vld [vmem:[%s13323_s9 + $0x68] sm:$0xff] }
  0xf7   : > { %9482 = vmatmul.mubr.msk.bf16.vlgmr.msra.gmra.mrb[0].mxu1 %vm737_vm3, %v697_v26  ;;  %v1008_v26 = vld [vmem:[%s13323_s9 + $0x48] sm:$0xff] }
  0xf8   : > { %9498 = vmatpush3.bf16.msra.mxu1 %v9580_v30  ;;  %v8558_v30 = vcombine.high %v1008_v26, %v1012_v27 }
  0xf9   : > { %9499 = vmatprep.subr.bf16.mxu1 %v9581_v31 }
  0xfc   : > { %9500 = vmatpush3.bf16.msra.mxu1 %v9581_v31  ;;  %v1016_v31 = vld [vmem:[%s13323_s9 + $0x88] sm:$0xff] }
  0xfd   : > { %9501 = vmatprep.subr.bf16.mxu1 %v9582_v47 }
 0x100   : > { %9502 = vmatpush3.bf16.msra.mxu1 %v9582_v47 }
 0x101   : > { %9503 = vmatprep.subr.bf16.mxu1 %v9583_v48 }
 0x104   : > { %9504 = vmatpush3.bf16.msra.mxu1 %v9583_v48  ;;  %v1047_v48 = vld [vmem:[%s13323_s9 + $0x180] sm:$0xff] }
 0x105   : > { %1478 = vmatprep.subr.bf16.mxu1 %v8550_v58  ;;  %v8596_v51 = vcombine.high %v1047_v48, %v1051_v49  ;;  %v8595_v53 = vcombine.low %v1047_v48, %v1051_v49  ;;  %v1056_v58 = vld [vmem:[%s13323_s9 + $0x1c8] sm:$0xff]  ;;  %v1034_v48 = vld [vmem:[%s13323_s9 + $0x118] sm:$0xff] }
 0x106   : > { %v1038_v49 = vld [vmem:[%s13323_s9 + $0x138] sm:$0xff] }
 0x1ca   : > { %v9483_v33 = vpop.f32.mrb[0].mxu1 }
 0x1cb   : > { %v787_v34 = vadd.f32 %v9483_v33, %v8526_v32  ;;  %v778_v35 = vpop.f32.mrb[1].mxu1  ;;  %v8557_v33 = vcombine.low %v1008_v26, %v1012_v27 }
 0x1cc   : > { %v779_v36 = vadd.f32 %v8526_v32, %v778_v35  ;;  %v9484_v37 = vpop.f32.mrb[2].mxu1  ;;  %v1024_v35 = vld [vmem:[%s13323_s9 + $0xc8] sm:$0xff] }
 0x1cd   : > { %v790_v38 = vadd.f32 %v9484_v37, %v8526_v32  ;;  %v781_v39 = vpop.f32.mrb[3].mxu1  ;;  %v795_v41 = vmax.f32 %v787_v34, 0.0 }
 0x1ce   : > { %v782_v40 = vadd.f32 %v8526_v32, %v781_v39  ;;  %v793_v43 = vmax.f32 %v779_v36, 0.0  ;;  %v1020_v32 = vld [vmem:[%s13323_s9 + $0xa8] sm:$0xff] }
 0x1cf   : > { %v796_v42 = vmax.f32 %v790_v38, 0.0  ;;  %v8566_v34 = vcombine.high %v1016_v31, %v1020_v32  ;;  %v1028_v36 = vld [vmem:[%s13323_s9 + $0xe8] sm:$0xff]  ;;  %v8565_v37 = vcombine.low %v1016_v31, %v1020_v32  ;;  %v1021_v31 = vld [vmem:[%s13323_s9 + $0xb0] sm:$0xff]  ;;  %v1018_v32 = vld [vmem:[%s13323_s9 + $0x98] sm:$0xff] }
 0x1d0   : > { %v794_v44 = vmax.f32 %v782_v40, 0.0  ;;  %v8574_v38 = vcombine.high %v1024_v35, %v1028_v36  ;;  %v1032_v39 = vld [vmem:[%s13323_s9 + $0x108] sm:$0xff] }
 0x1d1   : > { %v798_v45 = vpack.c.bf16 %v796_v42, %v795_v41  ;;  %v1036_v40 = vld [vmem:[%s13323_s9 + $0x128] sm:$0xff]  ;;  %v8573_v41 = vcombine.low %v1024_v35, %v1028_v36 }
 0x1d2   : > { %v797_v46 = vpack.c.bf16 %v794_v44, %v793_v43  ;;  %v8582_v42 = vcombine.high %v1032_v39, %v1036_v40  ;;  %v1040_v43 = vld [vmem:[%s13323_s9 + $0x148] sm:$0xff] }
 0x1d3   : > { %v1044_v44 = vld [vmem:[%s13323_s9 + $0x168] sm:$0xff] }
 0x1d4   : > { %9493 = vmatprep.mubr.msk.bf16.mxu0 %vm737_vm3, %v797_v46  ;;  %v8590_v46 = vcombine.high %v1040_v43, %v1044_v44  ;;  %v8589_v47 = vcombine.low %v1040_v43, %v1044_v44 }
 0x1d5   : > { %9494 = vmatmul.mubr.msk.bf16.vlgmr.msra.gmra.mrb[4].mxu0 %vm737_vm3, %v798_v45  ;;  %v8581_v45 = vcombine.low %v1032_v39, %v1036_v40  ;;  %v1029_v39 = vld [vmem:[%s13323_s9 + $0xf0] sm:$0xff]  ;;  %v1026_v40 = vld [vmem:[%s13323_s9 + $0xd8] sm:$0xff] }
 0x1d6   : > { %1426 = vmatpush1.bf16.msra.mxu0 %v8547_v52  ;;  %v1052_v52 = vld [vmem:[%s13323_s9 + $0x1a8] sm:$0xff] }
 0x1d7   : > { %1427 = vmatprep.subr.bf16.mxu0 %v8556_v59  ;;  %v8597_v54 = vcombine.low %v1048_v50, %v1052_v52  ;;  %v8598_v55 = vcombine.high %v1048_v50, %v1052_v52 }
 0x1da   : > { %1428 = vmatpush1.bf16.msra.mxu0 %v8555_v60  ;;  %v1060_v60 = vld [vmem:[%s13323_s9 + $0x1e8] sm:$0xff] }
 0x1db   : > { %1429 = vmatprep.subr.bf16.mxu0 %v8564_v63  ;;  %v8605_v62 = vcombine.low %v1056_v58, %v1060_v60  ;;  %v8606_v63 = vcombine.high %v1056_v58, %v1060_v60 }
 0x1de   : > { %1430 = vmatpush1.bf16.msra.mxu0 %v8563_v0  ;;  %v1001_v0 = vld [vmem:[%s13323_s9 + $0x10] sm:$0xff] }
 0x1df   : > { %1431 = vmatprep.subr.bf16.mxu0 %v8572_v3  ;;  %v8552_v3 = vcombine.high %v1001_v0, %v1005_v1  ;;  %v8551_v5 = vcombine.low %v1001_v0, %v1005_v1  ;;  %v1050_v0 = vld [vmem:[%s13323_s9 + $0x198] sm:$0xff] }
 0x1e0   : > { %v1054_v1 = vld [vmem:[%s13323_s9 + $0x1b8] sm:$0xff] }
 0x1e2   : > { %1432 = vmatpush1.bf16.msra.mxu0 %v8571_v4  ;;  %v1006_v4 = vld [vmem:[%s13323_s9 + $0x38] sm:$0xff] }
 0x1e3   : > { %1433 = vmatprep.subr.bf16.mxu0 %v8580_v7  ;;  %v8553_v6 = vcombine.low %v1002_v2, %v1006_v4  ;;  %v8554_v7 = vcombine.high %v1002_v2, %v1006_v4 }
 0x1e6   : > { %1434 = vmatpush1.bf16.msra.mxu0 %v8579_v8  ;;  %v10090_v8 = vmov 0  }
 0x1e7   : > { %1435 = vmatprep.subr.bf16.mxu0 %v8588_v11  ;;  %1457 = vmatprep.mubr.bf16.mxu0 %v10090_v8 }
 0x1ea   : > { %1436 = vmatpush1.bf16.msra.mxu0 %v8587_v12 }
 0x1eb   : > { %1437 = vmatprep.subr.bf16.mxu0 %v8596_v51 }
 0x1ee   : > { %1438 = vmatpush1.bf16.msra.mxu0 %v8595_v53  ;;  %v8586_v53 = vcombine.high %v1034_v48, %v1038_v49 }
 0x2a8   : > { %v9495_v14 = vpop.f32.mrb[4].mxu0 }
 0x2a9   : > { %v887_v15 = vadd.f32 %v9495_v14, %v8533_v13  ;;  %v878_v16 = vpop.f32.mrb[5].mxu0 }
 0x2aa   : > { %v879_v17 = vadd.f32 %v8533_v13, %v878_v16  ;;  %v9496_v18 = vpop.f32.mrb[6].mxu0 }
 0x2ab   : > { %v890_v19 = vadd.f32 %v9496_v18, %v8533_v13  ;;  %v881_v20 = vpop.f32.mrb[7].mxu0  ;;  %v895_v22 = vmax.f32 %v887_v15, 0.0  ;;  %v1009_v18 = vld [vmem:[%s13323_s9 + $0x50] sm:$0xff] }
 0x2ac   : > { %v882_v21 = vadd.f32 %v8533_v13, %v881_v20  ;;  %v893_v24 = vmax.f32 %v879_v17, 0.0 }
 0x2ad   : > { %v896_v23 = vmax.f32 %v890_v19, 0.0 }
 0x2ae   : > { %v894_v25 = vmax.f32 %v882_v21, 0.0  ;;  %v1013_v21 = vld [vmem:[%s13323_s9 + $0x70] sm:$0xff] }
 0x2af   : > { %v898_v28 = vpack.c.bf16 %v896_v23, %v895_v22  ;;  %v1010_v22 = vld [vmem:[%s13323_s9 + $0x58] sm:$0xff] }
 0x2b0   : > { %v897_v29 = vpack.c.bf16 %v894_v25, %v893_v24  ;;  %v1014_v23 = vld [vmem:[%s13323_s9 + $0x78] sm:$0xff] }
 0x2b1   : > { %v8561_v35 = vcombine.low %v1010_v22, %v1014_v23 }
 0x2b2   : > { %9505 = vmatprep.mubr.msk.bf16.mxu1 %vm737_vm3, %v897_v29  ;;  %v8562_v29 = vcombine.high %v1010_v22, %v1014_v23  ;;  %v9590_v22 = vld [vmem:[%s13325_s11 + $0x20] ss:$16 sps:$4 sm:$0xff]   ;;  %v9593_v23 = vld [vmem:[%s13325_s11 + $0x28] ss:$16 sps:$4 sm:$0xff]  }
 0x2b3   : > { %9506 = vmatmul.mubr.msk.bf16.vlgmr.msra.gmra.mrb[4].mxu1 %vm737_vm3, %v898_v28  ;;  %v8560_v28 = vcombine.high %v1009_v18, %v1013_v21 }
 0x2b4   : > { %1479 = vmatpush1.bf16.msra.mxu1 %v8549_v57  ;;  %v1059_v57 = vld [vmem:[%s13323_s9 + $0x1e0] sm:$0xff]  ;;  %1510 = vmatprep.mubr.bf16.mxu1 %v10090_v8 }
 0x2b5   : > { %1480 = vmatprep.subr.bf16.mxu1 %v8558_v30  ;;  %v8604_v59 = vcombine.high %v1055_v56, %v1059_v57  ;;  %v8603_v61 = vcombine.low %v1055_v56, %v1059_v57  ;;  %v1017_v30 = vld [vmem:[%s13323_s9 + $0x90] sm:$0xff]  ;;  %v1042_v56 = vld [vmem:[%s13323_s9 + $0x158] sm:$0xff] }
 0x2b6   : > { %v8568_v36 = vcombine.high %v1017_v30, %v1021_v31  ;;  %v1046_v57 = vld [vmem:[%s13323_s9 + $0x178] sm:$0xff] }
 0x2b7   : > { %1439 = vmatprep.subr.bf16.mxu0 %v8604_v59  ;;  %v8585_v59 = vcombine.low %v1034_v48, %v1038_v49  ;;  %v9634_v48 = vld [vmem:[%s13325_s11 + $0x104] ss:$16 sps:$4 sm:$0xff]   ;;  %v9637_v49 = vld [vmem:[%s13325_s11 + $0x10c] ss:$16 sps:$4 sm:$0xff]  }
 0x2b8   : > { %1481 = vmatpush1.bf16.msra.mxu1 %v8557_v33  ;;  %1440 = vmatpush1.bf16.msra.mxu0 %v8603_v61  ;;  %v1022_v33 = vld [vmem:[%s13323_s9 + $0xb8] sm:$0xff]  ;;  %v8594_v61 = vcombine.high %v1042_v56, %v1046_v57 }
 0x2b9   : > { %1482 = vmatprep.subr.bf16.mxu1 %v8566_v34  ;;  %1531 = vmatprep.subr.bf16.mxu0 %v8552_v3  ;;  %v8559_v34 = vcombine.low %v1009_v18, %v1013_v21  ;;  %v8569_v43 = vcombine.low %v1018_v32, %v1022_v33  ;;  %v8593_v3 = vcombine.low %v1042_v56, %v1046_v57  ;;  %v9589_v18 = vld [vmem:[%s13325_s11 + $0xc] ss:$16 sps:$4 sm:$0xff]   ;;  %v9646_v56 = vld [vmem:[%s13325_s11 + $0x144] ss:$16 sps:$4 sm:$0xff]  }
 0x2ba   : > { %v9595_v21 = vld [vmem:[%s13325_s11 + $0x2c] ss:$16 sps:$4 sm:$0xff]  }
 0x2bb   : > { %v9649_v57 = vld [vmem:[%s13325_s11 + $0x14c] ss:$16 sps:$4 sm:$0xff]  }
 0x2bc   : > { %1483 = vmatpush1.bf16.msra.mxu1 %v8565_v37  ;;  %v8570_v37 = vcombine.high %v1018_v32, %v1022_v33  ;;  %v9610_v32 = vld [vmem:[%s13325_s11 + $0x84] ss:$16 sps:$4 sm:$0xff]   ;;  %v9613_v33 = vld [vmem:[%s13325_s11 + $0x8c] ss:$16 sps:$4 sm:$0xff]  }
 0x2bd   : > { %1484 = vmatprep.subr.bf16.mxu1 %v8574_v38  ;;  %v1025_v38 = vld [vmem:[%s13323_s9 + $0xd0] sm:$0xff] }
 0x2be   : > { %v8576_v44 = vcombine.high %v1025_v38, %v1029_v39  ;;  %v8575_v50 = vcombine.low %v1025_v38, %v1029_v39  ;;  %v9614_v38 = vld [vmem:[%s13325_s11 + $0xa0] ss:$16 sps:$4 sm:$0xff]   ;;  %v9617_v39 = vld [vmem:[%s13325_s11 + $0xa8] ss:$16 sps:$4 sm:$0xff]  }
 0x2c0   : > { %1485 = vmatpush1.bf16.msra.mxu1 %v8573_v41  ;;  %v1030_v41 = vld [vmem:[%s13323_s9 + $0xf8] sm:$0xff] }
 0x2c1   : > { %1486 = vmatprep.subr.bf16.mxu1 %v8582_v42  ;;  %v8567_v42 = vcombine.low %v1017_v30, %v1021_v31  ;;  %v8577_v51 = vcombine.low %v1026_v40, %v1030_v41  ;;  %v9602_v30 = vld [vmem:[%s13325_s11 + $0x60] ss:$16 sps:$4 sm:$0xff]   ;;  %v9605_v31 = vld [vmem:[%s13325_s11 + $0x68] ss:$16 sps:$4 sm:$0xff]  }
 0x2c4   : > { %1487 = vmatpush1.bf16.msra.mxu1 %v8581_v45  ;;  %v8578_v45 = vcombine.high %v1026_v40, %v1030_v41  ;;  %v9622_v40 = vld [vmem:[%s13325_s11 + $0xc4] ss:$16 sps:$4 sm:$0xff]   ;;  %v9625_v41 = vld [vmem:[%s13325_s11 + $0xcc] ss:$16 sps:$4 sm:$0xff]  }
 0x2c5   : > { %1488 = vmatprep.subr.bf16.mxu1 %v8590_v46  ;;  %v1033_v46 = vld [vmem:[%s13323_s9 + $0x110] sm:$0xff] }
 0x2c8   : > { %1489 = vmatpush1.bf16.msra.mxu1 %v8589_v47  ;;  %v1037_v47 = vld [vmem:[%s13323_s9 + $0x130] sm:$0xff] }
 0x2c9   : > { %1490 = vmatprep.subr.bf16.mxu1 %v8598_v55  ;;  %v8584_v52 = vcombine.high %v1033_v46, %v1037_v47  ;;  %v1045_v55 = vld [vmem:[%s13323_s9 + $0x170] sm:$0xff]  ;;  %v8583_v58 = vcombine.low %v1033_v46, %v1037_v47  ;;  %v9629_v47 = vld [vmem:[%s13325_s11 + $0xe8] ss:$16 sps:$4 sm:$0xff]  }
 0x2ca   : > { %v9626_v46 = vld [vmem:[%s13325_s11 + $0xe0] ss:$16 sps:$4 sm:$0xff]  }
 0x2cc   : > { %1491 = vmatpush1.bf16.msra.mxu1 %v8597_v54  ;;  %v1041_v54 = vld [vmem:[%s13323_s9 + $0x150] sm:$0xff] }
 0x2cd   : > { %1492 = vmatprep.subr.bf16.mxu1 %v8606_v63  ;;  %v8592_v60 = vcombine.high %v1041_v54, %v1045_v55  ;;  %v1053_v63 = vld [vmem:[%s13323_s9 + $0x1b0] sm:$0xff]  ;;  %v8591_v2 = vcombine.low %v1041_v54, %v1045_v55  ;;  %v9641_v55 = vld [vmem:[%s13325_s11 + $0x128] ss:$16 sps:$4 sm:$0xff]  }
 0x2ce   : > { %v9638_v54 = vld [vmem:[%s13325_s11 + $0x120] ss:$16 sps:$4 sm:$0xff]  }
 0x2d0   : > { %1493 = vmatpush1.bf16.msra.mxu1 %v8605_v62  ;;  %v1049_v62 = vld [vmem:[%s13323_s9 + $0x190] sm:$0xff] }
 0x2d1   : > { %1584 = vmatprep.subr.bf16.mxu1 %v8554_v7  ;;  %v8600_v4 = vcombine.high %v1049_v62, %v1053_v63  ;;  %v1061_v7 = vld [vmem:[%s13323_s9 + $0x1f0] sm:$0xff] }
 0x386   : > { %v9507_v10 = vpop.f32.mrb[4].mxu1 }
 0x387   : > { %v987_v11 = vadd.f32 %v9507_v10, %v8540_v9  ;;  %v978_v12 = vpop.f32.mrb[5].mxu1  ;;  %v1062_v10 = vld [vmem:[%s13323_s9 + $0x1f8] sm:$0xff] }
 0x388   : > { %v979_v13 = vadd.f32 %v8540_v9, %v978_v12  ;;  %v9508_v14 = vpop.f32.mrb[6].mxu1  ;;  %v8601_v12 = vcombine.low %v1050_v0, %v1054_v1 }
 0x389   : > { %v990_v15 = vadd.f32 %v9508_v14, %v8540_v9  ;;  %v981_v16 = vpop.f32.mrb[7].mxu1  ;;  %v995_v19 = vmax.f32 %v987_v11, 0.0  ;;  %v8599_v11 = vcombine.low %v1049_v62, %v1053_v63  ;;  %v9650_v62 = vld [vmem:[%s13325_s11 + $0x160] ss:$16 sps:$4 sm:$0xff]   ;;  %v9653_v63 = vld [vmem:[%s13325_s11 + $0x168] ss:$16 sps:$4 sm:$0xff]  }
 0x38a   : > { %v982_v17 = vadd.f32 %v8540_v9, %v981_v16  ;;  %v993_v24 = vmax.f32 %v979_v13, 0.0  ;;  %v1058_v9 = vld [vmem:[%s13323_s9 + $0x1d8] sm:$0xff] }
 0x38b   : > { %v996_v20 = vmax.f32 %v990_v15, 0.0  ;;  %v8610_v14 = vcombine.high %v1058_v9, %v1062_v10  ;;  %v8609_v16 = vcombine.low %v1058_v9, %v1062_v10  ;;  %v9670_v9 = vld [vmem:[%s13325_s11 + $0x1c4] ss:$16 sps:$4 sm:$0xff]   ;;  %v9673_v10 = vld [vmem:[%s13325_s11 + $0x1cc] ss:$16 sps:$4 sm:$0xff]  }
 0x38c   : > { %v994_v25 = vmax.f32 %v982_v17, 0.0  ;;  %v9586_v17 = vld [vmem:[%s13325_s11 + $0x4] ss:$16 sps:$4 sm:$0xff]  }
 0x38d   : > { %v10388_v26 = vpack.c.bf16 %v996_v20, %v995_v19  ;;  %v9584_v19 = vld [vmem:[%s13325_s11] ss:$16 sps:$4 sm:$0xff]   ;;  %v9592_v20 = vld [vmem:[%s13325_s11 + $0x24] ss:$16 sps:$4 sm:$0xff]  }
 0x38e   : > { %v10390_v27 = vpack.c.bf16 %v994_v25, %v993_v24  ;;  %v9598_v24 = vld [vmem:[%s13325_s11 + $0x44] ss:$16 sps:$4 sm:$0xff]   ;;  %v9601_v25 = vld [vmem:[%s13325_s11 + $0x4c] ss:$16 sps:$4 sm:$0xff]  }
 0x390   : > { %1458 = vmatmul.mubr.bf16.vlgmr.msra.gmra.mrb[8].mxu0 %v10390_v27  ;;  %1511 = vmatmul.mubr.bf16.vlgmr.msra.gmra.mrb[8].mxu1 %v10390_v27 }
 0x391   : > { %1532 = vmatpush1.bf16.msra.mxu0 %v8551_v5  ;;  %1585 = vmatpush1.bf16.msra.mxu1 %v8553_v6  ;;  %v8602_v5 = vcombine.high %v1050_v0, %v1054_v1  ;;  %v1057_v6 = vld [vmem:[%s13323_s9 + $0x1d0] sm:$0xff]  ;;  %v9661_v1 = vld [vmem:[%s13325_s11 + $0x18c] ss:$16 sps:$4 sm:$0xff]  }
 0x392   : > { %1533 = vmatprep.subr.bf16.mxu0 %v8560_v28  ;;  %1586 = vmatprep.subr.bf16.mxu1 %v8562_v29  ;;  %v8608_v13 = vcombine.high %v1057_v6, %v1061_v7  ;;  %v8607_v15 = vcombine.low %v1057_v6, %v1061_v7  ;;  %v9604_v28 = vld [vmem:[%s13325_s11 + $0x64] ss:$16 sps:$4 sm:$0xff]   ;;  %v9607_v29 = vld [vmem:[%s13325_s11 + $0x6c] ss:$16 sps:$4 sm:$0xff]   ;;  %v9662_v6 = vld [vmem:[%s13325_s11 + $0x1a0] ss:$16 sps:$4 sm:$0xff]  }
 0x393   : > { %1467 = vmatprep.mubr.bf16.mxu0 %v10090_v8  ;;  %1520 = vmatprep.mubr.bf16.mxu1 %v10090_v8  ;;  %v9658_v0 = vld [vmem:[%s13325_s11 + $0x184] ss:$16 sps:$4 sm:$0xff]   ;;  %v9665_v7 = vld [vmem:[%s13325_s11 + $0x1a8] ss:$16 sps:$4 sm:$0xff]  }
 0x395   : > { %1534 = vmatpush1.bf16.msra.mxu0 %v8559_v34  ;;  %1587 = vmatpush1.bf16.msra.mxu1 %v8561_v35  ;;  %v9608_v34 = vld [vmem:[%s13325_s11 + $0x80] ss:$16 sps:$4 sm:$0xff]   ;;  %v9611_v35 = vld [vmem:[%s13325_s11 + $0x88] ss:$16 sps:$4 sm:$0xff]  }
 0x396   : > { %1535 = vmatprep.subr.bf16.mxu0 %v8568_v36  ;;  %1588 = vmatprep.subr.bf16.mxu1 %v8570_v37  ;;  %v9616_v36 = vld [vmem:[%s13325_s11 + $0xa4] ss:$16 sps:$4 sm:$0xff]   ;;  %v9619_v37 = vld [vmem:[%s13325_s11 + $0xac] ss:$16 sps:$4 sm:$0xff]  }
 0x398   : > { %1468 = vmatmul.mubr.bf16.gmra.mrb[12].mxu0 %v10388_v26  ;;  %1521 = vmatmul.mubr.bf16.gmra.mrb[12].mxu1 %v10388_v26 }
 0x399   : > { %1536 = vmatpush1.bf16.msra.mxu0 %v8567_v42  ;;  %1589 = vmatpush1.bf16.msra.mxu1 %v8569_v43  ;;  %v9620_v42 = vld [vmem:[%s13325_s11 + $0xc0] ss:$16 sps:$4 sm:$0xff]   ;;  %v9623_v43 = vld [vmem:[%s13325_s11 + $0xc8] ss:$16 sps:$4 sm:$0xff]  }
 0x39a   : > { %1537 = vmatprep.subr.bf16.mxu0 %v8576_v44  ;;  %1590 = vmatprep.subr.bf16.mxu1 %v8578_v45  ;;  %v9628_v44 = vld [vmem:[%s13325_s11 + $0xe4] ss:$16 sps:$4 sm:$0xff]   ;;  %v9631_v45 = vld [vmem:[%s13325_s11 + $0xec] ss:$16 sps:$4 sm:$0xff]  }
 0x39b   : > { %1563 = vmatprep.mubr.bf16.mxu0 %v10090_v8  ;;  %1616 = vmatprep.mubr.bf16.mxu1 %v10090_v8 }
 0x39d   : > { %1538 = vmatpush1.bf16.msra.mxu0 %v8575_v50  ;;  %1591 = vmatpush1.bf16.msra.mxu1 %v8577_v51  ;;  %v9632_v50 = vld [vmem:[%s13325_s11 + $0x100] ss:$16 sps:$4 sm:$0xff]   ;;  %v9635_v51 = vld [vmem:[%s13325_s11 + $0x108] ss:$16 sps:$4 sm:$0xff]  }
 0x39e   : > { %1539 = vmatprep.subr.bf16.mxu0 %v8584_v52  ;;  %1592 = vmatprep.subr.bf16.mxu1 %v8586_v53  ;;  %v9640_v52 = vld [vmem:[%s13325_s11 + $0x124] ss:$16 sps:$4 sm:$0xff]   ;;  %v9643_v53 = vld [vmem:[%s13325_s11 + $0x12c] ss:$16 sps:$4 sm:$0xff]  }
 0x3a1   : > { %1540 = vmatpush1.bf16.msra.mxu0 %v8583_v58  ;;  %1593 = vmatpush1.bf16.msra.mxu1 %v8585_v59  ;;  %v9644_v58 = vld [vmem:[%s13325_s11 + $0x140] ss:$16 sps:$4 sm:$0xff]   ;;  %v9647_v59 = vld [vmem:[%s13325_s11 + $0x148] ss:$16 sps:$4 sm:$0xff]  }
 0x3a2   : > { %1541 = vmatprep.subr.bf16.mxu0 %v8592_v60  ;;  %1594 = vmatprep.subr.bf16.mxu1 %v8594_v61  ;;  %v9652_v60 = vld [vmem:[%s13325_s11 + $0x164] ss:$16 sps:$4 sm:$0xff]   ;;  %v9655_v61 = vld [vmem:[%s13325_s11 + $0x16c] ss:$16 sps:$4 sm:$0xff]  }
 0x3a5   : > { %1542 = vmatpush1.bf16.msra.mxu0 %v8591_v2  ;;  %1595 = vmatpush1.bf16.msra.mxu1 %v8593_v3  ;;  %v9656_v2 = vld [vmem:[%s13325_s11 + $0x180] ss:$16 sps:$4 sm:$0xff]   ;;  %v9659_v3 = vld [vmem:[%s13325_s11 + $0x188] ss:$16 sps:$4 sm:$0xff]  }
 0x3a6   : > { %1543 = vmatprep.subr.bf16.mxu0 %v8600_v4  ;;  %1596 = vmatprep.subr.bf16.mxu1 %v8602_v5  ;;  %v9664_v4 = vld [vmem:[%s13325_s11 + $0x1a4] ss:$16 sps:$4 sm:$0xff]   ;;  %v9667_v5 = vld [vmem:[%s13325_s11 + $0x1ac] ss:$16 sps:$4 sm:$0xff]  }
 0x3a9   : > { %1544 = vmatpush1.bf16.msra.mxu0 %v8599_v11  ;;  %1597 = vmatpush1.bf16.msra.mxu1 %v8601_v12  ;;  %v9668_v11 = vld [vmem:[%s13325_s11 + $0x1c0] ss:$16 sps:$4 sm:$0xff]   ;;  %v9671_v12 = vld [vmem:[%s13325_s11 + $0x1c8] ss:$16 sps:$4 sm:$0xff]  }
 0x3aa   : > { %1545 = vmatprep.subr.bf16.mxu0 %v8608_v13  ;;  %1598 = vmatprep.subr.bf16.mxu1 %v8610_v14  ;;  %v9674_v13 = vld [vmem:[%s13325_s11 + $0x1e0] ss:$16 sps:$4 sm:$0xff]   ;;  %v9676_v14 = vld [vmem:[%s13325_s11 + $0x1e4] ss:$16 sps:$4 sm:$0xff]  }
 0x3ad   : > { %1546 = vmatpush1.bf16.msra.mxu0 %v8607_v15  ;;  %1599 = vmatpush1.bf16.msra.mxu1 %v8609_v16  ;;  %v9677_v15 = vld [vmem:[%s13325_s11 + $0x1e8] ss:$16 sps:$4 sm:$0xff]   ;;  %v9679_v16 = vld [vmem:[%s13325_s11 + $0x1ec] ss:$16 sps:$4 sm:$0xff]  }
 0x3ae   : > { %3480 = vmatprep.subr.bf16.mxu0 %v9586_v17  ;;  %3644 = vmatprep.subr.bf16.mxu1 %v9589_v18  ;;  %v9682_v17 = vld [vmem:[%s13325_s11 + $0x204] ss:$16 sps:$4 sm:$0xff]   ;;  %v9685_v18 = vld [vmem:[%s13325_s11 + $0x20c] ss:$16 sps:$4 sm:$0xff]  }
 0x3b0   : > { %1564 = vmatmul.mubr.bf16.vlgmr.msra.gmra.mrb[16].mxu0 %v10390_v27  ;;  %1617 = vmatmul.mubr.bf16.vlgmr.msra.gmra.mrb[16].mxu1 %v10390_v27  ;;  %v9599_v27 = vld [vmem:[%s13325_s11 + $0x48] ss:$16 sps:$4 sm:$0xff]  }
 0x3b1   : > { %1573 = vmatprep.mubr.bf16.mxu0 %v10090_v8  ;;  %1626 = vmatprep.mubr.bf16.mxu1 %v10090_v8  ;;  %v9587_v8 = vld [vmem:[%s13325_s11 + $0x8] ss:$16 sps:$4 sm:$0xff]  }
 0x3b2   : > { %3481 = vmatpush1.bf16.msra.mxu0 %v9584_v19  ;;  %3645 = vmatpush1.bf16.msra.mxu1 %v9587_v8  ;;  %v1065_v19 = vlaneseq }
 0x3b3   : > { %3482 = vmatprep.subr.bf16.mxu0 %v9592_v20  ;;  %3646 = vmatprep.subr.bf16.mxu1 %v9595_v21 }
 0x3b4   : > { %v10676_v8 = vshrl.u32 %v1065_v19, 7 }
 0x3b6   : > { %3483 = vmatpush1.bf16.msra.mxu0 %v9590_v22  ;;  %3647 = vmatpush1.bf16.msra.mxu1 %v9593_v23  ;;  %v10679_v20 = vsub.s32 0, %v10676_v8  ;;  %v10682_v21 = vsub.s32 2, %v10676_v8  ;;  %v10687_v22 = vld [vmem:[%s13324_s10] sm:$0xff]  ;;  %v10690_v23 = vsub.s32 1, %v10676_v8 }
 0x3b7   : > { %3484 = vmatprep.subr.bf16.mxu0 %v9598_v24  ;;  %3648 = vmatprep.subr.bf16.mxu1 %v9601_v25  ;;  %v10693_v24 = vsub.s32 3, %v10676_v8 }
 0x3b8   : > { %1574 = vmatmul.mubr.bf16.gmra.mrb[20].mxu0 %v10388_v26  ;;  %1627 = vmatmul.mubr.bf16.gmra.mrb[20].mxu1 %v10388_v26  ;;  %v9596_v26 = vld [vmem:[%s13325_s11 + $0x40] ss:$16 sps:$4 sm:$0xff]   ;;  %v1068_v25 = vrot.slane %v10687_v22, %v10679_v20 }
 0x3ba   : > { %3485 = vmatpush1.bf16.msra.mxu0 %v9596_v26  ;;  %3649 = vmatpush1.bf16.msra.mxu1 %v9599_v27  ;;  %v1076_v26 = vrot.slane %v10687_v22, %v10682_v21  ;;  %v1072_v27 = vrot.slane %v10687_v22, %v10690_v23 }
 0x3bb   : > { %3486 = vmatprep.subr.bf16.mxu0 %v9604_v28  ;;  %3650 = vmatprep.subr.bf16.mxu1 %v9607_v29  ;;  %v1080_v28 = vrot.slane %v10687_v22, %v10693_v24 }
 0x3be   : > { %3487 = vmatpush1.bf16.msra.mxu0 %v9602_v30  ;;  %3651 = vmatpush1.bf16.msra.mxu1 %v9605_v31 }
 0x3bf   : > { %3488 = vmatprep.subr.bf16.mxu0 %v9610_v32  ;;  %3652 = vmatprep.subr.bf16.mxu1 %v9613_v33 }
 0x3c2   : > { %3489 = vmatpush1.bf16.msra.mxu0 %v9608_v34  ;;  %3653 = vmatpush1.bf16.msra.mxu1 %v9611_v35 }
 0x3c3   : > { %3490 = vmatprep.subr.bf16.mxu0 %v9616_v36  ;;  %3654 = vmatprep.subr.bf16.mxu1 %v9619_v37 }
 0x3c6   : > { %3491 = vmatpush1.bf16.msra.mxu0 %v9614_v38  ;;  %3655 = vmatpush1.bf16.msra.mxu1 %v9617_v39 }
 0x3c7   : > { %3492 = vmatprep.subr.bf16.mxu0 %v9622_v40  ;;  %3656 = vmatprep.subr.bf16.mxu1 %v9625_v41 }
 0x3ca   : > { %3493 = vmatpush1.bf16.msra.mxu0 %v9620_v42  ;;  %3657 = vmatpush1.bf16.msra.mxu1 %v9623_v43 }
 0x3cb   : > { %3494 = vmatprep.subr.bf16.mxu0 %v9628_v44  ;;  %3658 = vmatprep.subr.bf16.mxu1 %v9631_v45 }
 0x3ce   : > { %3495 = vmatpush1.bf16.msra.mxu0 %v9626_v46  ;;  %3659 = vmatpush1.bf16.msra.mxu1 %v9629_v47 }
 0x3cf   : > { %3496 = vmatprep.subr.bf16.mxu0 %v9634_v48  ;;  %3660 = vmatprep.subr.bf16.mxu1 %v9637_v49 }
 0x3d2   : > { %3497 = vmatpush1.bf16.msra.mxu0 %v9632_v50  ;;  %3661 = vmatpush1.bf16.msra.mxu1 %v9635_v51 }
 0x3d3   : > { %3498 = vmatprep.subr.bf16.mxu0 %v9640_v52  ;;  %3662 = vmatprep.subr.bf16.mxu1 %v9643_v53 }
 0x3d6   : > { %3499 = vmatpush1.bf16.msra.mxu0 %v9638_v54  ;;  %3663 = vmatpush1.bf16.msra.mxu1 %v9641_v55 }
 0x3d7   : > { %3500 = vmatprep.subr.bf16.mxu0 %v9646_v56  ;;  %3664 = vmatprep.subr.bf16.mxu1 %v9649_v57 }
 0x3da   : > { %3501 = vmatpush1.bf16.msra.mxu0 %v9644_v58  ;;  %3665 = vmatpush1.bf16.msra.mxu1 %v9647_v59 }
 0x3db   : > { %3502 = vmatprep.subr.bf16.mxu0 %v9652_v60  ;;  %3666 = vmatprep.subr.bf16.mxu1 %v9655_v61 }
 0x3de   : > { %3503 = vmatpush1.bf16.msra.mxu0 %v9650_v62  ;;  %3667 = vmatpush1.bf16.msra.mxu1 %v9653_v63 }
 0x3df   : > { %3504 = vmatprep.subr.bf16.mxu0 %v9658_v0  ;;  %3668 = vmatprep.subr.bf16.mxu1 %v9661_v1 }
 0x3e2   : > { %3505 = vmatpush1.bf16.msra.mxu0 %v9656_v2  ;;  %3669 = vmatpush1.bf16.msra.mxu1 %v9659_v3 }
 0x3e3   : > { %3506 = vmatprep.subr.bf16.mxu0 %v9664_v4  ;;  %3670 = vmatprep.subr.bf16.mxu1 %v9667_v5 }
 0x3e6   : > { %3507 = vmatpush1.bf16.msra.mxu0 %v9662_v6  ;;  %3671 = vmatpush1.bf16.msra.mxu1 %v9665_v7 }
 0x3e7   : > { %3508 = vmatprep.subr.bf16.mxu0 %v9670_v9  ;;  %3672 = vmatprep.subr.bf16.mxu1 %v9673_v10 }
 0x3ea   : > { %3509 = vmatpush1.bf16.msra.mxu0 %v9668_v11  ;;  %3673 = vmatpush1.bf16.msra.mxu1 %v9671_v12 }
 0x3eb   : > { %3510 = vmatprep.subr.bf16.mxu0 %v9676_v14  ;;  %3674 = vmatprep.subr.bf16.mxu1 %v9679_v16 }
 0x3ee   : > { %3511 = vmatpush1.bf16.msra.mxu0 %v9674_v13  ;;  %3675 = vmatpush1.bf16.msra.mxu1 %v9677_v15 }
 0x3ef   : > { %3521 = vmatprep.subr.bf16.mxu0 %v9682_v17  ;;  %3685 = vmatprep.subr.bf16.mxu1 %v9685_v18 }
 0x463   : > { %v1459_v29 = vpop.f32.mrb[8].mxu0  ;;  %v1512_v30 = vpop.f32.mrb[8].mxu1 }
 0x464   : > { %v1460_v31 = vadd.f32 %v1459_v29, %v1068_v25  ;;  %v1513_v32 = vadd.f32 %v1512_v30, %v1076_v26  ;;  %v1461_v33 = vpop.f32.mrb[9].mxu0  ;;  %v1514_v34 = vpop.f32.mrb[9].mxu1 }
 0x465   : > { %v1462_v35 = vadd.f32 %v1461_v33, %v1072_v27  ;;  %v1515_v36 = vadd.f32 %v1514_v34, %v1080_v28  ;;  %v1463_v37 = vpop.f32.mrb[10].mxu0  ;;  %v1516_v38 = vpop.f32.mrb[10].mxu1 }
 0x466   : > { %v1464_v39 = vadd.f32 %v1463_v37, %v1068_v25  ;;  %v1517_v40 = vadd.f32 %v1516_v38, %v1076_v26  ;;  %v1465_v41 = vpop.f32.mrb[11].mxu0  ;;  %v1518_v42 = vpop.f32.mrb[11].mxu1  ;;  %v1637_v45 = vmax.f32 %v1460_v31, 0.0  ;;  %v1639_v46 = vmax.f32 %v1513_v32, 0.0 }
 0x467   : > { %v1466_v43 = vadd.f32 %v1465_v41, %v1072_v27  ;;  %v1519_v44 = vadd.f32 %v1518_v42, %v1080_v28  ;;  %v1638_v49 = vmax.f32 %v1462_v35, 0.0  ;;  %v1640_v50 = vmax.f32 %v1515_v36, 0.0 }
 0x468   : > { %v1645_v47 = vmax.f32 %v1464_v39, 0.0  ;;  %v1647_v48 = vmax.f32 %v1517_v40, 0.0 }
 0x469   : > { %v1646_v51 = vmax.f32 %v1466_v43, 0.0  ;;  %v1648_v52 = vmax.f32 %v1519_v44, 0.0 }
 0x46a   : > { %v1669_v53 = vmax.f32 %v1637_v45, %v1645_v47  ;;  %v1687_v54 = vmax.f32 %v1639_v46, %v1647_v48 }
 0x46b   : > { %v1678_v55 = vmax.f32 %v1638_v49, %v1646_v51  ;;  %v1696_v56 = vmax.f32 %v1640_v50, %v1648_v52  ;;  %v1469_v57 = vpop.f32.mrb[12].mxu0  ;;  %v1522_v58 = vpop.f32.mrb[12].mxu1  ;;  %v10704_v52 = vsub.s32 4, %v10676_v8 }
 0x46c   : > { %v1470_v59 = vadd.f32 %v1469_v57, %v1068_v25  ;;  %v1523_v60 = vadd.f32 %v1522_v58, %v1076_v26  ;;  %v1471_v61 = vpop.f32.mrb[13].mxu0  ;;  %v1524_v62 = vpop.f32.mrb[13].mxu1 }
 0x46d   : > { %v1472_v63 = vadd.f32 %v1471_v61, %v1072_v27  ;;  %v1525_v0 = vadd.f32 %v1524_v62, %v1080_v28  ;;  %v1473_v1 = vpop.f32.mrb[14].mxu0  ;;  %v1526_v2 = vpop.f32.mrb[14].mxu1 }
 0x46e   : > { %v1653_v3 = vmax.f32 %v1470_v59, 0.0  ;;  %v1655_v4 = vmax.f32 %v1523_v60, 0.0  ;;  %v1474_v5 = vadd.f32 %v1473_v1, %v1068_v25  ;;  %v1527_v6 = vadd.f32 %v1526_v2, %v1076_v26  ;;  %v1475_v7 = vpop.f32.mrb[15].mxu0  ;;  %v1528_v9 = vpop.f32.mrb[15].mxu1 }
 0x46f   : > { %v1654_v10 = vmax.f32 %v1472_v63, 0.0  ;;  %v1656_v11 = vmax.f32 %v1525_v0, 0.0  ;;  %v1476_v12 = vadd.f32 %v1475_v7, %v1072_v27  ;;  %v1529_v13 = vadd.f32 %v1528_v9, %v1080_v28 }
 0x470   : > { %v1670_v14 = vmax.f32 %v1669_v53, %v1653_v3  ;;  %v1688_v15 = vmax.f32 %v1687_v54, %v1655_v4  ;;  %v1661_v16 = vmax.f32 %v1474_v5, 0.0  ;;  %v1663_v17 = vmax.f32 %v1527_v6, 0.0 }
 0x471   : > { %v1679_v18 = vmax.f32 %v1678_v55, %v1654_v10  ;;  %v1697_v19 = vmax.f32 %v1696_v56, %v1656_v11  ;;  %v1662_v29 = vmax.f32 %v1476_v12, 0.0  ;;  %v1664_v30 = vmax.f32 %v1529_v13, 0.0 }
 0x472   : > { %v1671_v31 = vmax.f32 %v1670_v14, %v1661_v16  ;;  %v1689_v32 = vmax.f32 %v1688_v15, %v1663_v17  ;;  %v10091_v28 = vmov 1966171168   ;;  %v10707_v53 = vsub.s32 6, %v10676_v8 }
 0x473   : > { %v1680_v33 = vmax.f32 %v1679_v18, %v1662_v29  ;;  %v1698_v34 = vmax.f32 %v1697_v19, %v1664_v30  ;;  %v1758_v39 = vunpack.c.l.s4 %v10091_v28  ;;  %v10710_v56 = vsub.s32 5, %v10676_v8 }
 0x474   : > { %v1672_v25 = vrot.slane %v1671_v31, 4  ;;  %v1690_v26 = vrot.slane %v1689_v32, 4  ;;  %v10713_v59 = vsub.s32 7, %v10676_v8  ;;  %v1084_v63 = vrot.slane %v10687_v22, %v10704_v52 }
 0x475   : > { %v1681_v35 = vrot.slane %v1680_v33, 4  ;;  %v1699_v36 = vrot.slane %v1698_v34, 4  ;;  %v1759_v48 = vunpack.c.0.s8 %v1758_v39  ;;  %v1092_v0 = vrot.slane %v10687_v22, %v10707_v53 }
 0x476   : > { %v1673_v37 = vmax.f32 %v1671_v31, %v1672_v25  ;;  %v1691_v38 = vmax.f32 %v1689_v32, %v1690_v26  ;;  %v1088_v3 = vrot.slane %v10687_v22, %v10710_v56  ;;  %v1096_v4 = vrot.slane %v10687_v22, %v10713_v59 }
 0x477   : > { %v1682_v27 = vmax.f32 %v1680_v33, %v1681_v35  ;;  %v1700_v40 = vmax.f32 %v1698_v34, %v1699_v36  ;;  %v10716_v61 = vsub.s32 %v1759_v48, %v10676_v8 }
 0x478   : > { %v1674_v41 = vrot.slane %v1673_v37, 2  ;;  %v1692_v42 = vrot.slane %v1691_v38, 2 }
 0x479   : > { %v1683_v43 = vrot.slane %v1682_v27, 2  ;;  %v1701_v44 = vrot.slane %v1700_v40, 2 }
 0x47a   : > { %v1675_v45 = vmax.f32 %v1673_v37, %v1674_v41  ;;  %v1693_v46 = vmax.f32 %v1691_v38, %v1692_v42 }
 0x47b   : > { %v1684_v47 = vmax.f32 %v1682_v27, %v1683_v43  ;;  %v1702_v49 = vmax.f32 %v1700_v40, %v1701_v44 }
 0x47c   : > { %v1676_v50 = vrot.slane %v1675_v45, 1  ;;  %v1694_v51 = vrot.slane %v1693_v46, 1 }
 0x47d   : > { %v1685_v54 = vrot.slane %v1684_v47, 1  ;;  %v1703_v55 = vrot.slane %v1702_v49, 1 }
 0x47e   : > { %v1677_v57 = vmax.f32 %v1675_v45, %v1676_v50  ;;  %v1695_v58 = vmax.f32 %v1693_v46, %v1694_v51 }
 0x47f   : > { %v1686_v60 = vmax.f32 %v1684_v47, %v1685_v54  ;;  %v1704_v62 = vmax.f32 %v1702_v49, %v1703_v55 }
 0x481   : > { %v1753_v1 = vcombine.low %v1677_v57, %v1686_v60  ;;  %v1754_v2 = vcombine.low %v1695_v58, %v1704_v62 }
 0x483   : > { %v10727_v5 = vrot.slane %v1753_v1, %v10716_v61  ;;  %v10730_v8 = vrot.slane %v1754_v2, %v10716_v61  ;;  %v1565_v6 = vpop.f32.mrb[16].mxu0  ;;  %v1618_v7 = vpop.f32.mrb[16].mxu1 }
 0x484   : > { %v1566_v9 = vadd.f32 %v1565_v6, %v1084_v63  ;;  %v1619_v10 = vadd.f32 %v1618_v7, %v1092_v0  ;;  %v1567_v11 = vpop.f32.mrb[17].mxu0  ;;  %v1620_v12 = vpop.f32.mrb[17].mxu1 }
 0x485   : > { %v1785_v13 = vcombine.low %v10727_v5, %v10730_v8  ;;  %v1568_v14 = vadd.f32 %v1567_v11, %v1088_v3  ;;  %v1569_v15 = vpop.f32.mrb[18].mxu0  ;;  %v1622_v16 = vpop.f32.mrb[18].mxu1  ;;  %v1621_v17 = vadd.f32 %v1620_v12, %v1096_v4  ;;  %v9683_v5 = vld [vmem:[%s13325_s11 + $0x208] ss:$16 sps:$4 sm:$0xff]  }
 0x486   : > { %v1570_v22 = vadd.f32 %v1569_v15, %v1084_v63  ;;  %v1623_v18 = vadd.f32 %v1622_v16, %v1092_v0  ;;  %v1571_v19 = vpop.f32.mrb[19].mxu0  ;;  %v1624_v29 = vpop.f32.mrb[19].mxu1  ;;  %v1641_v30 = vmax.f32 %v1566_v9, 0.0  ;;  %v1643_v32 = vmax.f32 %v1619_v10, 0.0 }
 0x487   : > { %v1572_v31 = vadd.f32 %v1571_v19, %v1088_v3  ;;  %v1625_v25 = vadd.f32 %v1624_v29, %v1096_v4  ;;  %v1642_v26 = vmax.f32 %v1568_v14, 0.0  ;;  %v1644_v36 = vmax.f32 %v1621_v17, 0.0 }
 0x488   : > { %v1649_v33 = vmax.f32 %v1570_v22, 0.0  ;;  %v1651_v34 = vmax.f32 %v1623_v18, 0.0 }
 0x489   : > { %v1650_v35 = vmax.f32 %v1572_v31, 0.0  ;;  %v1652_v27 = vmax.f32 %v1625_v25, 0.0 }
 0x48a   : > { %v1705_v37 = vmax.f32 %v1641_v30, %v1649_v33  ;;  %v1723_v38 = vmax.f32 %v1643_v32, %v1651_v34 }
 0x48b   : > { %v1714_v28 = vmax.f32 %v1642_v26, %v1650_v35  ;;  %v1575_v39 = vpop.f32.mrb[20].mxu0  ;;  %v1628_v40 = vpop.f32.mrb[20].mxu1  ;;  %v1732_v41 = vmax.f32 %v1644_v36, %v1652_v27 }
 0x48c   : > { %v1576_v42 = vadd.f32 %v1575_v39, %v1084_v63  ;;  %v1629_v43 = vadd.f32 %v1628_v40, %v1092_v0  ;;  %v1577_v44 = vpop.f32.mrb[21].mxu0  ;;  %v1630_v45 = vpop.f32.mrb[21].mxu1 }
 0x48d   : > { %v1578_v46 = vadd.f32 %v1577_v44, %v1088_v3  ;;  %v1631_v47 = vadd.f32 %v1630_v45, %v1096_v4  ;;  %v1579_v48 = vpop.f32.mrb[22].mxu0  ;;  %v1632_v49 = vpop.f32.mrb[22].mxu1 }
 0x48e   : > { %v1657_v50 = vmax.f32 %v1576_v42, 0.0  ;;  %v1659_v51 = vmax.f32 %v1629_v43, 0.0  ;;  %v1580_v54 = vadd.f32 %v1579_v48, %v1084_v63  ;;  %v1633_v55 = vadd.f32 %v1632_v49, %v1092_v0  ;;  %v1581_v57 = vpop.f32.mrb[23].mxu0  ;;  %v1634_v58 = vpop.f32.mrb[23].mxu1 }
 0x48f   : > { %v1658_v60 = vmax.f32 %v1578_v46, 0.0  ;;  %v1660_v62 = vmax.f32 %v1631_v47, 0.0  ;;  %v1582_v1 = vadd.f32 %v1581_v57, %v1088_v3  ;;  %v1635_v2 = vadd.f32 %v1634_v58, %v1096_v4 }
 0x490   : > { %v1706_v6 = vmax.f32 %v1705_v37, %v1657_v50  ;;  %v1724_v7 = vmax.f32 %v1723_v38, %v1659_v51  ;;  %v1665_v9 = vmax.f32 %v1580_v54, 0.0  ;;  %v1667_v10 = vmax.f32 %v1633_v55, 0.0 }
 0x491   : > { %v1715_v11 = vmax.f32 %v1714_v28, %v1658_v60  ;;  %v1733_v12 = vmax.f32 %v1732_v41, %v1660_v62  ;;  %v1666_v14 = vmax.f32 %v1582_v1, 0.0  ;;  %v1668_v15 = vmax.f32 %v1635_v2, 0.0  ;;  %v9680_v60 = vld [vmem:[%s13325_s11 + $0x200] ss:$16 sps:$4 sm:$0xff]   ;;  %v9691_v62 = vld [vmem:[%s13325_s11 + $0x22c] ss:$16 sps:$4 sm:$0xff]  }
 0x492   : > { %v1707_v16 = vmax.f32 %v1706_v6, %v1665_v9  ;;  %v1725_v17 = vmax.f32 %v1724_v7, %v1667_v10  ;;  %v1793_v49 = vrot.slane %v1785_v13, %v10716_v61  ;;  %v9688_v13 = vld [vmem:[%s13325_s11 + $0x224] ss:$16 sps:$4 sm:$0xff]   ;;  %v9686_v2 = vld [vmem:[%s13325_s11 + $0x220] ss:$16 sps:$4 sm:$0xff]   ;;  %v9689_v6 = vld [vmem:[%s13325_s11 + $0x228] ss:$16 sps:$4 sm:$0xff]  }
 0x493   : > { %v1716_v22 = vmax.f32 %v1715_v11, %v1666_v14  ;;  %v1734_v18 = vmax.f32 %v1733_v12, %v1668_v15  ;;  %v9694_v7 = vld [vmem:[%s13325_s11 + $0x244] ss:$16 sps:$4 sm:$0xff]   ;;  %v9697_v9 = vld [vmem:[%s13325_s11 + $0x24c] ss:$16 sps:$4 sm:$0xff]   ;;  %v9692_v10 = vld [vmem:[%s13325_s11 + $0x240] ss:$16 sps:$4 sm:$0xff]  }
 0x494   : > { %v1708_v63 = vrot.slane %v1707_v16, 4  ;;  %v1726_v0 = vrot.slane %v1725_v17, 4  ;;  %v9695_v11 = vld [vmem:[%s13325_s11 + $0x248] ss:$16 sps:$4 sm:$0xff]   ;;  %v9700_v12 = vld [vmem:[%s13325_s11 + $0x264] ss:$16 sps:$4 sm:$0xff]  }
 0x495   : > { %v1717_v19 = vrot.slane %v1716_v22, 4  ;;  %v1735_v29 = vrot.slane %v1734_v18, 4  ;;  %v9703_v14 = vld [vmem:[%s13325_s11 + $0x26c] ss:$16 sps:$4 sm:$0xff]   ;;  %v9698_v15 = vld [vmem:[%s13325_s11 + $0x260] ss:$16 sps:$4 sm:$0xff]  }
 0x496   : > { %v1709_v30 = vmax.f32 %v1707_v16, %v1708_v63  ;;  %v1727_v31 = vmax.f32 %v1725_v17, %v1726_v0  ;;  %v9701_v16 = vld [vmem:[%s13325_s11 + $0x268] ss:$16 sps:$4 sm:$0xff]   ;;  %v9706_v17 = vld [vmem:[%s13325_s11 + $0x284] ss:$16 sps:$4 sm:$0xff]  }
 0x497   : > { %v1718_v3 = vmax.f32 %v1716_v22, %v1717_v19  ;;  %v1736_v4 = vmax.f32 %v1734_v18, %v1735_v29  ;;  %v9709_v22 = vld [vmem:[%s13325_s11 + $0x28c] ss:$16 sps:$4 sm:$0xff]   ;;  %v9704_v18 = vld [vmem:[%s13325_s11 + $0x280] ss:$16 sps:$4 sm:$0xff]   ;;  %v9707_v63 = vld [vmem:[%s13325_s11 + $0x288] ss:$16 sps:$4 sm:$0xff]  }
 0x498   : > { %v1710_v32 = vrot.slane %v1709_v30, 2  ;;  %v1728_v33 = vrot.slane %v1727_v31, 2  ;;  %v9712_v0 = vld [vmem:[%s13325_s11 + $0x2a4] ss:$16 sps:$4 sm:$0xff]   ;;  %v9715_v19 = vld [vmem:[%s13325_s11 + $0x2ac] ss:$16 sps:$4 sm:$0xff]  }
 0x499   : > { %v1719_v34 = vrot.slane %v1718_v3, 2  ;;  %v1737_v25 = vrot.slane %v1736_v4, 2  ;;  %v9710_v29 = vld [vmem:[%s13325_s11 + $0x2a0] ss:$16 sps:$4 sm:$0xff]  }
 0x49a   : > { %v1711_v26 = vmax.f32 %v1709_v30, %v1710_v32  ;;  %v1729_v35 = vmax.f32 %v1727_v31, %v1728_v33  ;;  %v9713_v30 = vld [vmem:[%s13325_s11 + $0x2a8] ss:$16 sps:$4 sm:$0xff]   ;;  %v9718_v31 = vld [vmem:[%s13325_s11 + $0x2c4] ss:$16 sps:$4 sm:$0xff]  }
 0x49b   : > { %v1720_v36 = vmax.f32 %v1718_v3, %v1719_v34  ;;  %v1738_v37 = vmax.f32 %v1736_v4, %v1737_v25  ;;  %v9721_v3 = vld [vmem:[%s13325_s11 + $0x2cc] ss:$16 sps:$4 sm:$0xff]   ;;  %v9716_v4 = vld [vmem:[%s13325_s11 + $0x2c0] ss:$16 sps:$4 sm:$0xff]   ;;  %v9719_v32 = vld [vmem:[%s13325_s11 + $0x2c8] ss:$16 sps:$4 sm:$0xff]  }
 0x49c   : > { %v1712_v38 = vrot.slane %v1711_v26, 1  ;;  %v1730_v27 = vrot.slane %v1729_v35, 1  ;;  %v9724_v33 = vld [vmem:[%s13325_s11 + $0x2e4] ss:$16 sps:$4 sm:$0xff]   ;;  %v9727_v34 = vld [vmem:[%s13325_s11 + $0x2ec] ss:$16 sps:$4 sm:$0xff]  }
 0x49d   : > { %v1721_v28 = vrot.slane %v1720_v36, 1  ;;  %v1739_v39 = vrot.slane %v1738_v37, 1  ;;  %v9722_v25 = vld [vmem:[%s13325_s11 + $0x2e0] ss:$16 sps:$4 sm:$0xff]  }
 0x49e   : > { %v1713_v40 = vmax.f32 %v1711_v26, %v1712_v38  ;;  %v1731_v41 = vmax.f32 %v1729_v35, %v1730_v27  ;;  %v9725_v26 = vld [vmem:[%s13325_s11 + $0x2e8] ss:$16 sps:$4 sm:$0xff]   ;;  %v9730_v35 = vld [vmem:[%s13325_s11 + $0x304] ss:$16 sps:$4 sm:$0xff]  }
 0x49f   : > { %v1722_v42 = vmax.f32 %v1720_v36, %v1721_v28  ;;  %v1740_v43 = vmax.f32 %v1738_v37, %v1739_v39  ;;  %v9733_v36 = vld [vmem:[%s13325_s11 + $0x30c] ss:$16 sps:$4 sm:$0xff]   ;;  %v9728_v37 = vld [vmem:[%s13325_s11 + $0x300] ss:$16 sps:$4 sm:$0xff]   ;;  %v9731_v38 = vld [vmem:[%s13325_s11 + $0x308] ss:$16 sps:$4 sm:$0xff]  }
 0x4a0   : > { %v9736_v27 = vld [vmem:[%s13325_s11 + $0x324] ss:$16 sps:$4 sm:$0xff]   ;;  %v9739_v28 = vld [vmem:[%s13325_s11 + $0x32c] ss:$16 sps:$4 sm:$0xff]   ;;  %v9734_v39 = vld [vmem:[%s13325_s11 + $0x320] ss:$16 sps:$4 sm:$0xff]  }
 0x4a1   : > { %v1755_v44 = vcombine.low %v1713_v40, %v1722_v42  ;;  %v1756_v45 = vcombine.low %v1731_v41, %v1740_v43  ;;  %v9737_v40 = vld [vmem:[%s13325_s11 + $0x328] ss:$16 sps:$4 sm:$0xff]   ;;  %v9742_v41 = vld [vmem:[%s13325_s11 + $0x344] ss:$16 sps:$4 sm:$0xff]   ;;  %v9745_v42 = vld [vmem:[%s13325_s11 + $0x34c] ss:$16 sps:$4 sm:$0xff]  }
 0x4a2   : > { %v9740_v43 = vld [vmem:[%s13325_s11 + $0x340] ss:$16 sps:$4 sm:$0xff]  }
 0x4a3   : > { %v1777_v46 = vrot.slane %v1755_v44, %v10716_v61  ;;  %v1784_v47 = vrot.slane %v1756_v45, %v10716_v61  ;;  %v9743_v44 = vld [vmem:[%s13325_s11 + $0x348] ss:$16 sps:$4 sm:$0xff]   ;;  %v9748_v45 = vld [vmem:[%s13325_s11 + $0x364] ss:$16 sps:$4 sm:$0xff]  }
 0x4a5   : > { %v1786_v48 = vcombine.low %v1777_v46, %v1784_v47  ;;  %v9751_v46 = vld [vmem:[%s13325_s11 + $0x36c] ss:$16 sps:$4 sm:$0xff]   ;;  %v9746_v47 = vld [vmem:[%s13325_s11 + $0x360] ss:$16 sps:$4 sm:$0xff]  }
 0x4a7   : > { %v1800_v50 = vrot.slane %v1786_v48, %v10716_v61  ;;  %v9749_v48 = vld [vmem:[%s13325_s11 + $0x368] ss:$16 sps:$4 sm:$0xff]  }
 0x4a9   : > { %v10741_v51 = vcombine.low %v1793_v49, %v1800_v50  ;;  %v9754_v49 = vld [vmem:[%s13325_s11 + $0x384] ss:$16 sps:$4 sm:$0xff]   ;;  %v9757_v50 = vld [vmem:[%s13325_s11 + $0x38c] ss:$16 sps:$4 sm:$0xff]  }
 0x4ab   : > { %v1881_v54 = vrot.slane %v10741_v51, %v10690_v23  ;;  %v1877_v55 = vrot.slane %v10741_v51, %v10679_v20  ;;  %v1889_v57 = vrot.slane %v10741_v51, %v10693_v24 }
 0x4ad   : > { %v1915_v58 = vpack.c.bf16 %v1881_v54, %v1881_v54  ;;  %v1914_v8 = vpack.c.bf16 %v1877_v55, %v1877_v55  ;;  %v1917_v1 = vpack.c.bf16 %v1889_v57, %v1889_v57  ;;  %v9752_v54 = vld [vmem:[%s13325_s11 + $0x380] ss:$16 sps:$4 sm:$0xff]   ;;  %v9755_v55 = vld [vmem:[%s13325_s11 + $0x388] ss:$16 sps:$4 sm:$0xff]   ;;  %v9760_v57 = vld [vmem:[%s13325_s11 + $0x3a4] ss:$16 sps:$4 sm:$0xff]  }
 0x4af   : > { %3512 = vmatprep.mubr.bf16.mxu0 %v1915_v58  ;;  %3676 = vmatprep.mubr.bf16.mxu1 %v1915_v58  ;;  %v9763_v58 = vld [vmem:[%s13325_s11 + $0x3ac] ss:$16 sps:$4 sm:$0xff]  }
 0x4b0   : > { %3513 = vmatmul.mubr.bf16.vlgmr.msra.gmra.mrb[24].mxu0 %v1914_v8  ;;  %3677 = vmatmul.mubr.bf16.vlgmr.msra.gmra.mrb[24].mxu1 %v1914_v8  ;;  %v9766_v8 = vld [vmem:[%s13325_s11 + $0x3c4] ss:$16 sps:$4 sm:$0xff]  }
 0x4b1   : > { %3522 = vmatpush1.bf16.msra.mxu0 %v9680_v60  ;;  %3686 = vmatpush1.bf16.msra.mxu1 %v9683_v5  ;;  %v9758_v60 = vld [vmem:[%s13325_s11 + $0x3a0] ss:$16 sps:$4 sm:$0xff]   ;;  %v9761_v5 = vld [vmem:[%s13325_s11 + $0x3a8] ss:$16 sps:$4 sm:$0xff]  }
 0x4b2   : > { %3553 = vmatprep.mubr.bf16.mxu0 %v1917_v1  ;;  %3717 = vmatprep.mubr.bf16.mxu1 %v1917_v1  ;;  %v9767_v1 = vld [vmem:[%s13325_s11 + $0x3c8] ss:$16 sps:$4 sm:$0xff]  }
 0x4b3   : > { %3523 = vmatprep.subr.bf16.mxu0 %v9688_v13  ;;  %3687 = vmatprep.subr.bf16.mxu1 %v9691_v62  ;;  %v9769_v13 = vld [vmem:[%s13325_s11 + $0x3cc] ss:$16 sps:$4 sm:$0xff]   ;;  %v9764_v62 = vld [vmem:[%s13325_s11 + $0x3c0] ss:$16 sps:$4 sm:$0xff]  }
 0x4b5   : > { %3524 = vmatpush1.bf16.msra.mxu0 %v9686_v2  ;;  %3688 = vmatpush1.bf16.msra.mxu1 %v9689_v6  ;;  %v9772_v2 = vld [vmem:[%s13325_s11 + $0x3e4] ss:$16 sps:$4 sm:$0xff]   ;;  %v9775_v6 = vld [vmem:[%s13325_s11 + $0x3ec] ss:$16 sps:$4 sm:$0xff]  }
 0x4b6   : > { %3525 = vmatprep.subr.bf16.mxu0 %v9694_v7  ;;  %3689 = vmatprep.subr.bf16.mxu1 %v9697_v9  ;;  %v9770_v7 = vld [vmem:[%s13325_s11 + $0x3e0] ss:$16 sps:$4 sm:$0xff]   ;;  %v9773_v9 = vld [vmem:[%s13325_s11 + $0x3e8] ss:$16 sps:$4 sm:$0xff]  }
 0x4b9   : > { %3526 = vmatpush1.bf16.msra.mxu0 %v9692_v10  ;;  %3690 = vmatpush1.bf16.msra.mxu1 %v9695_v11  ;;  %v1885_v10 = vrot.slane %v10741_v51, %v10682_v21  ;;  %v9778_v11 = vld [vmem:[%s13325_s11 + $0x404] ss:$16 sps:$4 sm:$0xff]  }
 0x4ba   : > { %3527 = vmatprep.subr.bf16.mxu0 %v9700_v12  ;;  %3691 = vmatprep.subr.bf16.mxu1 %v9703_v14  ;;  %v9781_v12 = vld [vmem:[%s13325_s11 + $0x40c] ss:$16 sps:$4 sm:$0xff]   ;;  %v1897_v14 = vrot.slane %v10741_v51, %v10710_v56 }
 0x4bd   : > { %3528 = vmatpush1.bf16.msra.mxu0 %v9698_v15  ;;  %3692 = vmatpush1.bf16.msra.mxu1 %v9701_v16  ;;  %v9776_v15 = vld [vmem:[%s13325_s11 + $0x400] ss:$16 sps:$4 sm:$0xff]   ;;  %v1916_v16 = vpack.c.bf16 %v1885_v10, %v1885_v10 }
 0x4be   : > { %3529 = vmatprep.subr.bf16.mxu0 %v9706_v17  ;;  %3693 = vmatprep.subr.bf16.mxu1 %v9709_v22  ;;  %v9779_v17 = vld [vmem:[%s13325_s11 + $0x408] ss:$16 sps:$4 sm:$0xff]   ;;  %v1919_v22 = vpack.c.bf16 %v1897_v14, %v1897_v14  ;;  %v9848_v10 = vld [vmem:[%s13325_s11 + $0x580] ss:$16 sps:$4 sm:$0xff]   ;;  %v9859_v14 = vld [vmem:[%s13325_s11 + $0x5ac] ss:$16 sps:$4 sm:$0xff]  }
 0x4c1   : > { %3530 = vmatpush1.bf16.msra.mxu0 %v9704_v18  ;;  %3694 = vmatpush1.bf16.msra.mxu1 %v9707_v63  ;;  %v9784_v18 = vld [vmem:[%s13325_s11 + $0x424] ss:$16 sps:$4 sm:$0xff]   ;;  %v9787_v63 = vld [vmem:[%s13325_s11 + $0x42c] ss:$16 sps:$4 sm:$0xff]  }
 0x4c2   : > { %3531 = vmatprep.subr.bf16.mxu0 %v9712_v0  ;;  %3695 = vmatprep.subr.bf16.mxu1 %v9715_v19  ;;  %v9782_v0 = vld [vmem:[%s13325_s11 + $0x420] ss:$16 sps:$4 sm:$0xff]   ;;  %v9785_v19 = vld [vmem:[%s13325_s11 + $0x428] ss:$16 sps:$4 sm:$0xff]  }
 0x4c5   : > { %3532 = vmatpush1.bf16.msra.mxu0 %v9710_v29  ;;  %3696 = vmatpush1.bf16.msra.mxu1 %v9713_v30  ;;  %v9790_v29 = vld [vmem:[%s13325_s11 + $0x444] ss:$16 sps:$4 sm:$0xff]   ;;  %v9793_v30 = vld [vmem:[%s13325_s11 + $0x44c] ss:$16 sps:$4 sm:$0xff]  }
 0x4c6   : > { %3533 = vmatprep.subr.bf16.mxu0 %v9718_v31  ;;  %3697 = vmatprep.subr.bf16.mxu1 %v9721_v3  ;;  %v9788_v31 = vld [vmem:[%s13325_s11 + $0x440] ss:$16 sps:$4 sm:$0xff]   ;;  %v9791_v3 = vld [vmem:[%s13325_s11 + $0x448] ss:$16 sps:$4 sm:$0xff]  }
 0x4c9   : > { %3534 = vmatpush1.bf16.msra.mxu0 %v9716_v4  ;;  %3698 = vmatpush1.bf16.msra.mxu1 %v9719_v32  ;;  %v9796_v4 = vld [vmem:[%s13325_s11 + $0x464] ss:$16 sps:$4 sm:$0xff]   ;;  %v9799_v32 = vld [vmem:[%s13325_s11 + $0x46c] ss:$16 sps:$4 sm:$0xff]  }
 0x4ca   : > { %3535 = vmatprep.subr.bf16.mxu0 %v9724_v33  ;;  %3699 = vmatprep.subr.bf16.mxu1 %v9727_v34  ;;  %v9794_v33 = vld [vmem:[%s13325_s11 + $0x460] ss:$16 sps:$4 sm:$0xff]   ;;  %v9797_v34 = vld [vmem:[%s13325_s11 + $0x468] ss:$16 sps:$4 sm:$0xff]  }
 0x4cd   : > { %3536 = vmatpush1.bf16.msra.mxu0 %v9722_v25  ;;  %3700 = vmatpush1.bf16.msra.mxu1 %v9725_v26  ;;  %v9802_v25 = vld [vmem:[%s13325_s11 + $0x484] ss:$16 sps:$4 sm:$0xff]   ;;  %v9805_v26 = vld [vmem:[%s13325_s11 + $0x48c] ss:$16 sps:$4 sm:$0xff]  }
 0x4ce   : > { %3537 = vmatprep.subr.bf16.mxu0 %v9730_v35  ;;  %3701 = vmatprep.subr.bf16.mxu1 %v9733_v36  ;;  %v9800_v35 = vld [vmem:[%s13325_s11 + $0x480] ss:$16 sps:$4 sm:$0xff]   ;;  %v9803_v36 = vld [vmem:[%s13325_s11 + $0x488] ss:$16 sps:$4 sm:$0xff]  }
 0x4d1   : > { %3538 = vmatpush1.bf16.msra.mxu0 %v9728_v37  ;;  %3702 = vmatpush1.bf16.msra.mxu1 %v9731_v38  ;;  %v9808_v37 = vld [vmem:[%s13325_s11 + $0x4a4] ss:$16 sps:$4 sm:$0xff]   ;;  %v9811_v38 = vld [vmem:[%s13325_s11 + $0x4ac] ss:$16 sps:$4 sm:$0xff]  }
 0x4d2   : > { %3539 = vmatprep.subr.bf16.mxu0 %v9736_v27  ;;  %3703 = vmatprep.subr.bf16.mxu1 %v9739_v28  ;;  %v9806_v27 = vld [vmem:[%s13325_s11 + $0x4a0] ss:$16 sps:$4 sm:$0xff]   ;;  %v9809_v28 = vld [vmem:[%s13325_s11 + $0x4a8] ss:$16 sps:$4 sm:$0xff]  }
 0x4d5   : > { %3540 = vmatpush1.bf16.msra.mxu0 %v9734_v39  ;;  %3704 = vmatpush1.bf16.msra.mxu1 %v9737_v40  ;;  %v9814_v39 = vld [vmem:[%s13325_s11 + $0x4c4] ss:$16 sps:$4 sm:$0xff]   ;;  %v9817_v40 = vld [vmem:[%s13325_s11 + $0x4cc] ss:$16 sps:$4 sm:$0xff]  }
 0x4d6   : > { %3541 = vmatprep.subr.bf16.mxu0 %v9742_v41  ;;  %3705 = vmatprep.subr.bf16.mxu1 %v9745_v42  ;;  %v9812_v41 = vld [vmem:[%s13325_s11 + $0x4c0] ss:$16 sps:$4 sm:$0xff]   ;;  %v9815_v42 = vld [vmem:[%s13325_s11 + $0x4c8] ss:$16 sps:$4 sm:$0xff]  }
 0x4d9   : > { %3542 = vmatpush1.bf16.msra.mxu0 %v9740_v43  ;;  %3706 = vmatpush1.bf16.msra.mxu1 %v9743_v44  ;;  %v9820_v43 = vld [vmem:[%s13325_s11 + $0x4e4] ss:$16 sps:$4 sm:$0xff]   ;;  %v9823_v44 = vld [vmem:[%s13325_s11 + $0x4ec] ss:$16 sps:$4 sm:$0xff]  }
 0x4da   : > { %3543 = vmatprep.subr.bf16.mxu0 %v9748_v45  ;;  %3707 = vmatprep.subr.bf16.mxu1 %v9751_v46  ;;  %v9818_v45 = vld [vmem:[%s13325_s11 + $0x4e0] ss:$16 sps:$4 sm:$0xff]   ;;  %v9821_v46 = vld [vmem:[%s13325_s11 + $0x4e8] ss:$16 sps:$4 sm:$0xff]  }
 0x4dd   : > { %3544 = vmatpush1.bf16.msra.mxu0 %v9746_v47  ;;  %3708 = vmatpush1.bf16.msra.mxu1 %v9749_v48  ;;  %v9826_v47 = vld [vmem:[%s13325_s11 + $0x504] ss:$16 sps:$4 sm:$0xff]   ;;  %v9829_v48 = vld [vmem:[%s13325_s11 + $0x50c] ss:$16 sps:$4 sm:$0xff]  }
 0x4de   : > { %3545 = vmatprep.subr.bf16.mxu0 %v9754_v49  ;;  %3709 = vmatprep.subr.bf16.mxu1 %v9757_v50  ;;  %v9824_v49 = vld [vmem:[%s13325_s11 + $0x500] ss:$16 sps:$4 sm:$0xff]   ;;  %v9827_v50 = vld [vmem:[%s13325_s11 + $0x508] ss:$16 sps:$4 sm:$0xff]  }
 0x4e1   : > { %3546 = vmatpush1.bf16.msra.mxu0 %v9752_v54  ;;  %3710 = vmatpush1.bf16.msra.mxu1 %v9755_v55  ;;  %v9832_v54 = vld [vmem:[%s13325_s11 + $0x524] ss:$16 sps:$4 sm:$0xff]   ;;  %v9835_v55 = vld [vmem:[%s13325_s11 + $0x52c] ss:$16 sps:$4 sm:$0xff]  }
 0x4e2   : > { %3547 = vmatprep.subr.bf16.mxu0 %v9760_v57  ;;  %3711 = vmatprep.subr.bf16.mxu1 %v9763_v58  ;;  %v9830_v57 = vld [vmem:[%s13325_s11 + $0x520] ss:$16 sps:$4 sm:$0xff]   ;;  %v9833_v58 = vld [vmem:[%s13325_s11 + $0x528] ss:$16 sps:$4 sm:$0xff]  }
 0x4e5   : > { %3548 = vmatpush1.bf16.msra.mxu0 %v9758_v60  ;;  %3712 = vmatpush1.bf16.msra.mxu1 %v9761_v5  ;;  %v9838_v60 = vld [vmem:[%s13325_s11 + $0x544] ss:$16 sps:$4 sm:$0xff]   ;;  %v9841_v5 = vld [vmem:[%s13325_s11 + $0x54c] ss:$16 sps:$4 sm:$0xff]  }
 0x4e6   : > { %3549 = vmatprep.subr.bf16.mxu0 %v9766_v8  ;;  %3713 = vmatprep.subr.bf16.mxu1 %v9769_v13  ;;  %v9836_v8 = vld [vmem:[%s13325_s11 + $0x540] ss:$16 sps:$4 sm:$0xff]   ;;  %v9839_v13 = vld [vmem:[%s13325_s11 + $0x548] ss:$16 sps:$4 sm:$0xff]  }
 0x4e9   : > { %3550 = vmatpush1.bf16.msra.mxu0 %v9764_v62  ;;  %3714 = vmatpush1.bf16.msra.mxu1 %v9767_v1  ;;  %v9844_v62 = vld [vmem:[%s13325_s11 + $0x564] ss:$16 sps:$4 sm:$0xff]   ;;  %v9847_v1 = vld [vmem:[%s13325_s11 + $0x56c] ss:$16 sps:$4 sm:$0xff]  }
 0x4ea   : > { %3551 = vmatprep.subr.bf16.mxu0 %v9772_v2  ;;  %3715 = vmatprep.subr.bf16.mxu1 %v9775_v6  ;;  %v9842_v2 = vld [vmem:[%s13325_s11 + $0x560] ss:$16 sps:$4 sm:$0xff]   ;;  %v9845_v6 = vld [vmem:[%s13325_s11 + $0x568] ss:$16 sps:$4 sm:$0xff]  }
 0x4ed   : > { %3552 = vmatpush1.bf16.msra.mxu0 %v9770_v7  ;;  %3716 = vmatpush1.bf16.msra.mxu1 %v9773_v9  ;;  %v9850_v7 = vld [vmem:[%s13325_s11 + $0x584] ss:$16 sps:$4 sm:$0xff]   ;;  %v9853_v9 = vld [vmem:[%s13325_s11 + $0x58c] ss:$16 sps:$4 sm:$0xff]  }
 0x4ee   : > { %3562 = vmatprep.subr.bf16.mxu0 %v9778_v11  ;;  %3726 = vmatprep.subr.bf16.mxu1 %v9781_v12  ;;  %v9851_v11 = vld [vmem:[%s13325_s11 + $0x588] ss:$16 sps:$4 sm:$0xff]   ;;  %v9856_v12 = vld [vmem:[%s13325_s11 + $0x5a4] ss:$16 sps:$4 sm:$0xff]  }
 0x4f0   : > { %3554 = vmatmul.mubr.bf16.vlgmr.msra.gmra.mrb[24].mxu0 %v1916_v16  ;;  %3718 = vmatmul.mubr.bf16.vlgmr.msra.gmra.mrb[24].mxu1 %v1916_v16  ;;  %v9857_v16 = vld [vmem:[%s13325_s11 + $0x5a8] ss:$16 sps:$4 sm:$0xff]  }
 0x4f1   : > { %3563 = vmatpush1.bf16.msra.mxu0 %v9776_v15  ;;  %3594 = vmatprep.mubr.bf16.mxu0 %v1919_v22  ;;  %v9854_v15 = vld [vmem:[%s13325_s11 + $0x5a0] ss:$16 sps:$4 sm:$0xff]  }
 0x4f2   : > { %3727 = vmatpush1.bf16.msra.mxu1 %v9779_v17  ;;  %3758 = vmatprep.mubr.bf16.mxu1 %v1919_v22  ;;  %v9862_v17 = vld [vmem:[%s13325_s11 + $0x5c4] ss:$16 sps:$4 sm:$0xff]   ;;  %v9865_v22 = vld [vmem:[%s13325_s11 + $0x5cc] ss:$16 sps:$4 sm:$0xff]  }
 0x4f3   : > { %3564 = vmatprep.subr.bf16.mxu0 %v9784_v18  ;;  %3728 = vmatprep.subr.bf16.mxu1 %v9787_v63  ;;  %v9860_v18 = vld [vmem:[%s13325_s11 + $0x5c0] ss:$16 sps:$4 sm:$0xff]   ;;  %v9863_v63 = vld [vmem:[%s13325_s11 + $0x5c8] ss:$16 sps:$4 sm:$0xff]  }
 0x4f5   : > { %3565 = vmatpush1.bf16.msra.mxu0 %v9782_v0  ;;  %v9868_v0 = vld [vmem:[%s13325_s11 + $0x5e4] ss:$16 sps:$4 sm:$0xff]  }
 0x4f6   : > { %3729 = vmatpush1.bf16.msra.mxu1 %v9785_v19  ;;  %3566 = vmatprep.subr.bf16.mxu0 %v9790_v29  ;;  %v9871_v19 = vld [vmem:[%s13325_s11 + $0x5ec] ss:$16 sps:$4 sm:$0xff]   ;;  %v9866_v29 = vld [vmem:[%s13325_s11 + $0x5e0] ss:$16 sps:$4 sm:$0xff]  }
 0x4f7   : > { %3730 = vmatprep.subr.bf16.mxu1 %v9793_v30  ;;  %v9869_v30 = vld [vmem:[%s13325_s11 + $0x5e8] ss:$16 sps:$4 sm:$0xff]  }
 0x4f9   : > { %3567 = vmatpush1.bf16.msra.mxu0 %v9788_v31  ;;  %v1893_v31 = vrot.slane %v10741_v51, %v10704_v52 }
 0x4fa   : > { %3731 = vmatpush1.bf16.msra.mxu1 %v9791_v3  ;;  %3568 = vmatprep.subr.bf16.mxu0 %v9796_v4  ;;  %v9874_v3 = vld [vmem:[%s13325_s11 + $0x604] ss:$16 sps:$4 sm:$0xff]   ;;  %v9877_v4 = vld [vmem:[%s13325_s11 + $0x60c] ss:$16 sps:$4 sm:$0xff]  }
 0x4fb   : > { %3732 = vmatprep.subr.bf16.mxu1 %v9799_v32  ;;  %v1905_v32 = vrot.slane %v10741_v51, %v10713_v59 }
 0x4fd   : > { %3569 = vmatpush1.bf16.msra.mxu0 %v9794_v33  ;;  %v9872_v33 = vld [vmem:[%s13325_s11 + $0x600] ss:$16 sps:$4 sm:$0xff]  }
 0x4fe   : > { %3733 = vmatpush1.bf16.msra.mxu1 %v9797_v34  ;;  %3570 = vmatprep.subr.bf16.mxu0 %v9802_v25  ;;  %v1918_v34 = vpack.c.bf16 %v1893_v31, %v1893_v31  ;;  %v9875_v25 = vld [vmem:[%s13325_s11 + $0x608] ss:$16 sps:$4 sm:$0xff]   ;;  %v9944_v31 = vld [vmem:[%s13325_s11 + $0x780] ss:$16 sps:$4 sm:$0xff]  }
 0x4ff   : > { %3734 = vmatprep.subr.bf16.mxu1 %v9805_v26  ;;  %v9880_v26 = vld [vmem:[%s13325_s11 + $0x624] ss:$16 sps:$4 sm:$0xff]  }
 0x501   : > { %3571 = vmatpush1.bf16.msra.mxu0 %v9800_v35  ;;  %v1921_v35 = vpack.c.bf16 %v1905_v32, %v1905_v32  ;;  %v9955_v32 = vld [vmem:[%s13325_s11 + $0x7ac] ss:$16 sps:$4 sm:$0xff]  }
 0x502   : > { %3735 = vmatpush1.bf16.msra.mxu1 %v9803_v36  ;;  %3572 = vmatprep.subr.bf16.mxu0 %v9808_v37  ;;  %v9883_v36 = vld [vmem:[%s13325_s11 + $0x62c] ss:$16 sps:$4 sm:$0xff]   ;;  %v9878_v37 = vld [vmem:[%s13325_s11 + $0x620] ss:$16 sps:$4 sm:$0xff]  }
 0x503   : > { %3736 = vmatprep.subr.bf16.mxu1 %v9811_v38  ;;  %v9881_v38 = vld [vmem:[%s13325_s11 + $0x628] ss:$16 sps:$4 sm:$0xff]  }
 0x505   : > { %3573 = vmatpush1.bf16.msra.mxu0 %v9806_v27  ;;  %v9886_v27 = vld [vmem:[%s13325_s11 + $0x644] ss:$16 sps:$4 sm:$0xff]  }
 0x506   : > { %3737 = vmatpush1.bf16.msra.mxu1 %v9809_v28  ;;  %3574 = vmatprep.subr.bf16.mxu0 %v9814_v39  ;;  %v9889_v28 = vld [vmem:[%s13325_s11 + $0x64c] ss:$16 sps:$4 sm:$0xff]   ;;  %v9884_v39 = vld [vmem:[%s13325_s11 + $0x640] ss:$16 sps:$4 sm:$0xff]  }
 0x507   : > { %3738 = vmatprep.subr.bf16.mxu1 %v9817_v40  ;;  %v9887_v40 = vld [vmem:[%s13325_s11 + $0x648] ss:$16 sps:$4 sm:$0xff]  }
 0x509   : > { %3575 = vmatpush1.bf16.msra.mxu0 %v9812_v41  ;;  %v9892_v41 = vld [vmem:[%s13325_s11 + $0x664] ss:$16 sps:$4 sm:$0xff]  }
 0x50a   : > { %3739 = vmatpush1.bf16.msra.mxu1 %v9815_v42  ;;  %3576 = vmatprep.subr.bf16.mxu0 %v9820_v43  ;;  %v9895_v42 = vld [vmem:[%s13325_s11 + $0x66c] ss:$16 sps:$4 sm:$0xff]   ;;  %v9890_v43 = vld [vmem:[%s13325_s11 + $0x660] ss:$16 sps:$4 sm:$0xff]  }
 0x50b   : > { %3740 = vmatprep.subr.bf16.mxu1 %v9823_v44  ;;  %v9893_v44 = vld [vmem:[%s13325_s11 + $0x668] ss:$16 sps:$4 sm:$0xff]  }
 0x50d   : > { %3577 = vmatpush1.bf16.msra.mxu0 %v9818_v45  ;;  %v9898_v45 = vld [vmem:[%s13325_s11 + $0x684] ss:$16 sps:$4 sm:$0xff]  }
 0x50e   : > { %3741 = vmatpush1.bf16.msra.mxu1 %v9821_v46  ;;  %3578 = vmatprep.subr.bf16.mxu0 %v9826_v47  ;;  %v9901_v46 = vld [vmem:[%s13325_s11 + $0x68c] ss:$16 sps:$4 sm:$0xff]   ;;  %v9896_v47 = vld [vmem:[%s13325_s11 + $0x680] ss:$16 sps:$4 sm:$0xff]  }
 0x50f   : > { %3742 = vmatprep.subr.bf16.mxu1 %v9829_v48  ;;  %v9899_v48 = vld [vmem:[%s13325_s11 + $0x688] ss:$16 sps:$4 sm:$0xff]  }
 0x511   : > { %3579 = vmatpush1.bf16.msra.mxu0 %v9824_v49  ;;  %v9904_v49 = vld [vmem:[%s13325_s11 + $0x6a4] ss:$16 sps:$4 sm:$0xff]  }
 0x512   : > { %3743 = vmatpush1.bf16.msra.mxu1 %v9827_v50  ;;  %3580 = vmatprep.subr.bf16.mxu0 %v9832_v54  ;;  %v9907_v50 = vld [vmem:[%s13325_s11 + $0x6ac] ss:$16 sps:$4 sm:$0xff]   ;;  %v9902_v54 = vld [vmem:[%s13325_s11 + $0x6a0] ss:$16 sps:$4 sm:$0xff]  }
 0x513   : > { %3744 = vmatprep.subr.bf16.mxu1 %v9835_v55  ;;  %v9905_v55 = vld [vmem:[%s13325_s11 + $0x6a8] ss:$16 sps:$4 sm:$0xff]  }
 0x515   : > { %3581 = vmatpush1.bf16.msra.mxu0 %v9830_v57  ;;  %v9910_v57 = vld [vmem:[%s13325_s11 + $0x6c4] ss:$16 sps:$4 sm:$0xff]  }
 0x516   : > { %3745 = vmatpush1.bf16.msra.mxu1 %v9833_v58  ;;  %3582 = vmatprep.subr.bf16.mxu0 %v9838_v60  ;;  %v9913_v58 = vld [vmem:[%s13325_s11 + $0x6cc] ss:$16 sps:$4 sm:$0xff]   ;;  %v9908_v60 = vld [vmem:[%s13325_s11 + $0x6c0] ss:$16 sps:$4 sm:$0xff]  }
 0x517   : > { %3746 = vmatprep.subr.bf16.mxu1 %v9841_v5  ;;  %v9911_v5 = vld [vmem:[%s13325_s11 + $0x6c8] ss:$16 sps:$4 sm:$0xff]  }
 0x519   : > { %3583 = vmatpush1.bf16.msra.mxu0 %v9836_v8  ;;  %v9916_v8 = vld [vmem:[%s13325_s11 + $0x6e4] ss:$16 sps:$4 sm:$0xff]  }
 0x51a   : > { %3747 = vmatpush1.bf16.msra.mxu1 %v9839_v13  ;;  %3584 = vmatprep.subr.bf16.mxu0 %v9844_v62  ;;  %v9919_v13 = vld [vmem:[%s13325_s11 + $0x6ec] ss:$16 sps:$4 sm:$0xff]   ;;  %v9914_v62 = vld [vmem:[%s13325_s11 + $0x6e0] ss:$16 sps:$4 sm:$0xff]  }
 0x51b   : > { %3748 = vmatprep.subr.bf16.mxu1 %v9847_v1  ;;  %v9917_v1 = vld [vmem:[%s13325_s11 + $0x6e8] ss:$16 sps:$4 sm:$0xff]  }
 0x51d   : > { %3585 = vmatpush1.bf16.msra.mxu0 %v9842_v2  ;;  %v9922_v2 = vld [vmem:[%s13325_s11 + $0x704] ss:$16 sps:$4 sm:$0xff]  }
 0x51e   : > { %3749 = vmatpush1.bf16.msra.mxu1 %v9845_v6  ;;  %3586 = vmatprep.subr.bf16.mxu0 %v9850_v7  ;;  %v9925_v6 = vld [vmem:[%s13325_s11 + $0x70c] ss:$16 sps:$4 sm:$0xff]   ;;  %v9920_v7 = vld [vmem:[%s13325_s11 + $0x700] ss:$16 sps:$4 sm:$0xff]  }
 0x51f   : > { %3750 = vmatprep.subr.bf16.mxu1 %v9853_v9  ;;  %v9923_v9 = vld [vmem:[%s13325_s11 + $0x708] ss:$16 sps:$4 sm:$0xff]  }
 0x521   : > { %3587 = vmatpush1.bf16.msra.mxu0 %v9848_v10  ;;  %v9928_v10 = vld [vmem:[%s13325_s11 + $0x724] ss:$16 sps:$4 sm:$0xff]  }
 0x522   : > { %3751 = vmatpush1.bf16.msra.mxu1 %v9851_v11  ;;  %3588 = vmatprep.subr.bf16.mxu0 %v9856_v12  ;;  %v9931_v11 = vld [vmem:[%s13325_s11 + $0x72c] ss:$16 sps:$4 sm:$0xff]   ;;  %v9926_v12 = vld [vmem:[%s13325_s11 + $0x720] ss:$16 sps:$4 sm:$0xff]  }
 0x523   : > { %3752 = vmatprep.subr.bf16.mxu1 %v9859_v14  ;;  %v9929_v14 = vld [vmem:[%s13325_s11 + $0x728] ss:$16 sps:$4 sm:$0xff]  }
 0x525   : > { %3589 = vmatpush1.bf16.msra.mxu0 %v9854_v15  ;;  %v9934_v15 = vld [vmem:[%s13325_s11 + $0x744] ss:$16 sps:$4 sm:$0xff]  }
 0x526   : > { %3753 = vmatpush1.bf16.msra.mxu1 %v9857_v16  ;;  %3590 = vmatprep.subr.bf16.mxu0 %v9862_v17  ;;  %v9937_v16 = vld [vmem:[%s13325_s11 + $0x74c] ss:$16 sps:$4 sm:$0xff]   ;;  %v9932_v17 = vld [vmem:[%s13325_s11 + $0x740] ss:$16 sps:$4 sm:$0xff]  }
 0x527   : > { %3754 = vmatprep.subr.bf16.mxu1 %v9865_v22  ;;  %v9935_v22 = vld [vmem:[%s13325_s11 + $0x748] ss:$16 sps:$4 sm:$0xff]  }
 0x529   : > { %3591 = vmatpush1.bf16.msra.mxu0 %v9860_v18  ;;  %v9940_v18 = vld [vmem:[%s13325_s11 + $0x764] ss:$16 sps:$4 sm:$0xff]  }
 0x52a   : > { %3755 = vmatpush1.bf16.msra.mxu1 %v9863_v63  ;;  %3592 = vmatprep.subr.bf16.mxu0 %v9868_v0  ;;  %v9943_v63 = vld [vmem:[%s13325_s11 + $0x76c] ss:$16 sps:$4 sm:$0xff]   ;;  %v9938_v0 = vld [vmem:[%s13325_s11 + $0x760] ss:$16 sps:$4 sm:$0xff]  }
 0x52b   : > { %3756 = vmatprep.subr.bf16.mxu1 %v9871_v19  ;;  %v9941_v19 = vld [vmem:[%s13325_s11 + $0x768] ss:$16 sps:$4 sm:$0xff]  }
 0x52d   : > { %3593 = vmatpush1.bf16.msra.mxu0 %v9866_v29  ;;  %v9946_v29 = vld [vmem:[%s13325_s11 + $0x784] ss:$16 sps:$4 sm:$0xff]  }
 0x52e   : > { %3757 = vmatpush1.bf16.msra.mxu1 %v9869_v30  ;;  %3603 = vmatprep.subr.bf16.mxu0 %v9874_v3  ;;  %v9949_v30 = vld [vmem:[%s13325_s11 + $0x78c] ss:$16 sps:$4 sm:$0xff]   ;;  %v9947_v3 = vld [vmem:[%s13325_s11 + $0x788] ss:$16 sps:$4 sm:$0xff]  }
 0x52f   : > { %3767 = vmatprep.subr.bf16.mxu1 %v9877_v4  ;;  %v9952_v4 = vld [vmem:[%s13325_s11 + $0x7a4] ss:$16 sps:$4 sm:$0xff]  }
 0x530   : > { %3595 = vmatmul.mubr.bf16.vlgmr.msra.gmra.mrb[24].mxu0 %v1918_v34 }
 0x531   : > { %3759 = vmatmul.mubr.bf16.vlgmr.msra.gmra.mrb[24].mxu1 %v1918_v34  ;;  %3604 = vmatpush1.bf16.msra.mxu0 %v9872_v33  ;;  %v9950_v33 = vld [vmem:[%s13325_s11 + $0x7a0] ss:$16 sps:$4 sm:$0xff]   ;;  %v9953_v34 = vld [vmem:[%s13325_s11 + $0x7a8] ss:$16 sps:$4 sm:$0xff]  }
 0x532   : > { %3635 = vmatprep.mubr.bf16.mxu0 %v1921_v35  ;;  %3768 = vmatpush1.bf16.msra.mxu1 %v9875_v25  ;;  %v9958_v25 = vld [vmem:[%s13325_s11 + $0x7c4] ss:$16 sps:$4 sm:$0xff]  }
 0x533   : > { %3799 = vmatprep.mubr.bf16.mxu1 %v1921_v35  ;;  %3605 = vmatprep.subr.bf16.mxu0 %v9880_v26  ;;  %v9961_v26 = vld [vmem:[%s13325_s11 + $0x7cc] ss:$16 sps:$4 sm:$0xff]   ;;  %v9956_v35 = vld [vmem:[%s13325_s11 + $0x7c0] ss:$16 sps:$4 sm:$0xff]  }
 0x534   : > { %3769 = vmatprep.subr.bf16.mxu1 %v9883_v36  ;;  %v9959_v36 = vld [vmem:[%s13325_s11 + $0x7c8] ss:$16 sps:$4 sm:$0xff]  }
 0x535   : > { %3606 = vmatpush1.bf16.msra.mxu0 %v9878_v37  ;;  %v9964_v37 = vld [vmem:[%s13325_s11 + $0x7e4] ss:$16 sps:$4 sm:$0xff]  }
 0x536   : > { %3770 = vmatpush1.bf16.msra.mxu1 %v9881_v38  ;;  %3607 = vmatprep.subr.bf16.mxu0 %v9886_v27  ;;  %v9967_v38 = vld [vmem:[%s13325_s11 + $0x7ec] ss:$16 sps:$4 sm:$0xff]   ;;  %v9962_v27 = vld [vmem:[%s13325_s11 + $0x7e0] ss:$16 sps:$4 sm:$0xff]  }
 0x537   : > { %3771 = vmatprep.subr.bf16.mxu1 %v9889_v28  ;;  %v9965_v28 = vld [vmem:[%s13325_s11 + $0x7e8] ss:$16 sps:$4 sm:$0xff]  }
 0x539   : > { %3608 = vmatpush1.bf16.msra.mxu0 %v9884_v39  ;;  %v1901_v39 = vrot.slane %v10741_v51, %v10707_v53  ;;  %v9971_v51 = vld [vmem:[%s13327_s13 + $0x10] ss:$8 sps:$4 sm:$0xff]  }
 0x53a   : > { %3772 = vmatpush1.bf16.msra.mxu1 %v9887_v40  ;;  %3609 = vmatprep.subr.bf16.mxu0 %v9892_v41  ;;  %v9970_v40 = vld [vmem:[%s13327_s13 + $0x4] ss:$8 sps:$4 sm:$0xff]   ;;  %v9968_v41 = vld [vmem:[%s13327_s13] ss:$8 sps:$4 sm:$0xff]  }
 0x53b   : > { %3773 = vmatprep.subr.bf16.mxu1 %v9895_v42  ;;  %v1920_v42 = vpack.c.bf16 %v1901_v39, %v1901_v39  ;;  %v4458_v39 = vld [vmem:[%s13329_s15 + $0x500] sm:$0xff] }
 0x53d   : > { %3610 = vmatpush1.bf16.msra.mxu0 %v9890_v43  ;;  %v9973_v43 = vld [vmem:[%s13327_s13 + $0x14] ss:$8 sps:$4 sm:$0xff]  }
 0x53e   : > { %3774 = vmatpush1.bf16.msra.mxu1 %v9893_v44  ;;  %3611 = vmatprep.subr.bf16.mxu0 %v9898_v45  ;;  %v9976_v44 = vld [vmem:[%s13327_s13 + $0x24] ss:$8 sps:$4 sm:$0xff]   ;;  %v9974_v45 = vld [vmem:[%s13327_s13 + $0x20] ss:$8 sps:$4 sm:$0xff]  }
 0x53f   : > { %3775 = vmatprep.subr.bf16.mxu1 %v9901_v46  ;;  %v9979_v46 = vld [vmem:[%s13327_s13 + $0x34] ss:$8 sps:$4 sm:$0xff]  }
 0x541   : > { %3612 = vmatpush1.bf16.msra.mxu0 %v9896_v47  ;;  %v9977_v47 = vld [vmem:[%s13327_s13 + $0x30] ss:$8 sps:$4 sm:$0xff]  }
 0x542   : > { %3776 = vmatpush1.bf16.msra.mxu1 %v9899_v48  ;;  %3613 = vmatprep.subr.bf16.mxu0 %v9904_v49  ;;  %v9982_v48 = vld [vmem:[%s13327_s13 + $0x44] ss:$8 sps:$4 sm:$0xff]   ;;  %v9980_v49 = vld [vmem:[%s13327_s13 + $0x40] ss:$8 sps:$4 sm:$0xff]  }
 0x543   : > { %3777 = vmatprep.subr.bf16.mxu1 %v9907_v50  ;;  %v9985_v50 = vld [vmem:[%s13327_s13 + $0x54] ss:$8 sps:$4 sm:$0xff]  }
 0x545   : > { %3614 = vmatpush1.bf16.msra.mxu0 %v9902_v54  ;;  %v9983_v54 = vld [vmem:[%s13327_s13 + $0x50] ss:$8 sps:$4 sm:$0xff]  }
 0x546   : > { %3778 = vmatpush1.bf16.msra.mxu1 %v9905_v55  ;;  %3615 = vmatprep.subr.bf16.mxu0 %v9910_v57  ;;  %v9988_v55 = vld [vmem:[%s13327_s13 + $0x64] ss:$8 sps:$4 sm:$0xff]   ;;  %v9986_v57 = vld [vmem:[%s13327_s13 + $0x60] ss:$8 sps:$4 sm:$0xff]  }
 0x547   : > { %3779 = vmatprep.subr.bf16.mxu1 %v9913_v58  ;;  %v9991_v58 = vld [vmem:[%s13327_s13 + $0x74] ss:$8 sps:$4 sm:$0xff]  }
 0x549   : > { %3616 = vmatpush1.bf16.msra.mxu0 %v9908_v60  ;;  %v9989_v60 = vld [vmem:[%s13327_s13 + $0x70] ss:$8 sps:$4 sm:$0xff]  }
 0x54a   : > { %3780 = vmatpush1.bf16.msra.mxu1 %v9911_v5  ;;  %3617 = vmatprep.subr.bf16.mxu0 %v9916_v8  ;;  %v9994_v5 = vld [vmem:[%s13327_s13 + $0x84] ss:$8 sps:$4 sm:$0xff]   ;;  %v9992_v8 = vld [vmem:[%s13327_s13 + $0x80] ss:$8 sps:$4 sm:$0xff]  }
 0x54b   : > { %3781 = vmatprep.subr.bf16.mxu1 %v9919_v13  ;;  %v9997_v13 = vld [vmem:[%s13327_s13 + $0x94] ss:$8 sps:$4 sm:$0xff]  }
 0x54d   : > { %3618 = vmatpush1.bf16.msra.mxu0 %v9914_v62  ;;  %v9995_v62 = vld [vmem:[%s13327_s13 + $0x90] ss:$8 sps:$4 sm:$0xff]  }
 0x54e   : > { %3782 = vmatpush1.bf16.msra.mxu1 %v9917_v1  ;;  %3619 = vmatprep.subr.bf16.mxu0 %v9922_v2  ;;  %v10000_v1 = vld [vmem:[%s13327_s13 + $0xa4] ss:$8 sps:$4 sm:$0xff]   ;;  %v9998_v2 = vld [vmem:[%s13327_s13 + $0xa0] ss:$8 sps:$4 sm:$0xff]  }
 0x54f   : > { %3783 = vmatprep.subr.bf16.mxu1 %v9925_v6  ;;  %v10003_v6 = vld [vmem:[%s13327_s13 + $0xb4] ss:$8 sps:$4 sm:$0xff]  }
 0x551   : > { %3620 = vmatpush1.bf16.msra.mxu0 %v9920_v7  ;;  %v10001_v7 = vld [vmem:[%s13327_s13 + $0xb0] ss:$8 sps:$4 sm:$0xff]  }
 0x552   : > { %3784 = vmatpush1.bf16.msra.mxu1 %v9923_v9  ;;  %3621 = vmatprep.subr.bf16.mxu0 %v9928_v10  ;;  %v10006_v9 = vld [vmem:[%s13327_s13 + $0xc4] ss:$8 sps:$4 sm:$0xff]   ;;  %v10004_v10 = vld [vmem:[%s13327_s13 + $0xc0] ss:$8 sps:$4 sm:$0xff]  }
 0x553   : > { %3785 = vmatprep.subr.bf16.mxu1 %v9931_v11  ;;  %v10009_v11 = vld [vmem:[%s13327_s13 + $0xd4] ss:$8 sps:$4 sm:$0xff]  }
 0x555   : > { %3622 = vmatpush1.bf16.msra.mxu0 %v9926_v12  ;;  %v10007_v12 = vld [vmem:[%s13327_s13 + $0xd0] ss:$8 sps:$4 sm:$0xff]  }
 0x556   : > { %3786 = vmatpush1.bf16.msra.mxu1 %v9929_v14  ;;  %3623 = vmatprep.subr.bf16.mxu0 %v9934_v15  ;;  %v10012_v14 = vld [vmem:[%s13327_s13 + $0xe4] ss:$8 sps:$4 sm:$0xff]   ;;  %v10010_v15 = vld [vmem:[%s13327_s13 + $0xe0] ss:$8 sps:$4 sm:$0xff]  }
 0x557   : > { %3787 = vmatprep.subr.bf16.mxu1 %v9937_v16  ;;  %v10015_v16 = vld [vmem:[%s13327_s13 + $0xf4] ss:$8 sps:$4 sm:$0xff]  }
 0x559   : > { %3624 = vmatpush1.bf16.msra.mxu0 %v9932_v17  ;;  %v10013_v17 = vld [vmem:[%s13327_s13 + $0xf0] ss:$8 sps:$4 sm:$0xff]  }
 0x55a   : > { %3788 = vmatpush1.bf16.msra.mxu1 %v9935_v22  ;;  %3625 = vmatprep.subr.bf16.mxu0 %v9940_v18  ;;  %v10018_v22 = vld [vmem:[%s13327_s13 + $0x104] ss:$8 sps:$4 sm:$0xff]  }
 0x55b   : > { %3789 = vmatprep.subr.bf16.mxu1 %v9943_v63  ;;  %v4298_v18 = vld [vmem:[%s13329_s15] sm:$0xff] }
 0x55c   : > { %v4314_v63 = vld [vmem:[%s13329_s15 + $0x80] sm:$0xff] }
 0x55d   : > { %3626 = vmatpush1.bf16.msra.mxu0 %v9938_v0  ;;  %v8931_v0 = vcombine.low %v4298_v18, %v4314_v63 }
 0x55e   : > { %3790 = vmatpush1.bf16.msra.mxu1 %v9941_v19  ;;  %3627 = vmatprep.subr.bf16.mxu0 %v9946_v29  ;;  %v8932_v19 = vcombine.high %v4298_v18, %v4314_v63  ;;  %v4330_v29 = vld [vmem:[%s13329_s15 + $0x100] sm:$0xff] }
 0x55f   : > { %3791 = vmatprep.subr.bf16.mxu1 %v9949_v30  ;;  %v4346_v30 = vld [vmem:[%s13329_s15 + $0x180] sm:$0xff] }
 0x561   : > { %3628 = vmatpush1.bf16.msra.mxu0 %v9944_v31  ;;  %v8964_v31 = vcombine.high %v4330_v29, %v4346_v30 }
 0x562   : > { %3792 = vmatpush1.bf16.msra.mxu1 %v9947_v3  ;;  %3629 = vmatprep.subr.bf16.mxu0 %v9952_v4  ;;  %v8963_v3 = vcombine.low %v4330_v29, %v4346_v30  ;;  %v4362_v4 = vld [vmem:[%s13329_s15 + $0x200] sm:$0xff] }
 0x563   : > { %3793 = vmatprep.subr.bf16.mxu1 %v9955_v32  ;;  %v4378_v32 = vld [vmem:[%s13329_s15 + $0x280] sm:$0xff] }
 0x565   : > { %3630 = vmatpush1.bf16.msra.mxu0 %v9950_v33  ;;  %v8996_v33 = vcombine.high %v4362_v4, %v4378_v32 }
 0x566   : > { %3794 = vmatpush1.bf16.msra.mxu1 %v9953_v34  ;;  %3631 = vmatprep.subr.bf16.mxu0 %v9958_v25  ;;  %v8995_v34 = vcombine.low %v4362_v4, %v4378_v32  ;;  %v4394_v25 = vld [vmem:[%s13329_s15 + $0x300] sm:$0xff] }
 0x567   : > { %3795 = vmatprep.subr.bf16.mxu1 %v9961_v26  ;;  %v4410_v26 = vld [vmem:[%s13329_s15 + $0x380] sm:$0xff] }
 0x569   : > { %3632 = vmatpush1.bf16.msra.mxu0 %v9956_v35  ;;  %v9028_v35 = vcombine.high %v4394_v25, %v4410_v26 }
 0x56a   : > { %3796 = vmatpush1.bf16.msra.mxu1 %v9959_v36  ;;  %3633 = vmatprep.subr.bf16.mxu0 %v9964_v37  ;;  %v9027_v36 = vcombine.low %v4394_v25, %v4410_v26  ;;  %v4426_v37 = vld [vmem:[%s13329_s15 + $0x400] sm:$0xff] }
 0x56b   : > { %3797 = vmatprep.subr.bf16.mxu1 %v9967_v38  ;;  %v4442_v38 = vld [vmem:[%s13329_s15 + $0x480] sm:$0xff] }
 0x56d   : > { %3634 = vmatpush1.bf16.msra.mxu0 %v9962_v27  ;;  %v9060_v27 = vcombine.high %v4426_v37, %v4442_v38 }
 0x56e   : > { %3798 = vmatpush1.bf16.msra.mxu1 %v9965_v28  ;;  %4212 = vmatprep.subr.bf16.mxu0 %v9970_v40  ;;  %v9059_v28 = vcombine.low %v4426_v37, %v4442_v38  ;;  %v4474_v40 = vld [vmem:[%s13329_s15 + $0x580] sm:$0xff] }
 0x56f   : > { %7538 = vmatprep.subr.bf16.mxu1 %v8932_v19 }
 0x570   : > { %3636 = vmatmul.mubr.bf16.vlgmr.msra.gmra.mrb[24].mxu0 %v1920_v42 }
 0x571   : > { %3800 = vmatmul.mubr.bf16.vlgmr.msra.gmra.mrb[24].mxu1 %v1920_v42  ;;  %4213 = vmatpush1.bf16.msra.mxu0 %v9968_v41  ;;  %v9092_v41 = vcombine.high %v4458_v39, %v4474_v40  ;;  %v9091_v42 = vcombine.low %v4458_v39, %v4474_v40  ;;  %v10016_v39 = vld [vmem:[%s13327_s13 + $0x100] ss:$8 sps:$4 sm:$0xff]  }
 0x572   : > { %4214 = vmatprep.subr.bf16.mxu0 %v9973_v43  ;;  %7539 = vmatpush1.bf16.msra.mxu1 %v8931_v0  ;;  %v4490_v43 = vld [vmem:[%s13329_s15 + $0x600] sm:$0xff] }
 0x573   : > { %7540 = vmatprep.subr.bf16.mxu1 %v8964_v31 }
 0x575   : > { %4215 = vmatpush1.bf16.msra.mxu0 %v9971_v51  ;;  %v4506_v51 = vld [vmem:[%s13329_s15 + $0x680] sm:$0xff] }
 0x576   : > { %4216 = vmatprep.subr.bf16.mxu0 %v9976_v44  ;;  %7541 = vmatpush1.bf16.msra.mxu1 %v8963_v3  ;;  %v9124_v44 = vcombine.high %v4490_v43, %v4506_v51 }
 0x577   : > { %7542 = vmatprep.subr.bf16.mxu1 %v8996_v33 }
 0x579   : > { %4217 = vmatpush1.bf16.msra.mxu0 %v9974_v45  ;;  %v9123_v45 = vcombine.low %v4490_v43, %v4506_v51  ;;  %v10019_v43 = vld [vmem:[%s13327_s13 + $0x110] ss:$8 sps:$4 sm:$0xff]   ;;  %v10024_v51 = vld [vmem:[%s13327_s13 + $0x124] ss:$8 sps:$4 sm:$0xff]  }
 0x57a   : > { %4218 = vmatprep.subr.bf16.mxu0 %v9979_v46  ;;  %7543 = vmatpush1.bf16.msra.mxu1 %v8995_v34  ;;  %v4522_v46 = vld [vmem:[%s13329_s15 + $0x700] sm:$0xff] }
 0x57b   : > { %7544 = vmatprep.subr.bf16.mxu1 %v9028_v35 }
 0x57d   : > { %4219 = vmatpush1.bf16.msra.mxu0 %v9977_v47  ;;  %v4538_v47 = vld [vmem:[%s13329_s15 + $0x780] sm:$0xff] }
 0x57e   : > { %4220 = vmatprep.subr.bf16.mxu0 %v9982_v48  ;;  %7545 = vmatpush1.bf16.msra.mxu1 %v9027_v36  ;;  %v9156_v48 = vcombine.high %v4522_v46, %v4538_v47 }
 0x57f   : > { %7546 = vmatprep.subr.bf16.mxu1 %v9060_v27 }
 0x581   : > { %4221 = vmatpush1.bf16.msra.mxu0 %v9980_v49  ;;  %v9155_v49 = vcombine.low %v4522_v46, %v4538_v47  ;;  %v10025_v46 = vld [vmem:[%s13327_s13 + $0x130] ss:$8 sps:$4 sm:$0xff]   ;;  %v10030_v47 = vld [vmem:[%s13327_s13 + $0x144] ss:$8 sps:$4 sm:$0xff]  }
 0x582   : > { %4222 = vmatprep.subr.bf16.mxu0 %v9985_v50  ;;  %7547 = vmatpush1.bf16.msra.mxu1 %v9059_v28  ;;  %v4554_v50 = vld [vmem:[%s13329_s15 + $0x800] sm:$0xff] }
 0x583   : > { %7548 = vmatprep.subr.bf16.mxu1 %v9092_v41  ;;  %v10021_v41 = vld [vmem:[%s13327_s13 + $0x114] ss:$8 sps:$4 sm:$0xff]  }
 0x585   : > { %4223 = vmatpush1.bf16.msra.mxu0 %v9983_v54  ;;  %v4570_v54 = vld [vmem:[%s13329_s15 + $0x880] sm:$0xff] }
 0x586   : > { %4224 = vmatprep.subr.bf16.mxu0 %v9988_v55  ;;  %7549 = vmatpush1.bf16.msra.mxu1 %v9091_v42  ;;  %v9188_v55 = vcombine.high %v4554_v50, %v4570_v54 }
 0x587   : > { %7550 = vmatprep.subr.bf16.mxu1 %v9124_v44  ;;  %v10022_v44 = vld [vmem:[%s13327_s13 + $0x120] ss:$8 sps:$4 sm:$0xff]  }
 0x589   : > { %4225 = vmatpush1.bf16.msra.mxu0 %v9986_v57  ;;  %v9187_v57 = vcombine.low %v4554_v50, %v4570_v54  ;;  %v10031_v50 = vld [vmem:[%s13327_s13 + $0x150] ss:$8 sps:$4 sm:$0xff]   ;;  %v10036_v54 = vld [vmem:[%s13327_s13 + $0x164] ss:$8 sps:$4 sm:$0xff]  }
 0x58a   : > { %4226 = vmatprep.subr.bf16.mxu0 %v9991_v58  ;;  %7551 = vmatpush1.bf16.msra.mxu1 %v9123_v45  ;;  %v4586_v58 = vld [vmem:[%s13329_s15 + $0x900] sm:$0xff]  ;;  %v10027_v45 = vld [vmem:[%s13327_s13 + $0x134] ss:$8 sps:$4 sm:$0xff]  }
 0x58b   : > { %7552 = vmatprep.subr.bf16.mxu1 %v9156_v48  ;;  %v10028_v48 = vld [vmem:[%s13327_s13 + $0x140] ss:$8 sps:$4 sm:$0xff]  }
 0x58d   : > { %4227 = vmatpush1.bf16.msra.mxu0 %v9989_v60  ;;  %v4602_v60 = vld [vmem:[%s13329_s15 + $0x980] sm:$0xff] }
 0x58e   : > { %4228 = vmatprep.subr.bf16.mxu0 %v9994_v5  ;;  %7553 = vmatpush1.bf16.msra.mxu1 %v9155_v49  ;;  %v9220_v5 = vcombine.high %v4586_v58, %v4602_v60  ;;  %v10033_v49 = vld [vmem:[%s13327_s13 + $0x154] ss:$8 sps:$4 sm:$0xff]  }
 0x58f   : > { %7554 = vmatprep.subr.bf16.mxu1 %v9188_v55  ;;  %v10034_v55 = vld [vmem:[%s13327_s13 + $0x160] ss:$8 sps:$4 sm:$0xff]  }
 0x591   : > { %4229 = vmatpush1.bf16.msra.mxu0 %v9992_v8  ;;  %v9219_v8 = vcombine.low %v4586_v58, %v4602_v60  ;;  %v10037_v58 = vld [vmem:[%s13327_s13 + $0x170] ss:$8 sps:$4 sm:$0xff]   ;;  %v10042_v60 = vld [vmem:[%s13327_s13 + $0x184] ss:$8 sps:$4 sm:$0xff]  }
 0x592   : > { %4230 = vmatprep.subr.bf16.mxu0 %v9997_v13  ;;  %7555 = vmatpush1.bf16.msra.mxu1 %v9187_v57  ;;  %v4618_v13 = vld [vmem:[%s13329_s15 + $0xa00] sm:$0xff]  ;;  %v10039_v57 = vld [vmem:[%s13327_s13 + $0x174] ss:$8 sps:$4 sm:$0xff]  }
 0x593   : > { %7556 = vmatprep.subr.bf16.mxu1 %v9220_v5  ;;  %v10040_v5 = vld [vmem:[%s13327_s13 + $0x180] ss:$8 sps:$4 sm:$0xff]  }
 0x595   : > { %4231 = vmatpush1.bf16.msra.mxu0 %v9995_v62  ;;  %v4634_v62 = vld [vmem:[%s13329_s15 + $0xa80] sm:$0xff] }
 0x596   : > { %4232 = vmatprep.subr.bf16.mxu0 %v10000_v1  ;;  %v9252_v1 = vcombine.high %v4618_v13, %v4634_v62  ;;  %7557 = vmatpush1.bf16.msra.mxu1 %v9219_v8  ;;  %v10045_v8 = vld [vmem:[%s13327_s13 + $0x194] ss:$8 sps:$4 sm:$0xff]  }
 0x598   : > { %7558 = vmatprep.subr.bf16.mxu1 %v9252_v1  ;;  %v10046_v1 = vld [vmem:[%s13327_s13 + $0x1a0] ss:$8 sps:$4 sm:$0xff]  }
 0x599   : > { %4233 = vmatpush1.bf16.msra.mxu0 %v9998_v2  ;;  %v9251_v2 = vcombine.low %v4618_v13, %v4634_v62  ;;  %v10043_v13 = vld [vmem:[%s13327_s13 + $0x190] ss:$8 sps:$4 sm:$0xff]   ;;  %v10048_v62 = vld [vmem:[%s13327_s13 + $0x1a4] ss:$8 sps:$4 sm:$0xff]  }
 0x59a   : > { %4234 = vmatprep.subr.bf16.mxu0 %v10003_v6  ;;  %v4650_v6 = vld [vmem:[%s13329_s15 + $0xb00] sm:$0xff] }
 0x59b   : > { %7559 = vmatpush1.bf16.msra.mxu1 %v9251_v2  ;;  %v10051_v2 = vld [vmem:[%s13327_s13 + $0x1b4] ss:$8 sps:$4 sm:$0xff]  }
 0x59d   : > { %4235 = vmatpush1.bf16.msra.mxu0 %v10001_v7  ;;  %v4666_v7 = vld [vmem:[%s13329_s15 + $0xb80] sm:$0xff] }
 0x59e   : > { %4236 = vmatprep.subr.bf16.mxu0 %v10006_v9  ;;  %v9284_v9 = vcombine.high %v4650_v6, %v4666_v7 }
 0x5a0   : > { %7560 = vmatprep.subr.bf16.mxu1 %v9284_v9  ;;  %v10052_v9 = vld [vmem:[%s13327_s13 + $0x1c0] ss:$8 sps:$4 sm:$0xff]  }
 0x5a1   : > { %4237 = vmatpush1.bf16.msra.mxu0 %v10004_v10  ;;  %v9283_v10 = vcombine.low %v4650_v6, %v4666_v7  ;;  %v10049_v6 = vld [vmem:[%s13327_s13 + $0x1b0] ss:$8 sps:$4 sm:$0xff]   ;;  %v10054_v7 = vld [vmem:[%s13327_s13 + $0x1c4] ss:$8 sps:$4 sm:$0xff]  }
 0x5a2   : > { %4238 = vmatprep.subr.bf16.mxu0 %v10009_v11  ;;  %v4682_v11 = vld [vmem:[%s13329_s15 + $0xc00] sm:$0xff] }
 0x5a3   : > { %7561 = vmatpush1.bf16.msra.mxu1 %v9283_v10  ;;  %v10057_v10 = vld [vmem:[%s13327_s13 + $0x1d4] ss:$8 sps:$4 sm:$0xff]  }
 0x5a5   : > { %4239 = vmatpush1.bf16.msra.mxu0 %v10007_v12  ;;  %v4698_v12 = vld [vmem:[%s13329_s15 + $0xc80] sm:$0xff] }
 0x5a6   : > { %4240 = vmatprep.subr.bf16.mxu0 %v10012_v14  ;;  %v9316_v14 = vcombine.high %v4682_v11, %v4698_v12 }
 0x5a8   : > { %7562 = vmatprep.subr.bf16.mxu1 %v9316_v14  ;;  %v10060_v14 = vld [vmem:[%s13327_s13 + $0x1e4] ss:$8 sps:$4 sm:$0xff]  }
 0x5a9   : > { %4241 = vmatpush1.bf16.msra.mxu0 %v10010_v15  ;;  %v9315_v15 = vcombine.low %v4682_v11, %v4698_v12  ;;  %v10055_v11 = vld [vmem:[%s13327_s13 + $0x1d0] ss:$8 sps:$4 sm:$0xff]  }
 0x5aa   : > { %4242 = vmatprep.subr.bf16.mxu0 %v10015_v16  ;;  %v11509_v16 = vld [vmem:[%s13326_s12] sm:$0xf] }
 0x5ab   : > { %v3463_v63 = vrot.slane %v11509_v16, %v10679_v20  ;;  %7563 = vmatpush1.bf16.msra.mxu1 %v9315_v15  ;;  %v3467_v19 = vrot.slane %v11509_v16, %v10690_v23  ;;  %v3475_v29 = vrot.slane %v11509_v16, %v10693_v24  ;;  %v3471_v12 = vrot.slane %v11509_v16, %v10682_v21  ;;  %v10058_v15 = vld [vmem:[%s13327_s13 + $0x1e0] ss:$8 sps:$4 sm:$0xff]   ;;  %v4300_v16 = vld [vmem:[%s13329_s15 + $0x10] sm:$0xff] }
 0x5ad   : > { %4243 = vmatpush1.bf16.msra.mxu0 %v10013_v17  ;;  %v4714_v17 = vld [vmem:[%s13329_s15 + $0xd00] sm:$0xff] }
 0x5ae   : > { %4253 = vmatprep.subr.bf16.mxu0 %v10018_v22  ;;  %v4730_v22 = vld [vmem:[%s13329_s15 + $0xd80] sm:$0xff] }
 0x5af   : > { %v9348_v18 = vcombine.high %v4714_v17, %v4730_v22  ;;  %v9347_v0 = vcombine.low %v4714_v17, %v4730_v22  ;;  %v10063_v22 = vld [vmem:[%s13327_s13 + $0x1f4] ss:$8 sps:$4 sm:$0xff]  }
 0x5b1   : > { %7564 = vmatprep.subr.bf16.mxu1 %v9348_v18  ;;  %v4316_v18 = vld [vmem:[%s13329_s15 + $0x90] sm:$0xff] }
 0x5b2   : > { %7565 = vmatpush1.bf16.msra.mxu1 %v9347_v0 }
 0x643   : > { %v3637_v30 = vpop.f32.mrb[24].mxu0 }
 0x644   : > { %v9509_v31 = vadd.f32 %v3637_v30, %v3463_v63  ;;  %v11523_v3 = vpop.f32.mrb[24].mxu1  ;;  %v3639_v4 = vpop.f32.mrb[25].mxu0  ;;  %v10061_v63 = vld [vmem:[%s13327_s13 + $0x1f0] ss:$8 sps:$4 sm:$0xff]  }
 0x645   : > { %v9510_v32 = vadd.f32 %v3639_v4, %v3467_v19  ;;  %v3803_v33 = vpop.f32.mrb[25].mxu1  ;;  %v3641_v34 = vpop.f32.mrb[26].mxu0  ;;  %v9511_v17 = vadd.f32 %v11523_v3, %v3471_v12  ;;  %v8936_v19 = vcombine.high %v4300_v16, %v4316_v18  ;;  %v4348_v30 = vld [vmem:[%s13329_s15 + $0x190] sm:$0xff] }
 0x646   : > { %v3808_v25 = vmax.f32 %v9509_v31, 0.0  ;;  %v9512_v26 = vadd.f32 %v3803_v33, %v3475_v29  ;;  %v3805_v35 = vpop.f32.mrb[26].mxu1  ;;  %v3642_v36 = vpop.f32.mrb[27].mxu0  ;;  %v4332_v29 = vld [vmem:[%s13329_s15 + $0x110] sm:$0xff]  ;;  %v8935_v31 = vcombine.low %v4300_v16, %v4316_v18 }
 0x647   : > { %v3809_v37 = vmax.f32 %v9510_v32, 0.0  ;;  %v3806_v38 = vpop.f32.mrb[27].mxu1  ;;  %v3810_v0 = vmax.f32 %v9511_v17, 0.0  ;;  %v8968_v4 = vcombine.high %v4332_v29, %v4348_v30  ;;  %v4364_v32 = vld [vmem:[%s13329_s15 + $0x210] sm:$0xff]  ;;  %v8967_v34 = vcombine.low %v4332_v29, %v4348_v30  ;;  %v4762_v29 = vld [vmem:[%s13329_s15 + $0xe80] sm:$0xff] }
 0x648   : > { %v3811_v27 = vmax.f32 %v9512_v26, 0.0  ;;  %v3812_v40 = vpack.c.bf16 %v3808_v25, %v3808_v25  ;;  %v4380_v33 = vld [vmem:[%s13329_s15 + $0x290] sm:$0xff] }
 0x649   : > { %v3813_v28 = vpack.c.bf16 %v3809_v37, %v3809_v37  ;;  %v3814_v3 = vpack.c.bf16 %v3810_v0, %v3810_v0  ;;  %v9000_v25 = vcombine.high %v4364_v32, %v4380_v33  ;;  %v4396_v26 = vld [vmem:[%s13329_s15 + $0x310] sm:$0xff]  ;;  %v8999_v36 = vcombine.low %v4364_v32, %v4380_v33 }
 0x64a   : > { %v3815_v42 = vpack.c.bf16 %v3811_v27, %v3811_v27  ;;  %v4412_v35 = vld [vmem:[%s13329_s15 + $0x390] sm:$0xff] }
 0x64b   : > { %4244 = vmatprep.mubr.bf16.mxu0 %v3813_v28  ;;  %v9032_v37 = vcombine.high %v4396_v26, %v4412_v35  ;;  %v4428_v38 = vld [vmem:[%s13329_s15 + $0x410] sm:$0xff]  ;;  %v9031_v28 = vcombine.low %v4396_v26, %v4412_v35 }
 0x64c   : > { %4245 = vmatmul.mubr.bf16.vlgmr.msra.gmra.mrb[28].mxu0 %v3812_v40  ;;  %v4444_v27 = vld [vmem:[%s13329_s15 + $0x490] sm:$0xff] }
 0x64d   : > { %4254 = vmatpush1.bf16.msra.mxu0 %v10016_v39  ;;  %4285 = vmatprep.mubr.bf16.mxu0 %v3815_v42  ;;  %v9064_v39 = vcombine.high %v4428_v38, %v4444_v27  ;;  %v4460_v40 = vld [vmem:[%s13329_s15 + $0x510] sm:$0xff]  ;;  %v9063_v42 = vcombine.low %v4428_v38, %v4444_v27 }
 0x64e   : > { %4255 = vmatprep.subr.bf16.mxu0 %v10021_v41  ;;  %v4476_v41 = vld [vmem:[%s13329_s15 + $0x590] sm:$0xff] }
 0x64f   : > { %v4684_v12 = vld [vmem:[%s13329_s15 + $0xc10] sm:$0xff] }
 0x650   : > { %v4732_v16 = vld [vmem:[%s13329_s15 + $0xd90] sm:$0xff] }
 0x651   : > { %4256 = vmatpush1.bf16.msra.mxu0 %v10019_v43  ;;  %v9096_v43 = vcombine.high %v4460_v40, %v4476_v41  ;;  %v4748_v30 = vld [vmem:[%s13329_s15 + $0xe10] sm:$0xff] }
 0x652   : > { %4257 = vmatprep.subr.bf16.mxu0 %v10024_v51  ;;  %v4492_v51 = vld [vmem:[%s13329_s15 + $0x610] sm:$0xff] }
 0x653   : > { %v4780_v26 = vld [vmem:[%s13329_s15 + $0xf10] sm:$0xff] }
 0x655   : > { %4258 = vmatpush1.bf16.msra.mxu0 %v10022_v44  ;;  %v4508_v44 = vld [vmem:[%s13329_s15 + $0x690] sm:$0xff] }
 0x656   : > { %4259 = vmatprep.subr.bf16.mxu0 %v10027_v45  ;;  %v9095_v45 = vcombine.low %v4460_v40, %v4476_v41  ;;  %v4302_v40 = vld [vmem:[%s13329_s15 + $0x20] sm:$0xff] }
 0x659   : > { %4260 = vmatpush1.bf16.msra.mxu0 %v10025_v46  ;;  %v9128_v46 = vcombine.high %v4492_v51, %v4508_v44 }
 0x65a   : > { %4261 = vmatprep.subr.bf16.mxu0 %v10030_v47  ;;  %v4524_v47 = vld [vmem:[%s13329_s15 + $0x710] sm:$0xff] }
 0x65d   : > { %4262 = vmatpush1.bf16.msra.mxu0 %v10028_v48  ;;  %v4540_v48 = vld [vmem:[%s13329_s15 + $0x790] sm:$0xff] }
 0x65e   : > { %4263 = vmatprep.subr.bf16.mxu0 %v10033_v49  ;;  %v9127_v49 = vcombine.low %v4492_v51, %v4508_v44 }
 0x661   : > { %4264 = vmatpush1.bf16.msra.mxu0 %v10031_v50  ;;  %v9160_v50 = vcombine.high %v4524_v47, %v4540_v48 }
 0x662   : > { %4265 = vmatprep.subr.bf16.mxu0 %v10036_v54  ;;  %v4556_v54 = vld [vmem:[%s13329_s15 + $0x810] sm:$0xff] }
 0x665   : > { %4266 = vmatpush1.bf16.msra.mxu0 %v10034_v55  ;;  %v4572_v55 = vld [vmem:[%s13329_s15 + $0x890] sm:$0xff] }
 0x666   : > { %4267 = vmatprep.subr.bf16.mxu0 %v10039_v57  ;;  %v9159_v57 = vcombine.low %v4524_v47, %v4540_v48 }
 0x669   : > { %4268 = vmatpush1.bf16.msra.mxu0 %v10037_v58  ;;  %v9192_v58 = vcombine.high %v4556_v54, %v4572_v55 }
 0x66a   : > { %4269 = vmatprep.subr.bf16.mxu0 %v10042_v60  ;;  %v4588_v60 = vld [vmem:[%s13329_s15 + $0x910] sm:$0xff] }
 0x66d   : > { %4270 = vmatpush1.bf16.msra.mxu0 %v10040_v5  ;;  %v4604_v5 = vld [vmem:[%s13329_s15 + $0x990] sm:$0xff] }
 0x66e   : > { %4271 = vmatprep.subr.bf16.mxu0 %v10045_v8  ;;  %v9191_v8 = vcombine.low %v4556_v54, %v4572_v55 }
 0x671   : > { %4272 = vmatpush1.bf16.msra.mxu0 %v10043_v13  ;;  %v9224_v13 = vcombine.high %v4588_v60, %v4604_v5 }
 0x672   : > { %4273 = vmatprep.subr.bf16.mxu0 %v10048_v62  ;;  %v4620_v62 = vld [vmem:[%s13329_s15 + $0xa10] sm:$0xff] }
 0x675   : > { %4274 = vmatpush1.bf16.msra.mxu0 %v10046_v1  ;;  %v4636_v1 = vld [vmem:[%s13329_s15 + $0xa90] sm:$0xff] }
 0x676   : > { %4275 = vmatprep.subr.bf16.mxu0 %v10051_v2  ;;  %v9223_v2 = vcombine.low %v4588_v60, %v4604_v5  ;;  %v4331_v5 = vld [vmem:[%s13329_s15 + $0x108] sm:$0xff] }
 0x679   : > { %4276 = vmatpush1.bf16.msra.mxu0 %v10049_v6  ;;  %v9256_v6 = vcombine.high %v4620_v62, %v4636_v1 }
 0x67a   : > { %4277 = vmatprep.subr.bf16.mxu0 %v10054_v7  ;;  %v4652_v7 = vld [vmem:[%s13329_s15 + $0xb10] sm:$0xff] }
 0x67d   : > { %4278 = vmatpush1.bf16.msra.mxu0 %v10052_v9  ;;  %v4668_v9 = vld [vmem:[%s13329_s15 + $0xb90] sm:$0xff] }
 0x67e   : > { %4279 = vmatprep.subr.bf16.mxu0 %v10057_v10  ;;  %v9255_v10 = vcombine.low %v4620_v62, %v4636_v1  ;;  %v4350_v62 = vld [vmem:[%s13329_s15 + $0x1a0] sm:$0xff] }
 0x681   : > { %4280 = vmatpush1.bf16.msra.mxu0 %v10055_v11  ;;  %v9288_v11 = vcombine.high %v4652_v7, %v4668_v9 }
 0x682   : > { %4281 = vmatprep.subr.bf16.mxu0 %v10060_v14  ;;  %v4700_v14 = vld [vmem:[%s13329_s15 + $0xc90] sm:$0xff] }
 0x683   : > { %v9320_v17 = vcombine.high %v4684_v12, %v4700_v14  ;;  %v9319_v18 = vcombine.low %v4684_v12, %v4700_v14  ;;  %v4382_v12 = vld [vmem:[%s13329_s15 + $0x2a0] sm:$0xff] }
 0x685   : > { %4282 = vmatpush1.bf16.msra.mxu0 %v10058_v15  ;;  %v9287_v15 = vcombine.low %v4652_v7, %v4668_v9 }
 0x686   : > { %4283 = vmatprep.subr.bf16.mxu0 %v10063_v22  ;;  %v4716_v22 = vld [vmem:[%s13329_s15 + $0xd10] sm:$0xff] }
 0x687   : > { %v9351_v0 = vcombine.low %v4716_v22, %v4732_v16 }
 0x689   : > { %4284 = vmatpush1.bf16.msra.mxu0 %v10061_v63  ;;  %v9352_v63 = vcombine.high %v4716_v22, %v4732_v16  ;;  %v4395_v16 = vld [vmem:[%s13329_s15 + $0x308] sm:$0xff] }
 0x68a   : > { %7620 = vmatprep.subr.bf16.mxu0 %v8936_v19  ;;  %v4746_v19 = vld [vmem:[%s13329_s15 + $0xe00] sm:$0xff] }
 0x68c   : > { %4286 = vmatmul.mubr.bf16.vlgmr.msra.gmra.mrb[28].mxu0 %v3814_v3  ;;  %v4764_v3 = vld [vmem:[%s13329_s15 + $0xe90] sm:$0xff] }
 0x68d   : > { %7621 = vmatpush1.bf16.msra.mxu0 %v8935_v31  ;;  %v9380_v31 = vcombine.high %v4746_v19, %v4762_v29  ;;  %v9383_v32 = vcombine.low %v4748_v30, %v4764_v3  ;;  %v9384_v33 = vcombine.high %v4748_v30, %v4764_v3  ;;  %v4427_v3 = vld [vmem:[%s13329_s15 + $0x408] sm:$0xff] }
 0x68e   : > { %7622 = vmatprep.subr.bf16.mxu0 %v8968_v4  ;;  %v9379_v4 = vcombine.low %v4746_v19, %v4762_v29 }
 0x68f   : > { %7566 = vmatprep.subr.bf16.mxu1 %v9380_v31 }
 0x690   : > { %7567 = vmatpush1.bf16.msra.mxu1 %v9379_v4  ;;  %v4443_v4 = vld [vmem:[%s13329_s15 + $0x488] sm:$0xff] }
 0x691   : > { %7623 = vmatpush1.bf16.msra.mxu0 %v8967_v34  ;;  %v4778_v34 = vld [vmem:[%s13329_s15 + $0xf00] sm:$0xff] }
 0x692   : > { %7624 = vmatprep.subr.bf16.mxu0 %v9000_v25  ;;  %v4794_v25 = vld [vmem:[%s13329_s15 + $0xf80] sm:$0xff] }
 0x693   : > { %v9412_v35 = vcombine.high %v4778_v34, %v4794_v25 }
 0x695   : > { %7625 = vmatpush1.bf16.msra.mxu0 %v8999_v36  ;;  %v4796_v36 = vld [vmem:[%s13329_s15 + $0xf90] sm:$0xff]  ;;  %7568 = vmatprep.subr.bf16.mxu1 %v9412_v35 }
 0x696   : > { %7626 = vmatprep.subr.bf16.mxu0 %v9032_v37  ;;  %v9411_v37 = vcombine.low %v4778_v34, %v4794_v25  ;;  %v9415_v38 = vcombine.low %v4780_v26, %v4796_v36  ;;  %v9416_v27 = vcombine.high %v4780_v26, %v4796_v36  ;;  %v9062_v26 = vcombine.high %v4427_v3, %v4443_v4  ;;  %v4459_v36 = vld [vmem:[%s13329_s15 + $0x508] sm:$0xff] }
 0x698   : > { %7569 = vmatpush1.bf16.msra.mxu1 %v9411_v37  ;;  %v4475_v37 = vld [vmem:[%s13329_s15 + $0x588] sm:$0xff] }
 0x699   : > { %7627 = vmatpush1.bf16.msra.mxu0 %v9031_v28  ;;  %v4299_v28 = vld [vmem:[%s13329_s15 + $0x8] sm:$0xff] }
 0x69a   : > { %7628 = vmatprep.subr.bf16.mxu0 %v9064_v39  ;;  %v4315_v39 = vld [vmem:[%s13329_s15 + $0x88] sm:$0xff] }
 0x69b   : > { %v8934_v41 = vcombine.high %v4299_v28, %v4315_v39 }
 0x69d   : > { %7629 = vmatpush1.bf16.msra.mxu0 %v9063_v42  ;;  %v4318_v42 = vld [vmem:[%s13329_s15 + $0xa0] sm:$0xff]  ;;  %7579 = vmatprep.subr.bf16.mxu1 %v8934_v41 }
 0x69e   : > { %7630 = vmatprep.subr.bf16.mxu0 %v9096_v43  ;;  %v8933_v43 = vcombine.low %v4299_v28, %v4315_v39  ;;  %v8939_v51 = vcombine.low %v4302_v40, %v4318_v42  ;;  %v8940_v44 = vcombine.high %v4302_v40, %v4318_v42  ;;  %v9061_v28 = vcombine.low %v4427_v3, %v4443_v4  ;;  %v4491_v42 = vld [vmem:[%s13329_s15 + $0x608] sm:$0xff] }
 0x69f   : > { %v9094_v40 = vcombine.high %v4459_v36, %v4475_v37 }
 0x6a1   : > { %7631 = vmatpush1.bf16.msra.mxu0 %v9095_v45  ;;  %v3880_v45 = vld [vmem:[%s13328_s14] sm:$0x3] }
 0x6a2   : > { %7632 = vmatprep.subr.bf16.mxu0 %v9128_v46  ;;  %v4205_v46 = vrot.slane %v3880_v45, %v10679_v20  ;;  %v4209_v47 = vrot.slane %v3880_v45, %v10690_v23  ;;  %v9093_v45 = vcombine.low %v4459_v36, %v4475_v37 }
 0x6a5   : > { %7633 = vmatpush1.bf16.msra.mxu0 %v9127_v49 }
 0x6a6   : > { %7634 = vmatprep.subr.bf16.mxu0 %v9160_v50 }
 0x6a9   : > { %7635 = vmatpush1.bf16.msra.mxu0 %v9159_v57 }
 0x6aa   : > { %7636 = vmatprep.subr.bf16.mxu0 %v9192_v58 }
 0x6ad   : > { %7637 = vmatpush1.bf16.msra.mxu0 %v9191_v8  ;;  %v4347_v8 = vld [vmem:[%s13329_s15 + $0x188] sm:$0xff] }
 0x6ae   : > { %7638 = vmatprep.subr.bf16.mxu0 %v9224_v13  ;;  %v4334_v13 = vld [vmem:[%s13329_s15 + $0x120] sm:$0xff]  ;;  %v8966_v7 = vcombine.high %v4331_v5, %v4347_v8  ;;  %v8965_v14 = vcombine.low %v4331_v5, %v4347_v8  ;;  %v4555_v8 = vld [vmem:[%s13329_s15 + $0x808] sm:$0xff] }
 0x6af   : > { %v8972_v9 = vcombine.high %v4334_v13, %v4350_v62 }
 0x6b1   : > { %7639 = vmatpush1.bf16.msra.mxu0 %v9223_v2 }
 0x6b2   : > { %7640 = vmatprep.subr.bf16.mxu0 %v9256_v6  ;;  %v4363_v6 = vld [vmem:[%s13329_s15 + $0x208] sm:$0xff] }
 0x6b5   : > { %7641 = vmatpush1.bf16.msra.mxu0 %v9255_v10  ;;  %v4379_v10 = vld [vmem:[%s13329_s15 + $0x288] sm:$0xff] }
 0x6b6   : > { %7642 = vmatprep.subr.bf16.mxu0 %v9288_v11  ;;  %v4366_v11 = vld [vmem:[%s13329_s15 + $0x220] sm:$0xff]  ;;  %v8997_v19 = vcombine.low %v4363_v6, %v4379_v10 }
 0x6b7   : > { %v9004_v22 = vcombine.high %v4366_v11, %v4382_v12  ;;  %v9003_v29 = vcombine.low %v4366_v11, %v4382_v12  ;;  %v4587_v12 = vld [vmem:[%s13329_s15 + $0x908] sm:$0xff] }
 0x6b9   : > { %7643 = vmatpush1.bf16.msra.mxu0 %v9287_v15  ;;  %v8971_v15 = vcombine.low %v4334_v13, %v4350_v62  ;;  %v4571_v13 = vld [vmem:[%s13329_s15 + $0x888] sm:$0xff]  ;;  %v4558_v62 = vld [vmem:[%s13329_s15 + $0x820] sm:$0xff] }
 0x6ba   : > { %7644 = vmatprep.subr.bf16.mxu0 %v9320_v17  ;;  %v8998_v17 = vcombine.high %v4363_v6, %v4379_v10  ;;  %v4574_v6 = vld [vmem:[%s13329_s15 + $0x8a0] sm:$0xff]  ;;  %v9190_v10 = vcombine.high %v4555_v8, %v4571_v13 }
 0x6bb   : > { %v9196_v11 = vcombine.high %v4558_v62, %v4574_v6 }
 0x6bd   : > { %7645 = vmatpush1.bf16.msra.mxu0 %v9319_v18  ;;  %v4411_v18 = vld [vmem:[%s13329_s15 + $0x388] sm:$0xff] }
 0x6be   : > { %7646 = vmatprep.subr.bf16.mxu0 %v9352_v63  ;;  %v4398_v63 = vld [vmem:[%s13329_s15 + $0x320] sm:$0xff]  ;;  %v9030_v30 = vcombine.high %v4395_v16, %v4411_v18  ;;  %v9029_v34 = vcombine.low %v4395_v16, %v4411_v18  ;;  %v9195_v16 = vcombine.low %v4558_v62, %v4574_v6  ;;  %v4779_v6 = vld [vmem:[%s13329_s15 + $0xf08] sm:$0xff] }
 0x6c1   : > { %7647 = vmatpush1.bf16.msra.mxu0 %v9351_v0  ;;  %v4414_v0 = vld [vmem:[%s13329_s15 + $0x3a0] sm:$0xff] }
 0x6c2   : > { %7648 = vmatprep.subr.bf16.mxu0 %v9384_v33  ;;  %v9036_v31 = vcombine.high %v4398_v63, %v4414_v0  ;;  %v4446_v33 = vld [vmem:[%s13329_s15 + $0x4a0] sm:$0xff]  ;;  %v9035_v25 = vcombine.low %v4398_v63, %v4414_v0  ;;  %v4619_v0 = vld [vmem:[%s13329_s15 + $0xa08] sm:$0xff] }
 0x6c5   : > { %7649 = vmatpush1.bf16.msra.mxu0 %v9383_v32  ;;  %v4430_v32 = vld [vmem:[%s13329_s15 + $0x420] sm:$0xff] }
 0x6c6   : > { %7650 = vmatprep.subr.bf16.mxu0 %v9416_v27  ;;  %v9068_v35 = vcombine.high %v4430_v32, %v4446_v33  ;;  %v4478_v27 = vld [vmem:[%s13329_s15 + $0x5a0] sm:$0xff]  ;;  %v9067_v39 = vcombine.low %v4430_v32, %v4446_v33  ;;  %v4651_v33 = vld [vmem:[%s13329_s15 + $0xb08] sm:$0xff] }
 0x6c9   : > { %7651 = vmatpush1.bf16.msra.mxu0 %v9415_v38  ;;  %v4462_v38 = vld [vmem:[%s13329_s15 + $0x520] sm:$0xff] }
 0x6ca   : > { %7702 = vmatprep.subr.bf16.mxu0 %v8940_v44  ;;  %v9100_v41 = vcombine.high %v4462_v38, %v4478_v27  ;;  %v4510_v44 = vld [vmem:[%s13329_s15 + $0x6a0] sm:$0xff] }
 0x75f   : > { %v4287_v48 = vpop.f32.mrb[28].mxu0 }
 0x760   : > { %v9513_v49 = vadd.f32 %v4287_v48, %v4205_v46  ;;  %v4289_v50 = vpop.f32.mrb[29].mxu0  ;;  %v9099_v46 = vcombine.low %v4462_v38, %v4478_v27  ;;  %v4683_v27 = vld [vmem:[%s13329_s15 + $0xc08] sm:$0xff] }
 0x761   : > { %v9514_v54 = vadd.f32 %v4289_v50, %v4209_v47  ;;  %v4291_v55 = vpop.f32.mrb[30].mxu0  ;;  %v4539_v50 = vld [vmem:[%s13329_s15 + $0x788] sm:$0xff] }
 0x762   : > { %v4294_v57 = vmax.f32 %v9513_v49, 0.0  ;;  %v4292_v58 = vpop.f32.mrb[31].mxu0  ;;  %v4523_v49 = vld [vmem:[%s13329_s15 + $0x708] sm:$0xff]  ;;  %v4542_v55 = vld [vmem:[%s13329_s15 + $0x7a0] sm:$0xff] }
 0x763   : > { %v4295_v60 = vmax.f32 %v9514_v54, 0.0  ;;  %v4526_v54 = vld [vmem:[%s13329_s15 + $0x720] sm:$0xff] }
 0x764   : > { %v11760_v2 = vpack.c.bf16 %v4294_v57, %v4294_v57  ;;  %v9164_v5 = vcombine.high %v4526_v54, %v4542_v55 }
 0x765   : > { %v11758_v1 = vpack.c.bf16 %v4295_v60, %v4295_v60  ;;  %v9158_v60 = vcombine.high %v4523_v49, %v4539_v50 }
 0x767   : > { %7570 = vmatprep.mubr.bf16.mxu1 %v11758_v1  ;;  %7652 = vmatprep.mubr.bf16.mxu0 %v11758_v1 }
 0x768   : > { %7571 = vmatmul.mubr.bf16.vlgmr.msra.gmra.mrb[28].mxu1 %v11760_v2  ;;  %7653 = vmatmul.mubr.bf16.vlgmr.msra.gmra.mrb[32].mxu0 %v11760_v2 }
 0x769   : > { %7580 = vmatpush1.bf16.msra.mxu1 %v8933_v43  ;;  %7703 = vmatpush1.bf16.msra.mxu0 %v8939_v51  ;;  %v4507_v43 = vld [vmem:[%s13329_s15 + $0x688] sm:$0xff]  ;;  %v4494_v51 = vld [vmem:[%s13329_s15 + $0x620] sm:$0xff] }
 0x76a   : > { %7611 = vmatprep.mubr.bf16.mxu1 %v11758_v1  ;;  %7734 = vmatprep.mubr.bf16.mxu0 %v11758_v1  ;;  %v9126_v47 = vcombine.high %v4491_v42, %v4507_v43  ;;  %v9132_v48 = vcombine.high %v4494_v51, %v4510_v44  ;;  %v9125_v57 = vcombine.low %v4491_v42, %v4507_v43 }
 0x76b   : > { %7581 = vmatprep.subr.bf16.mxu1 %v8966_v7  ;;  %7704 = vmatprep.subr.bf16.mxu0 %v8972_v9  ;;  %v9131_v58 = vcombine.low %v4494_v51, %v4510_v44  ;;  %v9157_v7 = vcombine.low %v4523_v49, %v4539_v50  ;;  %v9163_v9 = vcombine.low %v4526_v54, %v4542_v55  ;;  %v4715_v44 = vld [vmem:[%s13329_s15 + $0xd08] sm:$0xff] }
 0x76c   : > { %v4747_v55 = vld [vmem:[%s13329_s15 + $0xe08] sm:$0xff] }
 0x76d   : > { %7582 = vmatpush1.bf16.msra.mxu1 %v8965_v14  ;;  %7705 = vmatpush1.bf16.msra.mxu0 %v8971_v15  ;;  %v4603_v14 = vld [vmem:[%s13329_s15 + $0x988] sm:$0xff]  ;;  %v4590_v15 = vld [vmem:[%s13329_s15 + $0x920] sm:$0xff] }
 0x76e   : > { %7583 = vmatprep.subr.bf16.mxu1 %v8998_v17  ;;  %7706 = vmatprep.subr.bf16.mxu0 %v9004_v22  ;;  %v4606_v17 = vld [vmem:[%s13329_s15 + $0x9a0] sm:$0xff]  ;;  %v9189_v22 = vcombine.low %v4555_v8, %v4571_v13  ;;  %v9222_v18 = vcombine.high %v4587_v12, %v4603_v14 }
 0x76f   : > { %v9228_v63 = vcombine.high %v4590_v15, %v4606_v17  ;;  %v9227_v3 = vcombine.low %v4590_v15, %v4606_v17  ;;  %v4301_v17 = vld [vmem:[%s13329_s15 + $0x18] sm:$0xff] }
 0x771   : > { %7584 = vmatpush1.bf16.msra.mxu1 %v8997_v19  ;;  %7707 = vmatpush1.bf16.msra.mxu0 %v9003_v29  ;;  %v4635_v19 = vld [vmem:[%s13329_s15 + $0xa88] sm:$0xff]  ;;  %v4622_v29 = vld [vmem:[%s13329_s15 + $0xa20] sm:$0xff] }
 0x772   : > { %7585 = vmatprep.subr.bf16.mxu1 %v9030_v30  ;;  %7708 = vmatprep.subr.bf16.mxu0 %v9036_v31  ;;  %v4638_v30 = vld [vmem:[%s13329_s15 + $0xaa0] sm:$0xff]  ;;  %v9221_v31 = vcombine.low %v4587_v12, %v4603_v14  ;;  %v9254_v4 = vcombine.high %v4619_v0, %v4635_v19 }
 0x773   : > { %v9260_v32 = vcombine.high %v4622_v29, %v4638_v30  ;;  %v9259_v36 = vcombine.low %v4622_v29, %v4638_v30  ;;  %v4333_v30 = vld [vmem:[%s13329_s15 + $0x118] sm:$0xff] }
 0x775   : > { %7586 = vmatpush1.bf16.msra.mxu1 %v9029_v34  ;;  %7709 = vmatpush1.bf16.msra.mxu0 %v9035_v25  ;;  %v4667_v34 = vld [vmem:[%s13329_s15 + $0xb88] sm:$0xff]  ;;  %v4654_v25 = vld [vmem:[%s13329_s15 + $0xb20] sm:$0xff] }
 0x776   : > { %7587 = vmatprep.subr.bf16.mxu1 %v9062_v26  ;;  %7710 = vmatprep.subr.bf16.mxu0 %v9068_v35  ;;  %v4670_v26 = vld [vmem:[%s13329_s15 + $0xba0] sm:$0xff]  ;;  %v9253_v35 = vcombine.low %v4619_v0, %v4635_v19  ;;  %v9286_v37 = vcombine.high %v4651_v33, %v4667_v34 }
 0x777   : > { %v9292_v38 = vcombine.high %v4654_v25, %v4670_v26  ;;  %v9291_v42 = vcombine.low %v4654_v25, %v4670_v26  ;;  %v4365_v26 = vld [vmem:[%s13329_s15 + $0x218] sm:$0xff] }
 0x779   : > { %7588 = vmatpush1.bf16.msra.mxu1 %v9061_v28  ;;  %7711 = vmatpush1.bf16.msra.mxu0 %v9067_v39  ;;  %v4699_v28 = vld [vmem:[%s13329_s15 + $0xc88] sm:$0xff]  ;;  %v4686_v39 = vld [vmem:[%s13329_s15 + $0xc20] sm:$0xff] }
 0x77a   : > { %7589 = vmatprep.subr.bf16.mxu1 %v9094_v40  ;;  %7712 = vmatprep.subr.bf16.mxu0 %v9100_v41  ;;  %v4702_v40 = vld [vmem:[%s13329_s15 + $0xca0] sm:$0xff]  ;;  %v9285_v41 = vcombine.low %v4651_v33, %v4667_v34  ;;  %v9318_v43 = vcombine.high %v4683_v27, %v4699_v28 }
 0x77b   : > { %v9324_v51 = vcombine.high %v4686_v39, %v4702_v40  ;;  %v9323_v49 = vcombine.low %v4686_v39, %v4702_v40  ;;  %v4397_v40 = vld [vmem:[%s13329_s15 + $0x318] sm:$0xff] }
 0x77d   : > { %7590 = vmatpush1.bf16.msra.mxu1 %v9093_v45  ;;  %7713 = vmatpush1.bf16.msra.mxu0 %v9099_v46  ;;  %v4731_v45 = vld [vmem:[%s13329_s15 + $0xd88] sm:$0xff]  ;;  %v4718_v46 = vld [vmem:[%s13329_s15 + $0xd20] sm:$0xff] }
 0x77e   : > { %7591 = vmatprep.subr.bf16.mxu1 %v9126_v47  ;;  %7714 = vmatprep.subr.bf16.mxu0 %v9132_v48  ;;  %v4734_v47 = vld [vmem:[%s13329_s15 + $0xda0] sm:$0xff]  ;;  %v9317_v48 = vcombine.low %v4683_v27, %v4699_v28  ;;  %v9350_v50 = vcombine.high %v4715_v44, %v4731_v45 }
 0x77f   : > { %v9356_v54 = vcombine.high %v4718_v46, %v4734_v47  ;;  %v9355_v8 = vcombine.low %v4718_v46, %v4734_v47  ;;  %v4429_v47 = vld [vmem:[%s13329_s15 + $0x418] sm:$0xff] }
 0x781   : > { %7592 = vmatpush1.bf16.msra.mxu1 %v9125_v57  ;;  %7715 = vmatpush1.bf16.msra.mxu0 %v9131_v58  ;;  %v4763_v57 = vld [vmem:[%s13329_s15 + $0xe88] sm:$0xff]  ;;  %v4750_v58 = vld [vmem:[%s13329_s15 + $0xe20] sm:$0xff] }
 0x782   : > { %7593 = vmatprep.subr.bf16.mxu1 %v9158_v60  ;;  %7716 = vmatprep.subr.bf16.mxu0 %v9164_v5  ;;  %v4766_v60 = vld [vmem:[%s13329_s15 + $0xea0] sm:$0xff]  ;;  %v9349_v5 = vcombine.low %v4715_v44, %v4731_v45  ;;  %v9382_v13 = vcombine.high %v4747_v55, %v4763_v57 }
 0x783   : > { %v9388_v62 = vcombine.high %v4750_v58, %v4766_v60  ;;  %v9387_v12 = vcombine.low %v4750_v58, %v4766_v60  ;;  %v4461_v60 = vld [vmem:[%s13329_s15 + $0x518] sm:$0xff] }
 0x785   : > { %7594 = vmatpush1.bf16.msra.mxu1 %v9157_v7  ;;  %7717 = vmatpush1.bf16.msra.mxu0 %v9163_v9  ;;  %v4795_v7 = vld [vmem:[%s13329_s15 + $0xf88] sm:$0xff]  ;;  %v4782_v9 = vld [vmem:[%s13329_s15 + $0xf20] sm:$0xff] }
 0x786   : > { %7595 = vmatprep.subr.bf16.mxu1 %v9190_v10  ;;  %7718 = vmatprep.subr.bf16.mxu0 %v9196_v11  ;;  %v4798_v10 = vld [vmem:[%s13329_s15 + $0xfa0] sm:$0xff]  ;;  %v9381_v11 = vcombine.low %v4747_v55, %v4763_v57  ;;  %v9414_v14 = vcombine.high %v4779_v6, %v4795_v7 }
 0x787   : > { %v9420_v15 = vcombine.high %v4782_v9, %v4798_v10  ;;  %v9419_v0 = vcombine.low %v4782_v9, %v4798_v10  ;;  %v4493_v10 = vld [vmem:[%s13329_s15 + $0x618] sm:$0xff] }
 0x789   : > { %7596 = vmatpush1.bf16.msra.mxu1 %v9189_v22  ;;  %7719 = vmatpush1.bf16.msra.mxu0 %v9195_v16  ;;  %v4317_v22 = vld [vmem:[%s13329_s15 + $0x98] sm:$0xff]  ;;  %v4304_v16 = vld [vmem:[%s13329_s15 + $0x30] sm:$0xff] }
 0x78a   : > { %7597 = vmatprep.subr.bf16.mxu1 %v9222_v18  ;;  %7720 = vmatprep.subr.bf16.mxu0 %v9228_v63  ;;  %v4320_v18 = vld [vmem:[%s13329_s15 + $0xb0] sm:$0xff]  ;;  %v9413_v63 = vcombine.low %v4779_v6, %v4795_v7  ;;  %v8938_v19 = vcombine.high %v4301_v17, %v4317_v22 }
 0x78b   : > { %v8944_v29 = vcombine.high %v4304_v16, %v4320_v18  ;;  %v8943_v33 = vcombine.low %v4304_v16, %v4320_v18  ;;  %v4525_v18 = vld [vmem:[%s13329_s15 + $0x718] sm:$0xff] }
 0x78d   : > { %7598 = vmatpush1.bf16.msra.mxu1 %v9221_v31  ;;  %7721 = vmatpush1.bf16.msra.mxu0 %v9227_v3  ;;  %v4349_v31 = vld [vmem:[%s13329_s15 + $0x198] sm:$0xff]  ;;  %v4336_v3 = vld [vmem:[%s13329_s15 + $0x130] sm:$0xff] }
 0x78e   : > { %7599 = vmatprep.subr.bf16.mxu1 %v9254_v4  ;;  %7722 = vmatprep.subr.bf16.mxu0 %v9260_v32  ;;  %v4352_v4 = vld [vmem:[%s13329_s15 + $0x1b0] sm:$0xff]  ;;  %v8937_v32 = vcombine.low %v4301_v17, %v4317_v22  ;;  %v8970_v34 = vcombine.high %v4333_v30, %v4349_v31 }
 0x78f   : > { %v8976_v25 = vcombine.high %v4336_v3, %v4352_v4  ;;  %v8975_v27 = vcombine.low %v4336_v3, %v4352_v4  ;;  %v4557_v4 = vld [vmem:[%s13329_s15 + $0x818] sm:$0xff] }
 0x791   : > { %7600 = vmatpush1.bf16.msra.mxu1 %v9253_v35  ;;  %7723 = vmatpush1.bf16.msra.mxu0 %v9259_v36  ;;  %v4381_v35 = vld [vmem:[%s13329_s15 + $0x298] sm:$0xff]  ;;  %v4368_v36 = vld [vmem:[%s13329_s15 + $0x230] sm:$0xff] }
 0x792   : > { %7601 = vmatprep.subr.bf16.mxu1 %v9286_v37  ;;  %7724 = vmatprep.subr.bf16.mxu0 %v9292_v38  ;;  %v4384_v37 = vld [vmem:[%s13329_s15 + $0x2b0] sm:$0xff]  ;;  %v8969_v38 = vcombine.low %v4333_v30, %v4349_v31  ;;  %v9002_v28 = vcombine.high %v4365_v26, %v4381_v35 }
 0x793   : > { %v9008_v39 = vcombine.high %v4368_v36, %v4384_v37  ;;  %v9007_v44 = vcombine.low %v4368_v36, %v4384_v37  ;;  %v4589_v37 = vld [vmem:[%s13329_s15 + $0x918] sm:$0xff] }
 0x795   : > { %7602 = vmatpush1.bf16.msra.mxu1 %v9285_v41  ;;  %7725 = vmatpush1.bf16.msra.mxu0 %v9291_v42  ;;  %v4413_v41 = vld [vmem:[%s13329_s15 + $0x398] sm:$0xff]  ;;  %v4400_v42 = vld [vmem:[%s13329_s15 + $0x330] sm:$0xff] }
 0x796   : > { %7603 = vmatprep.subr.bf16.mxu1 %v9318_v43  ;;  %7726 = vmatprep.subr.bf16.mxu0 %v9324_v51  ;;  %v4416_v43 = vld [vmem:[%s13329_s15 + $0x3b0] sm:$0xff]  ;;  %v9001_v51 = vcombine.low %v4365_v26, %v4381_v35  ;;  %v9034_v45 = vcombine.high %v4397_v40, %v4413_v41 }
 0x797   : > { %v9040_v46 = vcombine.high %v4400_v42, %v4416_v43  ;;  %v9039_v55 = vcombine.low %v4400_v42, %v4416_v43  ;;  %v4621_v43 = vld [vmem:[%s13329_s15 + $0xa18] sm:$0xff] }
 0x799   : > { %7604 = vmatpush1.bf16.msra.mxu1 %v9317_v48  ;;  %7727 = vmatpush1.bf16.msra.mxu0 %v9323_v49  ;;  %v4445_v48 = vld [vmem:[%s13329_s15 + $0x498] sm:$0xff]  ;;  %v4432_v49 = vld [vmem:[%s13329_s15 + $0x430] sm:$0xff] }
 0x79a   : > { %7605 = vmatprep.subr.bf16.mxu1 %v9350_v50  ;;  %7728 = vmatprep.subr.bf16.mxu0 %v9356_v54  ;;  %v4448_v50 = vld [vmem:[%s13329_s15 + $0x4b0] sm:$0xff]  ;;  %v9033_v54 = vcombine.low %v4397_v40, %v4413_v41  ;;  %v9066_v57 = vcombine.high %v4429_v47, %v4445_v48 }
 0x79b   : > { %v9072_v58 = vcombine.high %v4432_v49, %v4448_v50  ;;  %v9071_v6 = vcombine.low %v4432_v49, %v4448_v50  ;;  %v4653_v50 = vld [vmem:[%s13329_s15 + $0xb18] sm:$0xff] }
 0x79d   : > { %7606 = vmatpush1.bf16.msra.mxu1 %v9349_v5  ;;  %7729 = vmatpush1.bf16.msra.mxu0 %v9355_v8  ;;  %v4477_v5 = vld [vmem:[%s13329_s15 + $0x598] sm:$0xff]  ;;  %v4464_v8 = vld [vmem:[%s13329_s15 + $0x530] sm:$0xff] }
 0x79e   : > { %7607 = vmatprep.subr.bf16.mxu1 %v9382_v13  ;;  %7730 = vmatprep.subr.bf16.mxu0 %v9388_v62  ;;  %v4480_v13 = vld [vmem:[%s13329_s15 + $0x5b0] sm:$0xff]  ;;  %v9065_v62 = vcombine.low %v4429_v47, %v4445_v48  ;;  %v9098_v7 = vcombine.high %v4461_v60, %v4477_v5 }
 0x79f   : > { %v9104_v9 = vcombine.high %v4464_v8, %v4480_v13  ;;  %v9103_v17 = vcombine.low %v4464_v8, %v4480_v13  ;;  %v4685_v13 = vld [vmem:[%s13329_s15 + $0xc18] sm:$0xff] }
 0x7a1   : > { %7608 = vmatpush1.bf16.msra.mxu1 %v9381_v11  ;;  %7731 = vmatpush1.bf16.msra.mxu0 %v9387_v12  ;;  %v4509_v11 = vld [vmem:[%s13329_s15 + $0x698] sm:$0xff]  ;;  %v4496_v12 = vld [vmem:[%s13329_s15 + $0x630] sm:$0xff] }
 0x7a2   : > { %7609 = vmatprep.subr.bf16.mxu1 %v9414_v14  ;;  %7732 = vmatprep.subr.bf16.mxu0 %v9420_v15  ;;  %v4512_v14 = vld [vmem:[%s13329_s15 + $0x6b0] sm:$0xff]  ;;  %v9097_v15 = vcombine.low %v4461_v60, %v4477_v5  ;;  %v9130_v22 = vcombine.high %v4493_v10, %v4509_v11 }
 0x7a3   : > { %v9136_v16 = vcombine.high %v4496_v12, %v4512_v14  ;;  %v9135_v30 = vcombine.low %v4496_v12, %v4512_v14  ;;  %v4717_v14 = vld [vmem:[%s13329_s15 + $0xd18] sm:$0xff] }
 0x7a5   : > { %7610 = vmatpush1.bf16.msra.mxu1 %v9413_v63  ;;  %7733 = vmatpush1.bf16.msra.mxu0 %v9419_v0  ;;  %v4541_v63 = vld [vmem:[%s13329_s15 + $0x798] sm:$0xff]  ;;  %v4528_v0 = vld [vmem:[%s13329_s15 + $0x730] sm:$0xff] }
 0x7a6   : > { %7661 = vmatprep.subr.bf16.mxu1 %v8938_v19  ;;  %7784 = vmatprep.subr.bf16.mxu0 %v8944_v29  ;;  %v4544_v19 = vld [vmem:[%s13329_s15 + $0x7b0] sm:$0xff]  ;;  %v9129_v29 = vcombine.low %v4493_v10, %v4509_v11  ;;  %v9162_v31 = vcombine.high %v4525_v18, %v4541_v63 }
 0x7a7   : > { %v9168_v3 = vcombine.high %v4528_v0, %v4544_v19  ;;  %v9167_v26 = vcombine.low %v4528_v0, %v4544_v19  ;;  %v4749_v19 = vld [vmem:[%s13329_s15 + $0xe18] sm:$0xff] }
 0x7a8   : > { %7612 = vmatmul.mubr.bf16.vlgmr.msra.gmra.mrb[32].mxu1 %v11760_v2  ;;  %7735 = vmatmul.mubr.bf16.vlgmr.msra.gmra.mrb[36].mxu0 %v11760_v2 }
 0x7a9   : > { %7662 = vmatpush1.bf16.msra.mxu1 %v8937_v32  ;;  %7693 = vmatprep.mubr.bf16.mxu1 %v11758_v1  ;;  %v4573_v32 = vld [vmem:[%s13329_s15 + $0x898] sm:$0xff] }
 0x7aa   : > { %7785 = vmatpush1.bf16.msra.mxu0 %v8943_v33  ;;  %7816 = vmatprep.mubr.bf16.mxu0 %v11758_v1  ;;  %v4560_v33 = vld [vmem:[%s13329_s15 + $0x830] sm:$0xff]  ;;  %v9194_v35 = vcombine.high %v4557_v4, %v4573_v32 }
 0x7ab   : > { %7663 = vmatprep.subr.bf16.mxu1 %v8970_v34  ;;  %7786 = vmatprep.subr.bf16.mxu0 %v8976_v25  ;;  %v4576_v34 = vld [vmem:[%s13329_s15 + $0x8b0] sm:$0xff]  ;;  %v9161_v25 = vcombine.low %v4525_v18, %v4541_v63 }
 0x7ac   : > { %v9200_v36 = vcombine.high %v4560_v33, %v4576_v34  ;;  %v9199_v40 = vcombine.low %v4560_v33, %v4576_v34  ;;  %v4781_v34 = vld [vmem:[%s13329_s15 + $0xf18] sm:$0xff] }
 0x7ad   : > { %7664 = vmatpush1.bf16.msra.mxu1 %v8969_v38  ;;  %v4605_v38 = vld [vmem:[%s13329_s15 + $0x998] sm:$0xff] }
 0x7ae   : > { %7787 = vmatpush1.bf16.msra.mxu0 %v8975_v27  ;;  %7665 = vmatprep.subr.bf16.mxu1 %v9002_v28  ;;  %v4592_v27 = vld [vmem:[%s13329_s15 + $0x930] sm:$0xff]  ;;  %v9226_v41 = vcombine.high %v4589_v37, %v4605_v38 }
 0x7af   : > { %7788 = vmatprep.subr.bf16.mxu0 %v9008_v39  ;;  %v4608_v28 = vld [vmem:[%s13329_s15 + $0x9b0] sm:$0xff]  ;;  %v9193_v39 = vcombine.low %v4557_v4, %v4573_v32 }
 0x7b0   : > { %v9232_v42 = vcombine.high %v4592_v27, %v4608_v28  ;;  %v9231_v47 = vcombine.low %v4592_v27, %v4608_v28  ;;  %v4303_v28 = vld [vmem:[%s13329_s15 + $0x28] sm:$0xff] }
 0x7b1   : > { %7666 = vmatpush1.bf16.msra.mxu1 %v9001_v51  ;;  %v4637_v51 = vld [vmem:[%s13329_s15 + $0xa98] sm:$0xff] }
 0x7b2   : > { %7789 = vmatpush1.bf16.msra.mxu0 %v9007_v44  ;;  %7667 = vmatprep.subr.bf16.mxu1 %v9034_v45  ;;  %v4624_v44 = vld [vmem:[%s13329_s15 + $0xa30] sm:$0xff]  ;;  %v9258_v48 = vcombine.high %v4621_v43, %v4637_v51 }
 0x7b3   : > { %7790 = vmatprep.subr.bf16.mxu0 %v9040_v46  ;;  %v4640_v45 = vld [vmem:[%s13329_s15 + $0xab0] sm:$0xff]  ;;  %v9225_v46 = vcombine.low %v4589_v37, %v4605_v38 }
 0x7b4   : > { %v9264_v49 = vcombine.high %v4624_v44, %v4640_v45  ;;  %v9263_v60 = vcombine.low %v4624_v44, %v4640_v45  ;;  %v4335_v45 = vld [vmem:[%s13329_s15 + $0x128] sm:$0xff] }
 0x7b5   : > { %7668 = vmatpush1.bf16.msra.mxu1 %v9033_v54  ;;  %v4669_v54 = vld [vmem:[%s13329_s15 + $0xb98] sm:$0xff] }
 0x7b6   : > { %7791 = vmatpush1.bf16.msra.mxu0 %v9039_v55  ;;  %7669 = vmatprep.subr.bf16.mxu1 %v9066_v57  ;;  %v4656_v55 = vld [vmem:[%s13329_s15 + $0xb30] sm:$0xff]  ;;  %v9290_v5 = vcombine.high %v4653_v50, %v4669_v54 }
 0x7b7   : > { %7792 = vmatprep.subr.bf16.mxu0 %v9072_v58  ;;  %v4672_v57 = vld [vmem:[%s13329_s15 + $0xbb0] sm:$0xff]  ;;  %v9257_v58 = vcombine.low %v4621_v43, %v4637_v51 }
 0x7b8   : > { %v9296_v8 = vcombine.high %v4656_v55, %v4672_v57  ;;  %v9295_v10 = vcombine.low %v4656_v55, %v4672_v57  ;;  %v4367_v55 = vld [vmem:[%s13329_s15 + $0x228] sm:$0xff] }
 0x7b9   : > { %7670 = vmatpush1.bf16.msra.mxu1 %v9065_v62  ;;  %v4701_v62 = vld [vmem:[%s13329_s15 + $0xc98] sm:$0xff]  ;;  %v4383_v57 = vld [vmem:[%s13329_s15 + $0x2a8] sm:$0xff] }
 0x7ba   : > { %7793 = vmatpush1.bf16.msra.mxu0 %v9071_v6  ;;  %7671 = vmatprep.subr.bf16.mxu1 %v9098_v7  ;;  %v4688_v6 = vld [vmem:[%s13329_s15 + $0xc30] sm:$0xff]  ;;  %v9322_v11 = vcombine.high %v4685_v13, %v4701_v62 }
 0x7bb   : > { %7794 = vmatprep.subr.bf16.mxu0 %v9104_v9  ;;  %v4704_v7 = vld [vmem:[%s13329_s15 + $0xcb0] sm:$0xff]  ;;  %v9289_v9 = vcombine.low %v4653_v50, %v4669_v54 }
 0x7bc   : > { %v9328_v12 = vcombine.high %v4688_v6, %v4704_v7  ;;  %v9327_v18 = vcombine.low %v4688_v6, %v4704_v7  ;;  %v4399_v7 = vld [vmem:[%s13329_s15 + $0x328] sm:$0xff] }
 0x7bd   : > { %7672 = vmatpush1.bf16.msra.mxu1 %v9097_v15  ;;  %v4733_v15 = vld [vmem:[%s13329_s15 + $0xd98] sm:$0xff] }
 0x7be   : > { %7795 = vmatpush1.bf16.msra.mxu0 %v9103_v17  ;;  %7673 = vmatprep.subr.bf16.mxu1 %v9130_v22  ;;  %v4720_v17 = vld [vmem:[%s13329_s15 + $0xd30] sm:$0xff]  ;;  %v9354_v63 = vcombine.high %v4717_v14, %v4733_v15 }
 0x7bf   : > { %7796 = vmatprep.subr.bf16.mxu0 %v9136_v16  ;;  %v4736_v22 = vld [vmem:[%s13329_s15 + $0xdb0] sm:$0xff]  ;;  %v9321_v16 = vcombine.low %v4685_v13, %v4701_v62  ;;  %v9006_v62 = vcombine.high %v4367_v55, %v4383_v57 }
 0x7c0   : > { %v9360_v0 = vcombine.high %v4720_v17, %v4736_v22  ;;  %v9359_v4 = vcombine.low %v4720_v17, %v4736_v22  ;;  %v4431_v22 = vld [vmem:[%s13329_s15 + $0x428] sm:$0xff] }
 0x7c1   : > { %7674 = vmatpush1.bf16.msra.mxu1 %v9129_v29  ;;  %v4765_v29 = vld [vmem:[%s13329_s15 + $0xe98] sm:$0xff] }
 0x7c2   : > { %7797 = vmatpush1.bf16.msra.mxu0 %v9135_v30  ;;  %7675 = vmatprep.subr.bf16.mxu1 %v9162_v31  ;;  %v4752_v30 = vld [vmem:[%s13329_s15 + $0xe30] sm:$0xff]  ;;  %v9386_v32 = vcombine.high %v4749_v19, %v4765_v29 }
 0x7c3   : > { %7798 = vmatprep.subr.bf16.mxu0 %v9168_v3  ;;  %v4768_v31 = vld [vmem:[%s13329_s15 + $0xeb0] sm:$0xff]  ;;  %v9353_v3 = vcombine.low %v4717_v14, %v4733_v15 }
 0x7c4   : > { %v9392_v33 = vcombine.high %v4752_v30, %v4768_v31  ;;  %v9391_v37 = vcombine.low %v4752_v30, %v4768_v31  ;;  %v4463_v31 = vld [vmem:[%s13329_s15 + $0x528] sm:$0xff] }
 0x7c5   : > { %7676 = vmatpush1.bf16.msra.mxu1 %v9161_v25  ;;  %v4797_v25 = vld [vmem:[%s13329_s15 + $0xf98] sm:$0xff] }
 0x7c6   : > { %7799 = vmatpush1.bf16.msra.mxu0 %v9167_v26  ;;  %7677 = vmatprep.subr.bf16.mxu1 %v9194_v35  ;;  %v4784_v26 = vld [vmem:[%s13329_s15 + $0xf30] sm:$0xff]  ;;  %v9418_v38 = vcombine.high %v4781_v34, %v4797_v25 }
 0x7c7   : > { %7800 = vmatprep.subr.bf16.mxu0 %v9200_v36  ;;  %v4800_v35 = vld [vmem:[%s13329_s15 + $0xfb0] sm:$0xff]  ;;  %v9385_v36 = vcombine.low %v4749_v19, %v4765_v29 }
 0x7c8   : > { %v9424_v27 = vcombine.high %v4784_v26, %v4800_v35  ;;  %v9423_v43 = vcombine.low %v4784_v26, %v4800_v35  ;;  %v4495_v35 = vld [vmem:[%s13329_s15 + $0x628] sm:$0xff] }
 0x7c9   : > { %7678 = vmatpush1.bf16.msra.mxu1 %v9193_v39  ;;  %v4319_v39 = vld [vmem:[%s13329_s15 + $0xa8] sm:$0xff] }
 0x7ca   : > { %7801 = vmatpush1.bf16.msra.mxu0 %v9199_v40  ;;  %7679 = vmatprep.subr.bf16.mxu1 %v9226_v41  ;;  %v4306_v40 = vld [vmem:[%s13329_s15 + $0x40] sm:$0xff]  ;;  %v8942_v51 = vcombine.high %v4303_v28, %v4319_v39 }
 0x7cb   : > { %7802 = vmatprep.subr.bf16.mxu0 %v9232_v42  ;;  %v4322_v41 = vld [vmem:[%s13329_s15 + $0xc0] sm:$0xff]  ;;  %v9417_v42 = vcombine.low %v4781_v34, %v4797_v25 }
 0x7cc   : > { %v8948_v44 = vcombine.high %v4306_v40, %v4322_v41  ;;  %v8947_v50 = vcombine.low %v4306_v40, %v4322_v41  ;;  %v4527_v41 = vld [vmem:[%s13329_s15 + $0x728] sm:$0xff] }
 0x7cd   : > { %7680 = vmatpush1.bf16.msra.mxu1 %v9225_v46  ;;  %v4351_v46 = vld [vmem:[%s13329_s15 + $0x1a8] sm:$0xff] }
 0x7ce   : > { %7803 = vmatpush1.bf16.msra.mxu0 %v9231_v47  ;;  %7681 = vmatprep.subr.bf16.mxu1 %v9258_v48  ;;  %v8941_v47 = vcombine.low %v4303_v28, %v4319_v39  ;;  %v4338_v48 = vld [vmem:[%s13329_s15 + $0x140] sm:$0xff]  ;;  %v8974_v54 = vcombine.high %v4335_v45, %v4351_v46 }
 0x7cf   : > { %7804 = vmatprep.subr.bf16.mxu0 %v9264_v49  ;;  %v4354_v49 = vld [vmem:[%s13329_s15 + $0x1c0] sm:$0xff] }
 0x7d0   : > { %v8979_v13 = vcombine.low %v4338_v48, %v4354_v49 }
 0x7d1   : > { %7682 = vmatpush1.bf16.msra.mxu1 %v9257_v58  ;;  %v8980_v58 = vcombine.high %v4338_v48, %v4354_v49  ;;  %v4559_v48 = vld [vmem:[%s13329_s15 + $0x828] sm:$0xff] }
 0x7d2   : > { %7805 = vmatpush1.bf16.msra.mxu0 %v9263_v60  ;;  %7683 = vmatprep.subr.bf16.mxu1 %v9290_v5  ;;  %v4370_v60 = vld [vmem:[%s13329_s15 + $0x240] sm:$0xff]  ;;  %v4575_v49 = vld [vmem:[%s13329_s15 + $0x8a8] sm:$0xff] }
 0x7d3   : > { %7806 = vmatprep.subr.bf16.mxu0 %v9296_v8  ;;  %v4386_v5 = vld [vmem:[%s13329_s15 + $0x2c0] sm:$0xff]  ;;  %v8973_v8 = vcombine.low %v4335_v45, %v4351_v46 }
 0x7d4   : > { %v9012_v6 = vcombine.high %v4370_v60, %v4386_v5  ;;  %v9011_v14 = vcombine.low %v4370_v60, %v4386_v5  ;;  %v4591_v5 = vld [vmem:[%s13329_s15 + $0x928] sm:$0xff] }
 0x7d5   : > { %7684 = vmatpush1.bf16.msra.mxu1 %v9289_v9  ;;  %v4415_v9 = vld [vmem:[%s13329_s15 + $0x3a8] sm:$0xff] }
 0x7d6   : > { %7807 = vmatpush1.bf16.msra.mxu0 %v9295_v10  ;;  %7685 = vmatprep.subr.bf16.mxu1 %v9322_v11  ;;  %v4402_v10 = vld [vmem:[%s13329_s15 + $0x340] sm:$0xff]  ;;  %v9038_v15 = vcombine.high %v4399_v7, %v4415_v9 }
 0x7d7   : > { %7808 = vmatprep.subr.bf16.mxu0 %v9328_v12  ;;  %v4418_v11 = vld [vmem:[%s13329_s15 + $0x3c0] sm:$0xff]  ;;  %v9005_v12 = vcombine.low %v4367_v55, %v4383_v57 }
 0x7d8   : > { %v9044_v17 = vcombine.high %v4402_v10, %v4418_v11  ;;  %v9043_v19 = vcombine.low %v4402_v10, %v4418_v11  ;;  %v4623_v11 = vld [vmem:[%s13329_s15 + $0xa28] sm:$0xff] }
 0x7d9   : > { %7686 = vmatpush1.bf16.msra.mxu1 %v9321_v16  ;;  %v4447_v16 = vld [vmem:[%s13329_s15 + $0x4a8] sm:$0xff] }
 0x7da   : > { %7809 = vmatpush1.bf16.msra.mxu0 %v9327_v18  ;;  %7687 = vmatprep.subr.bf16.mxu1 %v9354_v63  ;;  %v4434_v18 = vld [vmem:[%s13329_s15 + $0x440] sm:$0xff]  ;;  %v9070_v29 = vcombine.high %v4431_v22, %v4447_v16 }
 0x7db   : > { %7810 = vmatprep.subr.bf16.mxu0 %v9360_v0  ;;  %v4450_v63 = vld [vmem:[%s13329_s15 + $0x4c0] sm:$0xff]  ;;  %v9037_v0 = vcombine.low %v4399_v7, %v4415_v9 }
 0x7dc   : > { %v9076_v30 = vcombine.high %v4434_v18, %v4450_v63  ;;  %v9075_v34 = vcombine.low %v4434_v18, %v4450_v63  ;;  %v4655_v63 = vld [vmem:[%s13329_s15 + $0xb28] sm:$0xff] }
 0x7dd   : > { %7688 = vmatpush1.bf16.msra.mxu1 %v9353_v3  ;;  %v4479_v3 = vld [vmem:[%s13329_s15 + $0x5a8] sm:$0xff] }
 0x7de   : > { %7811 = vmatpush1.bf16.msra.mxu0 %v9359_v4  ;;  %7689 = vmatprep.subr.bf16.mxu1 %v9386_v32  ;;  %v4466_v4 = vld [vmem:[%s13329_s15 + $0x540] sm:$0xff]  ;;  %v9102_v25 = vcombine.high %v4463_v31, %v4479_v3 }
 0x7df   : > { %7812 = vmatprep.subr.bf16.mxu0 %v9392_v33  ;;  %v4482_v32 = vld [vmem:[%s13329_s15 + $0x5c0] sm:$0xff]  ;;  %v9069_v33 = vcombine.low %v4431_v22, %v4447_v16 }
 0x7e0   : > { %v9108_v26 = vcombine.high %v4466_v4, %v4482_v32  ;;  %v9107_v28 = vcombine.low %v4466_v4, %v4482_v32  ;;  %v4687_v32 = vld [vmem:[%s13329_s15 + $0xc28] sm:$0xff] }
 0x7e1   : > { %7690 = vmatpush1.bf16.msra.mxu1 %v9385_v36  ;;  %v4511_v36 = vld [vmem:[%s13329_s15 + $0x6a8] sm:$0xff] }
 0x7e2   : > { %7813 = vmatpush1.bf16.msra.mxu0 %v9391_v37  ;;  %7691 = vmatprep.subr.bf16.mxu1 %v9418_v38  ;;  %v4498_v37 = vld [vmem:[%s13329_s15 + $0x640] sm:$0xff]  ;;  %v9134_v39 = vcombine.high %v4495_v35, %v4511_v36 }
 0x7e3   : > { %7814 = vmatprep.subr.bf16.mxu0 %v9424_v27  ;;  %v4514_v38 = vld [vmem:[%s13329_s15 + $0x6c0] sm:$0xff]  ;;  %v9101_v27 = vcombine.low %v4463_v31, %v4479_v3 }
 0x7e4   : > { %v9140_v40 = vcombine.high %v4498_v37, %v4514_v38  ;;  %v9139_v45 = vcombine.low %v4498_v37, %v4514_v38  ;;  %v4719_v38 = vld [vmem:[%s13329_s15 + $0xd28] sm:$0xff] }
 0x7e5   : > { %7692 = vmatpush1.bf16.msra.mxu1 %v9417_v42  ;;  %v4543_v42 = vld [vmem:[%s13329_s15 + $0x7a8] sm:$0xff] }
 0x7e6   : > { %7815 = vmatpush1.bf16.msra.mxu0 %v9423_v43  ;;  %7743 = vmatprep.subr.bf16.mxu1 %v8942_v51  ;;  %v4530_v43 = vld [vmem:[%s13329_s15 + $0x740] sm:$0xff]  ;;  %v9166_v46 = vcombine.high %v4527_v41, %v4543_v42  ;;  %v9165_v55 = vcombine.low %v4527_v41, %v4543_v42 }
 0x7e7   : > { %7866 = vmatprep.subr.bf16.mxu0 %v8948_v44  ;;  %v4546_v51 = vld [vmem:[%s13329_s15 + $0x7c0] sm:$0xff]  ;;  %v9133_v44 = vcombine.low %v4495_v35, %v4511_v36 }
 0x7e8   : > { %7694 = vmatmul.mubr.bf16.vlgmr.msra.gmra.mrb[36].mxu1 %v11760_v2  ;;  %v9171_v57 = vcombine.low %v4530_v43, %v4546_v51 }
 0x7e9   : > { %7817 = vmatmul.mubr.bf16.vlgmr.msra.gmra.mrb[40].mxu0 %v11760_v2  ;;  %7744 = vmatpush1.bf16.msra.mxu1 %v8941_v47  ;;  %v9172_v47 = vcombine.high %v4530_v43, %v4546_v51  ;;  %v4751_v51 = vld [vmem:[%s13329_s15 + $0xe28] sm:$0xff] }
 0x7ea   : > { %7775 = vmatprep.mubr.bf16.mxu1 %v11758_v1  ;;  %7867 = vmatpush1.bf16.msra.mxu0 %v8947_v50  ;;  %v4562_v50 = vld [vmem:[%s13329_s15 + $0x840] sm:$0xff] }
 0x7eb   : > { %7898 = vmatprep.mubr.bf16.mxu0 %v11758_v1  ;;  %7745 = vmatprep.subr.bf16.mxu1 %v8974_v54  ;;  %v4578_v54 = vld [vmem:[%s13329_s15 + $0x8c0] sm:$0xff] }
 0x7ec   : > { %7868 = vmatprep.subr.bf16.mxu0 %v8980_v58  ;;  %v9198_v58 = vcombine.high %v4559_v48, %v4575_v49  ;;  %v9204_v60 = vcombine.high %v4562_v50, %v4578_v54  ;;  %v9203_v7 = vcombine.low %v4562_v50, %v4578_v54  ;;  %v4783_v54 = vld [vmem:[%s13329_s15 + $0xf28] sm:$0xff] }
 0x7ed   : > { %7746 = vmatpush1.bf16.msra.mxu1 %v8973_v8  ;;  %v4607_v8 = vld [vmem:[%s13329_s15 + $0x9a8] sm:$0xff] }
 0x7ee   : > { %7869 = vmatpush1.bf16.msra.mxu0 %v8979_v13  ;;  %7747 = vmatprep.subr.bf16.mxu1 %v9006_v62  ;;  %v4594_v13 = vld [vmem:[%s13329_s15 + $0x940] sm:$0xff]  ;;  %v9230_v9 = vcombine.high %v4591_v5, %v4607_v8 }
 0x7ef   : > { %7870 = vmatprep.subr.bf16.mxu0 %v9012_v6  ;;  %v4610_v62 = vld [vmem:[%s13329_s15 + $0x9c0] sm:$0xff]  ;;  %v9197_v6 = vcombine.low %v4559_v48, %v4575_v49 }
 0x7f0   : > { %v9236_v10 = vcombine.high %v4594_v13, %v4610_v62  ;;  %v9235_v22 = vcombine.low %v4594_v13, %v4610_v62  ;;  %v4305_v62 = vld [vmem:[%s13329_s15 + $0x38] sm:$0xff] }
 0x7f1   : > { %7748 = vmatpush1.bf16.msra.mxu1 %v9005_v12  ;;  %v4639_v12 = vld [vmem:[%s13329_s15 + $0xaa8] sm:$0xff] }
 0x7f2   : > { %7871 = vmatpush1.bf16.msra.mxu0 %v9011_v14  ;;  %7749 = vmatprep.subr.bf16.mxu1 %v9038_v15  ;;  %v4626_v14 = vld [vmem:[%s13329_s15 + $0xa40] sm:$0xff]  ;;  %v9262_v16 = vcombine.high %v4623_v11, %v4639_v12 }
 0x7f3   : > { %7872 = vmatprep.subr.bf16.mxu0 %v9044_v17  ;;  %v4642_v15 = vld [vmem:[%s13329_s15 + $0xac0] sm:$0xff]  ;;  %v9229_v17 = vcombine.low %v4591_v5, %v4607_v8 }
 0x7f4   : > { %v9268_v18 = vcombine.high %v4626_v14, %v4642_v15  ;;  %v9267_v31 = vcombine.low %v4626_v14, %v4642_v15  ;;  %v4337_v15 = vld [vmem:[%s13329_s15 + $0x138] sm:$0xff] }
 0x7f5   : > { %7750 = vmatpush1.bf16.msra.mxu1 %v9037_v0  ;;  %v4671_v0 = vld [vmem:[%s13329_s15 + $0xba8] sm:$0xff] }
 0x7f6   : > { %7873 = vmatpush1.bf16.msra.mxu0 %v9043_v19  ;;  %7751 = vmatprep.subr.bf16.mxu1 %v9070_v29  ;;  %v4658_v19 = vld [vmem:[%s13329_s15 + $0xb40] sm:$0xff]  ;;  %v9294_v3 = vcombine.high %v4655_v63, %v4671_v0 }
 0x7f7   : > { %7874 = vmatprep.subr.bf16.mxu0 %v9076_v30  ;;  %v4674_v29 = vld [vmem:[%s13329_s15 + $0xbc0] sm:$0xff]  ;;  %v9261_v30 = vcombine.low %v4623_v11, %v4639_v12 }
 0x7f8   : > { %v9300_v4 = vcombine.high %v4658_v19, %v4674_v29  ;;  %v9299_v35 = vcombine.low %v4658_v19, %v4674_v29  ;;  %v4369_v19 = vld [vmem:[%s13329_s15 + $0x238] sm:$0xff] }
 0x7f9   : > { %7752 = vmatpush1.bf16.msra.mxu1 %v9069_v33  ;;  %v4703_v33 = vld [vmem:[%s13329_s15 + $0xca8] sm:$0xff]  ;;  %v4385_v29 = vld [vmem:[%s13329_s15 + $0x2b8] sm:$0xff] }
 0x7fa   : > { %7875 = vmatpush1.bf16.msra.mxu0 %v9075_v34  ;;  %7753 = vmatprep.subr.bf16.mxu1 %v9102_v25  ;;  %v4690_v34 = vld [vmem:[%s13329_s15 + $0xc40] sm:$0xff]  ;;  %v9326_v36 = vcombine.high %v4687_v32, %v4703_v33 }
 0x7fb   : > { %7876 = vmatprep.subr.bf16.mxu0 %v9108_v26  ;;  %v4706_v25 = vld [vmem:[%s13329_s15 + $0xcc0] sm:$0xff]  ;;  %v9293_v26 = vcombine.low %v4655_v63, %v4671_v0 }
 0x7fc   : > { %v9332_v37 = vcombine.high %v4690_v34, %v4706_v25  ;;  %v9331_v41 = vcombine.low %v4690_v34, %v4706_v25  ;;  %v4401_v25 = vld [vmem:[%s13329_s15 + $0x338] sm:$0xff] }
 0x7fd   : > { %7754 = vmatpush1.bf16.msra.mxu1 %v9101_v27  ;;  %v4735_v27 = vld [vmem:[%s13329_s15 + $0xda8] sm:$0xff] }
 0x7fe   : > { %7877 = vmatpush1.bf16.msra.mxu0 %v9107_v28  ;;  %7755 = vmatprep.subr.bf16.mxu1 %v9134_v39  ;;  %v4722_v28 = vld [vmem:[%s13329_s15 + $0xd40] sm:$0xff]  ;;  %v9358_v42 = vcombine.high %v4719_v38, %v4735_v27 }
 0x7ff   : > { %7878 = vmatprep.subr.bf16.mxu0 %v9140_v40  ;;  %v4738_v39 = vld [vmem:[%s13329_s15 + $0xdc0] sm:$0xff]  ;;  %v9325_v40 = vcombine.low %v4687_v32, %v4703_v33  ;;  %v9010_v33 = vcombine.high %v4369_v19, %v4385_v29 }
 0x800   : > { %v9364_v43 = vcombine.high %v4722_v28, %v4738_v39  ;;  %v9363_v48 = vcombine.low %v4722_v28, %v4738_v39  ;;  %v4433_v39 = vld [vmem:[%s13329_s15 + $0x438] sm:$0xff] }
 0x801   : > { %7756 = vmatpush1.bf16.msra.mxu1 %v9133_v44  ;;  %v4767_v44 = vld [vmem:[%s13329_s15 + $0xea8] sm:$0xff] }
 0x802   : > { %7879 = vmatpush1.bf16.msra.mxu0 %v9139_v45  ;;  %7757 = vmatprep.subr.bf16.mxu1 %v9166_v46  ;;  %v4754_v45 = vld [vmem:[%s13329_s15 + $0xe40] sm:$0xff]  ;;  %v9390_v49 = vcombine.high %v4751_v51, %v4767_v44 }
 0x803   : > { %7880 = vmatprep.subr.bf16.mxu0 %v9172_v47  ;;  %v4770_v46 = vld [vmem:[%s13329_s15 + $0xec0] sm:$0xff]  ;;  %v9357_v47 = vcombine.low %v4719_v38, %v4735_v27 }
 0x804   : > { %v9396_v50 = vcombine.high %v4754_v45, %v4770_v46  ;;  %v9395_v5 = vcombine.low %v4754_v45, %v4770_v46  ;;  %v4465_v46 = vld [vmem:[%s13329_s15 + $0x538] sm:$0xff] }
 0x805   : > { %7758 = vmatpush1.bf16.msra.mxu1 %v9165_v55  ;;  %v4799_v55 = vld [vmem:[%s13329_s15 + $0xfa8] sm:$0xff] }
 0x806   : > { %7881 = vmatpush1.bf16.msra.mxu0 %v9171_v57  ;;  %7759 = vmatprep.subr.bf16.mxu1 %v9198_v58  ;;  %v4786_v57 = vld [vmem:[%s13329_s15 + $0xf40] sm:$0xff]  ;;  %v9422_v8 = vcombine.high %v4783_v54, %v4799_v55 }
 0x807   : > { %7882 = vmatprep.subr.bf16.mxu0 %v9204_v60  ;;  %v4802_v58 = vld [vmem:[%s13329_s15 + $0xfc0] sm:$0xff]  ;;  %v9389_v60 = vcombine.low %v4751_v51, %v4767_v44 }
 0x808   : > { %v9428_v13 = vcombine.high %v4786_v57, %v4802_v58  ;;  %v9427_v11 = vcombine.low %v4786_v57, %v4802_v58 }
 0x809   : > { %7760 = vmatpush1.bf16.msra.mxu1 %v9197_v6  ;;  %v4321_v6 = vld [vmem:[%s13329_s15 + $0xb8] sm:$0xff] }
 0x80a   : > { %7883 = vmatpush1.bf16.msra.mxu0 %v9203_v7  ;;  %7761 = vmatprep.subr.bf16.mxu1 %v9230_v9  ;;  %v4308_v7 = vld [vmem:[%s13329_s15 + $0x50] sm:$0xff]  ;;  %v8946_v12 = vcombine.high %v4305_v62, %v4321_v6 }
 0x80b   : > { %7884 = vmatprep.subr.bf16.mxu0 %v9236_v10  ;;  %v4324_v9 = vld [vmem:[%s13329_s15 + $0xd0] sm:$0xff]  ;;  %v9421_v10 = vcombine.low %v4783_v54, %v4799_v55  ;;  %v12407_v54 = vld [vmem:[%s13330_s16] sm:$0xff] }
 0x80c   : > { %v8952_v14 = vcombine.high %v4308_v7, %v4324_v9  ;;  %v8951_v63 = vcombine.low %v4308_v7, %v4324_v9  ;;  %v7385_v9 = vrot.slane %v12407_v54, %v10690_v23 }
 0x80d   : > { %7762 = vmatpush1.bf16.msra.mxu1 %v9229_v17  ;;  %v4353_v17 = vld [vmem:[%s13329_s15 + $0x1b8] sm:$0xff] }
 0x80e   : > { %7885 = vmatpush1.bf16.msra.mxu0 %v9235_v22  ;;  %7763 = vmatprep.subr.bf16.mxu1 %v9262_v16  ;;  %v8945_v22 = vcombine.low %v4305_v62, %v4321_v6  ;;  %v4340_v16 = vld [vmem:[%s13329_s15 + $0x150] sm:$0xff]  ;;  %v8978_v0 = vcombine.high %v4337_v15, %v4353_v17 }
 0x80f   : > { %7886 = vmatprep.subr.bf16.mxu0 %v9268_v18  ;;  %v4356_v18 = vld [vmem:[%s13329_s15 + $0x1d0] sm:$0xff] }
 0x810   : > { %v8983_v32 = vcombine.low %v4340_v16, %v4356_v18  ;;  %v4500_v62 = vld [vmem:[%s13329_s15 + $0x650] sm:$0xff] }
 0x811   : > { %7764 = vmatpush1.bf16.msra.mxu1 %v9261_v30  ;;  %v8984_v30 = vcombine.high %v4340_v16, %v4356_v18  ;;  %v4516_v6 = vld [vmem:[%s13329_s15 + $0x6d0] sm:$0xff]  ;;  %v4545_v16 = vld [vmem:[%s13329_s15 + $0x7b8] sm:$0xff] }
 0x812   : > { %7887 = vmatpush1.bf16.msra.mxu0 %v9267_v31  ;;  %7765 = vmatprep.subr.bf16.mxu1 %v9294_v3  ;;  %v4372_v31 = vld [vmem:[%s13329_s15 + $0x250] sm:$0xff] }
 0x813   : > { %7888 = vmatprep.subr.bf16.mxu0 %v9300_v4  ;;  %v4388_v3 = vld [vmem:[%s13329_s15 + $0x2d0] sm:$0xff]  ;;  %v8977_v4 = vcombine.low %v4337_v15, %v4353_v17  ;;  %v9144_v17 = vcombine.high %v4500_v62, %v4516_v6 }
 0x814   : > { %v9016_v34 = vcombine.high %v4372_v31, %v4388_v3  ;;  %v9015_v38 = vcombine.low %v4372_v31, %v4388_v3 }
 0x815   : > { %7766 = vmatpush1.bf16.msra.mxu1 %v9293_v26  ;;  %v4417_v26 = vld [vmem:[%s13329_s15 + $0x3b8] sm:$0xff] }
 0x816   : > { %7889 = vmatpush1.bf16.msra.mxu0 %v9299_v35  ;;  %7767 = vmatprep.subr.bf16.mxu1 %v9326_v36  ;;  %v4404_v35 = vld [vmem:[%s13329_s15 + $0x350] sm:$0xff]  ;;  %v9042_v27 = vcombine.high %v4401_v25, %v4417_v26 }
 0x817   : > { %7890 = vmatprep.subr.bf16.mxu0 %v9332_v37  ;;  %v4420_v36 = vld [vmem:[%s13329_s15 + $0x3d0] sm:$0xff]  ;;  %v9009_v37 = vcombine.low %v4369_v19, %v4385_v29 }
 0x818   : > { %v9048_v28 = vcombine.high %v4404_v35, %v4420_v36  ;;  %v9047_v51 = vcombine.low %v4404_v35, %v4420_v36  ;;  %v4532_v29 = vld [vmem:[%s13329_s15 + $0x750] sm:$0xff] }
 0x819   : > { %7768 = vmatpush1.bf16.msra.mxu1 %v9325_v40  ;;  %v4449_v40 = vld [vmem:[%s13329_s15 + $0x4b8] sm:$0xff] }
 0x81a   : > { %7891 = vmatpush1.bf16.msra.mxu0 %v9331_v41  ;;  %7769 = vmatprep.subr.bf16.mxu1 %v9358_v42  ;;  %v4436_v41 = vld [vmem:[%s13329_s15 + $0x450] sm:$0xff]  ;;  %v9074_v44 = vcombine.high %v4433_v39, %v4449_v40 }
 0x81b   : > { %7892 = vmatprep.subr.bf16.mxu0 %v9364_v43  ;;  %v4452_v42 = vld [vmem:[%s13329_s15 + $0x4d0] sm:$0xff]  ;;  %v9041_v43 = vcombine.low %v4401_v25, %v4417_v26  ;;  %v9143_v26 = vcombine.low %v4500_v62, %v4516_v6 }
 0x81c   : > { %v9080_v45 = vcombine.high %v4436_v41, %v4452_v42  ;;  %v9079_v55 = vcombine.low %v4436_v41, %v4452_v42 }
 0x81d   : > { %7770 = vmatpush1.bf16.msra.mxu1 %v9357_v47  ;;  %v4481_v47 = vld [vmem:[%s13329_s15 + $0x5b8] sm:$0xff] }
 0x81e   : > { %7893 = vmatpush1.bf16.msra.mxu0 %v9363_v48  ;;  %7771 = vmatprep.subr.bf16.mxu1 %v9390_v49  ;;  %v4468_v48 = vld [vmem:[%s13329_s15 + $0x550] sm:$0xff]  ;;  %v9106_v57 = vcombine.high %v4465_v46, %v4481_v47  ;;  %v9105_v7 = vcombine.low %v4465_v46, %v4481_v47 }
 0x81f   : > { %7894 = vmatprep.subr.bf16.mxu0 %v9396_v50  ;;  %v4484_v49 = vld [vmem:[%s13329_s15 + $0x5d0] sm:$0xff]  ;;  %v9073_v50 = vcombine.low %v4433_v39, %v4449_v40 }
 0x820   : > { %v9112_v58 = vcombine.high %v4468_v48, %v4484_v49  ;;  %v4564_v39 = vld [vmem:[%s13329_s15 + $0x850] sm:$0xff] }
 0x821   : > { %7772 = vmatpush1.bf16.msra.mxu1 %v9389_v60  ;;  %v4497_v60 = vld [vmem:[%s13329_s15 + $0x638] sm:$0xff]  ;;  %v4580_v40 = vld [vmem:[%s13329_s15 + $0x8d0] sm:$0xff] }
 0x822   : > { %7895 = vmatpush1.bf16.msra.mxu0 %v9395_v5  ;;  %7773 = vmatprep.subr.bf16.mxu1 %v9422_v8  ;;  %v4513_v5 = vld [vmem:[%s13329_s15 + $0x6b8] sm:$0xff]  ;;  %v7381_v8 = vrot.slane %v12407_v54, %v10679_v20  ;;  %v4596_v46 = vld [vmem:[%s13329_s15 + $0x950] sm:$0xff] }
 0x823   : > { %7896 = vmatprep.subr.bf16.mxu0 %v9428_v13  ;;  %v7397_v13 = vrot.slane %v12407_v54, %v10704_v52  ;;  %v4612_v47 = vld [vmem:[%s13329_s15 + $0x9d0] sm:$0xff] }
 0x825   : > { %7774 = vmatpush1.bf16.msra.mxu1 %v9421_v10  ;;  %v7401_v10 = vrot.slane %v12407_v54, %v10710_v56 }
 0x826   : > { %7897 = vmatpush1.bf16.msra.mxu0 %v9427_v11  ;;  %7825 = vmatprep.subr.bf16.mxu1 %v8946_v12  ;;  %v9111_v11 = vcombine.low %v4468_v48, %v4484_v49  ;;  %v9138_v12 = vcombine.high %v4497_v60, %v4513_v5  ;;  %v9207_v49 = vcombine.low %v4564_v39, %v4580_v40 }
 0x827   : > { %7948 = vmatprep.subr.bf16.mxu0 %v8952_v14 }
 0x828   : > { %7776 = vmatmul.mubr.bf16.vlgmr.msra.gmra.mrb[40].mxu1 %v11760_v2 }
 0x829   : > { %7899 = vmatmul.mubr.bf16.vlgmr.msra.gmra.mrb[44].mxu0 %v11760_v2  ;;  %7826 = vmatpush1.bf16.msra.mxu1 %v8945_v22  ;;  %v4529_v22 = vld [vmem:[%s13329_s15 + $0x738] sm:$0xff] }
 0x82a   : > { %7857 = vmatprep.mubr.bf16.mxu1 %v11758_v1  ;;  %7949 = vmatpush1.bf16.msra.mxu0 %v8951_v63  ;;  %v9170_v35 = vcombine.high %v4529_v22, %v4545_v16  ;;  %v9169_v41 = vcombine.low %v4529_v22, %v4545_v16  ;;  %v4689_v22 = vld [vmem:[%s13329_s15 + $0xc38] sm:$0xff] }
 0x82b   : > { %7980 = vmatprep.mubr.bf16.mxu0 %v11758_v1  ;;  %7827 = vmatprep.subr.bf16.mxu1 %v8978_v0  ;;  %v4705_v16 = vld [vmem:[%s13329_s15 + $0xcb8] sm:$0xff] }
 0x82c   : > { %7950 = vmatprep.subr.bf16.mxu0 %v8984_v30  ;;  %v4548_v30 = vld [vmem:[%s13329_s15 + $0x7d0] sm:$0xff] }
 0x82d   : > { %7828 = vmatpush1.bf16.msra.mxu1 %v8977_v4  ;;  %v9175_v42 = vcombine.low %v4532_v29, %v4548_v30 }
 0x82e   : > { %7951 = vmatpush1.bf16.msra.mxu0 %v8983_v32  ;;  %7829 = vmatprep.subr.bf16.mxu1 %v9010_v33  ;;  %v9137_v33 = vcombine.low %v4497_v60, %v4513_v5  ;;  %v4628_v60 = vld [vmem:[%s13329_s15 + $0xa50] sm:$0xff] }
 0x82f   : > { %7952 = vmatprep.subr.bf16.mxu0 %v9016_v34  ;;  %v4644_v5 = vld [vmem:[%s13329_s15 + $0xad0] sm:$0xff] }
 0x830   : > { %v9272_v6 = vcombine.high %v4628_v60, %v4644_v5 }
 0x831   : > { %7830 = vmatpush1.bf16.msra.mxu1 %v9009_v37 }
 0x832   : > { %7953 = vmatpush1.bf16.msra.mxu0 %v9015_v38  ;;  %7831 = vmatprep.subr.bf16.mxu1 %v9042_v27  ;;  %v9176_v38 = vcombine.high %v4532_v29, %v4548_v30  ;;  %v4561_v27 = vld [vmem:[%s13329_s15 + $0x838] sm:$0xff] }
 0x833   : > { %7954 = vmatprep.subr.bf16.mxu0 %v9048_v28  ;;  %v4577_v28 = vld [vmem:[%s13329_s15 + $0x8b8] sm:$0xff] }
 0x834   : > { %v9201_v48 = vcombine.low %v4561_v27, %v4577_v28 }
 0x835   : > { %7832 = vmatpush1.bf16.msra.mxu1 %v9041_v43  ;;  %v9202_v43 = vcombine.high %v4561_v27, %v4577_v28 }
 0x836   : > { %7955 = vmatpush1.bf16.msra.mxu0 %v9047_v51  ;;  %7833 = vmatprep.subr.bf16.mxu1 %v9074_v44  ;;  %v9208_v51 = vcombine.high %v4564_v39, %v4580_v40  ;;  %v4593_v44 = vld [vmem:[%s13329_s15 + $0x938] sm:$0xff] }
 0x837   : > { %7956 = vmatprep.subr.bf16.mxu0 %v9080_v45  ;;  %v4609_v45 = vld [vmem:[%s13329_s15 + $0x9b8] sm:$0xff] }
 0x838   : > { %v4753_v39 = vld [vmem:[%s13329_s15 + $0xe38] sm:$0xff] }
 0x839   : > { %7834 = vmatpush1.bf16.msra.mxu1 %v9073_v50  ;;  %v9234_v50 = vcombine.high %v4593_v44, %v4609_v45  ;;  %v4769_v40 = vld [vmem:[%s13329_s15 + $0xeb8] sm:$0xff] }
 0x83a   : > { %7957 = vmatpush1.bf16.msra.mxu0 %v9079_v55  ;;  %7835 = vmatprep.subr.bf16.mxu1 %v9106_v57  ;;  %v9240_v55 = vcombine.high %v4596_v46, %v4612_v47  ;;  %v4625_v57 = vld [vmem:[%s13329_s15 + $0xa38] sm:$0xff] }
 0x83b   : > { %v7572_v14 = vpop.f32.mrb[28].mxu1  ;;  %v7654_v15 = vpop.f32.mrb[32].mxu0  ;;  %7958 = vmatprep.subr.bf16.mxu0 %v9112_v58  ;;  %v4641_v58 = vld [vmem:[%s13329_s15 + $0xab8] sm:$0xff] }
 0x83c   : > { %v12435_v18 = vadd.f32 %v7572_v14, %v7381_v8  ;;  %v12437_v63 = vadd.f32 %v7654_v15, %v7397_v13  ;;  %v7574_v0 = vpop.f32.mrb[29].mxu1  ;;  %v7656_v19 = vpop.f32.mrb[33].mxu0  ;;  %v9233_v8 = vcombine.low %v4593_v44, %v4609_v45  ;;  %v9239_v13 = vcombine.low %v4596_v46, %v4612_v47  ;;  %v4785_v46 = vld [vmem:[%s13329_s15 + $0xf38] sm:$0xff] }
 0x83d   : > { %v12445_v31 = vadd.f32 %v7574_v0, %v7385_v9  ;;  %v12447_v3 = vadd.f32 %v7656_v19, %v7401_v10  ;;  %7836 = vmatpush1.bf16.msra.mxu1 %v9105_v7  ;;  %v7576_v4 = vpop.f32.mrb[30].mxu1  ;;  %v7658_v32 = vpop.f32.mrb[34].mxu0  ;;  %v9266_v62 = vcombine.high %v4625_v57, %v4641_v58  ;;  %v4657_v7 = vld [vmem:[%s13329_s15 + $0xb38] sm:$0xff]  ;;  %v4660_v10 = vld [vmem:[%s13329_s15 + $0xb50] sm:$0xff]  ;;  %v9271_v14 = vcombine.low %v4628_v60, %v4644_v5  ;;  %v4307_v60 = vld [vmem:[%s13329_s15 + $0x48] sm:$0xff] }
 0x83e   : > { %7959 = vmatpush1.bf16.msra.mxu0 %v9111_v11  ;;  %v7577_v34 = vpop.f32.mrb[31].mxu1  ;;  %v7659_v25 = vpop.f32.mrb[35].mxu0  ;;  %7837 = vmatprep.subr.bf16.mxu1 %v9138_v12  ;;  %v4673_v9 = vld [vmem:[%s13329_s15 + $0xbb8] sm:$0xff]  ;;  %v4676_v11 = vld [vmem:[%s13329_s15 + $0xbd0] sm:$0xff]  ;;  %v9265_v12 = vcombine.low %v4625_v57, %v4641_v58  ;;  %v9330_v4 = vcombine.high %v4689_v22, %v4705_v16  ;;  %v9394_v44 = vcombine.high %v4753_v39, %v4769_v40  ;;  %v4323_v5 = vld [vmem:[%s13329_s15 + $0xc8] sm:$0xff] }
 0x83f   : > { %v8226_v36 = vcombine.low %v12435_v18, %v12445_v31  ;;  %v8228_v37 = vcombine.low %v12437_v63, %v12447_v3  ;;  %7960 = vmatprep.subr.bf16.mxu0 %v9144_v17  ;;  %v9298_v15 = vcombine.high %v4657_v7, %v4673_v9  ;;  %v9304_v17 = vcombine.high %v4660_v10, %v4676_v11  ;;  %v4692_v0 = vld [vmem:[%s13329_s15 + $0xc50] sm:$0xff]  ;;  %v4737_v34 = vld [vmem:[%s13329_s15 + $0xdb8] sm:$0xff]  ;;  %v4595_v18 = vld [vmem:[%s13329_s15 + $0x948] sm:$0xff] }
 0x840   : > { %v4708_v19 = vld [vmem:[%s13329_s15 + $0xcd0] sm:$0xff]  ;;  %v9297_v29 = vcombine.low %v4657_v7, %v4673_v9  ;;  %v9303_v30 = vcombine.low %v4660_v10, %v4676_v11  ;;  %v4801_v47 = vld [vmem:[%s13329_s15 + $0xfb8] sm:$0xff]  ;;  %v8950_v7 = vcombine.high %v4307_v60, %v4323_v5  ;;  %v4339_v10 = vld [vmem:[%s13329_s15 + $0x148] sm:$0xff] }
 0x841   : > { %7838 = vmatpush1.bf16.msra.mxu1 %v9137_v33  ;;  %v9336_v32 = vcombine.high %v4692_v0, %v4708_v19  ;;  %v4721_v33 = vld [vmem:[%s13329_s15 + $0xd38] sm:$0xff]  ;;  %v4724_v25 = vld [vmem:[%s13329_s15 + $0xd50] sm:$0xff]  ;;  %v9426_v57 = vcombine.high %v4785_v46, %v4801_v47  ;;  %v4355_v11 = vld [vmem:[%s13329_s15 + $0x1c8] sm:$0xff] }
 0x842   : > { %7961 = vmatpush1.bf16.msra.mxu0 %v9143_v26  ;;  %7839 = vmatprep.subr.bf16.mxu1 %v9170_v35  ;;  %v4740_v26 = vld [vmem:[%s13329_s15 + $0xdd0] sm:$0xff]  ;;  %v9329_v35 = vcombine.low %v4689_v22, %v4705_v16  ;;  %v9362_v27 = vcombine.high %v4721_v33, %v4737_v34  ;;  %v8982_v22 = vcombine.high %v4339_v10, %v4355_v11  ;;  %v4371_v16 = vld [vmem:[%s13329_s15 + $0x248] sm:$0xff]  ;;  %v4613_v63 = vld [vmem:[%s13329_s15 + $0x9d8] sm:$0xff] }
 0x843   : > { %7962 = vmatprep.subr.bf16.mxu0 %v9176_v38  ;;  %v9335_v38 = vcombine.low %v4692_v0, %v4708_v19  ;;  %v9368_v28 = vcombine.high %v4724_v25, %v4740_v26  ;;  %v4387_v0 = vld [vmem:[%s13329_s15 + $0x2c8] sm:$0xff]  ;;  %v4600_v3 = vld [vmem:[%s13329_s15 + $0x970] sm:$0xff] }
 0x844   : > { %v4611_v31 = vld [vmem:[%s13329_s15 + $0x9c8] sm:$0xff] }
 0x845   : > { %7840 = vmatpush1.bf16.msra.mxu1 %v9169_v41  ;;  %v4756_v41 = vld [vmem:[%s13329_s15 + $0xe50] sm:$0xff] }
 0x846   : > { %7963 = vmatpush1.bf16.msra.mxu0 %v9175_v42  ;;  %7841 = vmatprep.subr.bf16.mxu1 %v9202_v43  ;;  %v4772_v42 = vld [vmem:[%s13329_s15 + $0xed0] sm:$0xff]  ;;  %v9361_v43 = vcombine.low %v4721_v33, %v4737_v34  ;;  %v9014_v33 = vcombine.high %v4371_v16, %v4387_v0 }
 0x847   : > { %7964 = vmatprep.subr.bf16.mxu0 %v9208_v51  ;;  %v9367_v51 = vcombine.low %v4724_v25, %v4740_v26  ;;  %v9400_v45 = vcombine.high %v4756_v41, %v4772_v42  ;;  %v4403_v25 = vld [vmem:[%s13329_s15 + $0x348] sm:$0xff] }
 0x848   : > { %v4419_v26 = vld [vmem:[%s13329_s15 + $0x3c8] sm:$0xff] }
 0x849   : > { %7842 = vmatpush1.bf16.msra.mxu1 %v9201_v48  ;;  %v4788_v48 = vld [vmem:[%s13329_s15 + $0xf50] sm:$0xff] }
 0x84a   : > { %7965 = vmatpush1.bf16.msra.mxu0 %v9207_v49  ;;  %7843 = vmatprep.subr.bf16.mxu1 %v9234_v50  ;;  %v4804_v49 = vld [vmem:[%s13329_s15 + $0xfd0] sm:$0xff]  ;;  %v9393_v50 = vcombine.low %v4753_v39, %v4769_v40  ;;  %v9046_v39 = vcombine.high %v4403_v25, %v4419_v26 }
 0x84b   : > { %7966 = vmatprep.subr.bf16.mxu0 %v9240_v55  ;;  %v9399_v55 = vcombine.low %v4756_v41, %v4772_v42  ;;  %v9432_v58 = vcombine.high %v4788_v48, %v4804_v49  ;;  %v4435_v41 = vld [vmem:[%s13329_s15 + $0x448] sm:$0xff] }
 0x84c   : > { %v4451_v42 = vld [vmem:[%s13329_s15 + $0x4c8] sm:$0xff] }
 0x84d   : > { %7844 = vmatpush1.bf16.msra.mxu1 %v9233_v8  ;;  %v4310_v8 = vld [vmem:[%s13329_s15 + $0x60] sm:$0xff] }
 0x84e   : > { %7967 = vmatpush1.bf16.msra.mxu0 %v9239_v13  ;;  %7845 = vmatprep.subr.bf16.mxu1 %v9266_v62  ;;  %v4326_v13 = vld [vmem:[%s13329_s15 + $0xe0] sm:$0xff]  ;;  %v9425_v62 = vcombine.low %v4785_v46, %v4801_v47  ;;  %v9078_v46 = vcombine.high %v4435_v41, %v4451_v42 }
 0x84f   : > { %7968 = vmatprep.subr.bf16.mxu0 %v9272_v6  ;;  %v9431_v6 = vcombine.low %v4788_v48, %v4804_v49  ;;  %v8956_v9 = vcombine.high %v4310_v8, %v4326_v13  ;;  %v4467_v48 = vld [vmem:[%s13329_s15 + $0x548] sm:$0xff] }
 0x850   : > { %v4483_v49 = vld [vmem:[%s13329_s15 + $0x5c8] sm:$0xff] }
 0x851   : > { %7846 = vmatpush1.bf16.msra.mxu1 %v9265_v12  ;;  %v8949_v12 = vcombine.low %v4307_v60, %v4323_v5  ;;  %v9110_v5 = vcombine.high %v4467_v48, %v4483_v49 }
 0x852   : > { %7969 = vmatpush1.bf16.msra.mxu0 %v9271_v14  ;;  %7847 = vmatprep.subr.bf16.mxu1 %v9298_v15  ;;  %v4342_v14 = vld [vmem:[%s13329_s15 + $0x160] sm:$0xff] }
 0x853   : > { %7970 = vmatprep.subr.bf16.mxu0 %v9304_v17  ;;  %v4358_v15 = vld [vmem:[%s13329_s15 + $0x1e0] sm:$0xff]  ;;  %v8955_v17 = vcombine.low %v4310_v8, %v4326_v13  ;;  %v4499_v13 = vld [vmem:[%s13329_s15 + $0x648] sm:$0xff] }
 0x854   : > { %v8988_v19 = vcombine.high %v4342_v14, %v4358_v15 }
 0x855   : > { %7848 = vmatpush1.bf16.msra.mxu1 %v9297_v29  ;;  %v4374_v29 = vld [vmem:[%s13329_s15 + $0x260] sm:$0xff] }
 0x856   : > { %7971 = vmatpush1.bf16.msra.mxu0 %v9303_v30  ;;  %7849 = vmatprep.subr.bf16.mxu1 %v9330_v4  ;;  %v4390_v30 = vld [vmem:[%s13329_s15 + $0x2e0] sm:$0xff]  ;;  %v8981_v4 = vcombine.low %v4339_v10, %v4355_v11  ;;  %v7393_v11 = vrot.slane %v12407_v54, %v10693_v24 }
 0x857   : > { %7972 = vmatprep.subr.bf16.mxu0 %v9336_v32  ;;  %v8987_v32 = vcombine.low %v4342_v14, %v4358_v15  ;;  %v9020_v34 = vcombine.high %v4374_v29, %v4390_v30  ;;  %v4518_v10 = vld [vmem:[%s13329_s15 + $0x6e0] sm:$0xff]  ;;  %v9109_v14 = vcombine.low %v4467_v48, %v4483_v49  ;;  %v12684_v49 = vrot.slane %v8226_v36, %v10716_v61 }
 0x858   : > { %v4582_v48 = vld [vmem:[%s13329_s15 + $0x8e0] sm:$0xff] }
 0x859   : > { %7850 = vmatpush1.bf16.msra.mxu1 %v9329_v35  ;;  %v4406_v35 = vld [vmem:[%s13329_s15 + $0x360] sm:$0xff] }
 0x85a   : > { %7973 = vmatpush1.bf16.msra.mxu0 %v9335_v38  ;;  %7851 = vmatprep.subr.bf16.mxu1 %v9362_v27  ;;  %v4422_v38 = vld [vmem:[%s13329_s15 + $0x3e0] sm:$0xff]  ;;  %v9013_v27 = vcombine.low %v4371_v16, %v4387_v0 }
 0x85b   : > { %7974 = vmatprep.subr.bf16.mxu0 %v9368_v28  ;;  %v9019_v28 = vcombine.low %v4374_v29, %v4390_v30  ;;  %v9052_v40 = vcombine.high %v4406_v35, %v4422_v38  ;;  %v4547_v29 = vld [vmem:[%s13329_s15 + $0x7c8] sm:$0xff]  ;;  %v4598_v36 = vld [vmem:[%s13329_s15 + $0x960] sm:$0xff] }
 0x85d   : > { %7852 = vmatpush1.bf16.msra.mxu1 %v9361_v43  ;;  %v4438_v43 = vld [vmem:[%s13329_s15 + $0x460] sm:$0xff] }
 0x85e   : > { %7975 = vmatpush1.bf16.msra.mxu0 %v9367_v51  ;;  %7853 = vmatprep.subr.bf16.mxu1 %v9394_v44  ;;  %v4454_v51 = vld [vmem:[%s13329_s15 + $0x4e0] sm:$0xff]  ;;  %v9045_v44 = vcombine.low %v4403_v25, %v4419_v26 }
 0x85f   : > { %7976 = vmatprep.subr.bf16.mxu0 %v9400_v45  ;;  %v9051_v45 = vcombine.low %v4406_v35, %v4422_v38  ;;  %v9084_v47 = vcombine.high %v4438_v43, %v4454_v51  ;;  %v9083_v60 = vcombine.low %v4438_v43, %v4454_v51  ;;  %v4550_v25 = vld [vmem:[%s13329_s15 + $0x7e0] sm:$0xff] }
 0x861   : > { %7854 = vmatpush1.bf16.msra.mxu1 %v9393_v50  ;;  %v4470_v50 = vld [vmem:[%s13329_s15 + $0x560] sm:$0xff] }
 0x862   : > { %7977 = vmatpush1.bf16.msra.mxu0 %v9399_v55  ;;  %7855 = vmatprep.subr.bf16.mxu1 %v9426_v57  ;;  %v4486_v55 = vld [vmem:[%s13329_s15 + $0x5e0] sm:$0xff]  ;;  %v9077_v57 = vcombine.low %v4435_v41, %v4451_v42 }
 0x863   : > { %7978 = vmatprep.subr.bf16.mxu0 %v9432_v58  ;;  %v12628_v58 = vld [vmem:[%s13330_s16 + $0x8] sm:$0xff]  ;;  %v9116_v8 = vcombine.high %v4470_v50, %v4486_v55  ;;  %v9115_v15 = vcombine.low %v4470_v50, %v4486_v55 }
 0x865   : > { %7856 = vmatpush1.bf16.msra.mxu1 %v9425_v62  ;;  %v4515_v62 = vld [vmem:[%s13329_s15 + $0x6c8] sm:$0xff] }
 0x866   : > { %7979 = vmatpush1.bf16.msra.mxu0 %v9431_v6  ;;  %7907 = vmatprep.subr.bf16.mxu1 %v8950_v7  ;;  %v7389_v6 = vrot.slane %v12407_v54, %v10682_v21  ;;  %v7413_v7 = vrot.slane %v12628_v58, %v10679_v20 }
 0x867   : > { %8030 = vmatprep.subr.bf16.mxu0 %v8956_v9  ;;  %v4502_v9 = vld [vmem:[%s13329_s15 + $0x660] sm:$0xff] }
 0x868   : > { %7858 = vmatmul.mubr.bf16.vlgmr.msra.gmra.mrb[44].mxu1 %v11760_v2  ;;  %v9148_v0 = vcombine.high %v4502_v9, %v4518_v10  ;;  %v9147_v41 = vcombine.low %v4502_v9, %v4518_v10  ;;  %v4627_v10 = vld [vmem:[%s13329_s15 + $0xa48] sm:$0xff] }
 0x869   : > { %7981 = vmatmul.mubr.bf16.vlgmr.msra.gmra.mrb[48].mxu0 %v11760_v2  ;;  %7908 = vmatpush1.bf16.msra.mxu1 %v8949_v12  ;;  %v7417_v12 = vrot.slane %v12628_v58, %v10690_v23 }
 0x86a   : > { %7939 = vmatprep.mubr.bf16.mxu1 %v11758_v1  ;;  %8031 = vmatpush1.bf16.msra.mxu0 %v8955_v17  ;;  %v9142_v17 = vcombine.high %v4499_v13, %v4515_v62 }
 0x86b   : > { %8062 = vmatprep.mubr.bf16.mxu0 %v11758_v1  ;;  %7909 = vmatprep.subr.bf16.mxu1 %v8982_v22 }
 0x86c   : > { %8032 = vmatprep.subr.bf16.mxu0 %v8988_v19  ;;  %v4531_v19 = vld [vmem:[%s13329_s15 + $0x748] sm:$0xff] }
 0x86d   : > { %7910 = vmatpush1.bf16.msra.mxu1 %v8981_v4  ;;  %v9174_v42 = vcombine.high %v4531_v19, %v4547_v29  ;;  %v9173_v55 = vcombine.low %v4531_v19, %v4547_v29  ;;  %v4675_v19 = vld [vmem:[%s13329_s15 + $0xbc8] sm:$0xff]  ;;  %v4662_v29 = vld [vmem:[%s13329_s15 + $0xb60] sm:$0xff] }
 0x86e   : > { %8033 = vmatpush1.bf16.msra.mxu0 %v8987_v32  ;;  %7911 = vmatprep.subr.bf16.mxu1 %v9014_v33 }
 0x86f   : > { %8034 = vmatprep.subr.bf16.mxu0 %v9020_v34  ;;  %v4534_v34 = vld [vmem:[%s13329_s15 + $0x760] sm:$0xff] }
 0x871   : > { %7912 = vmatpush1.bf16.msra.mxu1 %v9013_v27 }
 0x872   : > { %8035 = vmatpush1.bf16.msra.mxu0 %v9019_v28  ;;  %7913 = vmatprep.subr.bf16.mxu1 %v9046_v39  ;;  %v9141_v28 = vcombine.low %v4499_v13, %v4515_v62  ;;  %v4614_v13 = vld [vmem:[%s13329_s15 + $0x9e0] sm:$0xff] }
 0x873   : > { %8036 = vmatprep.subr.bf16.mxu0 %v9052_v40  ;;  %v9244_v9 = vcombine.high %v4598_v36, %v4614_v13 }
 0x875   : > { %7914 = vmatpush1.bf16.msra.mxu1 %v9045_v44  ;;  %v9180_v44 = vcombine.high %v4534_v34, %v4550_v25 }
 0x876   : > { %8037 = vmatpush1.bf16.msra.mxu0 %v9051_v45  ;;  %7915 = vmatprep.subr.bf16.mxu1 %v9078_v46  ;;  %v4563_v45 = vld [vmem:[%s13329_s15 + $0x848] sm:$0xff] }
 0x877   : > { %8038 = vmatprep.subr.bf16.mxu0 %v9084_v47  ;;  %v4579_v46 = vld [vmem:[%s13329_s15 + $0x8c8] sm:$0xff]  ;;  %v4566_v47 = vld [vmem:[%s13329_s15 + $0x860] sm:$0xff] }
 0x878   : > { %v9205_v62 = vcombine.low %v4563_v45, %v4579_v46 }
 0x879   : > { %7916 = vmatpush1.bf16.msra.mxu1 %v9077_v57  ;;  %v9179_v57 = vcombine.low %v4534_v34, %v4550_v25 }
 0x87a   : > { %8039 = vmatpush1.bf16.msra.mxu0 %v9083_v60  ;;  %7917 = vmatprep.subr.bf16.mxu1 %v9110_v5  ;;  %v9206_v60 = vcombine.high %v4563_v45, %v4579_v46  ;;  %v4726_v45 = vld [vmem:[%s13329_s15 + $0xd60] sm:$0xff] }
 0x87b   : > { %v7613_v22 = vpop.f32.mrb[32].mxu1  ;;  %v7736_v16 = vpop.f32.mrb[36].mxu0  ;;  %8040 = vmatprep.subr.bf16.mxu0 %v9116_v8  ;;  %v9212_v8 = vcombine.high %v4566_v47, %v4582_v48  ;;  %v4742_v46 = vld [vmem:[%s13329_s15 + $0xde0] sm:$0xff] }
 0x87c   : > { %v7614_v30 = vadd.f32 %v7613_v22, %v7389_v6  ;;  %v12656_v4 = vadd.f32 %v7736_v16, %v7413_v7  ;;  %v7615_v32 = vpop.f32.mrb[33].mxu1  ;;  %v7738_v33 = vpop.f32.mrb[37].mxu0  ;;  %v9211_v6 = vcombine.low %v4566_v47, %v4582_v48  ;;  %v9238_v7 = vcombine.high %v4595_v18, %v4611_v31 }
 0x87d   : > { %v7616_v26 = vadd.f32 %v7615_v32, %v7393_v11  ;;  %v12664_v35 = vadd.f32 %v7738_v33, %v7417_v12  ;;  %v7617_v38 = vpop.f32.mrb[34].mxu1  ;;  %v7740_v27 = vpop.f32.mrb[38].mxu0  ;;  %7918 = vmatpush1.bf16.msra.mxu1 %v9109_v14  ;;  %v4643_v11 = vld [vmem:[%s13329_s15 + $0xac8] sm:$0xff]  ;;  %v4630_v12 = vld [vmem:[%s13329_s15 + $0xa60] sm:$0xff] }
 0x87e   : > { %8041 = vmatpush1.bf16.msra.mxu0 %v9115_v15  ;;  %v7618_v39 = vpop.f32.mrb[35].mxu1  ;;  %v7741_v40 = vpop.f32.mrb[39].mxu0  ;;  %7919 = vmatprep.subr.bf16.mxu1 %v9142_v17  ;;  %v4646_v14 = vld [vmem:[%s13329_s15 + $0xae0] sm:$0xff]  ;;  %v9237_v15 = vcombine.low %v4595_v18, %v4611_v31  ;;  %v9243_v17 = vcombine.low %v4598_v36, %v4614_v13  ;;  %v9270_v22 = vcombine.high %v4627_v10, %v4643_v11  ;;  %v4707_v38 = vld [vmem:[%s13329_s15 + $0xcc8] sm:$0xff] }
 0x87f   : > { %v8227_v43 = vcombine.low %v7614_v30, %v7616_v26  ;;  %v8275_v51 = vcombine.low %v12656_v4, %v12664_v35  ;;  %8042 = vmatprep.subr.bf16.mxu0 %v9148_v0  ;;  %v9276_v16 = vcombine.high %v4630_v12, %v4646_v14  ;;  %v4659_v0 = vld [vmem:[%s13329_s15 + $0xb48] sm:$0xff]  ;;  %v4678_v30 = vld [vmem:[%s13329_s15 + $0xbe0] sm:$0xff]  ;;  %v9269_v32 = vcombine.low %v4627_v10, %v4643_v11 }
 0x880   : > { %v9275_v33 = vcombine.low %v4630_v12, %v4646_v14  ;;  %v9302_v34 = vcombine.high %v4659_v0, %v4675_v19  ;;  %v9308_v25 = vcombine.high %v4662_v29, %v4678_v30  ;;  %v4691_v26 = vld [vmem:[%s13329_s15 + $0xc48] sm:$0xff]  ;;  %v4694_v27 = vld [vmem:[%s13329_s15 + $0xc60] sm:$0xff]  ;;  %v9301_v39 = vcombine.low %v4659_v0, %v4675_v19  ;;  %v4312_v0 = vld [vmem:[%s13329_s15 + $0x70] sm:$0xff] }
 0x881   : > { %v12687_v50 = vrot.slane %v8227_v43, %v10716_v61  ;;  %7920 = vmatpush1.bf16.msra.mxu1 %v9141_v28  ;;  %v4710_v28 = vld [vmem:[%s13329_s15 + $0xce0] sm:$0xff]  ;;  %v9307_v40 = vcombine.low %v4662_v29, %v4678_v30  ;;  %v4723_v43 = vld [vmem:[%s13329_s15 + $0xd48] sm:$0xff]  ;;  %v9333_v47 = vcombine.low %v4691_v26, %v4707_v38  ;;  %v9371_v13 = vcombine.low %v4726_v45, %v4742_v46  ;;  %v4328_v19 = vld [vmem:[%s13329_s15 + $0xf0] sm:$0xff] }
 0x882   : > { %8043 = vmatpush1.bf16.msra.mxu0 %v9147_v41  ;;  %7921 = vmatprep.subr.bf16.mxu1 %v9174_v42  ;;  %v9334_v41 = vcombine.high %v4691_v26, %v4707_v38  ;;  %v9340_v42 = vcombine.high %v4694_v27, %v4710_v28  ;;  %v9339_v48 = vcombine.low %v4694_v27, %v4710_v28  ;;  %v4758_v18 = vld [vmem:[%s13329_s15 + $0xe60] sm:$0xff]  ;;  %v4344_v38 = vld [vmem:[%s13329_s15 + $0x170] sm:$0xff]  ;;  %v4615_v4 = vld [vmem:[%s13329_s15 + $0x9e8] sm:$0xff] }
 0x883   : > { %v8258_v5 = vcombine.low %v12684_v49, %v12687_v50  ;;  %8044 = vmatprep.subr.bf16.mxu0 %v9180_v44  ;;  %v4739_v44 = vld [vmem:[%s13329_s15 + $0xdc8] sm:$0xff]  ;;  %v4774_v31 = vld [vmem:[%s13329_s15 + $0xee0] sm:$0xff]  ;;  %v4360_v27 = vld [vmem:[%s13329_s15 + $0x1f0] sm:$0xff]  ;;  %v8959_v28 = vcombine.low %v4312_v0, %v4328_v19 }
 0x884   : > { %v9365_v36 = vcombine.low %v4723_v43, %v4739_v44  ;;  %v4790_v10 = vld [vmem:[%s13329_s15 + $0xf60] sm:$0xff]  ;;  %v9403_v14 = vcombine.low %v4758_v18, %v4774_v31  ;;  %v4629_v49 = vld [vmem:[%s13329_s15 + $0xa58] sm:$0xff] }
 0x885   : > { %7922 = vmatpush1.bf16.msra.mxu1 %v9173_v55  ;;  %v9366_v55 = vcombine.high %v4723_v43, %v4739_v44  ;;  %v4806_v11 = vld [vmem:[%s13329_s15 + $0xfe0] sm:$0xff]  ;;  %v4376_v43 = vld [vmem:[%s13329_s15 + $0x270] sm:$0xff]  ;;  %v4645_v50 = vld [vmem:[%s13329_s15 + $0xad8] sm:$0xff] }
 0x886   : > { %8045 = vmatpush1.bf16.msra.mxu0 %v9179_v57  ;;  %7923 = vmatprep.subr.bf16.mxu1 %v9206_v60  ;;  %v9372_v57 = vcombine.high %v4726_v45, %v4742_v46  ;;  %v4755_v60 = vld [vmem:[%s13329_s15 + $0xe48] sm:$0xff]  ;;  %v9435_v30 = vcombine.low %v4790_v10, %v4806_v11  ;;  %v4392_v44 = vld [vmem:[%s13329_s15 + $0x2f0] sm:$0xff]  ;;  %v8991_v46 = vcombine.low %v4344_v38, %v4360_v27 }
 0x887   : > { %8046 = vmatprep.subr.bf16.mxu0 %v9212_v8  ;;  %v4771_v8 = vld [vmem:[%s13329_s15 + $0xec8] sm:$0xff] }
 0x888   : > { %v9397_v12 = vcombine.low %v4755_v60, %v4771_v8 }
 0x889   : > { %7924 = vmatpush1.bf16.msra.mxu1 %v9205_v62  ;;  %v9398_v62 = vcombine.high %v4755_v60, %v4771_v8  ;;  %v4408_v60 = vld [vmem:[%s13329_s15 + $0x370] sm:$0xff] }
 0x88a   : > { %8047 = vmatpush1.bf16.msra.mxu0 %v9211_v6  ;;  %7925 = vmatprep.subr.bf16.mxu1 %v9238_v7  ;;  %v9404_v6 = vcombine.high %v4758_v18, %v4774_v31  ;;  %v4787_v7 = vld [vmem:[%s13329_s15 + $0xf48] sm:$0xff]  ;;  %v4424_v8 = vld [vmem:[%s13329_s15 + $0x3f0] sm:$0xff]  ;;  %v9023_v31 = vcombine.low %v4376_v43, %v4392_v44 }
 0x88b   : > { %8048 = vmatprep.subr.bf16.mxu0 %v9244_v9  ;;  %v4803_v9 = vld [vmem:[%s13329_s15 + $0xfc8] sm:$0xff] }
 0x88c   : > { %v9429_v29 = vcombine.low %v4787_v7, %v4803_v9 }
 0x88d   : > { %7926 = vmatpush1.bf16.msra.mxu1 %v9237_v15  ;;  %v9430_v15 = vcombine.high %v4787_v7, %v4803_v9  ;;  %v4440_v7 = vld [vmem:[%s13329_s15 + $0x470] sm:$0xff] }
 0x88e   : > { %8049 = vmatpush1.bf16.msra.mxu0 %v9243_v17  ;;  %7927 = vmatprep.subr.bf16.mxu1 %v9270_v22  ;;  %v9436_v17 = vcombine.high %v4790_v10, %v4806_v11  ;;  %v4309_v22 = vld [vmem:[%s13329_s15 + $0x58] sm:$0xff]  ;;  %v4456_v9 = vld [vmem:[%s13329_s15 + $0x4f0] sm:$0xff]  ;;  %v9055_v11 = vcombine.low %v4408_v60, %v4424_v8 }
 0x88f   : > { %8050 = vmatprep.subr.bf16.mxu0 %v9276_v16  ;;  %v4325_v16 = vld [vmem:[%s13329_s15 + $0xd8] sm:$0xff] }
 0x890   : > { %v8953_v26 = vcombine.low %v4309_v22, %v4325_v16 }
 0x891   : > { %7928 = vmatpush1.bf16.msra.mxu1 %v9269_v32  ;;  %v8954_v32 = vcombine.high %v4309_v22, %v4325_v16  ;;  %v4472_v22 = vld [vmem:[%s13329_s15 + $0x570] sm:$0xff] }
 0x892   : > { %8051 = vmatpush1.bf16.msra.mxu0 %v9275_v33  ;;  %7929 = vmatprep.subr.bf16.mxu1 %v9302_v34  ;;  %v8960_v33 = vcombine.high %v4312_v0, %v4328_v19  ;;  %v4341_v34 = vld [vmem:[%s13329_s15 + $0x158] sm:$0xff]  ;;  %v4488_v16 = vld [vmem:[%s13329_s15 + $0x5f0] sm:$0xff]  ;;  %v9087_v19 = vcombine.low %v4440_v7, %v4456_v9 }
 0x893   : > { %8052 = vmatprep.subr.bf16.mxu0 %v9308_v25  ;;  %v4357_v25 = vld [vmem:[%s13329_s15 + $0x1d8] sm:$0xff] }
 0x894   : > { %v8985_v45 = vcombine.low %v4341_v34, %v4357_v25 }
 0x895   : > { %7930 = vmatpush1.bf16.msra.mxu1 %v9301_v39  ;;  %v8986_v39 = vcombine.high %v4341_v34, %v4357_v25  ;;  %v7405_v34 = vrot.slane %v12407_v54, %v10707_v53  ;;  %v4504_v25 = vld [vmem:[%s13329_s15 + $0x670] sm:$0xff] }
 0x896   : > { %8053 = vmatpush1.bf16.msra.mxu0 %v9307_v40  ;;  %7931 = vmatprep.subr.bf16.mxu1 %v9334_v41  ;;  %v4373_v40 = vld [vmem:[%s13329_s15 + $0x258] sm:$0xff] }
 0x897   : > { %8054 = vmatprep.subr.bf16.mxu0 %v9340_v42  ;;  %v4389_v41 = vld [vmem:[%s13329_s15 + $0x2d8] sm:$0xff]  ;;  %v8992_v42 = vcombine.high %v4344_v38, %v4360_v27  ;;  %v7429_v38 = vrot.slane %v12628_v58, %v10704_v52  ;;  %v7409_v27 = vrot.slane %v12407_v54, %v10713_v59 }
 0x898   : > { %v9017_v18 = vcombine.low %v4373_v40, %v4389_v41 }
 0x899   : > { %7932 = vmatpush1.bf16.msra.mxu1 %v9333_v47  ;;  %v9018_v47 = vcombine.high %v4373_v40, %v4389_v41  ;;  %v9119_v40 = vcombine.low %v4472_v22, %v4488_v16 }
 0x89a   : > { %8055 = vmatpush1.bf16.msra.mxu0 %v9339_v48  ;;  %7933 = vmatprep.subr.bf16.mxu1 %v9366_v55  ;;  %v9024_v48 = vcombine.high %v4376_v43, %v4392_v44  ;;  %v4405_v55 = vld [vmem:[%s13329_s15 + $0x358] sm:$0xff] }
 0x89b   : > { %8056 = vmatprep.subr.bf16.mxu0 %v9372_v57  ;;  %v4421_v57 = vld [vmem:[%s13329_s15 + $0x3d8] sm:$0xff] }
 0x89c   : > { %v9049_v10 = vcombine.low %v4405_v55, %v4421_v57  ;;  %v4533_v44 = vld [vmem:[%s13329_s15 + $0x758] sm:$0xff] }
 0x89d   : > { %7934 = vmatpush1.bf16.msra.mxu1 %v9365_v36  ;;  %v9050_v36 = vcombine.high %v4405_v55, %v4421_v57  ;;  %v4552_v55 = vld [vmem:[%s13329_s15 + $0x7f0] sm:$0xff] }
 0x89e   : > { %8057 = vmatpush1.bf16.msra.mxu0 %v9371_v13  ;;  %7935 = vmatprep.subr.bf16.mxu1 %v9398_v62  ;;  %v9056_v13 = vcombine.high %v4408_v60, %v4424_v8  ;;  %v4437_v62 = vld [vmem:[%s13329_s15 + $0x458] sm:$0xff] }
 0x89f   : > { %8058 = vmatprep.subr.bf16.mxu0 %v9404_v6  ;;  %v4453_v6 = vld [vmem:[%s13329_s15 + $0x4d8] sm:$0xff] }
 0x8a0   : > { %v9081_v0 = vcombine.low %v4437_v62, %v4453_v6 }
 0x8a1   : > { %7936 = vmatpush1.bf16.msra.mxu1 %v9397_v12  ;;  %v9082_v12 = vcombine.high %v4437_v62, %v4453_v6 }
 0x8a2   : > { %8059 = vmatpush1.bf16.msra.mxu0 %v9403_v14  ;;  %7937 = vmatprep.subr.bf16.mxu1 %v9430_v15  ;;  %v9088_v14 = vcombine.high %v4440_v7, %v4456_v9  ;;  %v4469_v15 = vld [vmem:[%s13329_s15 + $0x558] sm:$0xff] }
 0x8a3   : > { %8060 = vmatprep.subr.bf16.mxu0 %v9436_v17  ;;  %v4485_v17 = vld [vmem:[%s13329_s15 + $0x5d8] sm:$0xff] }
 0x8a5   : > { %7938 = vmatpush1.bf16.msra.mxu1 %v9429_v29  ;;  %v9114_v29 = vcombine.high %v4469_v15, %v4485_v17 }
 0x8a6   : > { %8061 = vmatpush1.bf16.msra.mxu0 %v9435_v30  ;;  %7989 = vmatprep.subr.bf16.mxu1 %v8954_v32  ;;  %v9120_v30 = vcombine.high %v4472_v22, %v4488_v16  ;;  %v4501_v32 = vld [vmem:[%s13329_s15 + $0x658] sm:$0xff]  ;;  %v4584_v22 = vld [vmem:[%s13329_s15 + $0x8f0] sm:$0xff]  ;;  %v8250_v16 = vrot.slane %v8228_v37, %v10716_v61 }
 0x8a7   : > { %8112 = vmatprep.subr.bf16.mxu0 %v8960_v33  ;;  %v4517_v33 = vld [vmem:[%s13329_s15 + $0x6d8] sm:$0xff]  ;;  %v4616_v37 = vld [vmem:[%s13329_s15 + $0x9f0] sm:$0xff] }
 0x8a8   : > { %7940 = vmatmul.mubr.bf16.vlgmr.msra.gmra.mrb[48].mxu1 %v11760_v2  ;;  %v9146_v41 = vcombine.high %v4501_v32, %v4517_v33 }
 0x8a9   : > { %8063 = vmatmul.mubr.bf16.vlgmr.msra.gmra.mrb[52].mxu0 %v11760_v2  ;;  %7990 = vmatpush1.bf16.msra.mxu1 %v8953_v26  ;;  %v4520_v26 = vld [vmem:[%s13329_s15 + $0x6f0] sm:$0xff] }
 0x8aa   : > { %8021 = vmatprep.mubr.bf16.mxu1 %v11758_v1  ;;  %8113 = vmatpush1.bf16.msra.mxu0 %v8959_v28  ;;  %v9113_v28 = vcombine.low %v4469_v15, %v4485_v17  ;;  %v9152_v43 = vcombine.high %v4504_v25, %v4520_v26  ;;  %v9151_v6 = vcombine.low %v4504_v25, %v4520_v26  ;;  %v4568_v17 = vld [vmem:[%s13329_s15 + $0x870] sm:$0xff] }
 0x8ab   : > { %8144 = vmatprep.mubr.bf16.mxu0 %v11758_v1  ;;  %7991 = vmatprep.subr.bf16.mxu1 %v8986_v39  ;;  %v7433_v39 = vrot.slane %v12628_v58, %v10710_v56  ;;  %v8266_v25 = vrot.slane %v8258_v5, %v10716_v61  ;;  %v4632_v5 = vld [vmem:[%s13329_s15 + $0xa70] sm:$0xff] }
 0x8ac   : > { %8114 = vmatprep.subr.bf16.mxu0 %v8992_v42 }
 0x8ad   : > { %7992 = vmatpush1.bf16.msra.mxu1 %v8985_v45  ;;  %v4549_v45 = vld [vmem:[%s13329_s15 + $0x7d8] sm:$0xff] }
 0x8ae   : > { %8115 = vmatpush1.bf16.msra.mxu0 %v8991_v46  ;;  %7993 = vmatprep.subr.bf16.mxu1 %v9018_v47  ;;  %v9178_v7 = vcombine.high %v4533_v44, %v4549_v45 }
 0x8af   : > { %8116 = vmatprep.subr.bf16.mxu0 %v9024_v48  ;;  %v4536_v48 = vld [vmem:[%s13329_s15 + $0x770] sm:$0xff] }
 0x8b1   : > { %7994 = vmatpush1.bf16.msra.mxu1 %v9017_v18 }
 0x8b2   : > { %8117 = vmatpush1.bf16.msra.mxu0 %v9023_v31  ;;  %7995 = vmatprep.subr.bf16.mxu1 %v9050_v36  ;;  %v9145_v31 = vcombine.low %v4501_v32, %v4517_v33  ;;  %v9216_v33 = vcombine.high %v4568_v17, %v4584_v22 }
 0x8b3   : > { %8118 = vmatprep.subr.bf16.mxu0 %v9056_v13 }
 0x8b5   : > { %7996 = vmatpush1.bf16.msra.mxu1 %v9049_v10 }
 0x8b6   : > { %8119 = vmatpush1.bf16.msra.mxu0 %v9055_v11  ;;  %7997 = vmatprep.subr.bf16.mxu1 %v9082_v12  ;;  %v9184_v11 = vcombine.high %v4536_v48, %v4552_v55  ;;  %v4565_v12 = vld [vmem:[%s13329_s15 + $0x858] sm:$0xff] }
 0x8b7   : > { %8120 = vmatprep.subr.bf16.mxu0 %v9088_v14  ;;  %v4581_v14 = vld [vmem:[%s13329_s15 + $0x8d8] sm:$0xff] }
 0x8b9   : > { %7998 = vmatpush1.bf16.msra.mxu1 %v9081_v0 }
 0x8ba   : > { %8121 = vmatpush1.bf16.msra.mxu0 %v9087_v19  ;;  %7999 = vmatprep.subr.bf16.mxu1 %v9114_v29  ;;  %v9177_v19 = vcombine.low %v4533_v44, %v4549_v45  ;;  %v9183_v29 = vcombine.low %v4536_v48, %v4552_v55  ;;  %v9274_v44 = vcombine.high %v4629_v49, %v4645_v50  ;;  %v4680_v48 = vld [vmem:[%s13329_s15 + $0xbf0] sm:$0xff] }
 0x8bb   : > { %v7695_v42 = vpop.f32.mrb[36].mxu1  ;;  %8122 = vmatprep.subr.bf16.mxu0 %v9120_v30  ;;  %v9210_v30 = vcombine.high %v4565_v12, %v4581_v14  ;;  %v9273_v55 = vcombine.low %v4629_v49, %v4645_v50 }
 0x8bc   : > { %v7696_v54 = vadd.f32 %v7695_v42, %v7405_v34  ;;  %v7818_v46 = vpop.f32.mrb[40].mxu0  ;;  %v7697_v47 = vpop.f32.mrb[37].mxu1  ;;  %v4597_v34 = vld [vmem:[%s13329_s15 + $0x958] sm:$0xff] }
 0x8bd   : > { %v12883_v57 = vadd.f32 %v7818_v46, %v7429_v38  ;;  %v7698_v60 = vadd.f32 %v7697_v47, %v7409_v27  ;;  %v7820_v8 = vpop.f32.mrb[41].mxu0  ;;  %v7699_v18 = vpop.f32.mrb[38].mxu1  ;;  %8000 = vmatpush1.bf16.msra.mxu1 %v9113_v28  ;;  %v9209_v38 = vcombine.low %v4565_v12, %v4581_v14  ;;  %v9215_v27 = vcombine.low %v4568_v17, %v4584_v22  ;;  %v4677_v46 = vld [vmem:[%s13329_s15 + $0xbd8] sm:$0xff]  ;;  %v4664_v47 = vld [vmem:[%s13329_s15 + $0xb70] sm:$0xff] }
 0x8be   : > { %v12885_v36 = vadd.f32 %v7820_v8, %v7433_v39  ;;  %v7822_v13 = vpop.f32.mrb[42].mxu0  ;;  %8123 = vmatpush1.bf16.msra.mxu0 %v9119_v40  ;;  %v7700_v62 = vpop.f32.mrb[39].mxu1  ;;  %8001 = vmatprep.subr.bf16.mxu1 %v9146_v41  ;;  %v9242_v28 = vcombine.high %v4597_v34, %v4613_v63  ;;  %v9248_v40 = vcombine.high %v4600_v3, %v4616_v37  ;;  %v4648_v41 = vld [vmem:[%s13329_s15 + $0xaf0] sm:$0xff]  ;;  %v4725_v12 = vld [vmem:[%s13329_s15 + $0xd58] sm:$0xff] }
 0x8bf   : > { %v8229_v9 = vcombine.low %v7696_v54, %v7698_v60  ;;  %v7823_v10 = vpop.f32.mrb[43].mxu0  ;;  %8124 = vmatprep.subr.bf16.mxu0 %v9152_v43  ;;  %v9241_v42 = vcombine.low %v4597_v34, %v4613_v63  ;;  %v9247_v43 = vcombine.low %v4600_v3, %v4616_v37  ;;  %v9280_v45 = vcombine.high %v4632_v5, %v4648_v41  ;;  %v4661_v54 = vld [vmem:[%s13329_s15 + $0xb58] sm:$0xff]  ;;  %v4696_v62 = vld [vmem:[%s13329_s15 + $0xc70] sm:$0xff] }
 0x8c0   : > { %v8277_v15 = vcombine.low %v12883_v57, %v12885_v36  ;;  %v9279_v60 = vcombine.low %v4632_v5, %v4648_v41  ;;  %v9306_v8 = vcombine.high %v4661_v54, %v4677_v46  ;;  %v9312_v18 = vcombine.high %v4664_v47, %v4680_v48  ;;  %v4709_v13 = vld [vmem:[%s13329_s15 + $0xcd8] sm:$0xff]  ;;  %v4728_v17 = vld [vmem:[%s13329_s15 + $0xd70] sm:$0xff]  ;;  %v4311_v5 = vld [vmem:[%s13329_s15 + $0x68] sm:$0xff] }
 0x8c1   : > { %v8257_v0 = vrot.slane %v8229_v9, %v10716_v61  ;;  %8002 = vmatpush1.bf16.msra.mxu1 %v9145_v31  ;;  %v4693_v31 = vld [vmem:[%s13329_s15 + $0xc58] sm:$0xff]  ;;  %v9311_v9 = vcombine.low %v4664_v47, %v4680_v48  ;;  %v4744_v22 = vld [vmem:[%s13329_s15 + $0xdf0] sm:$0xff]  ;;  %v4327_v41 = vld [vmem:[%s13329_s15 + $0xe8] sm:$0xff] }
 0x8c2   : > { %8125 = vmatpush1.bf16.msra.mxu0 %v9151_v6  ;;  %8003 = vmatprep.subr.bf16.mxu1 %v9178_v7  ;;  %v4712_v6 = vld [vmem:[%s13329_s15 + $0xcf0] sm:$0xff]  ;;  %v9305_v7 = vcombine.low %v4661_v54, %v4677_v46  ;;  %v9338_v10 = vcombine.high %v4693_v31, %v4709_v13  ;;  %v4741_v14 = vld [vmem:[%s13329_s15 + $0xdd8] sm:$0xff]  ;;  %v9375_v3 = vcombine.low %v4728_v17, %v4744_v22  ;;  %v4359_v54 = vld [vmem:[%s13329_s15 + $0x1e8] sm:$0xff] }
 0x8c3   : > { %v8259_v32 = vcombine.low %v8250_v16, %v8257_v0  ;;  %8126 = vmatprep.subr.bf16.mxu0 %v9184_v11  ;;  %v9344_v11 = vcombine.high %v4696_v62, %v4712_v6  ;;  %v9337_v16 = vcombine.low %v4693_v31, %v4709_v13  ;;  %v9343_v0 = vcombine.low %v4696_v62, %v4712_v6  ;;  %v4776_v34 = vld [vmem:[%s13329_s15 + $0xef0] sm:$0xff]  ;;  %v4375_v48 = vld [vmem:[%s13329_s15 + $0x268] sm:$0xff] }
 0x8c4   : > { %v9369_v63 = vcombine.low %v4725_v12, %v4741_v14  ;;  %v8957_v46 = vcombine.low %v4311_v5, %v4327_v41  ;;  %v4423_v31 = vld [vmem:[%s13329_s15 + $0x3e8] sm:$0xff] }
 0x8c5   : > { %v8273_v26 = vrot.slane %v8259_v32, %v10716_v61  ;;  %8004 = vmatpush1.bf16.msra.mxu1 %v9177_v19  ;;  %v9370_v19 = vcombine.high %v4725_v12, %v4741_v14  ;;  %v4773_v32 = vld [vmem:[%s13329_s15 + $0xed8] sm:$0xff]  ;;  %v4439_v6 = vld [vmem:[%s13329_s15 + $0x468] sm:$0xff] }
 0x8c6   : > { %8127 = vmatpush1.bf16.msra.mxu0 %v9183_v29  ;;  %8005 = vmatprep.subr.bf16.mxu1 %v9210_v30  ;;  %v9376_v29 = vcombine.high %v4728_v17, %v4744_v22  ;;  %v4757_v30 = vld [vmem:[%s13329_s15 + $0xe58] sm:$0xff]  ;;  %v4487_v12 = vld [vmem:[%s13329_s15 + $0x5e8] sm:$0xff]  ;;  %v13044_v17 = vld [vmem:[%s13330_s16 + $0x10] sm:$0xff] }
 0x8c7   : > { %v8274_v39 = vcombine.low %v8266_v25, %v8273_v26  ;;  %8128 = vmatprep.subr.bf16.mxu0 %v9216_v33  ;;  %v4760_v33 = vld [vmem:[%s13329_s15 + $0xe70] sm:$0xff]  ;;  %v9402_v37 = vcombine.high %v4757_v30, %v4773_v32  ;;  %v4789_v26 = vld [vmem:[%s13329_s15 + $0xf58] sm:$0xff] }
 0x8c8   : > { %v9408_v25 = vcombine.high %v4760_v33, %v4776_v34 }
 0x8c9   : > { %8426 = vst [vmem:[%s12927_s0] sm:$0xff] %v8274_v39  ;;  %8006 = vmatpush1.bf16.msra.mxu1 %v9209_v38  ;;  %v4805_v38 = vld [vmem:[%s13329_s15 + $0xfd8] sm:$0xff]  ;;  %v9401_v39 = vcombine.low %v4757_v30, %v4773_v32  ;;  %v7425_v30 = vrot.slane %v12628_v58, %v10693_v24 }
 0x8ca   : > { %8129 = vmatpush1.bf16.msra.mxu0 %v9215_v27  ;;  %8007 = vmatprep.subr.bf16.mxu1 %v9242_v28  ;;  %v4792_v27 = vld [vmem:[%s13329_s15 + $0xf70] sm:$0xff]  ;;  %v9434_v49 = vcombine.high %v4789_v26, %v4805_v38 }
 0x8cb   : > { %8130 = vmatprep.subr.bf16.mxu0 %v9248_v40  ;;  %v4808_v28 = vld [vmem:[%s13329_s15 + $0xff0] sm:$0xff]  ;;  %v9407_v40 = vcombine.low %v4760_v33, %v4776_v34  ;;  %v7449_v33 = vrot.slane %v13044_v17, %v10690_v23 }
 0x8cc   : > { %v9440_v50 = vcombine.high %v4792_v27, %v4808_v28 }
 0x8cd   : > { %8008 = vmatpush1.bf16.msra.mxu1 %v9241_v42  ;;  %v9433_v42 = vcombine.low %v4789_v26, %v4805_v38 }
 0x8ce   : > { %8131 = vmatpush1.bf16.msra.mxu0 %v9247_v43  ;;  %8009 = vmatprep.subr.bf16.mxu1 %v9274_v44  ;;  %v9439_v43 = vcombine.low %v4792_v27, %v4808_v28  ;;  %v8958_v44 = vcombine.high %v4311_v5, %v4327_v41 }
 0x8cf   : > { %8132 = vmatprep.subr.bf16.mxu0 %v9280_v45  ;;  %v4343_v45 = vld [vmem:[%s13329_s15 + $0x168] sm:$0xff] }
 0x8d0   : > { %v8990_v47 = vcombine.high %v4343_v45, %v4359_v54 }
 0x8d1   : > { %8010 = vmatpush1.bf16.msra.mxu1 %v9273_v55  ;;  %v4391_v55 = vld [vmem:[%s13329_s15 + $0x2e8] sm:$0xff] }
 0x8d2   : > { %8133 = vmatpush1.bf16.msra.mxu0 %v9279_v60  ;;  %8011 = vmatprep.subr.bf16.mxu1 %v9306_v8  ;;  %v8989_v60 = vcombine.low %v4343_v45, %v4359_v54  ;;  %v9022_v8 = vcombine.high %v4375_v48, %v4391_v55  ;;  %v9021_v13 = vcombine.low %v4375_v48, %v4391_v55  ;;  %v4583_v45 = vld [vmem:[%s13329_s15 + $0x8e8] sm:$0xff] }
 0x8d3   : > { %8134 = vmatprep.subr.bf16.mxu0 %v9312_v18  ;;  %v4407_v18 = vld [vmem:[%s13329_s15 + $0x368] sm:$0xff] }
 0x8d4   : > { %v9054_v62 = vcombine.high %v4407_v18, %v4423_v31 }
 0x8d5   : > { %8012 = vmatpush1.bf16.msra.mxu1 %v9305_v7  ;;  %v4455_v7 = vld [vmem:[%s13329_s15 + $0x4e8] sm:$0xff] }
 0x8d6   : > { %8135 = vmatpush1.bf16.msra.mxu0 %v9311_v9  ;;  %8013 = vmatprep.subr.bf16.mxu1 %v9338_v10  ;;  %v9053_v9 = vcombine.low %v4407_v18, %v4423_v31  ;;  %v9086_v10 = vcombine.high %v4439_v6, %v4455_v7  ;;  %v9085_v14 = vcombine.low %v4439_v6, %v4455_v7  ;;  %v4631_v18 = vld [vmem:[%s13329_s15 + $0xa68] sm:$0xff] }
 0x8d7   : > { %8136 = vmatprep.subr.bf16.mxu0 %v9344_v11  ;;  %v4471_v11 = vld [vmem:[%s13329_s15 + $0x568] sm:$0xff] }
 0x8d8   : > { %v9118_v22 = vcombine.high %v4471_v11, %v4487_v12  ;;  %v9117_v32 = vcombine.low %v4471_v11, %v4487_v12  ;;  %v4647_v31 = vld [vmem:[%s13329_s15 + $0xae8] sm:$0xff] }
 0x8d9   : > { %8014 = vmatpush1.bf16.msra.mxu1 %v9337_v16  ;;  %v4503_v16 = vld [vmem:[%s13329_s15 + $0x668] sm:$0xff] }
 0x8da   : > { %8137 = vmatpush1.bf16.msra.mxu0 %v9343_v0  ;;  %8015 = vmatprep.subr.bf16.mxu1 %v9370_v19  ;;  %v4519_v0 = vld [vmem:[%s13329_s15 + $0x6e8] sm:$0xff]  ;;  %v7421_v19 = vrot.slane %v12628_v58, %v10682_v21 }
 0x8db   : > { %8138 = vmatprep.subr.bf16.mxu0 %v9376_v29  ;;  %v7445_v29 = vrot.slane %v13044_v17, %v10679_v20  ;;  %v9150_v34 = vcombine.high %v4503_v16, %v4519_v0  ;;  %v4663_v6 = vld [vmem:[%s13329_s15 + $0xb68] sm:$0xff] }
 0x8dc   : > { %v4679_v7 = vld [vmem:[%s13329_s15 + $0xbe8] sm:$0xff] }
 0x8dd   : > { %8016 = vmatpush1.bf16.msra.mxu1 %v9369_v63  ;;  %v4695_v11 = vld [vmem:[%s13329_s15 + $0xc68] sm:$0xff] }
 0x8de   : > { %8139 = vmatpush1.bf16.msra.mxu0 %v9375_v3  ;;  %8017 = vmatprep.subr.bf16.mxu1 %v9402_v37  ;;  %v4535_v3 = vld [vmem:[%s13329_s15 + $0x768] sm:$0xff] }
 0x8df   : > { %8140 = vmatprep.subr.bf16.mxu0 %v9408_v25  ;;  %v4551_v37 = vld [vmem:[%s13329_s15 + $0x7e8] sm:$0xff] }
 0x8e0   : > { %v9182_v41 = vcombine.high %v4535_v3, %v4551_v37  ;;  %v9181_v48 = vcombine.low %v4535_v3, %v4551_v37  ;;  %v4711_v12 = vld [vmem:[%s13329_s15 + $0xce8] sm:$0xff] }
 0x8e1   : > { %8018 = vmatpush1.bf16.msra.mxu1 %v9401_v39  ;;  %v4807_v3 = vld [vmem:[%s13329_s15 + $0xfe8] sm:$0xff] }
 0x8e2   : > { %8141 = vmatpush1.bf16.msra.mxu0 %v9407_v40  ;;  %8019 = vmatprep.subr.bf16.mxu1 %v9434_v49  ;;  %v9149_v40 = vcombine.low %v4503_v16, %v4519_v0  ;;  %v4727_v16 = vld [vmem:[%s13329_s15 + $0xd68] sm:$0xff] }
 0x8e3   : > { %8142 = vmatprep.subr.bf16.mxu0 %v9440_v50  ;;  %v4743_v0 = vld [vmem:[%s13329_s15 + $0xde8] sm:$0xff] }
 0x8e5   : > { %8020 = vmatpush1.bf16.msra.mxu1 %v9433_v42 }
 0x8e6   : > { %8143 = vmatpush1.bf16.msra.mxu0 %v9439_v43  ;;  %8071 = vmatprep.subr.bf16.mxu1 %v8958_v44  ;;  %v4567_v44 = vld [vmem:[%s13329_s15 + $0x868] sm:$0xff] }
 0x8e7   : > { %v9214_v55 = vcombine.high %v4567_v44, %v4583_v45  ;;  %v9213_v35 = vcombine.low %v4567_v44, %v4583_v45  ;;  %v4409_v45 = vld [vmem:[%s13329_s15 + $0x378] sm:$0xff] }
 0x8e8   : > { %8022 = vmatmul.mubr.bf16.vlgmr.msra.gmra.mrb[52].mxu1 %v11760_v2 }
 0x8e9   : > { %8145 = vmatmul.mubr.bf16.vlgmr.msra.gmra.mrb[56].mxu0 %v11760_v2  ;;  %8072 = vmatpush1.bf16.msra.mxu1 %v8957_v46  ;;  %v13082_v46 = vrot.slane %v8275_v51, %v10716_v61 }
 0x8ea   : > { %8103 = vmatprep.mubr.bf16.mxu1 %v11758_v1  ;;  %8073 = vmatprep.subr.bf16.mxu1 %v8990_v47 }
 0x8ed   : > { %8074 = vmatpush1.bf16.msra.mxu1 %v8989_v60 }
 0x8ee   : > { %8075 = vmatprep.subr.bf16.mxu1 %v9022_v8  ;;  %v4599_v8 = vld [vmem:[%s13329_s15 + $0x968] sm:$0xff] }
 0x8ef   : > { %v9246_v51 = vcombine.high %v4599_v8, %v4615_v4 }
 0x8f1   : > { %8076 = vmatpush1.bf16.msra.mxu1 %v9021_v13  ;;  %v9245_v13 = vcombine.low %v4599_v8, %v4615_v4  ;;  %v4441_v4 = vld [vmem:[%s13329_s15 + $0x478] sm:$0xff] }
 0x8f2   : > { %8077 = vmatprep.subr.bf16.mxu1 %v9054_v62  ;;  %v9278_v62 = vcombine.high %v4631_v18, %v4647_v31 }
 0x8f5   : > { %8078 = vmatpush1.bf16.msra.mxu1 %v9053_v9  ;;  %v9277_v9 = vcombine.low %v4631_v18, %v4647_v31  ;;  %v4473_v18 = vld [vmem:[%s13329_s15 + $0x578] sm:$0xff] }
 0x8f6   : > { %8079 = vmatprep.subr.bf16.mxu1 %v9086_v10  ;;  %v9310_v10 = vcombine.high %v4663_v6, %v4679_v7  ;;  %v4489_v31 = vld [vmem:[%s13329_s15 + $0x5f8] sm:$0xff] }
 0x8f9   : > { %8080 = vmatpush1.bf16.msra.mxu1 %v9085_v14  ;;  %v9309_v14 = vcombine.low %v4663_v6, %v4679_v7  ;;  %v4505_v6 = vld [vmem:[%s13329_s15 + $0x678] sm:$0xff] }
 0x8fa   : > { %8081 = vmatprep.subr.bf16.mxu1 %v9118_v22  ;;  %v9342_v22 = vcombine.high %v4695_v11, %v4711_v12  ;;  %v4521_v7 = vld [vmem:[%s13329_s15 + $0x6f8] sm:$0xff] }
 0x8fb   : > { %v7777_v63 = vpop.f32.mrb[40].mxu1 }
 0x8fc   : > { %v7778_v25 = vadd.f32 %v7777_v63, %v7421_v19  ;;  %v7900_v26 = vpop.f32.mrb[44].mxu0  ;;  %v7779_v38 = vpop.f32.mrb[41].mxu1  ;;  %v9341_v19 = vcombine.low %v4695_v11, %v4711_v12  ;;  %v4791_v63 = vld [vmem:[%s13329_s15 + $0xf68] sm:$0xff]  ;;  %v7461_v11 = vrot.slane %v13044_v17, %v10704_v52 }
 0x8fd   : > { %v13066_v27 = vadd.f32 %v7900_v26, %v7445_v29  ;;  %v7780_v58 = vadd.f32 %v7779_v38, %v7425_v30  ;;  %v7902_v28 = vpop.f32.mrb[45].mxu0  ;;  %v7781_v39 = vpop.f32.mrb[42].mxu1  ;;  %8082 = vmatpush1.bf16.msra.mxu1 %v9117_v32  ;;  %v9374_v29 = vcombine.high %v4727_v16, %v4743_v0  ;;  %v4759_v30 = vld [vmem:[%s13329_s15 + $0xe68] sm:$0xff]  ;;  %v4313_v26 = vld [vmem:[%s13329_s15 + $0x78] sm:$0xff] }
 0x8fe   : > { %v13068_v49 = vadd.f32 %v7902_v28, %v7449_v33  ;;  %v7904_v50 = vpop.f32.mrb[46].mxu0  ;;  %v7782_v5 = vpop.f32.mrb[43].mxu1  ;;  %8083 = vmatprep.subr.bf16.mxu1 %v9150_v34  ;;  %v4775_v32 = vld [vmem:[%s13329_s15 + $0xee8] sm:$0xff]  ;;  %v9373_v33 = vcombine.low %v4727_v16, %v4743_v0  ;;  %v4329_v38 = vld [vmem:[%s13329_s15 + $0xf8] sm:$0xff]  ;;  %v9154_v16 = vcombine.high %v4505_v6, %v4521_v7 }
 0x8ff   : > { %v8276_v42 = vcombine.low %v7778_v25, %v7780_v58  ;;  %v7905_v43 = vpop.f32.mrb[47].mxu0  ;;  %v9406_v34 = vcombine.high %v4759_v30, %v4775_v32  ;;  %v9405_v37 = vcombine.low %v4759_v30, %v4775_v32  ;;  %v9438_v25 = vcombine.high %v4791_v63, %v4807_v3  ;;  %v4345_v39 = vld [vmem:[%s13329_s15 + $0x178] sm:$0xff] }
 0x900   : > { %v8324_v54 = vcombine.low %v13066_v27, %v13068_v49  ;;  %v9437_v58 = vcombine.low %v4791_v63, %v4807_v3  ;;  %v8962_v28 = vcombine.high %v4313_v26, %v4329_v38  ;;  %v8961_v50 = vcombine.low %v4313_v26, %v4329_v38 }
 0x901   : > { %v13085_v47 = vrot.slane %v8276_v42, %v10716_v61  ;;  %8084 = vmatpush1.bf16.msra.mxu1 %v9149_v40  ;;  %v4361_v40 = vld [vmem:[%s13329_s15 + $0x1f8] sm:$0xff] }
 0x902   : > { %8085 = vmatprep.subr.bf16.mxu1 %v9182_v41  ;;  %v8994_v5 = vcombine.high %v4345_v39, %v4361_v40  ;;  %v4377_v41 = vld [vmem:[%s13329_s15 + $0x278] sm:$0xff]  ;;  %v8993_v43 = vcombine.low %v4345_v39, %v4361_v40 }
 0x903   : > { %v8307_v60 = vcombine.low %v13082_v46, %v13085_v47  ;;  %v4393_v42 = vld [vmem:[%s13329_s15 + $0x2f8] sm:$0xff] }
 0x904   : > { %v9026_v44 = vcombine.high %v4377_v41, %v4393_v42  ;;  %v4665_v47 = vld [vmem:[%s13329_s15 + $0xb78] sm:$0xff] }
 0x905   : > { %8086 = vmatpush1.bf16.msra.mxu1 %v9181_v48  ;;  %v4425_v48 = vld [vmem:[%s13329_s15 + $0x3f8] sm:$0xff]  ;;  %v8315_v57 = vrot.slane %v8307_v60, %v10716_v61 }
 0x906   : > { %8087 = vmatprep.subr.bf16.mxu1 %v9214_v55  ;;  %v9025_v55 = vcombine.low %v4377_v41, %v4393_v42  ;;  %v9058_v8 = vcombine.high %v4409_v45, %v4425_v48  ;;  %v8299_v42 = vrot.slane %v8277_v15, %v10716_v61  ;;  %v4681_v60 = vld [vmem:[%s13329_s15 + $0xbf8] sm:$0xff] }
 0x909   : > { %8088 = vmatpush1.bf16.msra.mxu1 %v9213_v35  ;;  %v9057_v35 = vcombine.low %v4409_v45, %v4425_v48 }
 0x90a   : > { %8089 = vmatprep.subr.bf16.mxu1 %v9246_v51 }
 0x90d   : > { %8090 = vmatpush1.bf16.msra.mxu1 %v9245_v13 }
 0x90e   : > { %8091 = vmatprep.subr.bf16.mxu1 %v9278_v62  ;;  %v9122_v62 = vcombine.high %v4473_v18, %v4489_v31 }
 0x911   : > { %8092 = vmatpush1.bf16.msra.mxu1 %v9277_v9  ;;  %v10064_v9 = vld [vmem:[%s13330_s16 + $0x8] sm:$0xff] }
 0x912   : > { %8093 = vmatprep.subr.bf16.mxu1 %v9310_v10  ;;  %v7437_v10 = vrot.slane %v10064_v9, %v10707_v53  ;;  %v7441_v12 = vrot.slane %v10064_v9, %v10713_v59 }
 0x915   : > { %8094 = vmatpush1.bf16.msra.mxu1 %v9309_v14  ;;  %v9121_v14 = vcombine.low %v4473_v18, %v4489_v31 }
 0x916   : > { %8095 = vmatprep.subr.bf16.mxu1 %v9342_v22  ;;  %v7465_v22 = vrot.slane %v13044_v17, %v10710_v56 }
 0x919   : > { %8096 = vmatpush1.bf16.msra.mxu1 %v9341_v19  ;;  %v4537_v19 = vld [vmem:[%s13329_s15 + $0x778] sm:$0xff] }
 0x91a   : > { %8097 = vmatprep.subr.bf16.mxu1 %v9374_v29  ;;  %v4553_v29 = vld [vmem:[%s13329_s15 + $0x7f8] sm:$0xff] }
 0x91d   : > { %8098 = vmatpush1.bf16.msra.mxu1 %v9373_v33 }
 0x91e   : > { %8099 = vmatprep.subr.bf16.mxu1 %v9406_v34 }
 0x921   : > { %8100 = vmatpush1.bf16.msra.mxu1 %v9405_v37 }
 0x922   : > { %8101 = vmatprep.subr.bf16.mxu1 %v9438_v25  ;;  %v9153_v25 = vcombine.low %v4505_v6, %v4521_v7  ;;  %v4713_v6 = vld [vmem:[%s13329_s15 + $0xcf8] sm:$0xff]  ;;  %v9313_v7 = vcombine.low %v4665_v47, %v4681_v60 }
 0x925   : > { %8102 = vmatpush1.bf16.msra.mxu1 %v9437_v58 }
 0x926   : > { %8153 = vmatprep.subr.bf16.mxu1 %v8962_v28  ;;  %v9186_v28 = vcombine.high %v4537_v19, %v4553_v29 }
 0x928   : > { %8104 = vmatmul.mubr.bf16.vlgmr.msra.gmra.mrb[56].mxu1 %v11760_v2 }
 0x929   : > { %8154 = vmatpush1.bf16.msra.mxu1 %v8961_v50  ;;  %8185 = vmatprep.mubr.bf16.mxu1 %v11758_v1  ;;  %v4457_v1 = vld [vmem:[%s13329_s15 + $0x4f8] sm:$0xff] }
 0x92a   : > { %8155 = vmatprep.subr.bf16.mxu1 %v8994_v5  ;;  %v9090_v51 = vcombine.high %v4441_v4, %v4457_v1  ;;  %v9089_v13 = vcombine.low %v4441_v4, %v4457_v1  ;;  %v4569_v50 = vld [vmem:[%s13329_s15 + $0x878] sm:$0xff] }
 0x92b   : > { %v4585_v5 = vld [vmem:[%s13329_s15 + $0x8f8] sm:$0xff] }
 0x92c   : > { %v9218_v45 = vcombine.high %v4569_v50, %v4585_v5  ;;  %v9217_v15 = vcombine.low %v4569_v50, %v4585_v5 }
 0x92d   : > { %8156 = vmatpush1.bf16.msra.mxu1 %v8993_v43 }
 0x92e   : > { %8157 = vmatprep.subr.bf16.mxu1 %v9026_v44  ;;  %v9185_v44 = vcombine.low %v4537_v19, %v4553_v29  ;;  %v4793_v29 = vld [vmem:[%s13329_s15 + $0xf78] sm:$0xff] }
 0x931   : > { %8158 = vmatpush1.bf16.msra.mxu1 %v9025_v55  ;;  %v4601_v55 = vld [vmem:[%s13329_s15 + $0x978] sm:$0xff] }
 0x932   : > { %8159 = vmatprep.subr.bf16.mxu1 %v9058_v8  ;;  %v4617_v8 = vld [vmem:[%s13329_s15 + $0x9f8] sm:$0xff] }
 0x933   : > { %v9250_v4 = vcombine.high %v4601_v55, %v4617_v8  ;;  %v9249_v18 = vcombine.low %v4601_v55, %v4617_v8 }
 0x935   : > { %8160 = vmatpush1.bf16.msra.mxu1 %v9057_v35  ;;  %v4633_v35 = vld [vmem:[%s13329_s15 + $0xa78] sm:$0xff] }
 0x936   : > { %8161 = vmatprep.subr.bf16.mxu1 %v9090_v51  ;;  %v4649_v51 = vld [vmem:[%s13329_s15 + $0xaf8] sm:$0xff] }
 0x937   : > { %v9282_v46 = vcombine.high %v4633_v35, %v4649_v51  ;;  %v9281_v31 = vcombine.low %v4633_v35, %v4649_v51 }
 0x939   : > { %8162 = vmatpush1.bf16.msra.mxu1 %v9089_v13  ;;  %v9314_v13 = vcombine.high %v4665_v47, %v4681_v60 }
 0x93a   : > { %8163 = vmatprep.subr.bf16.mxu1 %v9122_v62  ;;  %v4697_v62 = vld [vmem:[%s13329_s15 + $0xc78] sm:$0xff] }
 0x93b   : > { %v7859_v0 = vpop.f32.mrb[44].mxu1  ;;  %v9346_v9 = vcombine.high %v4697_v62, %v4713_v6 }
 0x93c   : > { %v7860_v30 = vadd.f32 %v7859_v0, %v7437_v10  ;;  %v7982_v32 = vpop.f32.mrb[48].mxu0  ;;  %v7861_v33 = vpop.f32.mrb[45].mxu1  ;;  %v4729_v10 = vld [vmem:[%s13329_s15 + $0xd78] sm:$0xff] }
 0x93d   : > { %v13190_v34 = vadd.f32 %v7982_v32, %v7461_v11  ;;  %v7862_v63 = vadd.f32 %v7861_v33, %v7441_v12  ;;  %v7984_v3 = vpop.f32.mrb[49].mxu0  ;;  %v7863_v37 = vpop.f32.mrb[46].mxu1  ;;  %8164 = vmatpush1.bf16.msra.mxu1 %v9121_v14  ;;  %v4745_v11 = vld [vmem:[%s13329_s15 + $0xdf8] sm:$0xff]  ;;  %v9345_v12 = vcombine.low %v4697_v62, %v4713_v6 }
 0x93e   : > { %v13192_v26 = vadd.f32 %v7984_v3, %v7465_v22  ;;  %v7986_v38 = vpop.f32.mrb[50].mxu0  ;;  %v7864_v58 = vpop.f32.mrb[47].mxu1  ;;  %8165 = vmatprep.subr.bf16.mxu1 %v9154_v16  ;;  %v9378_v14 = vcombine.high %v4729_v10, %v4745_v11  ;;  %v4761_v22 = vld [vmem:[%s13329_s15 + $0xe78] sm:$0xff]  ;;  %v9377_v0 = vcombine.low %v4729_v10, %v4745_v11  ;;  %v7453_v37 = vrot.slane %v13044_v17, %v10682_v21 }
 0x93f   : > { %v8278_v39 = vcombine.low %v7860_v30, %v7862_v63  ;;  %v7987_v40 = vpop.f32.mrb[51].mxu0  ;;  %v4777_v16 = vld [vmem:[%s13329_s15 + $0xef8] sm:$0xff]  ;;  %v7457_v38 = vrot.slane %v13044_v17, %v10693_v24 }
 0x940   : > { %v8326_v41 = vcombine.low %v13190_v34, %v13192_v26  ;;  %v9410_v19 = vcombine.high %v4761_v22, %v4777_v16  ;;  %v4809_v30 = vld [vmem:[%s13329_s15 + $0xff8] sm:$0xff]  ;;  %v9409_v32 = vcombine.low %v4761_v22, %v4777_v16 }
 0x941   : > { %v8306_v43 = vrot.slane %v8278_v39, %v10716_v61  ;;  %8166 = vmatpush1.bf16.msra.mxu1 %v9153_v25  ;;  %v9442_v33 = vcombine.high %v4793_v29, %v4809_v30  ;;  %v9441_v63 = vcombine.low %v4793_v29, %v4809_v30  ;;  %v13259_v3 = vld [vmem:[%s13330_s16 + $0x18] sm:$0xff] }
 0x942   : > { %8167 = vmatprep.subr.bf16.mxu1 %v9186_v28  ;;  %v7477_v25 = vrot.slane %v13259_v3, %v10679_v20  ;;  %v7481_v58 = vrot.slane %v13259_v3, %v10690_v23  ;;  %v7497_v35 = vrot.slane %v13259_v3, %v10710_v56  ;;  %v8348_v56 = vrot.slane %v8326_v41, %v10716_v61 }
 0x943   : > { %v8308_v48 = vcombine.low %v8299_v42, %v8306_v43  ;;  %v7489_v22 = vrot.slane %v13259_v3, %v10693_v24 }
 0x945   : > { %v8322_v36 = vrot.slane %v8308_v48, %v10716_v61  ;;  %8168 = vmatpush1.bf16.msra.mxu1 %v9185_v44 }
 0x946   : > { %8169 = vmatprep.subr.bf16.mxu1 %v9218_v45 }
 0x947   : > { %v8323_v1 = vcombine.low %v8315_v57, %v8322_v36  ;;  %v8334_v57 = vrot.slane %v8324_v54, %v10716_v61 }
 0x949   : > { %8427 = vst [vmem:[%s12927_s0 + $0x8] sm:$0xff] %v8323_v1  ;;  %8170 = vmatpush1.bf16.msra.mxu1 %v9217_v15  ;;  %v7469_v15 = vrot.slane %v13044_v17, %v10707_v53  ;;  %v7473_v1 = vrot.slane %v13044_v17, %v10713_v59 }
 0x94a   : > { %8171 = vmatprep.subr.bf16.mxu1 %v9250_v4  ;;  %v7493_v4 = vrot.slane %v13259_v3, %v10704_v52 }
 0x94d   : > { %8172 = vmatpush1.bf16.msra.mxu1 %v9249_v18 }
 0x94e   : > { %8173 = vmatprep.subr.bf16.mxu1 %v9282_v46 }
 0x951   : > { %8174 = vmatpush1.bf16.msra.mxu1 %v9281_v31 }
 0x952   : > { %8175 = vmatprep.subr.bf16.mxu1 %v9314_v13 }
 0x955   : > { %8176 = vmatpush1.bf16.msra.mxu1 %v9313_v7 }
 0x956   : > { %8177 = vmatprep.subr.bf16.mxu1 %v9346_v9 }
 0x959   : > { %8178 = vmatpush1.bf16.msra.mxu1 %v9345_v12 }
 0x95a   : > { %8179 = vmatprep.subr.bf16.mxu1 %v9378_v14  ;;  %v7485_v14 = vrot.slane %v13259_v3, %v10682_v21  ;;  %v7505_v21 = vrot.slane %v13259_v3, %v10713_v59 }
 0x95d   : > { %8180 = vmatpush1.bf16.msra.mxu1 %v9377_v0 }
 0x95e   : > { %8181 = vmatprep.subr.bf16.mxu1 %v9410_v19 }
 0x961   : > { %8182 = vmatpush1.bf16.msra.mxu1 %v9409_v32 }
 0x962   : > { %8183 = vmatprep.subr.bf16.mxu1 %v9442_v33 }
 0x965   : > { %8184 = vmatpush1.bf16.msra.mxu1 %v9441_v63  ;;  %v7501_v63 = vrot.slane %v13259_v3, %v10707_v53 }
 0x968   : > { %8186 = vmatmul.mubr.bf16.vlgmr.msra.gmra.mrb[60].mxu1 %v11760_v2 }
 0x97b   : > { %v7941_v28 = vpop.f32.mrb[48].mxu1 }
 0x97c   : > { %v7942_v39 = vadd.f32 %v7941_v28, %v7453_v37  ;;  %v8064_v2 = vpop.f32.mrb[52].mxu0  ;;  %v7943_v40 = vpop.f32.mrb[49].mxu1 }
 0x97d   : > { %v8065_v50 = vadd.f32 %v8064_v2, %v7477_v25  ;;  %v7944_v5 = vadd.f32 %v7943_v40, %v7457_v38  ;;  %v8066_v42 = vpop.f32.mrb[53].mxu0  ;;  %v7945_v43 = vpop.f32.mrb[50].mxu1 }
 0x97e   : > { %v8067_v44 = vadd.f32 %v8066_v42, %v7481_v58  ;;  %v8068_v45 = vpop.f32.mrb[54].mxu0  ;;  %v7946_v48 = vpop.f32.mrb[51].mxu1 }
 0x97f   : > { %v8325_v55 = vcombine.low %v7942_v39, %v7944_v5  ;;  %v8069_v8 = vpop.f32.mrb[55].mxu0 }
 0x980   : > { %v8373_v20 = vcombine.low %v8065_v50, %v8067_v44 }
 0x981   : > { %v8341_v23 = vrot.slane %v8325_v55, %v10716_v61 }
 0x982   : > { %v8383_v30 = vrot.slane %v8373_v20, %v10716_v61 }
 0x983   : > { %v8356_v36 = vcombine.low %v8334_v57, %v8341_v23 }
 0x985   : > { %v8364_v10 = vrot.slane %v8356_v36, %v10716_v61 }
 0x9bb   : > { %v8023_v51 = vpop.f32.mrb[52].mxu1 }
 0x9bc   : > { %v8024_v18 = vadd.f32 %v8023_v51, %v7469_v15  ;;  %v8146_v46 = vpop.f32.mrb[56].mxu0  ;;  %v8025_v27 = vpop.f32.mrb[53].mxu1 }
 0x9bd   : > { %v8147_v49 = vadd.f32 %v8146_v46, %v7493_v4  ;;  %v8026_v54 = vadd.f32 %v8025_v27, %v7473_v1  ;;  %v8148_v47 = vpop.f32.mrb[57].mxu0  ;;  %v8027_v60 = vpop.f32.mrb[54].mxu1 }
 0x9be   : > { %v8149_v31 = vadd.f32 %v8148_v47, %v7497_v35  ;;  %v8150_v13 = vpop.f32.mrb[58].mxu0  ;;  %v8028_v62 = vpop.f32.mrb[55].mxu1 }
 0x9bf   : > { %v8327_v6 = vcombine.low %v8024_v18, %v8026_v54  ;;  %v8151_v52 = vpop.f32.mrb[59].mxu0 }
 0x9c0   : > { %v8375_v7 = vcombine.low %v8147_v49, %v8149_v31 }
 0x9c1   : > { %v8355_v17 = vrot.slane %v8327_v6, %v10716_v61 }
 0x9c2   : > { %v8397_v2 = vrot.slane %v8375_v7, %v10716_v61 }
 0x9c3   : > { %v8357_v9 = vcombine.low %v8348_v56, %v8355_v17 }
 0x9c5   : > { %v8371_v11 = vrot.slane %v8357_v9, %v10716_v61 }
 0x9c7   : > { %v8372_v12 = vcombine.low %v8364_v10, %v8371_v11 }
 0x9c9   : > { %8428 = vst [vmem:[%s12927_s0 + $0x10] sm:$0xff] %v8372_v12 }
 0x9fb   : > { %v8105_v16 = vpop.f32.mrb[56].mxu1 }
 0x9fc   : > { %v8106_v0 = vadd.f32 %v8105_v16, %v7485_v14  ;;  %v8107_v19 = vpop.f32.mrb[57].mxu1 }
 0x9fd   : > { %v8108_v34 = vadd.f32 %v8107_v19, %v7489_v22  ;;  %v8109_v26 = vpop.f32.mrb[58].mxu1 }
 0x9fe   : > { %v8110_v41 = vpop.f32.mrb[59].mxu1 }
 0x9ff   : > { %v8374_v29 = vcombine.low %v8106_v0, %v8108_v34 }
 0xa01   : > { %v8390_v32 = vrot.slane %v8374_v29, %v10716_v61 }
 0xa03   : > { %v8405_v33 = vcombine.low %v8383_v30, %v8390_v32 }
 0xa05   : > { %v8413_v5 = vrot.slane %v8405_v33, %v10716_v61 }
 0xa3b   : > { %v8187_v24 = vpop.f32.mrb[60].mxu1 }
 0xa3c   : > { %v8188_v37 = vadd.f32 %v8187_v24, %v7501_v63  ;;  %v8189_v25 = vpop.f32.mrb[61].mxu1 }
 0xa3d   : > { %v8190_v38 = vadd.f32 %v8189_v25, %v7505_v21  ;;  %v8191_v58 = vpop.f32.mrb[62].mxu1 }
 0xa3e   : > { %v8192_v28 = vpop.f32.mrb[63].mxu1 }
 0xa3f   : > { %v8376_v39 = vcombine.low %v8188_v37, %v8190_v38 }
 0xa41   : > { %v8404_v40 = vrot.slane %v8376_v39, %v10716_v61 }
 0xa43   : > { %v8406_v50 = vcombine.low %v8397_v2, %v8404_v40 }
 0xa45   : > { %v8420_v42 = vrot.slane %v8406_v50, %v10716_v61 }
 0xa47   : > { %v8421_v53 = vcombine.low %v8413_v5, %v8420_v42 }
 0xa49   : > { %8429 = vst [vmem:[%s12927_s0 + $0x18] sm:$0xff] %v8421_v53 }
 0xa4a PF: > { %s27_s26 = sadd.s32 1, %s10087_s26   ;;  %s13337_s1 = sld [smem:[#allocation3_spill]] }
 0xa4b   : > { %p24_p5 = scmp.ge.s32.totalorder %s27_s26, 4   ;;  %s13338_s24 = smov %s10083_s25 }
 0xa4d   :  { %26 = sbr.rel (!%p24_p5) target bundleno = 3 (0x3), region = 133 }
 0xa50   : > { %s13339_s25 = smov %s13337_s1 }

</bundles_post_ra>
